<compile_context>
chip_gen: v5e
topology: v5e:2x2
jax: 0.10.0
libtpu: 0.0.40
codegen_flags: <defaults>
</compile_context>

<pallas_src>
import jax
import jax.numpy as jnp
from jax.experimental import pallas as pl
from jax.experimental.pallas import tpu as pltpu


# --------------------------------------------------------------------------- #
# helpers
# --------------------------------------------------------------------------- #
def _vmem_limit_bytes(working_set_bytes):
    """Generation-aware VMEM budget: never request more than half the physical
    VMEM (64 MiB on v7x, 128 MiB on v5e/v6e), with a comfortable floor."""
    try:
        cap = int(pltpu.get_tpu_info().vmem_capacity_bytes)
    except Exception:  # interpret mode / older runtimes
        cap = 64 * 1024 * 1024
    want = 4 * int(working_set_bytes) + (8 << 20)
    return int(min(max(want, 32 << 20), cap // 2))


# --------------------------------------------------------------------------- #
# kernel 1: ConvTranspose2d(k=2, s=2) + bias + ReLU, paired-row output layout
# --------------------------------------------------------------------------- #
def _convT2x2_kernel(x_ref, w_ref, b_ref, o_ref):
    # x_ref : (1, h*w, Cin)         bf16
    # w_ref : (Cin, 4*Cout)         bf16   columns ordered (a, c, co)
    # b_ref : (1, 4*Cout)           f32
    # o_ref : (1, h, 2, w, 2*Cout)  bf16   element [0, i, a, j, c*Cout+co]
    h = o_ref.shape[1]
    w = o_ref.shape[3]
    half = o_ref.shape[4]                       # 2*Cout  (c, co packed on lanes)
    z = jnp.dot(x_ref[0], w_ref[...], preferred_element_type=jnp.float32)
    z = jnp.maximum(z + b_ref[...], 0.0).astype(o_ref.dtype)       # (h*w, 4*Cout)
    o_ref[0, :, 0, :, :] = z[:, :half].reshape(h, w, half)         # even rows (a=0)
    o_ref[0, :, 1, :, :] = z[:, half:].reshape(h, w, half)         # odd rows  (a=1)


def conv_transpose2x2_relu(inp_nhwc, w, b):
    """ConvTranspose2d(k=2, s=2) + bias + ReLU.
    inp_nhwc: (N, h, w, Cin); w: PyTorch (Cin, Cout, 2, 2); b: (Cout,).
    Returns x_up NHWC (N, 2h, 2w, Cout) bf16.  The pixel shuffle is free: the
    kernel writes a paired-row (N, h, 2, w, 2*Cout) array whose reshape to
    (N, 2h, 2w, Cout) is contiguous, so no HBM transpose pass is needed."""
    N, h, wd, Cin = inp_nhwc.shape
    Cout = w.shape[1]
    x2d = inp_nhwc.reshape(N, h * wd, Cin).astype(jnp.bfloat16)
    # (Cin, Cout, a, c) -> (Cin, a, c, Cout) -> (Cin, 4*Cout); no K/N zero-padding.
    w_mat = jnp.transpose(w, (0, 2, 3, 1)).reshape(Cin, 4 * Cout).astype(jnp.bfloat16)
    b4 = jnp.tile(b.astype(jnp.float32), 4).reshape(1, 4 * Cout)

    ws = (2 * h * wd * Cin * 2 + Cin * 4 * Cout * 2 + 4 * Cout * 4
          + 2 * h * wd * 4 * Cout * 2 + h * wd * 4 * Cout * 4)

    zpair = pl.pallas_call(
        _convT2x2_kernel,
        out_shape=jax.ShapeDtypeStruct((N, h, 2, wd, 2 * Cout), jnp.bfloat16),
        grid_spec=pltpu.PrefetchScalarGridSpec(
            num_scalar_prefetch=0,
            grid=(N,),
            in_specs=[
                pl.BlockSpec((1, h * wd, Cin), lambda n: (n, 0, 0)),
                pl.BlockSpec((Cin, 4 * Cout), lambda n: (0, 0)),
                pl.BlockSpec((1, 4 * Cout), lambda n: (0, 0)),
            ],
            out_specs=pl.BlockSpec((1, h, 2, wd, 2 * Cout),
                                   lambda n: (n, 0, 0, 0, 0))),
        compiler_params=pltpu.CompilerParams(
            dimension_semantics=("parallel",),
            vmem_limit_bytes=_vmem_limit_bytes(ws)),
    )(x2d, w_mat, b4)
    return zpair.reshape(N, 2 * h, 2 * wd, Cout)   # contiguous reshape (free)


# --------------------------------------------------------------------------- #
# kernel 2: fused concat + Conv3x3 + ReLU + Conv3x3 + ReLU
# --------------------------------------------------------------------------- #
def _cat_conv3x3_x2_kernel(tail_ref, xup_ref, w1_ref, b1_ref, w2_ref, b2_ref,
                           o_ref, pad1, pad2):
    # tail_ref: (1, H, W, Ct) bf16     xup_ref: (1, H, W, Cx) bf16
    # w1_ref : (9*(Ct+Cx), Cout) bf16  b1_ref: (1, Cout) f32
    # w2_ref : (9*Cout, Cout)   bf16   b2_ref: (1, Cout) f32
    # o_ref  : (1, H, W, Cout)  bf16
    # pad1   : VMEM (H+2, W+2, Ct+Cx) bf16,   pad2: VMEM (H+2, W+2, Cout) bf16
    H = tail_ref.shape[1]
    W = tail_ref.shape[2]
    c1 = pad1.shape[-1]
    c2 = pad2.shape[-1]
    M = H * W

    # fused channel concat, written once into the zero-haloed VMEM buffer
    pad1[...] = jnp.zeros_like(pad1)
    pad1[1:H + 1, 1:W + 1, :] = jnp.concatenate(
        [tail_ref[0], xup_ref[0]], axis=-1)

    # conv1: build the (M, 9*Cin) im2col slab on-chip, single MXU contraction
    slab1 = jnp.concatenate(
        [pad1[dy:dy + H, dx:dx + W, :].reshape(M, c1)
         for dy in range(3) for dx in range(3)], axis=-1)
    y1 = jnp.dot(slab1, w1_ref[...], preferred_element_type=jnp.float32)
    y1 = jnp.maximum(y1 + b1_ref[...], 0.0).astype(jnp.bfloat16)    # (M, Cout)

    # conv2: same pattern, consuming y1 straight from VMEM (never touches HBM)
    pad2[...] = jnp.zeros_like(pad2)
    pad2[1:H + 1, 1:W + 1, :] = y1.reshape(H, W, c2)
    slab2 = jnp.concatenate(
        [pad2[dy:dy + H, dx:dx + W, :].reshape(M, c2)
         for dy in range(3) for dx in range(3)], axis=-1)
    y2 = jnp.dot(slab2, w2_ref[...], preferred_element_type=jnp.float32)
    y2 = jnp.maximum(y2 + b2_ref[...], 0.0)
    o_ref[0] = y2.reshape(H, W, o_ref.shape[-1]).astype(o_ref.dtype)


def cat_conv3x3_x2(tail_nhwc, xup_nhwc, w1, b1, w2, b2):
    """relu(conv3x3(concat([tail, x], ch))) -> relu(conv3x3(.)), fused into one
    pallas_call per batch element; the concat and the conv1 activation stay in
    VMEM.  Weights are PyTorch-layout (Cout, Cin, 3, 3)."""
    N, H, W, Ct = tail_nhwc.shape
    Cx = xup_nhwc.shape[-1]
    Cout = w1.shape[0]
    Cin1 = Ct + Cx
    assert w1.shape == (Cout, Cin1, 3, 3) and w2.shape == (Cout, Cout, 3, 3)

    # (Cout, Cin, ky, kx) -> (ky, kx, Cin, Cout) -> (9*Cin, Cout): rows are
    # tap-major / channel-minor, matching the on-chip im2col slab columns.
    w1m = jnp.transpose(w1, (2, 3, 1, 0)).reshape(9 * Cin1, Cout).astype(jnp.bfloat16)
    w2m = jnp.transpose(w2, (2, 3, 1, 0)).reshape(9 * Cout, Cout).astype(jnp.bfloat16)
    b1m = b1.astype(jnp.float32).reshape(1, Cout)
    b2m = b2.astype(jnp.float32).reshape(1, Cout)

    ws = (2 * H * W * (Ct + Cx + Cout) * 2            # in/out blocks (double buffered)
          + (H + 2) * (W + 2) * (Cin1 + Cout) * 2     # padded VMEM activations
          + H * W * 9 * (Cin1 + Cout) * 2             # im2col slabs (VMEM temporaries)
          + 9 * (Cin1 + Cout) * Cout * 2 + H * W * Cout * 4)

    # TODO(synk): for large H*W, add a grid axis over row blocks with a 1-row
    # halo so the pad/slab VMEM stays bounded (also gives v7x a second parallel axis).
    return pl.pallas_call(
        _cat_conv3x3_x2_kernel,
        out_shape=jax.ShapeDtypeStruct((N, H, W, Cout), jnp.bfloat16),
        grid_spec=pltpu.PrefetchScalarGridSpec(
            num_scalar_prefetch=0,
            grid=(N,),
            in_specs=[
                pl.BlockSpec((1, H, W, Ct), lambda n: (n, 0, 0, 0)),
                pl.BlockSpec((1, H, W, Cx), lambda n: (n, 0, 0, 0)),
                pl.BlockSpec((9 * Cin1, Cout), lambda n: (0, 0)),
                pl.BlockSpec((1, Cout), lambda n: (0, 0)),
                pl.BlockSpec((9 * Cout, Cout), lambda n: (0, 0)),
                pl.BlockSpec((1, Cout), lambda n: (0, 0)),
            ],
            out_specs=pl.BlockSpec((1, H, W, Cout), lambda n: (n, 0, 0, 0)),
            scratch_shapes=[
                pltpu.VMEM((H + 2, W + 2, Cin1), jnp.bfloat16),
                pltpu.VMEM((H + 2, W + 2, Cout), jnp.bfloat16),
            ]),
        compiler_params=pltpu.CompilerParams(
            dimension_semantics=("parallel",),
            vmem_limit_bytes=_vmem_limit_bytes(ws)),
    )(tail_nhwc.astype(jnp.bfloat16), xup_nhwc.astype(jnp.bfloat16),
      w1m, b1m, w2m, b2m)


# --------------------------------------------------------------------------- #
# UpBlock forward (public wrapper: NCHW f32 in / out, like the PyTorch module)
# --------------------------------------------------------------------------- #
def upblock_forward(params, tail_nchw, inp_nchw):
    tail = jnp.transpose(tail_nchw, (0, 2, 3, 1)).astype(jnp.bfloat16)
    inp = jnp.transpose(inp_nchw, (0, 2, 3, 1)).astype(jnp.bfloat16)
    x_up = conv_transpose2x2_relu(inp, params['up']['w'], params['up']['b'])
    y = cat_conv3x3_x2(tail, x_up,
                       params['c1']['w'], params['c1']['b'],
                       params['c2']['w'], params['c2']['b'])
    return jnp.transpose(y, (0, 3, 1, 2)).astype(jnp.float32)


# --------------------------------------------------------------------------- #
# pure-JAX reference (f32 math on bf16-rounded operands, matches kernel precision)
# --------------------------------------------------------------------------- #
def _q(t):
    return t.astype(jnp.bfloat16).astype(jnp.float32)


def upblock_ref(params, tail_nchw, inp_nchw):
    x = _q(inp_nchw)
    w = _q(params['up']['w'])
    y = jnp.einsum('nihw,ioac->nohawc', x, w)
    Nb, Co, H, A, W, C = y.shape
    y = y.reshape(Nb, Co, H * A, W * C) + params['up']['b'][None, :, None, None]
    y = _q(jax.nn.relu(y))
    cat = jnp.concatenate([_q(tail_nchw), y], axis=1)

    def conv(x, w, b):
        z = jax.lax.conv_general_dilated(
            x, _q(w), window_strides=(1, 1), padding=((1, 1), (1, 1)),
            dimension_numbers=('NCHW', 'OIHW', 'NCHW'))
        return _q(jax.nn.relu(z + b[None, :, None, None]))

    y = conv(cat, params['c1']['w'], params['c1']['b'])
    y = conv(y, params['c2']['w'], params['c2']['b'])
    return y


# --------------------------------------------------------------------------- #
# params / main
# --------------------------------------------------------------------------- #
def init_params(key, in_ch, out_ch):
    ks = jax.random.split(key, 6)

    def conv_w(k, co, ci, kh, kw):
        return jax.random.normal(k, (co, ci, kh, kw), jnp.float32) / jnp.sqrt(ci * kh * kw)

    return {
        'up': {'w': jax.random.normal(ks[0], (in_ch, out_ch, 2, 2), jnp.float32)
                    / jnp.sqrt(in_ch * 4),
               'b': jax.random.normal(ks[1], (out_ch,), jnp.float32) * 0.1},
        'c1': {'w': conv_w(ks[2], out_ch, 2 * out_ch, 3, 3),
               'b': jax.random.normal(ks[3], (out_ch,), jnp.float32) * 0.1},
        'c2': {'w': conv_w(ks[4], out_ch, out_ch, 3, 3),
               'b': jax.random.normal(ks[5], (out_ch,), jnp.float32) * 0.1},
    }


if __name__ == "__main__":
    key = jax.random.PRNGKey(0)
    in_ch, out_ch = 8, 4
    N, h, w = 2, 8, 8
    k0, k1, k2 = jax.random.split(key, 3)
    params = init_params(k0, in_ch, out_ch)
    inp = jax.random.normal(k1, (N, in_ch, h, w), jnp.float32)             # (2, 8, 8, 8)
    tail = jax.random.normal(k2, (N, out_ch, 2 * h, 2 * w), jnp.float32)   # (2, 4, 16, 16)

    out = jax.jit(upblock_forward)(params, tail, inp)
    out = jax.block_until_ready(out)
    assert out.shape == (N, out_ch, 2 * h, 2 * w), out.shape

    ref = upblock_ref(params, tail, inp)
    err = float(jnp.max(jnp.abs(out - ref)))
    assert err < 0.1, f"max abs error {err}"
    print("KERNEL_OK")
</pallas_src>

<mosaic_0001>
module attributes {stable_mosaic.version = 11 : i64} {
  func.func @_convT2x2_kernel(%arg0: i32, %arg1: memref<1x64x8xbf16, #tpu.memory_space<vmem>>, %arg2: memref<8x16xbf16, #tpu.memory_space<vmem>>, %arg3: memref<1x16xf32, #tpu.memory_space<vmem>>, %arg4: memref<1x8x2x8x8xbf16, #tpu.memory_space<vmem>>) attributes {dimension_semantics = [#tpu.dimension_semantics<parallel>], iteration_bounds = array<i64: 2>, scalar_prefetch = 0 : i64, scratch_operands = 0 : i64, tpu.core_type = #tpu.core_type<tc>, window_params = [{transform_indices = @transform_0, window_bounds = array<i64: 1, 64, 8>}, {pipeline_mode = #tpu.pipeline_mode<synchronous>, transform_indices = @transform_1, window_bounds = array<i64: 8, 16>}, {pipeline_mode = #tpu.pipeline_mode<synchronous>, transform_indices = @transform_2, window_bounds = array<i64: 1, 16>}, {transform_indices = @transform_3, window_bounds = array<i64: 1, 8, 2, 8, 8>}]} {
    %c0 = arith.constant 0 : index
    %c0_0 = arith.constant 0 : index
    %c0_1 = arith.constant 0 : index
    %0 = vector.load %arg1[%c0, %c0_0, %c0_1] : memref<1x64x8xbf16, #tpu.memory_space<vmem>>, vector<1x64x8xbf16>
    %1 = vector.shape_cast %0 : vector<1x64x8xbf16> to vector<64x8xbf16>
    %c0_2 = arith.constant 0 : index
    %c0_3 = arith.constant 0 : index
    %2 = vector.load %arg2[%c0_2, %c0_3] : memref<8x16xbf16, #tpu.memory_space<vmem>>, vector<8x16xbf16>
    %cst = arith.constant dense<0.000000e+00> : vector<64x16xf32>
    %3 = tpu.matmul %1, %2, %cst {dimension_numbers = #tpu.dot_dimension_numbers<[1], [0], [0], [1], [0, 0, 1, 1], [], []>} : vector<64x8xbf16>, vector<8x16xbf16>, vector<64x16xf32> -> vector<64x16xf32>
    %c0_4 = arith.constant 0 : index
    %c0_5 = arith.constant 0 : index
    %4 = vector.load %arg3[%c0_4, %c0_5] : memref<1x16xf32, #tpu.memory_space<vmem>>, vector<1x16xf32>
    %5 = vector.broadcast %4 : vector<1x16xf32> to vector<64x16xf32>
    %6 = arith.addf %3, %5 : vector<64x16xf32>
    %cst_6 = arith.constant 0.000000e+00 : f32
    %7 = vector.broadcast %cst_6 : f32 to vector<64x16xf32>
    %8 = arith.maximumf %6, %7 : vector<64x16xf32>
    %9 = arith.truncf %8 : vector<64x16xf32> to vector<64x16xbf16>
    %10 = vector.extract_strided_slice %9 {offsets = [0, 0], sizes = [64, 8], strides = [1, 1]} : vector<64x16xbf16> to vector<64x8xbf16>
    %11 = vector.shape_cast %10 : vector<64x8xbf16> to vector<8x8x8xbf16>
    %c0_7 = arith.constant 0 : index
    %c0_8 = arith.constant 0 : index
    %c0_9 = arith.constant 0 : index
    %c0_10 = arith.constant 0 : index
    %c0_11 = arith.constant 0 : index
    %12 = vector.load %arg4[%c0_7, %c0_8, %c0_9, %c0_10, %c0_11] : memref<1x8x2x8x8xbf16, #tpu.memory_space<vmem>>, vector<1x8x1x8x8xbf16>
    %13 = vector.shape_cast %12 : vector<1x8x1x8x8xbf16> to vector<8x8x8xbf16>
    %14 = vector.shape_cast %11 : vector<8x8x8xbf16> to vector<1x8x1x8x8xbf16>
    tpu.vector_store %arg4[%c0_7, %c0_8, %c0_9, %c0_10, %c0_11], %14 {strides = array<i32>} : memref<1x8x2x8x8xbf16, #tpu.memory_space<vmem>>, vector<1x8x1x8x8xbf16>,
    %15 = vector.extract_strided_slice %9 {offsets = [0, 8], sizes = [64, 8], strides = [1, 1]} : vector<64x16xbf16> to vector<64x8xbf16>
    %16 = vector.shape_cast %15 : vector<64x8xbf16> to vector<8x8x8xbf16>
    %c0_12 = arith.constant 0 : index
    %c0_13 = arith.constant 0 : index
    %c1 = arith.constant 1 : index
    %c0_14 = arith.constant 0 : index
    %c0_15 = arith.constant 0 : index
    %17 = vector.load %arg4[%c0_12, %c0_13, %c1, %c0_14, %c0_15] : memref<1x8x2x8x8xbf16, #tpu.memory_space<vmem>>, vector<1x8x1x8x8xbf16>
    %18 = vector.shape_cast %17 : vector<1x8x1x8x8xbf16> to vector<8x8x8xbf16>
    %19 = vector.shape_cast %16 : vector<8x8x8xbf16> to vector<1x8x1x8x8xbf16>
    tpu.vector_store %arg4[%c0_12, %c0_13, %c1, %c0_14, %c0_15], %19 {strides = array<i32>} : memref<1x8x2x8x8xbf16, #tpu.memory_space<vmem>>, vector<1x8x1x8x8xbf16>,
    return
  }
  func.func @transform_0(%arg0: i32) -> (i32, i32, i32) {
    %c0_i32 = arith.constant 0 : i32
    %c0_i32_0 = arith.constant 0 : i32
    %c0_i32_1 = arith.constant 0 : i32
    return %arg0, %c0_i32, %c0_i32_0 : i32, i32, i32
  }
  func.func @transform_1(%arg0: i32) -> (i32, i32) {
    %c0_i32 = arith.constant 0 : i32
    %c0_i32_0 = arith.constant 0 : i32
    %c0_i32_1 = arith.constant 0 : i32
    return %c0_i32, %c0_i32_0 : i32, i32
  }
  func.func @transform_2(%arg0: i32) -> (i32, i32) {
    %c0_i32 = arith.constant 0 : i32
    %c0_i32_0 = arith.constant 0 : i32
    %c0_i32_1 = arith.constant 0 : i32
    return %c0_i32, %c0_i32_0 : i32, i32
  }
  func.func @transform_3(%arg0: i32) -> (i32, i32, i32, i32, i32) {
    %c0_i32 = arith.constant 0 : i32
    %c0_i32_0 = arith.constant 0 : i32
    %c0_i32_1 = arith.constant 0 : i32
    %c0_i32_2 = arith.constant 0 : i32
    %c0_i32_3 = arith.constant 0 : i32
    return %arg0, %c0_i32, %c0_i32_0, %c0_i32_1, %c0_i32_2 : i32, i32, i32, i32, i32
  }
}

module attributes {stable_mosaic.version = 11 : i64} {
  func.func @_cat_conv3x3_x2_kernel(%arg0: i32, %arg1: memref<1x16x16x4xbf16, #tpu.memory_space<vmem>>, %arg2: memref<1x16x16x4xbf16, #tpu.memory_space<vmem>>, %arg3: memref<72x4xbf16, #tpu.memory_space<vmem>>, %arg4: memref<1x4xf32, #tpu.memory_space<vmem>>, %arg5: memref<36x4xbf16, #tpu.memory_space<vmem>>, %arg6: memref<1x4xf32, #tpu.memory_space<vmem>>, %arg7: memref<1x16x16x4xbf16, #tpu.memory_space<vmem>>, %arg8: memref<18x18x8xbf16, #tpu.memory_space<vmem>>, %arg9: memref<18x18x4xbf16, #tpu.memory_space<vmem>>) attributes {dimension_semantics = [#tpu.dimension_semantics<parallel>], iteration_bounds = array<i64: 2>, scalar_prefetch = 0 : i64, scratch_operands = 2 : i64, tpu.core_type = #tpu.core_type<tc>, window_params = [{transform_indices = @transform_0, window_bounds = array<i64: 1, 16, 16, 4>}, {transform_indices = @transform_1, window_bounds = array<i64: 1, 16, 16, 4>}, {pipeline_mode = #tpu.pipeline_mode<synchronous>, transform_indices = @transform_2, window_bounds = array<i64: 72, 4>}, {pipeline_mode = #tpu.pipeline_mode<synchronous>, transform_indices = @transform_3, window_bounds = array<i64: 1, 4>}, {pipeline_mode = #tpu.pipeline_mode<synchronous>, transform_indices = @transform_4, window_bounds = array<i64: 36, 4>}, {pipeline_mode = #tpu.pipeline_mode<synchronous>, transform_indices = @transform_5, window_bounds = array<i64: 1, 4>}, {transform_indices = @transform_6, window_bounds = array<i64: 1, 16, 16, 4>}]} {
    %cst = arith.constant 0.000000e+00 : bf16
    %0 = vector.broadcast %cst : bf16 to vector<18x18x8xbf16>
    %c0 = arith.constant 0 : index
    %c0_0 = arith.constant 0 : index
    %c0_1 = arith.constant 0 : index
    %1 = vector.load %arg8[%c0, %c0_0, %c0_1] : memref<18x18x8xbf16, #tpu.memory_space<vmem>>, vector<18x18x8xbf16>
    tpu.vector_store %arg8[%c0, %c0_0, %c0_1], %0 {strides = array<i32>} : memref<18x18x8xbf16, #tpu.memory_space<vmem>>, vector<18x18x8xbf16>,
    %c0_2 = arith.constant 0 : index
    %c0_3 = arith.constant 0 : index
    %c0_4 = arith.constant 0 : index
    %c0_5 = arith.constant 0 : index
    %2 = vector.load %arg1[%c0_2, %c0_3, %c0_4, %c0_5] : memref<1x16x16x4xbf16, #tpu.memory_space<vmem>>, vector<1x16x16x4xbf16>
    %3 = vector.shape_cast %2 : vector<1x16x16x4xbf16> to vector<16x16x4xbf16>
    %c0_6 = arith.constant 0 : index
    %c0_7 = arith.constant 0 : index
    %c0_8 = arith.constant 0 : index
    %c0_9 = arith.constant 0 : index
    %4 = vector.load %arg2[%c0_6, %c0_7, %c0_8, %c0_9] : memref<1x16x16x4xbf16, #tpu.memory_space<vmem>>, vector<1x16x16x4xbf16>
    %5 = vector.shape_cast %4 : vector<1x16x16x4xbf16> to vector<16x16x4xbf16>
    %6 = tpu.concatenate %3, %5 in 2 : vector<16x16x4xbf16>, vector<16x16x4xbf16> -> vector<16x16x8xbf16>
    %c1 = arith.constant 1 : index
    %c1_10 = arith.constant 1 : index
    %c0_11 = arith.constant 0 : index
    %7 = vector.load %arg8[%c1, %c1_10, %c0_11] : memref<18x18x8xbf16, #tpu.memory_space<vmem>>, vector<16x16x8xbf16>
    tpu.vector_store %arg8[%c1, %c1_10, %c0_11], %6 {strides = array<i32>} : memref<18x18x8xbf16, #tpu.memory_space<vmem>>, vector<16x16x8xbf16>,
    %c0_12 = arith.constant 0 : index
    %c0_13 = arith.constant 0 : index
    %c0_14 = arith.constant 0 : index
    %8 = vector.load %arg8[%c0_12, %c0_13, %c0_14] : memref<18x18x8xbf16, #tpu.memory_space<vmem>>, vector<16x16x8xbf16>
    %9 = vector.shape_cast %8 : vector<16x16x8xbf16> to vector<256x8xbf16>
    %c0_15 = arith.constant 0 : index
    %c1_16 = arith.constant 1 : index
    %c0_17 = arith.constant 0 : index
    %10 = vector.load %arg8[%c0_15, %c1_16, %c0_17] : memref<18x18x8xbf16, #tpu.memory_space<vmem>>, vector<16x16x8xbf16>
    %11 = vector.shape_cast %10 : vector<16x16x8xbf16> to vector<256x8xbf16>
    %c0_18 = arith.constant 0 : index
    %c2 = arith.constant 2 : index
    %c0_19 = arith.constant 0 : index
    %12 = vector.load %arg8[%c0_18, %c2, %c0_19] : memref<18x18x8xbf16, #tpu.memory_space<vmem>>, vector<16x16x8xbf16>
    %13 = vector.shape_cast %12 : vector<16x16x8xbf16> to vector<256x8xbf16>
    %c1_20 = arith.constant 1 : index
    %c0_21 = arith.constant 0 : index
    %c0_22 = arith.constant 0 : index
    %14 = vector.load %arg8[%c1_20, %c0_21, %c0_22] : memref<18x18x8xbf16, #tpu.memory_space<vmem>>, vector<16x16x8xbf16>
    %15 = vector.shape_cast %14 : vector<16x16x8xbf16> to vector<256x8xbf16>
    %c1_23 = arith.constant 1 : index
    %c1_24 = arith.constant 1 : index
    %c0_25 = arith.constant 0 : index
    %16 = vector.load %arg8[%c1_23, %c1_24, %c0_25] : memref<18x18x8xbf16, #tpu.memory_space<vmem>>, vector<16x16x8xbf16>
    %17 = vector.shape_cast %16 : vector<16x16x8xbf16> to vector<256x8xbf16>
    %c1_26 = arith.constant 1 : index
    %c2_27 = arith.constant 2 : index
    %c0_28 = arith.constant 0 : index
    %18 = vector.load %arg8[%c1_26, %c2_27, %c0_28] : memref<18x18x8xbf16, #tpu.memory_space<vmem>>, vector<16x16x8xbf16>
    %19 = vector.shape_cast %18 : vector<16x16x8xbf16> to vector<256x8xbf16>
    %c2_29 = arith.constant 2 : index
    %c0_30 = arith.constant 0 : index
    %c0_31 = arith.constant 0 : index
    %20 = vector.load %arg8[%c2_29, %c0_30, %c0_31] : memref<18x18x8xbf16, #tpu.memory_space<vmem>>, vector<16x16x8xbf16>
    %21 = vector.shape_cast %20 : vector<16x16x8xbf16> to vector<256x8xbf16>
    %c2_32 = arith.constant 2 : index
    %c1_33 = arith.constant 1 : index
    %c0_34 = arith.constant 0 : index
    %22 = vector.load %arg8[%c2_32, %c1_33, %c0_34] : memref<18x18x8xbf16, #tpu.memory_space<vmem>>, vector<16x16x8xbf16>
    %23 = vector.shape_cast %22 : vector<16x16x8xbf16> to vector<256x8xbf16>
    %c2_35 = arith.constant 2 : index
    %c2_36 = arith.constant 2 : index
    %c0_37 = arith.constant 0 : index
    %24 = vector.load %arg8[%c2_35, %c2_36, %c0_37] : memref<18x18x8xbf16, #tpu.memory_space<vmem>>, vector<16x16x8xbf16>
    %25 = vector.shape_cast %24 : vector<16x16x8xbf16> to vector<256x8xbf16>
    %26 = tpu.concatenate %9, %11, %13, %15, %17, %19, %21, %23, %25 in 1 : vector<256x8xbf16>, vector<256x8xbf16>, vector<256x8xbf16>, vector<256x8xbf16>, vector<256x8xbf16>, vector<256x8xbf16>, vector<256x8xbf16>, vector<256x8xbf16>, vector<256x8xbf16> -> vector<256x72xbf16>
    %c0_38 = arith.constant 0 : index
    %c0_39 = arith.constant 0 : index
    %27 = vector.load %arg3[%c0_38, %c0_39] : memref<72x4xbf16, #tpu.memory_space<vmem>>, vector<72x4xbf16>
    %cst_40 = arith.constant dense<0.000000e+00> : vector<256x4xf32>
    %28 = tpu.matmul %26, %27, %cst_40 {dimension_numbers = #tpu.dot_dimension_numbers<[1], [0], [0], [1], [0, 0, 1, 1], [], []>} : vector<256x72xbf16>, vector<72x4xbf16>, vector<256x4xf32> -> vector<256x4xf32>
    %c0_41 = arith.constant 0 : index
    %c0_42 = arith.constant 0 : index
    %29 = vector.load %arg4[%c0_41, %c0_42] : memref<1x4xf32, #tpu.memory_space<vmem>>, vector<1x4xf32>
    %30 = vector.broadcast %29 : vector<1x4xf32> to vector<256x4xf32>
    %31 = arith.addf %28, %30 : vector<256x4xf32>
    %cst_43 = arith.constant 0.000000e+00 : f32
    %32 = vector.broadcast %cst_43 : f32 to vector<256x4xf32>
    %33 = arith.maximumf %31, %32 : vector<256x4xf32>
    %34 = arith.truncf %33 : vector<256x4xf32> to vector<256x4xbf16>
    %cst_44 = arith.constant 0.000000e+00 : bf16
    %35 = vector.broadcast %cst_44 : bf16 to vector<18x18x4xbf16>
    %c0_45 = arith.constant 0 : index
    %c0_46 = arith.constant 0 : index
    %c0_47 = arith.constant 0 : index
    %36 = vector.load %arg9[%c0_45, %c0_46, %c0_47] : memref<18x18x4xbf16, #tpu.memory_space<vmem>>, vector<18x18x4xbf16>
    tpu.vector_store %arg9[%c0_45, %c0_46, %c0_47], %35 {strides = array<i32>} : memref<18x18x4xbf16, #tpu.memory_space<vmem>>, vector<18x18x4xbf16>,
    %37 = vector.shape_cast %34 : vector<256x4xbf16> to vector<16x16x4xbf16>
    %c1_48 = arith.constant 1 : index
    %c1_49 = arith.constant 1 : index
    %c0_50 = arith.constant 0 : index
    %38 = vector.load %arg9[%c1_48, %c1_49, %c0_50] : memref<18x18x4xbf16, #tpu.memory_space<vmem>>, vector<16x16x4xbf16>
    tpu.vector_store %arg9[%c1_48, %c1_49, %c0_50], %37 {strides = array<i32>} : memref<18x18x4xbf16, #tpu.memory_space<vmem>>, vector<16x16x4xbf16>,
    %c0_51 = arith.constant 0 : index
    %c0_52 = arith.constant 0 : index
    %c0_53 = arith.constant 0 : index
    %39 = vector.load %arg9[%c0_51, %c0_52, %c0_53] : memref<18x18x4xbf16, #tpu.memory_space<vmem>>, vector<16x16x4xbf16>
    %40 = vector.shape_cast %39 : vector<16x16x4xbf16> to vector<256x4xbf16>
    %c0_54 = arith.constant 0 : index
    %c1_55 = arith.constant 1 : index
    %c0_56 = arith.constant 0 : index
    %41 = vector.load %arg9[%c0_54, %c1_55, %c0_56] : memref<18x18x4xbf16, #tpu.memory_space<vmem>>, vector<16x16x4xbf16>
    %42 = vector.shape_cast %41 : vector<16x16x4xbf16> to vector<256x4xbf16>
    %c0_57 = arith.constant 0 : index
    %c2_58 = arith.constant 2 : index
    %c0_59 = arith.constant 0 : index
    %43 = vector.load %arg9[%c0_57, %c2_58, %c0_59] : memref<18x18x4xbf16, #tpu.memory_space<vmem>>, vector<16x16x4xbf16>
    %44 = vector.shape_cast %43 : vector<16x16x4xbf16> to vector<256x4xbf16>
    %c1_60 = arith.constant 1 : index
    %c0_61 = arith.constant 0 : index
    %c0_62 = arith.constant 0 : index
    %45 = vector.load %arg9[%c1_60, %c0_61, %c0_62] : memref<18x18x4xbf16, #tpu.memory_space<vmem>>, vector<16x16x4xbf16>
    %46 = vector.shape_cast %45 : vector<16x16x4xbf16> to vector<256x4xbf16>
    %c1_63 = arith.constant 1 : index
    %c1_64 = arith.constant 1 : index
    %c0_65 = arith.constant 0 : index
    %47 = vector.load %arg9[%c1_63, %c1_64, %c0_65] : memref<18x18x4xbf16, #tpu.memory_space<vmem>>, vector<16x16x4xbf16>
    %48 = vector.shape_cast %47 : vector<16x16x4xbf16> to vector<256x4xbf16>
    %c1_66 = arith.constant 1 : index
    %c2_67 = arith.constant 2 : index
    %c0_68 = arith.constant 0 : index
    %49 = vector.load %arg9[%c1_66, %c2_67, %c0_68] : memref<18x18x4xbf16, #tpu.memory_space<vmem>>, vector<16x16x4xbf16>
    %50 = vector.shape_cast %49 : vector<16x16x4xbf16> to vector<256x4xbf16>
    %c2_69 = arith.constant 2 : index
    %c0_70 = arith.constant 0 : index
    %c0_71 = arith.constant 0 : index
    %51 = vector.load %arg9[%c2_69, %c0_70, %c0_71] : memref<18x18x4xbf16, #tpu.memory_space<vmem>>, vector<16x16x4xbf16>
    %52 = vector.shape_cast %51 : vector<16x16x4xbf16> to vector<256x4xbf16>
    %c2_72 = arith.constant 2 : index
    %c1_73 = arith.constant 1 : index
    %c0_74 = arith.constant 0 : index
    %53 = vector.load %arg9[%c2_72, %c1_73, %c0_74] : memref<18x18x4xbf16, #tpu.memory_space<vmem>>, vector<16x16x4xbf16>
    %54 = vector.shape_cast %53 : vector<16x16x4xbf16> to vector<256x4xbf16>
    %c2_75 = arith.constant 2 : index
    %c2_76 = arith.constant 2 : index
    %c0_77 = arith.constant 0 : index
    %55 = vector.load %arg9[%c2_75, %c2_76, %c0_77] : memref<18x18x4xbf16, #tpu.memory_space<vmem>>, vector<16x16x4xbf16>
    %56 = vector.shape_cast %55 : vector<16x16x4xbf16> to vector<256x4xbf16>
    %57 = tpu.concatenate %40, %42, %44, %46, %48, %50, %52, %54, %56 in 1 : vector<256x4xbf16>, vector<256x4xbf16>, vector<256x4xbf16>, vector<256x4xbf16>, vector<256x4xbf16>, vector<256x4xbf16>, vector<256x4xbf16>, vector<256x4xbf16>, vector<256x4xbf16> -> vector<256x36xbf16>
    %c0_78 = arith.constant 0 : index
    %c0_79 = arith.constant 0 : index
    %58 = vector.load %arg5[%c0_78, %c0_79] : memref<36x4xbf16, #tpu.memory_space<vmem>>, vector<36x4xbf16>
    %cst_80 = arith.constant dense<0.000000e+00> : vector<256x4xf32>
    %59 = tpu.matmul %57, %58, %cst_80 {dimension_numbers = #tpu.dot_dimension_numbers<[1], [0], [0], [1], [0, 0, 1, 1], [], []>} : vector<256x36xbf16>, vector<36x4xbf16>, vector<256x4xf32> -> vector<256x4xf32>
    %c0_81 = arith.constant 0 : index
    %c0_82 = arith.constant 0 : index
    %60 = vector.load %arg6[%c0_81, %c0_82] : memref<1x4xf32, #tpu.memory_space<vmem>>, vector<1x4xf32>
    %61 = vector.broadcast %60 : vector<1x4xf32> to vector<256x4xf32>
    %62 = arith.addf %59, %61 : vector<256x4xf32>
    %cst_83 = arith.constant 0.000000e+00 : f32
    %63 = vector.broadcast %cst_83 : f32 to vector<256x4xf32>
    %64 = arith.maximumf %62, %63 : vector<256x4xf32>
    %65 = vector.shape_cast %64 : vector<256x4xf32> to vector<16x16x4xf32>
    %66 = arith.truncf %65 : vector<16x16x4xf32> to vector<16x16x4xbf16>
    %c0_84 = arith.constant 0 : index
    %c0_85 = arith.constant 0 : index
    %c0_86 = arith.constant 0 : index
    %c0_87 = arith.constant 0 : index
    %67 = vector.load %arg7[%c0_84, %c0_85, %c0_86, %c0_87] : memref<1x16x16x4xbf16, #tpu.memory_space<vmem>>, vector<1x16x16x4xbf16>
    %68 = vector.shape_cast %67 : vector<1x16x16x4xbf16> to vector<16x16x4xbf16>
    %69 = vector.shape_cast %66 : vector<16x16x4xbf16> to vector<1x16x16x4xbf16>
    tpu.vector_store %arg7[%c0_84, %c0_85, %c0_86, %c0_87], %69 {strides = array<i32>} : memref<1x16x16x4xbf16, #tpu.memory_space<vmem>>, vector<1x16x16x4xbf16>,
    return
  }
  func.func @transform_0(%arg0: i32) -> (i32, i32, i32, i32) {
    %c0_i32 = arith.constant 0 : i32
    %c0_i32_0 = arith.constant 0 : i32
    %c0_i32_1 = arith.constant 0 : i32
    %c0_i32_2 = arith.constant 0 : i32
    return %arg0, %c0_i32, %c0_i32_0, %c0_i32_1 : i32, i32, i32, i32
  }
  func.func @transform_1(%arg0: i32) -> (i32, i32, i32, i32) {
    %c0_i32 = arith.constant 0 : i32
    %c0_i32_0 = arith.constant 0 : i32
    %c0_i32_1 = arith.constant 0 : i32
    %c0_i32_2 = arith.constant 0 : i32
    return %arg0, %c0_i32, %c0_i32_0, %c0_i32_1 : i32, i32, i32, i32
  }
  func.func @transform_2(%arg0: i32) -> (i32, i32) {
    %c0_i32 = arith.constant 0 : i32
    %c0_i32_0 = arith.constant 0 : i32
    %c0_i32_1 = arith.constant 0 : i32
    return %c0_i32, %c0_i32_0 : i32, i32
  }
  func.func @transform_3(%arg0: i32) -> (i32, i32) {
    %c0_i32 = arith.constant 0 : i32
    %c0_i32_0 = arith.constant 0 : i32
    %c0_i32_1 = arith.constant 0 : i32
    return %c0_i32, %c0_i32_0 : i32, i32
  }
  func.func @transform_4(%arg0: i32) -> (i32, i32) {
    %c0_i32 = arith.constant 0 : i32
    %c0_i32_0 = arith.constant 0 : i32
    %c0_i32_1 = arith.constant 0 : i32
    return %c0_i32, %c0_i32_0 : i32, i32
  }
  func.func @transform_5(%arg0: i32) -> (i32, i32) {
    %c0_i32 = arith.constant 0 : i32
    %c0_i32_0 = arith.constant 0 : i32
    %c0_i32_1 = arith.constant 0 : i32
    return %c0_i32, %c0_i32_0 : i32, i32
  }
  func.func @transform_6(%arg0: i32) -> (i32, i32, i32, i32) {
    %c0_i32 = arith.constant 0 : i32
    %c0_i32_0 = arith.constant 0 : i32
    %c0_i32_1 = arith.constant 0 : i32
    %c0_i32_2 = arith.constant 0 : i32
    return %arg0, %c0_i32, %c0_i32_0, %c0_i32_1 : i32, i32, i32, i32
  }
}

</mosaic_0001>

<bundles_post_ra>
// kernel: tile.9
= control target key start
LH: loop header
LB: loop body
LE: loop exit
PB: predicated region body
PF: predicated region fallthrough
CT: control target
= control target key end

     0   :  { %s37_s8 = smov 4   ;;  %s38_s9 = smov 8   ;;  %vm7_vm0 = vcmask 31744   ;;  %vm13_vm1 = vcmask 130144   ;;  %vm19_vm2 = vcmask 97344   ;;  %vm25_vm3 = vcmask 64544   ;;  %s55_s0 = inlined_call_operand.vmem [shape: f32[4,4], index: 0, kind: input, shape index: {}]   ;;  %s56_s1 = inlined_call_operand.vmem [shape: f32[1,16], index: 1, kind: output, shape index: {}]  }
   0x1   :  { %v4_v0 = vld [vmem:[%s55_s0] sm:$0xf]  ;;  %s36_s0 = smov 12  }
   0x2   :  { %5 = vst [vmem:[#allocation1] sm:$0xf] %v4_v0 }
   0x9   :  { %v10_v1 = vld [vmem:[#allocation1 + $0x3] sm:$0x1]   ;;  %v22_v2 = vld [vmem:[#allocation1 + $0x1] sm:$0x1]   ;;  %v16_v3 = vld [vmem:[#allocation1 + $0x2] sm:$0x1]  }
   0xa   :  { %11 = vrot.lane.b32.xlu0 %v10_v1, %s36_s0  ;;  %23 = vrot.lane.b32.xlu1 %v22_v2, %s37_s8  ;;  %v6_v4 = vld [vmem:[#allocation1] sm:$0x1]  }
   0xb   :  { %8 = vst.msk [vmem:[#allocation0] sm:$0x1] %vm7_vm0, %v6_v4  }
  0x12   :  { %17 = vrot.lane.b32.xlu0 %v16_v3, %s38_s9 }
  0x7c   :  { %v12_v5 = vpop.permute.xlu0 %11   ;;  %v24_v6 = vpop.permute.xlu1 %23  }
  0x7d   :  { %14 = vst.msk [vmem:[#allocation0] sm:$0x1] %vm13_vm1, %v12_v5  }
  0x84   :  { %v18_v7 = vpop.permute.xlu0 %17  }
  0x85   :  { %20 = vst.msk [vmem:[#allocation0] sm:$0x1] %vm19_vm2, %v18_v7  }
  0x86   :  { %26 = vst.msk [vmem:[#allocation0] sm:$0x1] %vm25_vm3, %v24_v6  }
  0x8d   :  { %v29_v8 = vld [vmem:[#allocation0] sm:$0x1] }
  0x8e   :  { %32 = vst [vmem:[%s56_s1] sm:$0x1] %v29_v8 }

// kernel: tile.8
= control target key start
LH: loop header
LB: loop body
LE: loop exit
PB: predicated region body
PF: predicated region fallthrough
CT: control target
= control target key end

     0   :  { %2 = vsyncpa [#allocation1], 0  ;;  %s48_s8 = smov [#allocation0]   ;;  %s65_s0 = inlined_call_operand.hbm [shape: f32[4], index: 0, kind: input, shape index: {}]   ;;  %s66_s1 = inlined_call_operand.vmem [shape: f32[4,4], index: 1, kind: output, shape index: {}]  }
   0x1   :  { %s8_s0 = sshll.u32 %s65_s0, 4  ;;  %s10_s9 = sshll.u32 %s48_s8, 4  ;;  %s9_s0 = int_to_ptr.hbm [resolvable:$true] %s8_s0  ;;  %s11_s9 = int_to_ptr.vmem [resolvable:$true] %s10_s9 }
   0x2   :  { %13 = dma.hbm_to_vmem [thread:$0]  %s9_s0, 16, %s11_s9, [#allocation1]  }
   0x3   :  { %46 = dma.done.wait [#allocation1], 16  }
   0x4   :  { %47 = vsyncadd [#allocation1], 4294967280  ;;  %v18_v0 = vld [vmem:[#allocation0] ss:$0 sm:$0xff] }
   0x5   :  { %19 = vst [vmem:[%s66_s1] sm:$0xf] %v18_v0 }
   0x6   :  { %20 = vsyncpa [#allocation1], 1 }

// kernel: upblock_forward.2
= control target key start
LH: loop header
LB: loop body
LE: loop exit
PB: predicated region body
PF: predicated region fallthrough
CT: control target
= control target key end

     0   :  { %s459_s12 = smov 0   ;;  %s524_s0 = inlined_call_operand.vmem [shape: bf16[2,64,8], index: 0, kind: input, shape index: {}]   ;;  %s525_s1 = inlined_call_operand.vmem [shape: bf16[8,16], index: 1, kind: input, shape index: {}]   ;;  %s526_s2 = inlined_call_operand.vmem [shape: f32[1,16], index: 2, kind: input, shape index: {}]   ;;  %s527_s3 = inlined_call_operand.vmem [shape: bf16[2,8,2,8,8], index: 3, kind: output, shape index: {}]  }
   0x1 LB: > { %s372_s13 = sadd.s32 4294967295, %s436_s12   ;;  %p376_p0 = scmp.ge.s32.totalorder %s436_s12, 1  ;;  %s436_s12 = sphi %s459_s12, %s13_s12  }
   0x2   : > { %p137_p1 = scmp.lt.s32.totalorder %s436_s12, 3 }
   0x4   : > { %p138_p2 = pnand %p376_p0, %p137_p1 }
   0x5   : > { %p161_p3 = scmp.lt.s32.totalorder (!%p138_p2), %s372_s13, 1  ;;  %s438_s26 = smov (!%p138_p2), 120  }
   0x6   : > { %141 = sbr.rel (%p138_p2) target bundleno = 281 (0x119), region = 32 }
   0xb   : > { %v180_v0 = vld [vmem:[%s525_s1] sm:$0xf]  ;;  %vm218_vm0 = vcmask 1043456   ;;  %s529_s13 = smov (!%p161_p3, %s372_s13), 1  ;;  %vm205_vm1 = vcmask 64512   ;;  %vm267_vm2 = vcmask 60416  }
   0xc   : > { %v220_v1 = vsel %vm218_vm0, %v180_v0, 0  ;;  %s411_s16 = sshll.u32 %s529_s13, 5  ;;  %v429_v6 = vld [vmem:[%s526_s2] ss:$0 sm:$0xff]  ;;  %s412_s22 = sshll.u32 %s529_s13, 6 }
   0xd   : > { %229 = vmatpush.bf16.msra.mxu0 %v220_v1  ;;  %417 = vmatpush.bf16.msra.mxu1 %v220_v1  ;;  %s165_s19 = scalar_lea.vmem %s524_s0, %s411_s16  ;;  %s479_s25 = scalar_lea.vmem %s527_s3, %s412_s22 }
   0xe   : > { %419 = vmatpush.bf16.msra.mxu3 %v220_v1  ;;  %418 = vmatpush.bf16.msra.mxu2 %v220_v1  ;;  %v413_v2 = vld [vmem:[%s165_s19] sm:$0xff]  ;;  %v414_v3 = vld [vmem:[%s165_s19 + $0x8] sm:$0xff]  ;;  %v416_v4 = vld [vmem:[%s165_s19 + $0x18] sm:$0xff] }
   0xf   : > { %v415_v5 = vld [vmem:[%s165_s19 + $0x10] sm:$0xff] }
  0x10   : > { %397 = vmatmul.msk.bf16.vlgmr.msra.gmra.mxu0 %vm205_vm1, %v413_v2  ;;  %398 = vmatmul.msk.bf16.vlgmr.msra.gmra.mxu1 %vm205_vm1, %v414_v3 }
  0x11   : > { %400 = vmatmul.msk.bf16.vlgmr.msra.gmra.mxu3 %vm205_vm1, %v416_v4  ;;  %399 = vmatmul.msk.bf16.vlgmr.msra.gmra.mxu2 %vm205_vm1, %v415_v5 }
  0x8d   : > { %v231_v7 = vpop.f32.mrf.mxu0  ;;  %v236_v8 = vpop.f32.mrf.mxu1 }
  0x8e   : > { %v232_v9 = vadd.f32 %v429_v6, %v231_v7  ;;  %v237_v10 = vadd.f32 %v429_v6, %v236_v8 }
  0x90   : > { %v251_v11 = vmax.f32 %v232_v9, 0.0  ;;  %v253_v12 = vmax.f32 %v237_v10, 0.0 }
  0x92   : > { %v261_v13 = vpack.c.bf16 %v253_v12, %v253_v12  ;;  %v259_v14 = vpack.c.bf16 %v251_v11, %v251_v11 }
  0x94   : > { %v246_v15 = vpop.f32.mrf.mxu3  ;;  %288 = vrot.lane.b32.xlu1 %v261_v13, %s438_s26  ;;  %270 = vst.msk [vmem:[%s479_s25 + $0x10] sm:$0xf] %vm267_vm2, %v261_v13  ;;  %284 = vrot.lane.b32.xlu0 %v259_v14, %s438_s26  ;;  %v241_v16 = vpop.f32.mrf.mxu2 }
  0x95   : > { %v247_v17 = vadd.f32 %v429_v6, %v246_v15  ;;  %268 = vst.msk [vmem:[%s479_s25] sm:$0xf] %vm267_vm2, %v259_v14  ;;  %v233_v18 = vpop.f32.mrf.mxu0  ;;  %v238_v19 = vpop.f32.mrf.mxu1  ;;  %v242_v20 = vadd.f32 %v429_v6, %v241_v16 }
  0x96   : > { %v234_v21 = vadd.f32 %v429_v6, %v233_v18  ;;  %v239_v22 = vadd.f32 %v429_v6, %v238_v19 }
  0x97   : > { %v257_v23 = vmax.f32 %v247_v17, 0.0  ;;  %v255_v24 = vmax.f32 %v242_v20, 0.0 }
  0x98   : > { %v252_v25 = vmax.f32 %v234_v21, 0.0  ;;  %v254_v26 = vmax.f32 %v239_v22, 0.0 }
  0x99   : > { %v265_v27 = vpack.c.bf16 %v257_v23, %v257_v23  ;;  %v263_v28 = vpack.c.bf16 %v255_v24, %v255_v24 }
  0x9a   : > { %v260_v29 = vpack.c.bf16 %v252_v25, %v252_v25  ;;  %v262_v30 = vpack.c.bf16 %v254_v26, %v254_v26 }
  0x9b   : > { %274 = vst.msk [vmem:[%s479_s25 + $0x30] sm:$0xf] %vm267_vm2, %v265_v27  ;;  %292 = vrot.lane.b32.xlu2 %v263_v28, %s438_s26 }
  0x9c   : > { %269 = vst.msk [vmem:[%s479_s25 + $0x8] sm:$0xf] %vm267_vm2, %v260_v29  ;;  %v248_v31 = vpop.f32.mrf.mxu3  ;;  %290 = vrot.lane.b32.xlu1 %v262_v30, %s438_s26  ;;  %286 = vrot.lane.b32.xlu0 %v260_v29, %s438_s26  ;;  %v243_v32 = vpop.f32.mrf.mxu2 }
  0x9d   : > { %271 = vst.msk [vmem:[%s479_s25 + $0x18] sm:$0xf] %vm267_vm2, %v262_v30  ;;  %v249_v33 = vadd.f32 %v429_v6, %v248_v31  ;;  %v244_v34 = vadd.f32 %v429_v6, %v243_v32 }
  0x9e   : > { %272 = vst.msk [vmem:[%s479_s25 + $0x20] sm:$0xf] %vm267_vm2, %v263_v28 }
  0x9f   : > { %v258_v35 = vmax.f32 %v249_v33, 0.0  ;;  %v256_v36 = vmax.f32 %v244_v34, 0.0 }
  0xa1   : > { %v266_v37 = vpack.c.bf16 %v258_v35, %v258_v35  ;;  %v264_v38 = vpack.c.bf16 %v256_v36, %v256_v36 }
  0xa3   : > { %275 = vst.msk [vmem:[%s479_s25 + $0x38] sm:$0xf] %vm267_vm2, %v266_v37  ;;  %294 = vrot.lane.b32.xlu2 %v264_v38, %s438_s26 }
  0xa4   : > { %298 = vrot.lane.b32.xlu1 %v266_v37, %s438_s26  ;;  %296 = vrot.lane.b32.xlu0 %v265_v27, %s438_s26  ;;  %273 = vst.msk [vmem:[%s479_s25 + $0x28] sm:$0xf] %vm267_vm2, %v264_v38 }
  0xf5   : > { %v293_v39 = vpop.permute.xlu2 %292 }
  0xf6   : > { %405 = vst.msk [vmem:[%s479_s25 + $0x24] sm:$0xf] %vm267_vm2, %v293_v39 }
  0xfd   : > { %v295_v40 = vpop.permute.xlu2 %294 }
  0xfe   : > { %406 = vst.msk [vmem:[%s479_s25 + $0x2c] sm:$0xf] %vm267_vm2, %v295_v40 }
 0x106   : > { %v289_v41 = vpop.permute.xlu1 %288  ;;  %v285_v42 = vpop.permute.xlu0 %284 }
 0x107   : > { %403 = vst.msk [vmem:[%s479_s25 + $0x14] sm:$0xf] %vm267_vm2, %v289_v41 }
 0x108   : > { %401 = vst.msk [vmem:[%s479_s25 + $0x4] sm:$0xf] %vm267_vm2, %v285_v42 }
 0x10e   : > { %v291_v43 = vpop.permute.xlu1 %290  ;;  %v287_v44 = vpop.permute.xlu0 %286 }
 0x10f   : > { %404 = vst.msk [vmem:[%s479_s25 + $0x1c] sm:$0xf] %vm267_vm2, %v291_v43 }
 0x110   : > { %402 = vst.msk [vmem:[%s479_s25 + $0xc] sm:$0xf] %vm267_vm2, %v287_v44 }
 0x116   : > { %v299_v45 = vpop.permute.xlu1 %298  ;;  %v297_v46 = vpop.permute.xlu0 %296 }
 0x117   : > { %408 = vst.msk [vmem:[%s479_s25 + $0x3c] sm:$0xf] %vm267_vm2, %v299_v45 }
 0x118   : > { %407 = vst.msk [vmem:[%s479_s25 + $0x34] sm:$0xf] %vm267_vm2, %v297_v46 }
 0x119 PF: > { %s13_s12 = sadd.s32 1, %s436_s12  }
 0x11a   : > { %p10_p4 = scmp.ge.s32.totalorder %s13_s12, 4  }
 0x11c   :  { %12 = sbr.rel (!%p10_p4) target bundleno = 1 (0x1), region = 63 }

// kernel: upblock_forward.3
= control target key start
LH: loop header
LB: loop body
LE: loop exit
PB: predicated region body
PF: predicated region fallthrough
CT: control target
= control target key end

     0   :  { %s8793_s21 = smov 0   ;;  %s11893_s0 = inlined_call_operand.vmem [shape: bf16[2,16,16,4], index: 0, kind: input, shape index: {}]   ;;  %s11894_s1 = inlined_call_operand.vmem [shape: bf16[2,16,16,4], index: 1, kind: input, shape index: {}]   ;;  %s11895_s2 = inlined_call_operand.vmem [shape: bf16[72,4], index: 2, kind: input, shape index: {}]   ;;  %s11896_s3 = inlined_call_operand.vmem [shape: f32[1,4], index: 3, kind: input, shape index: {}]   ;;  %s11897_s4 = inlined_call_operand.vmem [shape: bf16[36,4], index: 4, kind: input, shape index: {}]   ;;  %s11898_s5 = inlined_call_operand.vmem [shape: f32[1,4], index: 5, kind: input, shape index: {}]   ;;  %s11899_s6 = inlined_call_operand.vmem [shape: bf16[2,16,16,4], index: 6, kind: output, shape index: {}]  }
   0x1 LB: > { %s7874_s22 = sadd.s32 4294967295, %s8743_s21   ;;  %p7878_p0 = scmp.ge.s32.totalorder %s8743_s21, 1  ;;  %s8743_s21 = sphi %s8793_s21, %s16_s21  }
   0x2   : > { %p222_p1 = scmp.lt.s32.totalorder %s8743_s21, 3 }
   0x4   : > { %p223_p2 = pnand %p7878_p0, %p222_p1 }
   0x6   : > { %226 = sbr.rel (%p223_p2) target bundleno = 1382 (0x566), region = 44 }
   0xb   : > { %p257_p3 = scmp.lt.s32.totalorder %s7874_s22, 1  ;;  %s8745_s27 = smov 4   ;;  %vm273_vm0 = vcmask 60416   ;;  %v11900_v3 = vmov 0   ;;  %vm276_vm1 = vcmask 57344   ;;  %vm585_vm2 = vcmask 31744  }
   0xc   : > { %290 = vst.msk [vmem:[#allocation2 + $0x3c] sm:$0xf] %vm273_vm0, %v11900_v3  ;;  %vm714_vm3 = vsmask.f32 256  ;;  %vm715_vm4 = vsmask.f32 4368 }
   0xd   : > { %s12008_s22 = smov (!%p257_p3, %s7874_s22), 1  ;;  %291 = vst.msk [vmem:[#allocation2 + $0x40] sm:$0xf] %vm273_vm0, %v11900_v3  ;;  %vm1654_vm5 = vcmask 1042432   ;;  %vm1655_vm6 = vcmask 1046532   ;;  %vm8974_vm9 = vmand %vm276_vm1, %vm714_vm3  ;;  %v11908_v53 = vmov 0 }
   0xe   : > { %s8801_s23 = sshll.u32 %s12008_s22, 7  ;;  %292 = vst.msk [vmem:[#allocation2 + $0x44] sm:$0x1] %vm276_vm1, %v11900_v3  ;;  %vm8963_vm7 = vmor %vm1654_vm5, %vm1655_vm6  ;;  %vm1039_vm8 = vsmask.f32 7938  ;;  %s8747_s7 = smov 16  }
   0xf   : > { %s8807_s26 = scalar_lea.vmem %s11894_s1, %s8801_s23  ;;  %274 = vst.msk [vmem:[#allocation2] sm:$0xf] %vm273_vm0, %v11900_v3  ;;  %s8952_s30 = scalar_lea.vmem %s11893_s0, %s8801_s23  ;;  %vm8981_vm10 = vmor %vm714_vm3, %vm715_vm4  ;;  %vm1203_vm12 = vsmask.f32 3328  ;;  %vm1204_vm13 = vsmask.f32 7440 }
  0x10   : > { %v8572_v0 = vld [vmem:[%s8807_s26 + $0x10] sm:$0xff]  ;;  %v8570_v1 = vld [vmem:[%s8807_s26] sm:$0xff]  ;;  %v8573_v4 = vld [vmem:[%s8807_s26 + $0x18] sm:$0xff]  ;;  %275 = vst.msk [vmem:[#allocation2 + $0x4] sm:$0xf] %vm273_vm0, %v11900_v3  ;;  %v11909_v53 = vsel %vm8981_vm10, 4294967295, %v11908_v53 }
  0x11   : > { %557 = vrot.lane.b32.xlu1 %v8572_v0, %s8745_s27  ;;  %553 = vrot.lane.b32.xlu0 %v8570_v1, %s8745_s27  ;;  %v8574_v2 = vld [vmem:[%s8807_s26 + $0x20] sm:$0xff]  ;;  %v8571_v5 = vld [vmem:[%s8807_s26 + $0x8] sm:$0xff]  ;;  %277 = vst.msk [vmem:[#allocation2 + $0x8] sm:$0x1] %vm276_vm1, %v11900_v3  ;;  %vm8987_vm11 = vmand %vm273_vm0, %vm1039_vm8  ;;  %s8748_s8 = smov 24   ;;  %s8749_s9 = smov 8  }
  0x12   : > { %561 = vrot.lane.b32.xlu2 %v8574_v2, %s8745_s27  ;;  %v8575_v6 = vld [vmem:[%s8807_s26 + $0x28] sm:$0xff]  ;;  %278 = vst.msk [vmem:[#allocation2 + $0xc] sm:$0xf] %vm273_vm0, %v11900_v3  ;;  %v8576_v7 = vld [vmem:[%s8807_s26 + $0x30] sm:$0xff]  ;;  %v8577_v8 = vld [vmem:[%s8807_s26 + $0x38] sm:$0xff]  ;;  %s8750_s10 = smov 32  }
  0x13   : > { %279 = vst.msk [vmem:[#allocation2 + $0x10] sm:$0xf] %vm273_vm0, %v11900_v3  ;;  %v8578_v9 = vld [vmem:[%s8807_s26 + $0x40] sm:$0xff]  ;;  %v8579_v10 = vld [vmem:[%s8807_s26 + $0x48] sm:$0xff]  ;;  %v8580_v11 = vld [vmem:[%s8807_s26 + $0x50] sm:$0xff]  ;;  %s8751_s11 = smov 40  }
  0x14   : > { %280 = vst.msk [vmem:[#allocation2 + $0x14] sm:$0x1] %vm276_vm1, %v11900_v3  ;;  %v8581_v12 = vld [vmem:[%s8807_s26 + $0x58] sm:$0xff]  ;;  %v8582_v13 = vld [vmem:[%s8807_s26 + $0x60] sm:$0xff]  ;;  %v8583_v14 = vld [vmem:[%s8807_s26 + $0x68] sm:$0xff]  ;;  %s8752_s12 = smov 56  }
  0x15   : > { %281 = vst.msk [vmem:[#allocation2 + $0x18] sm:$0xf] %vm273_vm0, %v11900_v3  ;;  %v8584_v15 = vld [vmem:[%s8807_s26 + $0x70] sm:$0xff]  ;;  %v8585_v16 = vld [vmem:[%s8807_s26 + $0x78] sm:$0xff]  ;;  %v8558_v17 = vld [vmem:[%s8952_s30 + $0x20] sm:$0xff]  ;;  %s8753_s13 = smov 64   ;;  %s11540_s26 = scalar_lea.vmem %s11899_s6, %s8801_s23 }
  0x16   : > { %282 = vst.msk [vmem:[#allocation2 + $0x1c] sm:$0xf] %vm273_vm0, %v11900_v3  ;;  %v1590_v27 = vld [vmem:[#allocation2] sm:$0xe]  ;;  %v8559_v29 = vld [vmem:[%s8952_s30 + $0x28] sm:$0xff]  ;;  %vm9011_vm14 = vmor %vm1203_vm12, %vm1204_vm13  ;;  %s8754_s14 = smov 48  }
  0x17   : > { %283 = vst.msk [vmem:[#allocation2 + $0x20] sm:$0x1] %vm276_vm1, %v11900_v3  ;;  %v8957_v20 = vld [vmem:[#allocation2 + $0x4] sm:$0xf]  ;;  %v1155_v28 = vld [vmem:[#allocation2] sm:$0xf] }
  0x18   : > { %284 = vst.msk [vmem:[#allocation2 + $0x24] sm:$0xf] %vm273_vm0, %v11900_v3  ;;  %v1659_v23 = vrot.slane %v8957_v20, 5  ;;  %v8960_v24 = vld [vmem:[#allocation2 + $0x8] sm:$0x1]  ;;  %v8013_v31 = vrot.slane %v1590_v27, 9 }
  0x19   : > { %559 = vrot.lane.b32.xlu1 %v8573_v4, %s8745_s27  ;;  %555 = vrot.lane.b32.xlu0 %v8571_v5, %s8745_s27  ;;  %285 = vst.msk [vmem:[#allocation2 + $0x28] sm:$0xf] %vm273_vm0, %v11900_v3  ;;  %v1662_v33 = vrot.slane %v8960_v24, 5  ;;  %v1207_v34 = vshrl.u32 %v1155_v28, 16  ;;  %v1210_v41 = vshll.u32 %v1155_v28, 16  ;;  %v8562_v4 = vld [vmem:[%s8952_s30 + $0x40] sm:$0xff] }
  0x1a   : > { %563 = vrot.lane.b32.xlu2 %v8575_v6, %s8745_s27  ;;  %286 = vst.msk [vmem:[#allocation2 + $0x2c] sm:$0x1] %vm276_vm1, %v11900_v3  ;;  %v1661_v32 = vrot.slane %v1659_v23, 4  ;;  %v1660_v39 = vsel %vm8963_vm7, %v8013_v31, %v1659_v23  ;;  %v1071_v48 = vld [vmem:[#allocation2 + $0x3c] sm:$0xf]  ;;  %v1216_v6 = vshll.u32 %v8957_v20, 16 }
  0x1b   : > { %287 = vst.msk [vmem:[#allocation2 + $0x30] sm:$0xf] %vm273_vm0, %v11900_v3  ;;  %v3130_v45 = vunpack.c.l.b16 %v1660_v39  ;;  %v1075_v49 = vld [vmem:[#allocation2 + $0x44] sm:$0x1]  ;;  %v1209_v51 = vrot.slane %v1207_v34, 4  ;;  %v1212_v52 = vrot.slane %v1210_v41, 5 }
  0x1c   : > { %288 = vst.msk [vmem:[#allocation2 + $0x34] sm:$0xf] %vm273_vm0, %v11900_v3  ;;  %v1663_v40 = vsel %vm8963_vm7, %v1661_v32, %v1662_v33  ;;  %v8556_v23 = vld [vmem:[%s8952_s30 + $0x10] sm:$0xff]  ;;  %vm3722_vm15 = vcmask 64512   ;;  %vm3804_vm4 = vcmask 195584   ;;  %vm3837_vm5 = vcmask 261120  }
  0x1d   : > { %289 = vst.msk [vmem:[#allocation2 + $0x38] sm:$0x1] %vm276_vm1, %v11900_v3  ;;  %v3131_v46 = vunpack.c.l.b16 %v1663_v40  ;;  %v1213_v5 = vor.u32 %v1212_v52, %v1209_v51  ;;  %vm3870_vm6 = vcmask 326656   ;;  %vm3969_vm12 = vcmask 523264  }
  0x1e   : > { %293 = vst.msk [vmem:[#allocation2 + $0x48] sm:$0xf] %vm273_vm0, %v11900_v3  ;;  %vm4042_vm13 = vcmask 588800  }
  0x1f   : > { %294 = vst.msk [vmem:[#allocation2 + $0x4c] sm:$0xf] %vm273_vm0, %v11900_v3  ;;  %v3162_v61 = vpack.c.b16 %v3131_v46, %v3130_v45 }
  0x20   : > { %295 = vst.msk [vmem:[#allocation2 + $0x50] sm:$0x1] %vm276_vm1, %v11900_v3 }
  0x21   : > { %565 = vrot.lane.b32.xlu0 %v8576_v7, %s8745_s27  ;;  %567 = vrot.lane.b32.xlu1 %v8577_v8, %s8745_s27  ;;  %296 = vst.msk [vmem:[#allocation2 + $0x54] sm:$0xf] %vm273_vm0, %v11900_v3 }
  0x22   : > { %569 = vrot.lane.b32.xlu2 %v8578_v9, %s8745_s27  ;;  %297 = vst.msk [vmem:[#allocation2 + $0x58] sm:$0xf] %vm273_vm0, %v11900_v3 }
  0x23   : > { %298 = vst.msk [vmem:[#allocation2 + $0x5c] sm:$0x1] %vm276_vm1, %v11900_v3 }
  0x24   : > { %299 = vst.msk [vmem:[#allocation2 + $0x60] sm:$0xf] %vm273_vm0, %v11900_v3 }
  0x25   : > { %300 = vst.msk [vmem:[#allocation2 + $0x64] sm:$0xf] %vm273_vm0, %v11900_v3 }
  0x26   : > { %301 = vst.msk [vmem:[#allocation2 + $0x68] sm:$0x1] %vm276_vm1, %v11900_v3 }
  0x27   : > { %302 = vst.msk [vmem:[#allocation2 + $0x6c] sm:$0xf] %vm273_vm0, %v11900_v3 }
  0x28   : > { %303 = vst.msk [vmem:[#allocation2 + $0x70] sm:$0xf] %vm273_vm0, %v11900_v3 }
  0x29   : > { %571 = vrot.lane.b32.xlu0 %v8579_v10, %s8745_s27  ;;  %573 = vrot.lane.b32.xlu1 %v8580_v11, %s8745_s27  ;;  %304 = vst.msk [vmem:[#allocation2 + $0x74] sm:$0x1] %vm276_vm1, %v11900_v3 }
  0x2a   : > { %575 = vrot.lane.b32.xlu2 %v8581_v12, %s8745_s27  ;;  %305 = vst.msk [vmem:[#allocation2 + $0x78] sm:$0xf] %vm273_vm0, %v11900_v3  ;;  %v1220_v12 = vshrl.u32 %v8957_v20, 16 }
  0x2b   : > { %306 = vst.msk [vmem:[#allocation2 + $0x7c] sm:$0xf] %vm273_vm0, %v11900_v3 }
  0x2c   : > { %307 = vst.msk [vmem:[#allocation2 + $0x80] sm:$0x1] %vm276_vm1, %v11900_v3  ;;  %v1222_v33 = vrot.slane %v1220_v12, 4 }
  0x2d   : > { %308 = vst.msk [vmem:[#allocation2 + $0x84] sm:$0xf] %vm273_vm0, %v11900_v3 }
  0x2e   : > { %309 = vst.msk [vmem:[#allocation2 + $0x88] sm:$0xf] %vm273_vm0, %v11900_v3 }
  0x2f   : > { %310 = vst.msk [vmem:[#allocation2 + $0x8c] sm:$0x1] %vm276_vm1, %v11900_v3 }
  0x30   : > { %311 = vst.msk [vmem:[#allocation2 + $0x90] sm:$0xf] %vm273_vm0, %v11900_v3 }
  0x31   : > { %577 = vrot.lane.b32.xlu0 %v8582_v13, %s8745_s27  ;;  %579 = vrot.lane.b32.xlu1 %v8583_v14, %s8745_s27  ;;  %312 = vst.msk [vmem:[#allocation2 + $0x94] sm:$0xf] %vm273_vm0, %v11900_v3 }
  0x32   : > { %581 = vrot.lane.b32.xlu2 %v8584_v15, %s8745_s27  ;;  %313 = vst.msk [vmem:[#allocation2 + $0x98] sm:$0x1] %vm276_vm1, %v11900_v3 }
  0x33   : > { %314 = vst.msk [vmem:[#allocation2 + $0x9c] sm:$0xf] %vm273_vm0, %v11900_v3 }
  0x34   : > { %315 = vst.msk [vmem:[#allocation2 + $0xa0] sm:$0xf] %vm273_vm0, %v11900_v3 }
  0x35   : > { %316 = vst.msk [vmem:[#allocation2 + $0xa4] sm:$0x1] %vm276_vm1, %v11900_v3 }
  0x36   : > { %317 = vst.msk [vmem:[#allocation2 + $0xa8] sm:$0xf] %vm273_vm0, %v11900_v3 }
  0x37   : > { %318 = vst.msk [vmem:[#allocation2 + $0xac] sm:$0xf] %vm273_vm0, %v11900_v3 }
  0x38   : > { %319 = vst.msk [vmem:[#allocation2 + $0xb0] sm:$0x1] %vm276_vm1, %v11900_v3 }
  0x39   : > { %320 = vst.msk [vmem:[#allocation2 + $0xb4] sm:$0xf] %vm273_vm0, %v11900_v3  ;;  %583 = vrot.lane.b32.xlu0 %v8585_v16, %s8745_s27  ;;  %v1078_v16 = vld [vmem:[#allocation2 + $0x48] sm:$0xf] }
  0x3a   : > { %321 = vst.msk [vmem:[#allocation2 + $0xb8] sm:$0xf] %vm273_vm0, %v11900_v3  ;;  %3178 = vrot.lane.b32.xlu2 %v3162_v61, %s8747_s7 }
  0x3b   : > { %322 = vst.msk [vmem:[#allocation2 + $0xbc] sm:$0x1] %vm276_vm1, %v11900_v3 }
  0x3c   : > { %323 = vst.msk [vmem:[#allocation2 + $0xc0] sm:$0xf] %vm273_vm0, %v11900_v3 }
  0x3d   : > { %324 = vst.msk [vmem:[#allocation2 + $0xc4] sm:$0xf] %vm273_vm0, %v11900_v3 }
  0x3e   : > { %325 = vst.msk [vmem:[#allocation2 + $0xc8] sm:$0x1] %vm276_vm1, %v11900_v3 }
  0x3f   : > { %326 = vst.msk [vmem:[#allocation2 + $0xcc] sm:$0xf] %vm273_vm0, %v11900_v3 }
  0x40   : > { %327 = vst.msk [vmem:[#allocation2 + $0xd0] sm:$0xf] %vm273_vm0, %v11900_v3 }
  0x41   : > { %328 = vst.msk [vmem:[#allocation2 + $0xd4] sm:$0x1] %vm276_vm1, %v11900_v3  ;;  %vm4075_vm1 = vcmask 1043456  }
  0x42   : > { %11910 = vst [vmem:[#allocation4_spill] sm:$0xff] %v11909_v53 }
  0x6c   : > { %v562_v18 = vpop.permute.xlu2 %561 }
  0x6d   : > { %v600_v19 = vsel %vm585_vm2, %v8558_v17, %v562_v18  ;;  %v1082_v17 = vld [vmem:[#allocation2 + $0x50] sm:$0x1] }
  0x6e   : > { %v658_v21 = vunpack.c.l.b16 %v600_v19  ;;  %v659_v22 = vunpack.c.h.b16 %v600_v19 }
  0x70   : > { %v690_v25 = vpack.c.b16 %v658_v21, %v658_v21  ;;  %v691_v26 = vpack.c.b16 %v659_v22, %v659_v22  ;;  %v9003_v21 = vrot.slane %v1213_v5, 4  ;;  %v9005_v22 = vrot.slane %v1216_v6, 5 }
  0x72   : > { %v786_v35 = vshrl.u32 %v690_v25, 16  ;;  %v789_v36 = vshll.u32 %v690_v25, 16  ;;  %v794_v37 = vshrl.u32 %v691_v26, 16  ;;  %v797_v38 = vshll.u32 %v691_v26, 16  ;;  %v8554_v25 = vld [vmem:[%s8952_s30] sm:$0xff] }
  0x74   : > { %v788_v42 = vrot.slane %v786_v35, 7  ;;  %v796_v43 = vrot.slane %v794_v37, 7  ;;  %v564_v44 = vpop.permute.xlu2 %563  ;;  %v1226_v37 = vshll.u32 %v8960_v24, 16  ;;  %v1223_v24 = vor.u32 %v1222_v33, %v9005_v22 }
  0x75   : > { %v603_v50 = vsel %vm585_vm2, %v8559_v29, %v564_v44 }
  0x76   : > { %v791_v54 = vor.u32 %v789_v36, %v788_v42  ;;  %v792_v55 = vrot.slane %v788_v42, 4  ;;  %v799_v56 = vor.u32 %v797_v38, %v796_v43  ;;  %v801_v57 = vrot.slane %v796_v43, 4 }
  0x77   : > { %v660_v59 = vunpack.c.l.b16 %v603_v50  ;;  %v661_v60 = vunpack.c.h.b16 %v603_v50  ;;  %v1219_v43 = vsel %vm9011_vm14, %v9003_v21, %v9005_v22 }
  0x78   : > { %v800_v62 = vsel %vm8981_vm10, %v792_v55, %v799_v56  ;;  %v1072_v63 = vsel %vm8987_vm11, %v791_v54, %v1071_v48  ;;  %v1076_v0 = vsel %vm8974_vm9, %v801_v57, %v1075_v49  ;;  %v9032_v55 = vrot.slane %v1223_v24, 4  ;;  %v1103_v24 = vld [vmem:[#allocation2 + $0x74] sm:$0x1] }
  0x79   : > { %1073 = vst [vmem:[#allocation2 + $0x3c] sm:$0xf] %v1072_v63  ;;  %v692_v1 = vpack.c.b16 %v660_v59, %v660_v59  ;;  %v693_v2 = vpack.c.b16 %v661_v60, %v661_v60  ;;  %v9034_v56 = vrot.slane %v1226_v37, 5  ;;  %v8555_v63 = vld [vmem:[%s8952_s30 + $0x8] sm:$0xff] }
  0x7a   : > { %1074 = vst.msk [vmem:[#allocation2 + $0x40] sm:$0xf] %vm273_vm0, %v800_v62  ;;  %v8557_v62 = vld [vmem:[%s8952_s30 + $0x18] sm:$0xff] }
  0x7b   : > { %1077 = vst [vmem:[#allocation2 + $0x44] sm:$0x1] %v1076_v0  ;;  %v803_v7 = vshrl.u32 %v692_v1, 16  ;;  %v806_v8 = vshll.u32 %v692_v1, 16  ;;  %v811_v9 = vshrl.u32 %v693_v2, 16  ;;  %v814_v10 = vshll.u32 %v693_v2, 16 }
  0x7c   : > { %v570_v11 = vpop.permute.xlu2 %569  ;;  %v1099_v0 = vld [vmem:[#allocation2 + $0x6c] sm:$0xf]  ;;  %v1229_v21 = vsel %vm9011_vm14, %v9032_v55, %v9034_v56 }
  0x7d   : > { %v805_v13 = vrot.slane %v803_v7, 7  ;;  %v813_v14 = vrot.slane %v811_v9, 7  ;;  %v612_v15 = vsel %vm585_vm2, %v8562_v4, %v570_v11 }
  0x7e   : > { %v666_v18 = vunpack.c.l.b16 %v612_v15  ;;  %v667_v19 = vunpack.c.h.b16 %v612_v15 }
  0x7f   : > { %v808_v26 = vor.u32 %v806_v8, %v805_v13  ;;  %v809_v27 = vrot.slane %v805_v13, 4  ;;  %v816_v28 = vor.u32 %v814_v10, %v813_v14  ;;  %v818_v29 = vrot.slane %v813_v14, 4  ;;  %v1057_v14 = vld [vmem:[#allocation2 + $0x24] sm:$0xf] }
  0x80   : > { %v698_v31 = vpack.c.b16 %v666_v18, %v666_v18  ;;  %v699_v32 = vpack.c.b16 %v667_v19, %v667_v19 }
  0x81   : > { %v817_v34 = vsel %vm8981_vm10, %v809_v27, %v816_v28  ;;  %v1079_v35 = vsel %vm8987_vm11, %v808_v26, %v1078_v16  ;;  %v1083_v36 = vsel %vm8974_vm9, %v818_v29, %v1082_v17 }
  0x82   : > { %1080 = vst [vmem:[#allocation2 + $0x48] sm:$0xf] %v1079_v35  ;;  %v854_v40 = vshrl.u32 %v698_v31, 16  ;;  %v857_v41 = vshll.u32 %v698_v31, 16  ;;  %v862_v42 = vshrl.u32 %v699_v32, 16  ;;  %v865_v46 = vshll.u32 %v699_v32, 16 }
  0x83   : > { %v558_v38 = vpop.permute.xlu1 %557  ;;  %v554_v39 = vpop.permute.xlu0 %553  ;;  %1081 = vst.msk [vmem:[#allocation2 + $0x4c] sm:$0xf] %vm273_vm0, %v817_v34  ;;  %v1041_v35 = vld [vmem:[#allocation2 + $0xc] sm:$0xf] }
  0x84   : > { %v594_v44 = vsel %vm585_vm2, %v8556_v23, %v558_v38  ;;  %v588_v45 = vsel %vm585_vm2, %v8554_v25, %v554_v39  ;;  %1084 = vst [vmem:[#allocation2 + $0x50] sm:$0x1] %v1083_v36  ;;  %v856_v52 = vrot.slane %v854_v40, 7  ;;  %v9030_v54 = vrot.slane %v862_v42, 7  ;;  %v1061_v25 = vld [vmem:[#allocation2 + $0x2c] sm:$0x1] }
  0x85   : > { %v654_v48 = vunpack.c.l.b16 %v594_v44  ;;  %v655_v49 = vunpack.c.h.b16 %v594_v44  ;;  %v650_v50 = vunpack.c.l.b16 %v588_v45  ;;  %v651_v51 = vunpack.c.h.b16 %v588_v45  ;;  %v1047_v36 = vld [vmem:[#allocation2 + $0x14] sm:$0x1] }
  0x86   : > { %v859_v1 = vor.u32 %v857_v41, %v856_v52  ;;  %v860_v2 = vrot.slane %v856_v52, 4  ;;  %v867_v4 = vor.u32 %v865_v46, %v9030_v54  ;;  %v869_v5 = vrot.slane %v9030_v54, 4  ;;  %v8565_v41 = vld [vmem:[%s8952_s30 + $0x58] sm:$0xff]  ;;  %v8560_v52 = vld [vmem:[%s8952_s30 + $0x30] sm:$0xff] }
  0x87   : > { %v686_v57 = vpack.c.b16 %v654_v48, %v654_v48  ;;  %v687_v59 = vpack.c.b16 %v655_v49, %v655_v49  ;;  %v682_v60 = vpack.c.b16 %v650_v50, %v650_v50  ;;  %v683_v61 = vpack.c.b16 %v651_v51, %v651_v51  ;;  %v576_v48 = vpop.permute.xlu2 %575  ;;  %v8561_v54 = vld [vmem:[%s8952_s30 + $0x38] sm:$0xff] }
  0x88   : > { %v868_v19 = vsel %vm8981_vm10, %v860_v2, %v867_v4  ;;  %v1100_v23 = vsel %vm8987_vm11, %v859_v1, %v1099_v0  ;;  %v1104_v0 = vsel %vm8974_vm9, %v869_v5, %v1103_v24  ;;  %v9077_v22 = vsel %vm585_vm2, %v8565_v41, %v576_v48 }
  0x89   : > { %v752_v6 = vshrl.u32 %v686_v57, 16  ;;  %v755_v7 = vshll.u32 %v686_v57, 16  ;;  %v760_v8 = vshrl.u32 %v687_v59, 16  ;;  %v763_v9 = vshll.u32 %v687_v59, 16  ;;  %1101 = vst [vmem:[#allocation2 + $0x6c] sm:$0xf] %v1100_v23 }
  0x8a   : > { %v718_v10 = vshrl.u32 %v682_v60, 16  ;;  %v721_v11 = vshll.u32 %v682_v60, 16  ;;  %v726_v12 = vshrl.u32 %v683_v61, 16  ;;  %v729_v13 = vshll.u32 %v683_v61, 16  ;;  %1102 = vst.msk [vmem:[#allocation2 + $0x70] sm:$0xf] %vm273_vm0, %v868_v19 }
  0x8b   : > { %v754_v15 = vrot.slane %v752_v6, 7  ;;  %v762_v16 = vrot.slane %v760_v8, 7  ;;  %v560_v17 = vpop.permute.xlu1 %559  ;;  %v556_v18 = vpop.permute.xlu0 %555  ;;  %v9065_v57 = vunpack.c.l.b16 %v1219_v43  ;;  %1105 = vst [vmem:[#allocation2 + $0x74] sm:$0x1] %v1104_v0 }
  0x8c   : > { %v720_v26 = vrot.slane %v718_v10, 7  ;;  %v728_v27 = vrot.slane %v726_v12, 7  ;;  %v597_v28 = vsel %vm585_vm2, %v8557_v62, %v560_v17  ;;  %v591_v29 = vsel %vm585_vm2, %v8555_v63, %v556_v18  ;;  %v1068_v18 = vld [vmem:[#allocation2 + $0x38] sm:$0x1] }
  0x8d   : > { %v757_v31 = vor.u32 %v755_v7, %v754_v15  ;;  %v758_v32 = vrot.slane %v754_v15, 4  ;;  %v765_v33 = vor.u32 %v763_v9, %v762_v16  ;;  %v767_v34 = vrot.slane %v762_v16, 4 }
  0x8e   : > { %v723_v37 = vor.u32 %v721_v11, %v720_v26  ;;  %v724_v38 = vrot.slane %v720_v26, 4  ;;  %v731_v39 = vor.u32 %v729_v13, %v728_v27  ;;  %v733_v40 = vrot.slane %v728_v27, 4  ;;  %v1064_v13 = vld [vmem:[#allocation2 + $0x30] sm:$0xf] }
  0x8f   : > { %v766_v42 = vsel %vm8981_vm10, %v758_v32, %v765_v33  ;;  %v1058_v44 = vsel %vm8987_vm11, %v757_v31, %v1057_v14  ;;  %v1062_v45 = vsel %vm8974_vm9, %v767_v34, %v1061_v25  ;;  %v656_v46 = vunpack.c.l.b16 %v597_v28 }
  0x90   : > { %1059 = vst [vmem:[#allocation2 + $0x24] sm:$0xf] %v1058_v44  ;;  %v732_v49 = vsel %vm8981_vm10, %v724_v38, %v731_v39  ;;  %v1042_v50 = vsel %vm8987_vm11, %v723_v37, %v1041_v35  ;;  %v657_v51 = vunpack.c.h.b16 %v597_v28  ;;  %v1048_v59 = vsel %vm8974_vm9, %v733_v40, %v1047_v36  ;;  %v1054_v35 = vld [vmem:[#allocation2 + $0x20] sm:$0x1] }
  0x91   : > { %1060 = vst.msk [vmem:[#allocation2 + $0x28] sm:$0xf] %vm273_vm0, %v766_v42  ;;  %v688_v60 = vpack.c.b16 %v656_v46, %v656_v46  ;;  %v652_v61 = vunpack.c.l.b16 %v591_v29  ;;  %v653_v62 = vunpack.c.h.b16 %v591_v29  ;;  %v1050_v29 = vld [vmem:[#allocation2 + $0x18] sm:$0xf] }
  0x92   : > { %1063 = vst [vmem:[#allocation2 + $0x2c] sm:$0x1] %v1062_v45  ;;  %v689_v63 = vpack.c.b16 %v657_v51, %v657_v51 }
  0x93   : > { %1043 = vst [vmem:[#allocation2 + $0xc] sm:$0xf] %v1042_v50  ;;  %v769_v43 = vshrl.u32 %v688_v60, 16  ;;  %v772_v1 = vshll.u32 %v688_v60, 16  ;;  %v684_v2 = vpack.c.b16 %v652_v61, %v652_v61  ;;  %v685_v4 = vpack.c.b16 %v653_v62, %v653_v62  ;;  %v566_v6 = vpop.permute.xlu0 %565  ;;  %v568_v7 = vpop.permute.xlu1 %567 }
  0x94   : > { %1044 = vst.msk [vmem:[#allocation2 + $0x10] sm:$0xf] %vm273_vm0, %v732_v49  ;;  %v777_v8 = vshrl.u32 %v689_v63, 16  ;;  %v780_v9 = vshll.u32 %v689_v63, 16  ;;  %v606_v5 = vsel %vm585_vm2, %v8560_v52, %v566_v6  ;;  %v9082_v10 = vsel %vm585_vm2, %v8561_v54, %v568_v7  ;;  %v1085_v54 = vld [vmem:[#allocation2 + $0x54] sm:$0xf] }
  0x95   : > { %1049 = vst [vmem:[#allocation2 + $0x14] sm:$0x1] %v1048_v59  ;;  %v771_v55 = vrot.slane %v769_v43, 7  ;;  %v735_v56 = vshrl.u32 %v684_v2, 16  ;;  %v738_v11 = vshll.u32 %v684_v2, 16  ;;  %v743_v12 = vshrl.u32 %v685_v4, 16 }
  0x96   : > { %v779_v14 = vrot.slane %v777_v8, 7  ;;  %v746_v15 = vshll.u32 %v685_v4, 16  ;;  %v662_v16 = vunpack.c.l.b16 %v606_v5  ;;  %v663_v17 = vunpack.c.h.b16 %v606_v5  ;;  %v1089_v63 = vld [vmem:[#allocation2 + $0x5c] sm:$0x1]  ;;  %v8607_v4 = vld [vmem:[#allocation2 + $0x48] sm:$0xff]  ;;  %v8564_v5 = vld [vmem:[%s8952_s30 + $0x50] sm:$0xff] }
  0x97   : > { %v774_v19 = vor.u32 %v772_v1, %v771_v55  ;;  %v775_v23 = vrot.slane %v771_v55, 4  ;;  %v737_v25 = vrot.slane %v735_v56, 7  ;;  %v745_v26 = vrot.slane %v743_v12, 7 }
  0x98   : > { %v782_v27 = vor.u32 %v780_v9, %v779_v14  ;;  %v784_v28 = vrot.slane %v779_v14, 4  ;;  %v694_v31 = vpack.c.b16 %v662_v16, %v662_v16  ;;  %v695_v32 = vpack.c.b16 %v663_v17, %v663_v17  ;;  %v8604_v33 = vld [vmem:[#allocation2 + $0x24] sm:$0xff] }
  0x99   : > { %v1065_v34 = vsel %vm8987_vm11, %v774_v19, %v1064_v13  ;;  %v740_v36 = vor.u32 %v738_v11, %v737_v25  ;;  %v741_v37 = vrot.slane %v737_v25, 4  ;;  %v748_v38 = vor.u32 %v746_v15, %v745_v26  ;;  %3278 = vrot.lane.b32.xlu2 %v8604_v33, %s8748_s8  ;;  %v8563_v9 = vld [vmem:[%s8952_s30 + $0x48] sm:$0xff]  ;;  %v9109_v14 = vld [vmem:[#allocation2 + $0x24] sm:$0xe] }
  0x9a   : > { %v783_v39 = vsel %vm8981_vm10, %v775_v23, %v782_v27  ;;  %1066 = vst [vmem:[#allocation2 + $0x30] sm:$0xf] %v1065_v34  ;;  %v1069_v40 = vsel %vm8974_vm9, %v784_v28, %v1068_v18  ;;  %v750_v41 = vrot.slane %v745_v26, 4  ;;  %v820_v42 = vshrl.u32 %v694_v31, 16  ;;  %v1092_v26 = vld [vmem:[#allocation2 + $0x60] sm:$0xf] }
  0x9b   : > { %1067 = vst.msk [vmem:[#allocation2 + $0x34] sm:$0xf] %vm273_vm0, %v783_v39  ;;  %v749_v44 = vsel %vm8981_vm10, %v741_v37, %v748_v38  ;;  %v1051_v45 = vsel %vm8987_vm11, %v740_v36, %v1050_v29  ;;  %v823_v46 = vshll.u32 %v694_v31, 16  ;;  %v828_v24 = vshrl.u32 %v695_v32, 16  ;;  %v8602_v48 = vld [vmem:[#allocation2 + $0xc] sm:$0xff]  ;;  %v572_v12 = vpop.permute.xlu0 %571  ;;  %v574_v13 = vpop.permute.xlu1 %573 }
  0x9c   : > { %1070 = vst [vmem:[#allocation2 + $0x38] sm:$0x1] %v1069_v40  ;;  %v1055_v49 = vsel %vm8974_vm9, %v750_v41, %v1054_v35  ;;  %v822_v50 = vrot.slane %v820_v42, 7  ;;  %v831_v51 = vshll.u32 %v695_v32, 16  ;;  %v664_v52 = vunpack.c.l.b16 %v9082_v10  ;;  %3274 = vrot.lane.b32.xlu0 %v8602_v48, %s8748_s8  ;;  %v1096_v32 = vld [vmem:[#allocation2 + $0x68] sm:$0x1] }
  0x9d   : > { %1052 = vst [vmem:[#allocation2 + $0x18] sm:$0xf] %v1051_v45  ;;  %v830_v59 = vrot.slane %v828_v24, 7  ;;  %v665_v60 = vunpack.c.h.b16 %v9082_v10  ;;  %v3051_v61 = vunpack.c.l.b16 %v1229_v21  ;;  %v672_v62 = vunpack.c.l.b16 %v9077_v22  ;;  %v1120_v39 = vld [vmem:[#allocation2 + $0x90] sm:$0xf] }
  0x9e   : > { %1053 = vst.msk [vmem:[#allocation2 + $0x1c] sm:$0xf] %vm273_vm0, %v749_v44  ;;  %v825_v0 = vor.u32 %v823_v46, %v822_v50  ;;  %v826_v43 = vrot.slane %v822_v50, 4  ;;  %v696_v1 = vpack.c.b16 %v664_v52, %v664_v52  ;;  %v673_v2 = vunpack.c.h.b16 %v9077_v22  ;;  %v8610_v48 = vld [vmem:[#allocation2 + $0x6c] sm:$0xff] }
  0x9f   : > { %1056 = vst [vmem:[#allocation2 + $0x20] sm:$0x1] %v1055_v49  ;;  %v833_v6 = vor.u32 %v831_v51, %v830_v59  ;;  %v835_v7 = vrot.slane %v830_v59, 4  ;;  %v697_v8 = vpack.c.b16 %v665_v60, %v665_v60  ;;  %v3082_v21 = vpack.c.b16 %v3051_v61, %v9065_v57  ;;  %v1124_v51 = vld [vmem:[#allocation2 + $0x98] sm:$0x1] }
  0xa0   : > { %v1086_v10 = vsel %vm8987_vm11, %v825_v0, %v1085_v54  ;;  %v837_v55 = vshrl.u32 %v696_v1, 16  ;;  %v840_v56 = vshll.u32 %v696_v1, 16  ;;  %v704_v11 = vpack.c.b16 %v672_v62, %v672_v62  ;;  %v9128_v59 = vld [vmem:[#allocation2 + $0x28] sm:$0xf]  ;;  %v8566_v0 = vld [vmem:[%s8952_s30 + $0x60] sm:$0xff] }
  0xa1   : > { %v834_v22 = vsel %vm8981_vm10, %v826_v43, %v833_v6  ;;  %1087 = vst [vmem:[#allocation2 + $0x54] sm:$0xf] %v1086_v10  ;;  %v1090_v15 = vsel %vm8974_vm9, %v835_v7, %v1089_v63  ;;  %v845_v57 = vshrl.u32 %v697_v8, 16  ;;  %v848_v16 = vshll.u32 %v697_v8, 16  ;;  %3098 = vrot.lane.b32.xlu1 %v3082_v21, %s8749_s9  ;;  %3284 = vrot.lane.b32.xlu2 %v8607_v4, %s8748_s8 }
  0xa2   : > { %1088 = vst.msk [vmem:[#allocation2 + $0x58] sm:$0xf] %vm273_vm0, %v834_v22  ;;  %v839_v17 = vrot.slane %v837_v55, 7  ;;  %v705_v18 = vpack.c.b16 %v673_v2, %v673_v2  ;;  %v905_v19 = vshrl.u32 %v704_v11, 16  ;;  %v908_v23 = vshll.u32 %v704_v11, 16  ;;  %v8605_v25 = vld [vmem:[#allocation2 + $0x30] sm:$0xff] }
  0xa3   : > { %1091 = vst [vmem:[#allocation2 + $0x5c] sm:$0x1] %v1090_v15  ;;  %v847_v27 = vrot.slane %v845_v57, 7  ;;  %v615_v28 = vsel %vm585_vm2, %v8563_v9, %v572_v12  ;;  %v618_v29 = vsel %vm585_vm2, %v8564_v5, %v574_v13  ;;  %v8016_v31 = vrot.slane %v9109_v14, 9  ;;  %v578_v7 = vpop.permute.xlu0 %577  ;;  %v1106_v12 = vld [vmem:[#allocation2 + $0x78] sm:$0xf] }
  0xa4   : > { %v842_v33 = vor.u32 %v840_v56, %v839_v17  ;;  %v843_v34 = vrot.slane %v839_v17, 4  ;;  %v907_v35 = vrot.slane %v905_v19, 7  ;;  %v913_v36 = vshrl.u32 %v705_v18, 16  ;;  %3280 = vrot.lane.b32.xlu0 %v8605_v25, %s8748_s8  ;;  %v1110_v57 = vld [vmem:[#allocation2 + $0x80] sm:$0x1] }
  0xa5   : > { %v850_v37 = vor.u32 %v848_v16, %v847_v27  ;;  %v852_v38 = vrot.slane %v847_v27, 4  ;;  %v916_v40 = vshll.u32 %v705_v18, 16  ;;  %v668_v41 = vunpack.c.l.b16 %v615_v28  ;;  %v8603_v42 = vld [vmem:[#allocation2 + $0x18] sm:$0xff] }
  0xa6   : > { %v1093_v44 = vsel %vm8987_vm11, %v842_v33, %v1092_v26  ;;  %v910_v45 = vor.u32 %v908_v23, %v907_v35  ;;  %v911_v46 = vrot.slane %v907_v35, 4  ;;  %v915_v24 = vrot.slane %v913_v36, 7  ;;  %v1113_v23 = vld [vmem:[#allocation2 + $0x84] sm:$0xf]  ;;  %v8606_v27 = vld [vmem:[#allocation2 + $0x3c] sm:$0xff] }
  0xa7   : > { %v851_v49 = vsel %vm8981_vm10, %v843_v34, %v850_v37  ;;  %1094 = vst [vmem:[#allocation2 + $0x60] sm:$0xf] %v1093_v44  ;;  %v1097_v50 = vsel %vm8974_vm9, %v852_v38, %v1096_v32  ;;  %v669_v52 = vunpack.c.h.b16 %v615_v28  ;;  %v700_v54 = vpack.c.b16 %v668_v41, %v668_v41  ;;  %v9150_v36 = vld [vmem:[#allocation2 + $0x2c] sm:$0x1]  ;;  %v1591_v41 = vld [vmem:[#allocation2 + $0xc] sm:$0xe] }
  0xa8   : > { %1095 = vst.msk [vmem:[#allocation2 + $0x64] sm:$0xf] %vm273_vm0, %v851_v49  ;;  %v918_v60 = vor.u32 %v916_v40, %v915_v24  ;;  %v920_v61 = vrot.slane %v915_v24, 4  ;;  %v1121_v62 = vsel %vm8987_vm11, %v910_v45, %v1120_v39  ;;  %v670_v63 = vunpack.c.l.b16 %v618_v29  ;;  %v9157_v24 = vld [vmem:[#allocation2 + $0x10] sm:$0xf] }
  0xa9   : > { %1098 = vst [vmem:[#allocation2 + $0x68] sm:$0x1] %v1097_v50  ;;  %v701_v43 = vpack.c.b16 %v669_v52, %v669_v52  ;;  %v871_v1 = vshrl.u32 %v700_v54, 16  ;;  %v874_v2 = vshll.u32 %v700_v54, 16  ;;  %v671_v4 = vunpack.c.h.b16 %v618_v29  ;;  %3276 = vrot.lane.b32.xlu1 %v8603_v42, %s8748_s8  ;;  %v8608_v6 = vld [vmem:[#allocation2 + $0x54] sm:$0xff]  ;;  %3290 = vrot.lane.b32.xlu2 %v8610_v48, %s8748_s8 }
  0xaa   : > { %v919_v8 = vsel %vm8981_vm10, %v911_v46, %v918_v60  ;;  %1122 = vst [vmem:[#allocation2 + $0x90] sm:$0xf] %v1121_v62  ;;  %v1125_v21 = vsel %vm8974_vm9, %v920_v61, %v1124_v51  ;;  %v702_v9 = vpack.c.b16 %v670_v63, %v670_v63  ;;  %v1680_v5 = vrot.slane %v9128_v59, 5  ;;  %v9159_v48 = vld [vmem:[#allocation2 + $0x14] sm:$0x1]  ;;  %v582_v61 = vpop.permute.xlu2 %581 }
  0xab   : > { %1123 = vst.msk [vmem:[#allocation2 + $0x94] sm:$0xf] %vm273_vm0, %v919_v8  ;;  %v873_v10 = vrot.slane %v871_v1, 7  ;;  %v879_v55 = vshrl.u32 %v701_v43, 16  ;;  %v882_v56 = vshll.u32 %v701_v43, 16  ;;  %v703_v11 = vpack.c.b16 %v671_v4, %v671_v4  ;;  %v8568_v49 = vld [vmem:[%s8952_s30 + $0x70] sm:$0xff] }
  0xac   : > { %1126 = vst [vmem:[#allocation2 + $0x98] sm:$0x1] %v1125_v21  ;;  %v888_v13 = vshrl.u32 %v702_v9, 16  ;;  %v891_v14 = vshll.u32 %v702_v9, 16  ;;  %v624_v22 = vsel %vm585_vm2, %v8566_v0, %v578_v7  ;;  %v9145_v15 = vsel %vm8963_vm7, %v8016_v31, %v1680_v5  ;;  %3286 = vrot.lane.b32.xlu0 %v8608_v6, %s8748_s8  ;;  %v1117_v31 = vld [vmem:[#allocation2 + $0x8c] sm:$0x1] }
  0xad   : > { %v876_v16 = vor.u32 %v874_v2, %v873_v10  ;;  %v877_v17 = vrot.slane %v873_v10, 4  ;;  %v881_v18 = vrot.slane %v879_v55, 7  ;;  %v896_v19 = vshrl.u32 %v703_v11, 16  ;;  %v1127_v0 = vld [vmem:[#allocation2 + $0x9c] sm:$0xf] }
  0xae   : > { %v890_v25 = vrot.slane %v888_v13, 7  ;;  %v899_v26 = vshll.u32 %v703_v11, 16  ;;  %v674_v28 = vunpack.c.l.b16 %v624_v22  ;;  %v675_v29 = vunpack.c.h.b16 %v624_v22  ;;  %v1131_v43 = vld [vmem:[#allocation2 + $0xa4] sm:$0x1]  ;;  %v8567_v13 = vld [vmem:[%s8952_s30 + $0x68] sm:$0xff] }
  0xaf   : > { %v884_v32 = vor.u32 %v882_v56, %v881_v18  ;;  %v886_v33 = vrot.slane %v881_v18, 4  ;;  %v1107_v34 = vsel %vm8987_vm11, %v876_v16, %v1106_v12  ;;  %v898_v35 = vrot.slane %v896_v19, 7  ;;  %v1596_v18 = vld [vmem:[#allocation2 + $0x48] sm:$0xe] }
  0xb0   : > { %1108 = vst [vmem:[#allocation2 + $0x78] sm:$0xf] %v1107_v34  ;;  %v893_v37 = vor.u32 %v891_v14, %v890_v25  ;;  %v894_v38 = vrot.slane %v890_v25, 4  ;;  %v706_v39 = vpack.c.b16 %v674_v28, %v674_v28  ;;  %v707_v40 = vpack.c.b16 %v675_v29, %v675_v29  ;;  %v8609_v14 = vld [vmem:[#allocation2 + $0x60] sm:$0xff] }
  0xb1   : > { %v885_v42 = vsel %vm8981_vm10, %v877_v17, %v884_v32  ;;  %v1111_v44 = vsel %vm8974_vm9, %v886_v33, %v1110_v57  ;;  %v901_v45 = vor.u32 %v899_v26, %v898_v35  ;;  %v903_v46 = vrot.slane %v898_v35, 4  ;;  %3282 = vrot.lane.b32.xlu1 %v8606_v27, %s8748_s8  ;;  %v580_v17 = vpop.permute.xlu1 %579  ;;  %v9187_v27 = vld [vmem:[#allocation2 + $0x4c] sm:$0xf] }
  0xb2   : > { %1109 = vst.msk [vmem:[#allocation2 + $0x7c] sm:$0xf] %vm273_vm0, %v885_v42  ;;  %v1114_v50 = vsel %vm8987_vm11, %v893_v37, %v1113_v23  ;;  %v8613_v51 = vld [vmem:[#allocation2 + $0x90] sm:$0xff]  ;;  %v922_v52 = vshrl.u32 %v706_v39, 16  ;;  %v925_v54 = vshll.u32 %v706_v39, 16  ;;  %v930_v60 = vshrl.u32 %v707_v40, 16 }
  0xb3   : > { %1112 = vst [vmem:[#allocation2 + $0x80] sm:$0x1] %v1111_v44  ;;  %v902_v62 = vsel %vm8981_vm10, %v894_v38, %v901_v45  ;;  %v1118_v63 = vsel %vm8974_vm9, %v903_v46, %v1117_v31  ;;  %v933_v1 = vshll.u32 %v707_v40, 16  ;;  %v1682_v2 = vrot.slane %v1680_v5, 4  ;;  %3296 = vrot.lane.b32.xlu2 %v8613_v51, %s8748_s8  ;;  %v9192_v31 = vld [vmem:[#allocation2 + $0x50] sm:$0x1] }
  0xb4   : > { %1115 = vst [vmem:[#allocation2 + $0x84] sm:$0xf] %v1114_v50  ;;  %v924_v4 = vrot.slane %v922_v52, 7  ;;  %v932_v6 = vrot.slane %v930_v60, 7  ;;  %v1683_v7 = vrot.slane %v9150_v36, 5  ;;  %v3136_v8 = vunpack.c.l.b16 %v9145_v15 }
  0xb5   : > { %1116 = vst.msk [vmem:[#allocation2 + $0x88] sm:$0xf] %vm273_vm0, %v902_v62  ;;  %v8014_v21 = vrot.slane %v1591_v41, 9  ;;  %v1666_v9 = vrot.slane %v9157_v24, 5  ;;  %v1669_v10 = vrot.slane %v9159_v48, 5  ;;  %v630_v55 = vsel %vm585_vm2, %v8568_v49, %v582_v61 }
  0xb6   : > { %1119 = vst [vmem:[#allocation2 + $0x8c] sm:$0x1] %v1118_v63  ;;  %v927_v5 = vor.u32 %v925_v54, %v924_v4  ;;  %v928_v56 = vrot.slane %v924_v4, 4  ;;  %v935_v11 = vor.u32 %v933_v1, %v932_v6  ;;  %v937_v12 = vrot.slane %v932_v6, 4  ;;  %v1592_v45 = vld [vmem:[#allocation2 + $0x18] sm:$0xe] }
  0xb7   : > { %v1684_v22 = vsel %vm8963_vm7, %v1682_v2, %v1683_v7  ;;  %v1667_v15 = vsel %vm8963_vm7, %v8014_v21, %v1666_v9  ;;  %v1668_v57 = vrot.slane %v1666_v9, 4  ;;  %v678_v16 = vunpack.c.l.b16 %v630_v55  ;;  %v1141_v62 = vld [vmem:[#allocation2 + $0xb4] sm:$0xf]  ;;  %v1145_v63 = vld [vmem:[#allocation2 + $0xbc] sm:$0x1] }
  0xb8   : > { %v936_v19 = vsel %vm8981_vm10, %v928_v56, %v935_v11  ;;  %v1128_v23 = vsel %vm8987_vm11, %v927_v5, %v1127_v0  ;;  %v1132_v25 = vsel %vm8974_vm9, %v937_v12, %v1131_v43  ;;  %v3137_v26 = vunpack.c.l.b16 %v1684_v22  ;;  %v9202_v9 = vld [vmem:[#allocation2 + $0x1c] sm:$0xf]  ;;  %v1138_v22 = vld [vmem:[#allocation2 + $0xb0] sm:$0x1]  ;;  %v1787_v3 = vld [vmem:[#allocation2 + $0x78] sm:$0xf] }
  0xb9   : > { %3288 = vrot.lane.b32.xlu1 %v8609_v14, %s8748_s8  ;;  %v8611_v28 = vld [vmem:[#allocation2 + $0x78] sm:$0xff]  ;;  %1129 = vst [vmem:[#allocation2 + $0x9c] sm:$0xf] %v1128_v23  ;;  %v1670_v29 = vsel %vm8963_vm7, %v1668_v57, %v1669_v10  ;;  %v3132_v32 = vunpack.c.l.b16 %v1667_v15  ;;  %v679_v33 = vunpack.c.h.b16 %v630_v55  ;;  %v710_v34 = vpack.c.b16 %v678_v16, %v678_v16  ;;  %v1134_v10 = vld [vmem:[#allocation2 + $0xa8] sm:$0xf] }
  0xba   : > { %1130 = vst.msk [vmem:[#allocation2 + $0xa0] sm:$0xf] %vm273_vm0, %v936_v19  ;;  %v3165_v35 = vpack.c.b16 %v3137_v26, %v3136_v8  ;;  %v3133_v37 = vunpack.c.l.b16 %v1670_v29  ;;  %v627_v38 = vsel %vm585_vm2, %v8567_v13, %v580_v17  ;;  %v8019_v39 = vrot.slane %v1596_v18, 9  ;;  %3292 = vrot.lane.b32.xlu0 %v8611_v28, %s8748_s8  ;;  %v9209_v57 = vld [vmem:[#allocation2 + $0x20] sm:$0x1] }
  0xbb   : > { %1133 = vst [vmem:[#allocation2 + $0xa4] sm:$0x1] %v1132_v25  ;;  %v711_v40 = vpack.c.b16 %v679_v33, %v679_v33  ;;  %v956_v41 = vshrl.u32 %v710_v34, 16  ;;  %v959_v42 = vshll.u32 %v710_v34, 16  ;;  %v676_v44 = vunpack.c.l.b16 %v627_v38  ;;  %v9211_v16 = vld [vmem:[#allocation2 + $0x34] sm:$0xf] }
  0xbc   : > { %3184 = vrot.lane.b32.xlu2 %v3165_v35, %s8747_s7  ;;  %v3163_v46 = vpack.c.b16 %v3133_v37, %v3132_v32  ;;  %v677_v49 = vunpack.c.h.b16 %v627_v38  ;;  %v1701_v50 = vrot.slane %v9187_v27, 5  ;;  %v1704_v51 = vrot.slane %v9192_v31, 5  ;;  %v8612_v4 = vld [vmem:[#allocation2 + $0x84] sm:$0xff]  ;;  %v9214_v25 = vld [vmem:[#allocation2 + $0x38] sm:$0x1] }
  0xbd   : > { %v958_v52 = vrot.slane %v956_v41, 7  ;;  %v964_v54 = vshrl.u32 %v711_v40, 16  ;;  %v967_v60 = vshll.u32 %v711_v40, 16  ;;  %v708_v61 = vpack.c.b16 %v676_v44, %v676_v44  ;;  %v1594_v33 = vld [vmem:[#allocation2 + $0x30] sm:$0xe] }
  0xbe   : > { %v709_v0 = vpack.c.b16 %v677_v49, %v677_v49  ;;  %v1702_v43 = vsel %vm8963_vm7, %v8019_v39, %v1701_v50  ;;  %v1703_v1 = vrot.slane %v1701_v50, 4  ;;  %v8015_v2 = vrot.slane %v1592_v45, 9  ;;  %v9221_v34 = vld [vmem:[#allocation2 + $0x70] sm:$0xf]  ;;  %v1599_v40 = vld [vmem:[#allocation2 + $0x6c] sm:$0xe] }
  0xbf   : > { %v961_v6 = vor.u32 %v959_v42, %v958_v52  ;;  %v962_v7 = vrot.slane %v958_v52, 4  ;;  %v966_v8 = vrot.slane %v964_v54, 7  ;;  %v939_v21 = vshrl.u32 %v708_v61, 16  ;;  %v9237_v54 = vld [vmem:[#allocation2 + $0x44] sm:$0x1] }
  0xc0   : > { %v942_v55 = vshll.u32 %v708_v61, 16  ;;  %v947_v5 = vshrl.u32 %v709_v0, 16  ;;  %v950_v56 = vshll.u32 %v709_v0, 16  ;;  %v1705_v11 = vsel %vm8963_vm7, %v1703_v1, %v1704_v51 }
  0xc1   : > { %3294 = vrot.lane.b32.xlu1 %v8612_v4, %s8748_s8  ;;  %v969_v12 = vor.u32 %v967_v60, %v966_v8  ;;  %v971_v13 = vrot.slane %v966_v8, 4  ;;  %v1142_v14 = vsel %vm8987_vm11, %v961_v6, %v1141_v62  ;;  %v941_v15 = vrot.slane %v939_v21, 7  ;;  %v1595_v60 = vld [vmem:[#allocation2 + $0x3c] sm:$0xe]  ;;  %v1597_v6 = vld [vmem:[#allocation2 + $0x54] sm:$0xe] }
  0xc2   : > { %1143 = vst [vmem:[#allocation2 + $0xb4] sm:$0xf] %v1142_v14  ;;  %v949_v17 = vrot.slane %v947_v5, 7  ;;  %v3142_v18 = vunpack.c.l.b16 %v1702_v43  ;;  %v3143_v19 = vunpack.c.l.b16 %v1705_v11  ;;  %v1673_v23 = vrot.slane %v9202_v9, 5  ;;  %3180 = vrot.lane.b32.xlu0 %v3163_v46, %s8747_s7  ;;  %v9229_v46 = vld [vmem:[#allocation2 + $0x74] sm:$0x1] }
  0xc3   : > { %v970_v26 = vsel %vm8981_vm10, %v962_v7, %v969_v12  ;;  %v1146_v28 = vsel %vm8974_vm9, %v971_v13, %v1145_v63  ;;  %v944_v29 = vor.u32 %v942_v55, %v941_v15  ;;  %v945_v32 = vrot.slane %v941_v15, 4  ;;  %v9251_v5 = vld [vmem:[#allocation2 + $0x58] sm:$0xf]  ;;  %v9256_v14 = vld [vmem:[#allocation2 + $0x5c] sm:$0x1] }
  0xc4   : > { %1144 = vst.msk [vmem:[#allocation2 + $0xb8] sm:$0xf] %vm273_vm0, %v970_v26  ;;  %v952_v35 = vor.u32 %v950_v56, %v949_v17  ;;  %v954_v37 = vrot.slane %v949_v17, 4  ;;  %v3168_v38 = vpack.c.b16 %v3143_v19, %v3142_v18  ;;  %v1674_v39 = vsel %vm8963_vm7, %v8015_v2, %v1673_v23 }
  0xc5   : > { %1147 = vst [vmem:[#allocation2 + $0xbc] sm:$0x1] %v1146_v28  ;;  %v1135_v41 = vsel %vm8987_vm11, %v944_v29, %v1134_v10  ;;  %v1675_v42 = vrot.slane %v1673_v23, 4  ;;  %v1676_v44 = vrot.slane %v9209_v57, 5  ;;  %v3134_v45 = vunpack.c.l.b16 %v1674_v39  ;;  %v9249_v10 = vld [vmem:[#allocation2 + $0x40] sm:$0xf] }
  0xc6   : > { %v953_v49 = vsel %vm8981_vm10, %v945_v32, %v952_v35  ;;  %1136 = vst [vmem:[#allocation2 + $0xa8] sm:$0xf] %v1135_v41  ;;  %v1139_v50 = vsel %vm8974_vm9, %v954_v37, %v1138_v22  ;;  %3190 = vrot.lane.b32.xlu2 %v3168_v38, %s8747_s7  ;;  %v8017_v51 = vrot.slane %v1594_v33, 9  ;;  %v1687_v52 = vrot.slane %v9211_v16, 5  ;;  %v1602_v22 = vld [vmem:[#allocation2 + $0x90] sm:$0xe] }
  0xc7   : > { %1137 = vst.msk [vmem:[#allocation2 + $0xac] sm:$0xf] %vm273_vm0, %v953_v49  ;;  %v1677_v61 = vsel %vm8963_vm7, %v1675_v42, %v1676_v44  ;;  %v1690_v62 = vrot.slane %v9214_v25, 5  ;;  %v8022_v63 = vrot.slane %v1599_v40, 9  ;;  %v1722_v0 = vrot.slane %v9221_v34, 5 }
  0xc8   : > { %1140 = vst [vmem:[#allocation2 + $0xb0] sm:$0x1] %v1139_v50  ;;  %v3135_v43 = vunpack.c.l.b16 %v1677_v61  ;;  %v1688_v1 = vsel %vm8963_vm7, %v8017_v51, %v1687_v52  ;;  %v1689_v2 = vrot.slane %v1687_v52, 4  ;;  %v1725_v4 = vrot.slane %v9229_v46, 5  ;;  %v9265_v32 = vld [vmem:[#allocation2 + $0x94] sm:$0xf] }
  0xc9   : > { %v3138_v7 = vunpack.c.l.b16 %v1688_v1  ;;  %v1723_v8 = vsel %vm8963_vm7, %v8022_v63, %v1722_v0  ;;  %v1724_v21 = vrot.slane %v1722_v0, 4  ;;  %v8018_v55 = vrot.slane %v1595_v60, 9  ;;  %v9267_v33 = vld [vmem:[#allocation2 + $0x98] sm:$0x1]  ;;  %v9270_v40 = vld [vmem:[#allocation2 + $0x68] sm:$0x1] }
  0xca   : > { %v3164_v56 = vpack.c.b16 %v3135_v43, %v3134_v45  ;;  %v1691_v11 = vsel %vm8963_vm7, %v1689_v2, %v1690_v62  ;;  %v3148_v12 = vunpack.c.l.b16 %v1723_v8  ;;  %v1694_v13 = vrot.slane %v9249_v10, 5  ;;  %v1598_v41 = vld [vmem:[#allocation2 + $0x60] sm:$0xe]  ;;  %v9279_v61 = vld [vmem:[#allocation2 + $0x64] sm:$0xf] }
  0xcb   : > { %v3139_v15 = vunpack.c.l.b16 %v1691_v11  ;;  %v1726_v17 = vsel %vm8963_vm7, %v1724_v21, %v1725_v4  ;;  %v1697_v18 = vrot.slane %v9237_v54, 5  ;;  %v8020_v19 = vrot.slane %v1597_v6, 9  ;;  %v1600_v62 = vld [vmem:[#allocation2 + $0x78] sm:$0xe]  ;;  %v9286_v2 = vld [vmem:[#allocation2 + $0x7c] sm:$0xf] }
  0xcc   : > { %3182 = vrot.lane.b32.xlu1 %v3164_v56, %s8747_s7  ;;  %v3149_v23 = vunpack.c.l.b16 %v1726_v17  ;;  %v1695_v26 = vsel %vm8963_vm7, %v8018_v55, %v1694_v13  ;;  %v1696_v28 = vrot.slane %v1694_v13, 4  ;;  %v1708_v29 = vrot.slane %v9251_v5, 5  ;;  %v9290_v21 = vld [vmem:[#allocation2 + $0x80] sm:$0x1]  ;;  %v1605_v55 = vld [vmem:[#allocation2 + $0xb4] sm:$0xe] }
  0xcd   : > { %v3166_v35 = vpack.c.b16 %v3139_v15, %v3138_v7  ;;  %v3140_v37 = vunpack.c.l.b16 %v1695_v26  ;;  %v1711_v38 = vrot.slane %v9256_v14, 5  ;;  %v8025_v39 = vrot.slane %v1602_v22, 9  ;;  %v9294_v22 = vld [vmem:[#allocation2 + $0xb8] sm:$0xf]  ;;  %v1601_v26 = vld [vmem:[#allocation2 + $0x84] sm:$0xe] }
  0xce   : > { %v3171_v42 = vpack.c.b16 %v3149_v23, %v3148_v12  ;;  %v1698_v44 = vsel %vm8963_vm7, %v1696_v28, %v1697_v18  ;;  %v1709_v45 = vsel %vm8963_vm7, %v8020_v19, %v1708_v29  ;;  %v1710_v49 = vrot.slane %v1708_v29, 4  ;;  %v9299_v23 = vld [vmem:[#allocation2 + $0xbc] sm:$0x1] }
  0xcf   : > { %3186 = vrot.lane.b32.xlu0 %v3166_v35, %s8747_s7  ;;  %v3141_v50 = vunpack.c.l.b16 %v1698_v44  ;;  %v3144_v51 = vunpack.c.l.b16 %v1709_v45  ;;  %v1743_v52 = vrot.slane %v9265_v32, 5  ;;  %v1746_v60 = vrot.slane %v9267_v33, 5  ;;  %v9308_v44 = vld [vmem:[#allocation2 + $0x8c] sm:$0x1] }
  0xd0   : > { %3196 = vrot.lane.b32.xlu2 %v3171_v42, %s8747_s7  ;;  %v1712_v63 = vsel %vm8963_vm7, %v1710_v49, %v1711_v38  ;;  %v8021_v0 = vrot.slane %v1598_v41, 9  ;;  %v1715_v43 = vrot.slane %v9279_v61, 5  ;;  %v1718_v1 = vrot.slane %v9270_v40, 5 }
  0xd1   : > { %v3167_v4 = vpack.c.b16 %v3141_v50, %v3140_v37  ;;  %v3145_v6 = vunpack.c.l.b16 %v1712_v63  ;;  %v1744_v7 = vsel %vm8963_vm7, %v8025_v39, %v1743_v52  ;;  %v1745_v8 = vrot.slane %v1743_v52, 4  ;;  %v9311_v52 = vld [vmem:[#allocation2 + $0xa4] sm:$0x1] }
  0xd2   : > { %v3154_v56 = vunpack.c.l.b16 %v1744_v7  ;;  %v1716_v11 = vsel %vm8963_vm7, %v8021_v0, %v1715_v43  ;;  %v1717_v12 = vrot.slane %v1715_v43, 4  ;;  %v8023_v13 = vrot.slane %v1600_v62, 9 }
  0xd3   : > { %v3169_v15 = vpack.c.b16 %v3145_v6, %v3144_v51  ;;  %v1747_v17 = vsel %vm8963_vm7, %v1745_v8, %v1746_v60  ;;  %v3146_v18 = vunpack.c.l.b16 %v1716_v11  ;;  %v1729_v19 = vrot.slane %v9286_v2, 5  ;;  %v1603_v60 = vld [vmem:[#allocation2 + $0x9c] sm:$0xe] }
  0xd4   : > { %3188 = vrot.lane.b32.xlu1 %v3167_v4, %s8747_s7  ;;  %v3155_v28 = vunpack.c.l.b16 %v1747_v17  ;;  %v1719_v29 = vsel %vm8963_vm7, %v1717_v12, %v1718_v1  ;;  %v1732_v35 = vrot.slane %v9290_v21, 5  ;;  %v8028_v37 = vrot.slane %v1605_v55, 9  ;;  %v9318_v1 = vld [vmem:[#allocation2 + $0x88] sm:$0xf]  ;;  %v9323_v55 = vld [vmem:[#allocation2 + $0xa0] sm:$0xf] }
  0xd5   : > { %v3147_v38 = vunpack.c.l.b16 %v1719_v29  ;;  %v1730_v39 = vsel %vm8963_vm7, %v8023_v13, %v1729_v19  ;;  %v1731_v41 = vrot.slane %v1729_v19, 4  ;;  %v1764_v42 = vrot.slane %v9294_v22, 5  ;;  %v1159_v29 = vld [vmem:[#allocation2 + $0x18] sm:$0xf] }
  0xd6   : > { %v3174_v45 = vpack.c.b16 %v3155_v28, %v3154_v56  ;;  %v3150_v49 = vunpack.c.l.b16 %v1730_v39  ;;  %v1767_v50 = vrot.slane %v9299_v23, 5  ;;  %v8024_v51 = vrot.slane %v1601_v26, 9  ;;  %v1604_v56 = vld [vmem:[#allocation2 + $0xa8] sm:$0xe]  ;;  %v9331_v28 = vld [vmem:[#allocation2 + $0xb0] sm:$0x1] }
  0xd7   : > { %3192 = vrot.lane.b32.xlu0 %v3169_v15, %s8747_s7  ;;  %v3170_v62 = vpack.c.b16 %v3147_v38, %v3146_v18  ;;  %v1733_v63 = vsel %vm8963_vm7, %v1731_v41, %v1732_v35  ;;  %v1765_v0 = vsel %vm8963_vm7, %v8028_v37, %v1764_v42  ;;  %v1766_v43 = vrot.slane %v1764_v42, 4  ;;  %v9335_v39 = vld [vmem:[#allocation2 + $0xac] sm:$0xf] }
  0xd8   : > { %3202 = vrot.lane.b32.xlu2 %v3174_v45, %s8747_s7  ;;  %v3151_v4 = vunpack.c.l.b16 %v1733_v63  ;;  %v3160_v6 = vunpack.c.l.b16 %v1765_v0  ;;  %v1736_v7 = vrot.slane %v9318_v1, 5  ;;  %v1739_v8 = vrot.slane %v9308_v44, 5 }
  0xd9   : > { %v1768_v11 = vsel %vm8963_vm7, %v1766_v43, %v1767_v50  ;;  %v8026_v12 = vrot.slane %v1603_v60, 9  ;;  %v1750_v13 = vrot.slane %v9323_v55, 5  ;;  %v1753_v15 = vrot.slane %v9311_v52, 5 }
  0xda   : > { %v3172_v17 = vpack.c.b16 %v3151_v4, %v3150_v49  ;;  %v3161_v18 = vunpack.c.l.b16 %v1768_v11  ;;  %v1737_v19 = vsel %vm8963_vm7, %v8024_v51, %v1736_v7  ;;  %v1738_v26 = vrot.slane %v1736_v7, 4 }
  0xdb   : > { %v3152_v35 = vunpack.c.l.b16 %v1737_v19  ;;  %v1751_v37 = vsel %vm8963_vm7, %v8026_v12, %v1750_v13  ;;  %v1752_v38 = vrot.slane %v1750_v13, 4  ;;  %v8027_v41 = vrot.slane %v1604_v56, 9 }
  0xdc   : > { %3194 = vrot.lane.b32.xlu1 %v3170_v62, %s8747_s7  ;;  %v3177_v42 = vpack.c.b16 %v3161_v18, %v3160_v6  ;;  %v1740_v45 = vsel %vm8963_vm7, %v1738_v26, %v1739_v8  ;;  %v3156_v49 = vunpack.c.l.b16 %v1751_v37  ;;  %v1757_v50 = vrot.slane %v9335_v39, 5  ;;  %v1157_v6 = vld [vmem:[#allocation2 + $0xc] sm:$0xf] }
  0xdd   : > { %v3153_v51 = vunpack.c.l.b16 %v1740_v45  ;;  %v1754_v60 = vsel %vm8963_vm7, %v1752_v38, %v1753_v15  ;;  %v1760_v63 = vrot.slane %v9331_v28, 5  ;;  %v1255_v0 = vshrl.u32 %v1159_v29, 16 }
  0xde   : > { %v3157_v43 = vunpack.c.l.b16 %v1754_v60  ;;  %v1758_v4 = vsel %vm8963_vm7, %v8027_v41, %v1757_v50  ;;  %v1759_v7 = vrot.slane %v1757_v50, 4  ;;  %v1258_v62 = vshll.u32 %v1159_v29, 16  ;;  %v1161_v50 = vld [vmem:[#allocation2 + $0x24] sm:$0xf] }
  0xdf   : > { %3198 = vrot.lane.b32.xlu0 %v3172_v17, %s8747_s7  ;;  %v3173_v8 = vpack.c.b16 %v3153_v51, %v3152_v35  ;;  %v3158_v56 = vunpack.c.l.b16 %v1758_v4  ;;  %v1257_v11 = vrot.slane %v1255_v0, 4  ;;  %v1264_v12 = vshll.u32 %v9202_v9, 16 }
  0xe0   : > { %3208 = vrot.lane.b32.xlu2 %v3177_v42, %s8747_s7  ;;  %v3175_v13 = vpack.c.b16 %v3157_v43, %v3156_v49  ;;  %v1761_v15 = vsel %vm8963_vm7, %v1759_v7, %v1760_v63  ;;  %v1260_v18 = vrot.slane %v1258_v62, 5  ;;  %v1268_v19 = vshrl.u32 %v9202_v9, 16 }
  0xe1   : > { %v3159_v26 = vunpack.c.l.b16 %v1761_v15  ;;  %v1266_v37 = vrot.slane %v1264_v12, 5  ;;  %v1274_v29 = vshll.u32 %v9209_v57, 16  ;;  %v1231_v38 = vshrl.u32 %v1157_v6, 16 }
  0xe2   : > { %v1261_v17 = vor.u32 %v1260_v18, %v1257_v11  ;;  %v1270_v35 = vrot.slane %v1268_v19, 4  ;;  %v1234_v41 = vshll.u32 %v1157_v6, 16  ;;  %v1240_v45 = vshll.u32 %v9157_v24, 16  ;;  %v1165_v19 = vld [vmem:[#allocation2 + $0x3c] sm:$0xf] }
  0xe3   : > { %v3176_v51 = vpack.c.b16 %v3159_v26, %v3158_v56  ;;  %v1276_v42 = vrot.slane %v1274_v29, 5  ;;  %v1233_v49 = vrot.slane %v1231_v38, 4  ;;  %v1244_v60 = vshrl.u32 %v9157_v24, 16 }
  0xe4   : > { %3200 = vrot.lane.b32.xlu1 %v3173_v8, %s8747_s7  ;;  %v1262_v63 = vrot.slane %v1261_v17, 4  ;;  %v1271_v9 = vor.u32 %v1270_v35, %v1266_v37  ;;  %v1236_v0 = vrot.slane %v1234_v41, 5  ;;  %v1242_v43 = vrot.slane %v1240_v45, 5 }
  0xe5   : > { %v1246_v4 = vrot.slane %v1244_v60, 4  ;;  %v1250_v57 = vshll.u32 %v9159_v48, 16  ;;  %v1279_v7 = vshrl.u32 %v1161_v50, 16  ;;  %v1282_v62 = vshll.u32 %v1161_v50, 16 }
  0xe6   : > { %v1267_v6 = vsel %vm9011_vm14, %v1262_v63, %v1266_v37  ;;  %v1272_v11 = vrot.slane %v1271_v9, 4  ;;  %v1237_v56 = vor.u32 %v1236_v0, %v1233_v49  ;;  %v1288_v12 = vshll.u32 %v9128_v59, 16  ;;  %v1163_v0 = vld [vmem:[#allocation2 + $0x30] sm:$0xf] }
  0xe7   : > { %3204 = vrot.lane.b32.xlu0 %v3175_v13, %s8747_s7  ;;  %v3054_v24 = vunpack.c.l.b16 %v1267_v6  ;;  %v1247_v8 = vor.u32 %v1246_v4, %v1242_v43  ;;  %v1252_v15 = vrot.slane %v1250_v57, 5  ;;  %v1281_v18 = vrot.slane %v1279_v7, 4 }
  0xe8   : > { %v1277_v26 = vsel %vm9011_vm14, %v1272_v11, %v1276_v42  ;;  %v1238_v48 = vrot.slane %v1237_v56, 4  ;;  %v1284_v29 = vrot.slane %v1282_v62, 5  ;;  %v1290_v38 = vrot.slane %v1288_v12, 5 }
  0xe9   : > { %v3055_v17 = vunpack.c.l.b16 %v1277_v26  ;;  %v1248_v35 = vrot.slane %v1247_v8, 4  ;;  %v1292_v37 = vshrl.u32 %v9128_v59, 16  ;;  %v1298_v41 = vshll.u32 %v9150_v36, 16 }
  0xea   : > { %v1243_v13 = vsel %vm9011_vm14, %v1238_v48, %v1242_v43  ;;  %v1285_v45 = vor.u32 %v1284_v29, %v1281_v18  ;;  %v1327_v50 = vshrl.u32 %v1165_v19, 16  ;;  %v1330_v49 = vshll.u32 %v1165_v19, 16 }
  0xeb   : > { %v3084_v60 = vpack.c.b16 %v3055_v17, %v3054_v24  ;;  %v1253_v63 = vsel %vm9011_vm14, %v1248_v35, %v1252_v15  ;;  %v3052_v42 = vunpack.c.l.b16 %v1243_v13  ;;  %v1294_v9 = vrot.slane %v1292_v37, 4 }
  0xec   : > { %3206 = vrot.lane.b32.xlu1 %v3176_v51, %s8747_s7  ;;  %v3053_v4 = vunpack.c.l.b16 %v1253_v63  ;;  %v1286_v57 = vrot.slane %v1285_v45, 4  ;;  %v1300_v59 = vrot.slane %v1298_v41, 5  ;;  %v1329_v7 = vrot.slane %v1327_v50, 4 }
  0xed   : > { %v1295_v36 = vor.u32 %v1294_v9, %v1290_v38  ;;  %v1332_v62 = vrot.slane %v1330_v49, 5  ;;  %v1336_v43 = vshll.u32 %v9249_v10, 16  ;;  %v1340_v6 = vshrl.u32 %v9249_v10, 16  ;;  %v1167_v10 = vld [vmem:[#allocation2 + $0x48] sm:$0xf] }
  0xee   : > { %v3083_v11 = vpack.c.b16 %v3053_v4, %v3052_v42  ;;  %v1291_v56 = vsel %vm9011_vm14, %v1286_v57, %v1290_v38  ;;  %v1346_v12 = vshll.u32 %v9237_v54, 16  ;;  %v1303_v24 = vshrl.u32 %v1163_v0, 16 }
  0xef   : > { %3102 = vrot.lane.b32.xlu0 %v3084_v60, %s8749_s9  ;;  %v1296_v51 = vrot.slane %v1295_v36, 4  ;;  %v3056_v8 = vunpack.c.l.b16 %v1291_v56  ;;  %v1333_v15 = vor.u32 %v1332_v62, %v1329_v7  ;;  %v1338_v18 = vrot.slane %v1336_v43, 5 }
  0xf0   : > { %3100 = vrot.lane.b32.xlu2 %v3083_v11, %s8749_s9  ;;  %v1342_v19 = vrot.slane %v1340_v6, 4  ;;  %v1348_v26 = vrot.slane %v1346_v12, 5  ;;  %v1305_v48 = vrot.slane %v1303_v24, 4  ;;  %v1306_v29 = vshll.u32 %v1163_v0, 16 }
  0xf1   : > { %v1301_v17 = vsel %vm9011_vm14, %v1296_v51, %v1300_v59  ;;  %v1334_v38 = vrot.slane %v1333_v15, 4  ;;  %v1312_v54 = vshll.u32 %v9211_v16, 16  ;;  %v1316_v35 = vshrl.u32 %v9211_v16, 16  ;;  %v1171_v16 = vld [vmem:[#allocation2 + $0x60] sm:$0xf] }
  0xf2   : > { %v3057_v37 = vunpack.c.l.b16 %v1301_v17  ;;  %v1343_v41 = vor.u32 %v1342_v19, %v1338_v18  ;;  %v1308_v13 = vrot.slane %v1306_v29, 5  ;;  %v1322_v45 = vshll.u32 %v9214_v25, 16 }
  0xf3   : > { %v1339_v50 = vsel %vm9011_vm14, %v1334_v38, %v1338_v18  ;;  %v1314_v49 = vrot.slane %v1312_v54, 5  ;;  %v1318_v60 = vrot.slane %v1316_v35, 4  ;;  %v1351_v63 = vshrl.u32 %v1167_v10, 16 }
  0xf4   : > { %v3085_v42 = vpack.c.b16 %v3057_v37, %v3056_v8  ;;  %v1344_v9 = vrot.slane %v1343_v41, 4  ;;  %v3060_v0 = vunpack.c.l.b16 %v1339_v50  ;;  %v1309_v4 = vor.u32 %v1308_v13, %v1305_v48 }
  0xf5   : > { %v1319_v57 = vor.u32 %v1318_v60, %v1314_v49  ;;  %v1324_v59 = vrot.slane %v1322_v45, 5  ;;  %v1353_v7 = vrot.slane %v1351_v63, 4  ;;  %v1354_v36 = vshll.u32 %v1167_v10, 16  ;;  %v1169_v10 = vld [vmem:[#allocation2 + $0x54] sm:$0xf]  ;;  %v8569_v60 = vld [vmem:[%s8952_s30 + $0x78] sm:$0xff] }
  0xf6   : > { %3104 = vrot.lane.b32.xlu1 %v3085_v42, %s8749_s9  ;;  %v1349_v25 = vsel %vm9011_vm14, %v1344_v9, %v1348_v26  ;;  %v1310_v62 = vrot.slane %v1309_v4, 4  ;;  %v1360_v43 = vshll.u32 %v9187_v27, 16  ;;  %v1364_v6 = vshrl.u32 %v9187_v27, 16  ;;  %v584_v4 = vpop.permute.xlu0 %583  ;;  %s8755_s30 = smov 12  }
  0xf7   : > { %v3061_v11 = vunpack.c.l.b16 %v1349_v25  ;;  %v1320_v56 = vrot.slane %v1319_v57, 4  ;;  %v1356_v12 = vrot.slane %v1354_v36, 5  ;;  %v1370_v24 = vshll.u32 %v9192_v31, 16 }
  0xf8   : > { %v1315_v51 = vsel %vm9011_vm14, %v1310_v62, %v1314_v49  ;;  %v1362_v8 = vrot.slane %v1360_v43, 5  ;;  %v1366_v15 = vrot.slane %v1364_v6, 4  ;;  %v1399_v18 = vshrl.u32 %v1171_v16, 16 }
  0xf9   : > { %v3087_v19 = vpack.c.b16 %v3061_v11, %v3060_v0  ;;  %v1325_v26 = vsel %vm9011_vm14, %v1320_v56, %v1324_v59  ;;  %v3058_v48 = vunpack.c.l.b16 %v1315_v51  ;;  %v1357_v29 = vor.u32 %v1356_v12, %v1353_v7 }
  0xfa   : > { %v3059_v27 = vunpack.c.l.b16 %v1325_v26  ;;  %v1367_v17 = vor.u32 %v1366_v15, %v1362_v8  ;;  %v1372_v38 = vrot.slane %v1370_v24, 5  ;;  %v1401_v54 = vrot.slane %v1399_v18, 4  ;;  %v1173_v26 = vld [vmem:[#allocation2 + $0x6c] sm:$0xf] }
  0xfb   : > { %3108 = vrot.lane.b32.xlu0 %v3087_v19, %s8749_s9  ;;  %v1358_v31 = vrot.slane %v1357_v29, 4  ;;  %v1402_v35 = vshll.u32 %v1171_v16, 16  ;;  %v1408_v37 = vshll.u32 %v9279_v61, 16  ;;  %v1412_v41 = vshrl.u32 %v9279_v61, 16 }
  0xfc   : > { %v3086_v13 = vpack.c.b16 %v3059_v27, %v3058_v48  ;;  %v1368_v45 = vrot.slane %v1367_v17, 4  ;;  %v1418_v50 = vshll.u32 %v9270_v40, 16  ;;  %v1375_v49 = vshrl.u32 %v1169_v10, 16 }
  0xfd   : > { %v1363_v63 = vsel %vm9011_vm14, %v1358_v31, %v1362_v8  ;;  %v1404_v42 = vrot.slane %v1402_v35, 5  ;;  %v1410_v9 = vrot.slane %v1408_v37, 5  ;;  %v1414_v0 = vrot.slane %v1412_v41, 4 }
  0xfe   : > { %3106 = vrot.lane.b32.xlu2 %v3086_v13, %s8749_s9  ;;  %v1373_v57 = vsel %vm9011_vm14, %v1368_v45, %v1372_v38  ;;  %v3062_v59 = vunpack.c.l.b16 %v1363_v63  ;;  %v1420_v61 = vrot.slane %v1418_v50, 5  ;;  %v1377_v7 = vrot.slane %v1375_v49, 4 }
  0xff   : > { %v3063_v36 = vunpack.c.l.b16 %v1373_v57  ;;  %v1405_v16 = vor.u32 %v1404_v42, %v1401_v54  ;;  %v1415_v40 = vor.u32 %v1414_v0, %v1410_v9  ;;  %v1378_v25 = vshll.u32 %v1169_v10, 16  ;;  %v9413_v10 = vpop.permute.xlu2 %3178 }
 0x100   : > { %v1384_v62 = vshll.u32 %v9251_v5, 16  ;;  %v1388_v43 = vshrl.u32 %v9251_v5, 16  ;;  %v1394_v6 = vshll.u32 %v9256_v14, 16  ;;  %v633_v11 = vsel %vm585_vm2, %v8569_v60, %v584_v4 }
 0x101   : > { %v3088_v56 = vpack.c.b16 %v3063_v36, %v3062_v59  ;;  %v1406_v12 = vrot.slane %v1405_v16, 4  ;;  %v1416_v24 = vrot.slane %v1415_v40, 4  ;;  %v1380_v51 = vrot.slane %v1378_v25, 5  ;;  %v1152_v25 = vld [vmem:[#allocation2 + $0xc8] sm:$0x1] }
 0x102   : > { %v1386_v8 = vrot.slane %v1384_v62, 5  ;;  %v1390_v15 = vrot.slane %v1388_v43, 4  ;;  %v1396_v18 = vrot.slane %v1394_v6, 5  ;;  %v680_v19 = vunpack.c.l.b16 %v633_v11 }
 0x103   : > { %3110 = vrot.lane.b32.xlu1 %v3088_v56, %s8749_s9  ;;  %v1411_v48 = vsel %vm9011_vm14, %v1406_v12, %v1410_v9  ;;  %v1421_v5 = vsel %vm9011_vm14, %v1416_v24, %v1420_v61  ;;  %v1381_v14 = vor.u32 %v1380_v51, %v1377_v7  ;;  %v681_v29 = vunpack.c.h.b16 %v633_v11  ;;  %v1148_v7 = vld [vmem:[#allocation2 + $0xc0] sm:$0xf]  ;;  %v1177_v56 = vld [vmem:[#allocation2 + $0x84] sm:$0xf] }
 0x104   : > { %v3066_v27 = vunpack.c.l.b16 %v1411_v48  ;;  %v3067_v17 = vunpack.c.l.b16 %v1421_v5  ;;  %v1391_v38 = vor.u32 %v1390_v15, %v1386_v8  ;;  %v712_v54 = vpack.c.b16 %v680_v19, %v680_v19 }
 0x105   : > { %v1382_v31 = vrot.slane %v1381_v14, 4  ;;  %v713_v35 = vpack.c.b16 %v681_v29, %v681_v29  ;;  %v1423_v37 = vshrl.u32 %v1173_v26, 16  ;;  %v1426_v41 = vshll.u32 %v1173_v26, 16  ;;  %v1175_v14 = vld [vmem:[#allocation2 + $0x78] sm:$0xf] }
 0x106   : > { %v3090_v13 = vpack.c.b16 %v3067_v17, %v3066_v27  ;;  %v1392_v45 = vrot.slane %v1391_v38, 4  ;;  %v973_v50 = vshrl.u32 %v712_v54, 16  ;;  %v976_v49 = vshll.u32 %v712_v54, 16 }
 0x107   : > { %v1387_v60 = vsel %vm9011_vm14, %v1382_v31, %v1386_v8  ;;  %v981_v63 = vshrl.u32 %v713_v35, 16  ;;  %v984_v42 = vshll.u32 %v713_v35, 16  ;;  %v1425_v9 = vrot.slane %v1423_v37, 4  ;;  %v9430_v29 = vpop.permute.xlu2 %3278 }
 0x108   : > { %3114 = vrot.lane.b32.xlu0 %v3090_v13, %s8749_s9  ;;  %v1397_v0 = vsel %vm9011_vm14, %v1392_v45, %v1396_v18  ;;  %v3064_v4 = vunpack.c.l.b16 %v1387_v60  ;;  %v975_v57 = vrot.slane %v973_v50, 7  ;;  %v1428_v59 = vrot.slane %v1426_v41, 5  ;;  %11915 = vst [vmem:[#allocation5_spill] sm:$0xff] %v9430_v29 }
 0x109   : > { %v3065_v61 = vunpack.c.l.b16 %v1397_v0  ;;  %v983_v36 = vrot.slane %v981_v63, 7  ;;  %v1432_v16 = vshll.u32 %v9221_v34, 16  ;;  %v1436_v40 = vshrl.u32 %v9221_v34, 16 }
 0x10a   : > { %v978_v62 = vor.u32 %v976_v49, %v975_v57  ;;  %v979_v43 = vrot.slane %v975_v57, 4  ;;  %v1429_v6 = vor.u32 %v1428_v59, %v1425_v9  ;;  %v1442_v11 = vshll.u32 %v9229_v46, 16 }
 0x10b   : > { %v3089_v12 = vpack.c.b16 %v3065_v61, %v3064_v4  ;;  %v986_v24 = vor.u32 %v984_v42, %v983_v36  ;;  %v988_v51 = vrot.slane %v983_v36, 4  ;;  %v1434_v8 = vrot.slane %v1432_v16, 5  ;;  %v1179_v42 = vld [vmem:[#allocation2 + $0x90] sm:$0xf] }
 0x10c   : > { %v1149_v15 = vsel %vm8987_vm11, %v978_v62, %v1148_v7  ;;  %v1430_v18 = vrot.slane %v1429_v6, 4  ;;  %v1438_v19 = vrot.slane %v1436_v40, 4  ;;  %v1444_v26 = vrot.slane %v1442_v11, 5 }
 0x10d   : > { %3112 = vrot.lane.b32.xlu2 %v3089_v12, %s8749_s9  ;;  %v987_v34 = vsel %vm8981_vm10, %v979_v43, %v986_v24  ;;  %1150 = vst [vmem:[#allocation2 + $0xc0] sm:$0xf] %v1149_v15  ;;  %v1153_v46 = vsel %vm8974_vm9, %v988_v51, %v1152_v25  ;;  %v1471_v48 = vshrl.u32 %v1177_v56, 16  ;;  %v1474_v5 = vshll.u32 %v1177_v56, 16  ;;  %v1183_v24 = vld [vmem:[#allocation2 + $0xa8] sm:$0xf] }
 0x10e   : > { %1151 = vst.msk [vmem:[#allocation2 + $0xc4] sm:$0xf] %vm273_vm0, %v987_v34  ;;  %v1435_v58 = vsel %vm9011_vm14, %v1430_v18, %v1434_v8  ;;  %v1439_v27 = vor.u32 %v1438_v19, %v1434_v8  ;;  %v1480_v17 = vshll.u32 %v9318_v1, 16  ;;  %v1484_v38 = vshrl.u32 %v9318_v1, 16 }
 0x10f   : > { %1154 = vst [vmem:[#allocation2 + $0xc8] sm:$0x1] %v1153_v46  ;;  %v3068_v54 = vunpack.c.l.b16 %v1435_v58  ;;  %v1473_v31 = vrot.slane %v1471_v48, 4  ;;  %v1476_v47 = vrot.slane %v1474_v5, 5  ;;  %v1490_v35 = vshll.u32 %v9308_v44, 16  ;;  %v9448_v19 = vpop.permute.xlu2 %3284 }
 0x110   : > { %v1440_v37 = vrot.slane %v1439_v27, 4  ;;  %v1482_v41 = vrot.slane %v1480_v17, 5  ;;  %v1486_v13 = vrot.slane %v1484_v38, 4  ;;  %v1447_v45 = vshrl.u32 %v1175_v14, 16  ;;  %11916 = vst [vmem:[#allocation6_spill] sm:$0xff] %v9448_v19 }
 0x111   : > { %v1477_v50 = vor.u32 %v1476_v47, %v1473_v31  ;;  %v1492_v49 = vrot.slane %v1490_v35, 5  ;;  %v1450_v60 = vshll.u32 %v1175_v14, 16  ;;  %v1456_v63 = vshll.u32 %v9286_v2, 16  ;;  %v1181_v31 = vld [vmem:[#allocation2 + $0x9c] sm:$0xf] }
 0x112   : > { %v1445_v9 = vsel %vm9011_vm14, %v1440_v37, %v1444_v26  ;;  %v1487_v1 = vor.u32 %v1486_v13, %v1482_v41  ;;  %v1449_v0 = vrot.slane %v1447_v45, 4  ;;  %v1460_v4 = vshrl.u32 %v9286_v2, 16 }
 0x113   : > { %v3069_v57 = vunpack.c.l.b16 %v1445_v9  ;;  %v1478_v59 = vrot.slane %v1477_v50, 4  ;;  %v1452_v44 = vrot.slane %v1450_v60, 5  ;;  %v1458_v61 = vrot.slane %v1456_v63, 5 }
 0x114   : > { %v1488_v7 = vrot.slane %v1487_v1, 4  ;;  %v1462_v36 = vrot.slane %v1460_v4, 4  ;;  %v1466_v16 = vshll.u32 %v9290_v21, 16  ;;  %v1495_v40 = vshrl.u32 %v1179_v42, 16 }
 0x115   : > { %v3091_v25 = vpack.c.b16 %v3069_v57, %v3068_v54  ;;  %v1483_v62 = vsel %vm9011_vm14, %v1478_v59, %v1482_v41  ;;  %v1453_v43 = vor.u32 %v1452_v44, %v1449_v0  ;;  %v1498_v6 = vshll.u32 %v1179_v42, 16 }
 0x116   : > { %v1493_v11 = vsel %vm9011_vm14, %v1488_v7, %v1492_v49  ;;  %v3072_v56 = vunpack.c.l.b16 %v1483_v62  ;;  %v1463_v2 = vor.u32 %v1462_v36, %v1458_v61  ;;  %v1468_v12 = vrot.slane %v1466_v16, 5  ;;  %v1185_v62 = vld [vmem:[#allocation2 + $0xb4] sm:$0xf] }
 0x117   : > { %3116 = vrot.lane.b32.xlu1 %v3091_v25, %s8749_s9  ;;  %v3073_v51 = vunpack.c.l.b16 %v1493_v11  ;;  %v1454_v8 = vrot.slane %v1453_v43, 4  ;;  %v1497_v15 = vrot.slane %v1495_v40, 4  ;;  %v1500_v21 = vrot.slane %v1498_v6, 5 }
 0x118   : > { %v1464_v18 = vrot.slane %v1463_v2, 4  ;;  %v1504_v26 = vshll.u32 %v9265_v32, 16  ;;  %v1508_v34 = vshrl.u32 %v9265_v32, 16  ;;  %v1514_v46 = vshll.u32 %v9267_v33, 16 }
 0x119   : > { %v3093_v48 = vpack.c.b16 %v3073_v51, %v3072_v56  ;;  %v1459_v5 = vsel %vm9011_vm14, %v1454_v8, %v1458_v61  ;;  %v1501_v14 = vor.u32 %v1500_v21, %v1497_v15  ;;  %v1543_v58 = vshrl.u32 %v1183_v24, 16  ;;  %v9469_v56 = vpop.permute.xlu2 %3290 }
 0x11a   : > { %v1469_v27 = vsel %vm9011_vm14, %v1464_v18, %v1468_v12  ;;  %v3070_v17 = vunpack.c.l.b16 %v1459_v5  ;;  %v1506_v38 = vrot.slane %v1504_v26, 5  ;;  %v1510_v54 = vrot.slane %v1508_v34, 4  ;;  %11917 = vst [vmem:[#allocation7_spill] sm:$0xff] %v9469_v56  ;;  %v9476_v34 = vpop.permute.xlu0 %3274  ;;  %v9478_v5 = vpop.permute.xlu1 %3098 }
 0x11b   : > { %3120 = vrot.lane.b32.xlu0 %v3093_v48, %s8749_s9  ;;  %v3071_v47 = vunpack.c.l.b16 %v1469_v27  ;;  %v1502_v35 = vrot.slane %v1501_v14, 4  ;;  %v1516_v32 = vrot.slane %v1514_v46, 5  ;;  %v1545_v37 = vrot.slane %v1543_v58, 4 }
 0x11c   : > { %v1511_v33 = vor.u32 %v1510_v54, %v1506_v38  ;;  %v1546_v41 = vshll.u32 %v1183_v24, 16  ;;  %v1552_v13 = vshll.u32 %v9335_v39, 16  ;;  %v1556_v45 = vshrl.u32 %v9335_v39, 16 }
 0x11d   : > { %v3092_v50 = vpack.c.b16 %v3071_v47, %v3070_v17  ;;  %v1507_v49 = vsel %vm9011_vm14, %v1502_v35, %v1506_v38  ;;  %v1562_v60 = vshll.u32 %v9331_v28, 16  ;;  %v1519_v63 = vshrl.u32 %v1181_v31, 16 }
 0x11e   : > { %v1512_v42 = vrot.slane %v1511_v33, 4  ;;  %v3074_v9 = vunpack.c.l.b16 %v1507_v49  ;;  %v1548_v1 = vrot.slane %v1546_v41, 5  ;;  %v1554_v0 = vrot.slane %v1552_v13, 5 }
 0x11f   : > { %3118 = vrot.lane.b32.xlu2 %v3092_v50, %s8749_s9  ;;  %v1558_v4 = vrot.slane %v1556_v45, 4  ;;  %v1564_v57 = vrot.slane %v1562_v60, 5  ;;  %v1521_v59 = vrot.slane %v1519_v63, 4  ;;  %v1522_v44 = vshll.u32 %v1181_v31, 16  ;;  %v1771_v31 = vld [vmem:[#allocation2 + $0x18] sm:$0xf] }
 0x120   : > { %v1517_v39 = vsel %vm9011_vm14, %v1512_v42, %v1516_v32  ;;  %v1549_v61 = vor.u32 %v1548_v1, %v1545_v37  ;;  %v1528_v7 = vshll.u32 %v9323_v55, 16  ;;  %v1532_v36 = vshrl.u32 %v9323_v55, 16  ;;  %v9487_v45 = vld [vmem:[#allocation2 + $0x1c] sm:$0xf]  ;;  %v9490_v50 = vld [vmem:[#allocation2 + $0x20] sm:$0x1] }
 0x121   : > { %v3075_v28 = vunpack.c.l.b16 %v1517_v39  ;;  %v1559_v16 = vor.u32 %v1558_v4, %v1554_v0  ;;  %v1524_v40 = vrot.slane %v1522_v44, 5  ;;  %v1538_v25 = vshll.u32 %v9311_v52, 16  ;;  %v9492_v1 = vpop.permute.xlu2 %3296 }
 0x122   : > { %v1550_v43 = vrot.slane %v1549_v61, 4  ;;  %v1530_v6 = vrot.slane %v1528_v7, 5  ;;  %v1534_v11 = vrot.slane %v1532_v36, 4  ;;  %v1567_v55 = vshrl.u32 %v1185_v62, 16  ;;  %11918 = vst [vmem:[#allocation8_spill] sm:$0xff] %v9492_v1 }
 0x123   : > { %v3094_v2 = vpack.c.b16 %v3075_v28, %v3074_v9  ;;  %v1560_v12 = vrot.slane %v1559_v16, 4  ;;  %v1525_v24 = vor.u32 %v1524_v40, %v1521_v59  ;;  %v1540_v15 = vrot.slane %v1538_v25, 5  ;;  %v1769_v9 = vld [vmem:[#allocation2 + $0xc] sm:$0xf]  ;;  %v9500_v7 = vld [vmem:[#allocation2 + $0x10] sm:$0xf]  ;;  %v9502_v40 = vpop.permute.xlu1 %3276 }
 0x124   : > { %v1555_v51 = vsel %vm9011_vm14, %v1550_v43, %v1554_v0  ;;  %v1535_v8 = vor.u32 %v1534_v11, %v1530_v6  ;;  %v1570_v26 = vshll.u32 %v1185_v62, 16  ;;  %v1569_v14 = vrot.slane %v1567_v55, 4  ;;  %11919 = vst [vmem:[#allocation9_spill] sm:$0xff] %v9502_v40  ;;  %v9504_v25 = vld [vmem:[#allocation2 + $0x14] sm:$0x1] }
 0x125   : > { %3122 = vrot.lane.b32.xlu1 %v3094_v2, %s8749_s9  ;;  %v1565_v52 = vsel %vm9011_vm14, %v1560_v12, %v1564_v57  ;;  %v3078_v21 = vunpack.c.l.b16 %v1555_v51  ;;  %v1526_v18 = vrot.slane %v1525_v24, 4  ;;  %v1576_v58 = vshll.u32 %v9294_v22, 16  ;;  %v9508_v2 = vpop.permute.xlu0 %3280  ;;  %v1773_v24 = vld [vmem:[#allocation2 + $0x24] sm:$0xf] }
 0x126   : > { %v3079_v46 = vunpack.c.l.b16 %v1565_v52  ;;  %v1536_v48 = vrot.slane %v1535_v8, 4  ;;  %v1572_v17 = vrot.slane %v1570_v26, 5  ;;  %v1580_v38 = vshrl.u32 %v9294_v22, 16  ;;  %11920 = vst [vmem:[#allocation10_spill] sm:$0xff] %v9508_v2  ;;  %v8614_v8 = vld [vmem:[#allocation2 + $0x9c] sm:$0xff] }
 0x127   : > { %v1531_v27 = vsel %vm9011_vm14, %v1526_v18, %v1530_v6  ;;  %v1586_v54 = vshll.u32 %v9299_v23, 16  ;;  %v1578_v37 = vrot.slane %v1576_v58, 5  ;;  %v1842_v49 = vshrl.u32 %v1771_v31, 16  ;;  %v9652_v2 = vld [vmem:[#allocation2 + $0x94] sm:$0xf] }
 0x128   : > { %v3096_v47 = vpack.c.b16 %v3079_v46, %v3078_v21  ;;  %v1541_v35 = vsel %vm9011_vm14, %v1536_v48, %v1540_v15  ;;  %v3076_v32 = vunpack.c.l.b16 %v1531_v27  ;;  %v1573_v41 = vor.u32 %v1572_v17, %v1569_v14  ;;  %v9513_v48 = vld [vmem:[#allocation2 + $0x28] sm:$0xf] }
 0x129   : > { %v3077_v33 = vunpack.c.l.b16 %v1541_v35  ;;  %v1582_v13 = vrot.slane %v1580_v38, 4  ;;  %v1845_v22 = vshll.u32 %v1771_v31, 16  ;;  %v1588_v42 = vrot.slane %v1586_v54, 5  ;;  %v8616_v38 = vld [vmem:[#allocation2 + $0xb4] sm:$0xff] }
 0x12a   : > { %3126 = vrot.lane.b32.xlu0 %v3096_v47, %s8749_s9  ;;  %v1574_v23 = vrot.slane %v1573_v41, 4  ;;  %v1844_v0 = vrot.slane %v1842_v49, 4  ;;  %v1851_v57 = vshll.u32 %v9487_v45, 16  ;;  %v1855_v39 = vshrl.u32 %v9487_v45, 16  ;;  %v1777_v49 = vld [vmem:[#allocation2 + $0x3c] sm:$0xf] }
 0x12b   : > { %v3095_v60 = vpack.c.b16 %v3077_v33, %v3076_v32  ;;  %v1583_v63 = vor.u32 %v1582_v13, %v1578_v37  ;;  %v1847_v4 = vrot.slane %v1845_v22, 5  ;;  %v1861_v61 = vshll.u32 %v9490_v50, 16  ;;  %v9518_v32 = vld [vmem:[#allocation2 + $0x2c] sm:$0x1] }
 0x12c   : > { %v1579_v59 = vsel %vm9011_vm14, %v1574_v23, %v1578_v37  ;;  %v1853_v16 = vrot.slane %v1851_v57, 5  ;;  %v1818_v62 = vshrl.u32 %v1769_v9, 16  ;;  %v1857_v6 = vrot.slane %v1855_v39, 4 }
 0x12d   : > { %3124 = vrot.lane.b32.xlu2 %v3095_v60, %s8749_s9  ;;  %v1584_v44 = vrot.slane %v1583_v63, 4  ;;  %v3080_v36 = vunpack.c.l.b16 %v1579_v59  ;;  %v1848_v28 = vor.u32 %v1847_v4, %v1844_v0  ;;  %v1863_v11 = vrot.slane %v1861_v61, 5  ;;  %v9526_v0 = vpop.permute.xlu2 %3184 }
 0x12e   : > { %v1821_v12 = vshll.u32 %v1769_v9, 16  ;;  %v1820_v55 = vrot.slane %v1818_v62, 4  ;;  %v1827_v52 = vshll.u32 %v9500_v7, 16  ;;  %v1858_v21 = vor.u32 %v1857_v6, %v1853_v16  ;;  %11921 = vst [vmem:[#allocation11_spill] sm:$0xff] %v9526_v0  ;;  %v9682_v0 = vld [vmem:[#allocation2 + $0xa0] sm:$0xf] }
 0x12f   : > { %v1589_v43 = vsel %vm9011_vm14, %v1584_v44, %v1588_v42  ;;  %v1849_v15 = vrot.slane %v1848_v28, 4  ;;  %v1831_v26 = vshrl.u32 %v9500_v7, 16  ;;  %v1837_v46 = vshll.u32 %v9504_v25, 16  ;;  %v8617_v42 = vld [vmem:[#allocation2 + $0xc0] sm:$0xff] }
 0x130   : > { %v3081_v51 = vunpack.c.l.b16 %v1589_v43  ;;  %v1823_v18 = vrot.slane %v1821_v12, 5  ;;  %v1829_v27 = vrot.slane %v1827_v52, 5  ;;  %v1866_v17 = vshrl.u32 %v1773_v24, 16  ;;  %v9537_v12 = vpop.permute.xlu1 %3282  ;;  %v9541_v52 = vpop.permute.xlu0 %3286 }
 0x131   : > { %v1854_v58 = vsel %vm9011_vm14, %v1849_v15, %v1853_v16  ;;  %v1859_v54 = vrot.slane %v1858_v21, 4  ;;  %v1833_v35 = vrot.slane %v1831_v26, 4  ;;  %v1839_v37 = vrot.slane %v1837_v46, 5  ;;  %11922 = vst [vmem:[#allocation12_spill] sm:$0xff] %v9537_v12  ;;  %v8615_v21 = vld [vmem:[#allocation2 + $0xa8] sm:$0xff] }
 0x132   : > { %v3097_v14 = vpack.c.b16 %v3081_v51, %v3080_v36  ;;  %3298 = vrot.lane.b32.xlu0 %v8614_v8, %s8748_s8  ;;  %v3308_v31 = vunpack.c.l.b16 %v1854_v58  ;;  %v1824_v47 = vor.u32 %v1823_v18, %v1820_v55  ;;  %v1868_v33 = vrot.slane %v1866_v17, 4  ;;  %v9531_v36 = vld [vmem:[#allocation2 + $0x40] sm:$0xf]  ;;  %11923 = vst [vmem:[#allocation13_spill] sm:$0xff] %v9541_v52  ;;  %v9638_v52 = vld [vmem:[#allocation2 + $0x7c] sm:$0xf] }
 0x133   : > { %v1869_v41 = vshll.u32 %v1773_v24, 16  ;;  %v1875_v13 = vshll.u32 %v9513_v48, 16  ;;  %v1864_v22 = vsel %vm9011_vm14, %v1859_v54, %v1863_v11  ;;  %v1834_v23 = vor.u32 %v1833_v35, %v1829_v27  ;;  %v9535_v11 = vld [vmem:[#allocation2 + $0x44] sm:$0x1]  ;;  %v1775_v24 = vld [vmem:[#allocation2 + $0x30] sm:$0xf] }
 0x134   : > { %3128 = vrot.lane.b32.xlu1 %v3097_v14, %s8749_s9  ;;  %v1825_v60 = vrot.slane %v1824_v47, 4  ;;  %v1879_v63 = vshrl.u32 %v9513_v48, 16  ;;  %v3309_v9 = vunpack.c.l.b16 %v1864_v22  ;;  %v1885_v59 = vshll.u32 %v9518_v32, 16 }
 0x135   : > { %3302 = vrot.lane.b32.xlu2 %v8616_v38, %s8748_s8  ;;  %v1871_v4 = vrot.slane %v1869_v41, 5  ;;  %v1877_v57 = vrot.slane %v1875_v13, 5  ;;  %v1835_v39 = vrot.slane %v1834_v23, 4  ;;  %v1914_v28 = vshrl.u32 %v1777_v49, 16 }
 0x136   : > { %v1830_v44 = vsel %vm9011_vm14, %v1825_v60, %v1829_v27  ;;  %v1881_v61 = vrot.slane %v1879_v63, 4  ;;  %v3339_v16 = vpack.c.b16 %v3309_v9, %v3308_v31  ;;  %v1887_v6 = vrot.slane %v1885_v59, 5  ;;  %v1779_v60 = vld [vmem:[#allocation2 + $0x48] sm:$0xf] }
 0x137   : > { %v9533_v62 = vunpack.c.l.b16 %v1830_v44  ;;  %v1872_v43 = vor.u32 %v1871_v4, %v1868_v33  ;;  %v1840_v51 = vsel %vm9011_vm14, %v1835_v39, %v1839_v37  ;;  %v1916_v15 = vrot.slane %v1914_v28, 4  ;;  %v9551_v37 = vld [vmem:[#allocation2 + $0x34] sm:$0xf]  ;;  %v9553_v33 = vld [vmem:[#allocation2 + $0x38] sm:$0x1] }
 0x138   : > { %v1882_v8 = vor.u32 %v1881_v61, %v1877_v57  ;;  %v1917_v55 = vshll.u32 %v1777_v49, 16  ;;  %v3307_v18 = vunpack.c.l.b16 %v1840_v51  ;;  %v1923_v46 = vshll.u32 %v9531_v36, 16  ;;  %v1783_v39 = vld [vmem:[#allocation2 + $0x60] sm:$0xf] }
 0x139   : > { %v1873_v26 = vrot.slane %v1872_v43, 4  ;;  %v1927_v14 = vshrl.u32 %v9531_v36, 16  ;;  %v1933_v17 = vshll.u32 %v9535_v11, 16  ;;  %v1890_v38 = vshrl.u32 %v1775_v24, 16  ;;  %v9563_v43 = vld [vmem:[#allocation2 + $0x4c] sm:$0xf] }
 0x13a   : > { %3304 = vrot.lane.b32.xlu0 %v8617_v42, %s8748_s8  ;;  %v1883_v58 = vrot.slane %v1882_v8, 4  ;;  %v1919_v27 = vrot.slane %v1917_v55, 5  ;;  %v3338_v54 = vpack.c.b16 %v3307_v18, %v9533_v62  ;;  %v1925_v47 = vrot.slane %v1923_v46, 5  ;;  %v9567_v55 = vld [vmem:[#allocation2 + $0x50] sm:$0x1] }
 0x13b   : > { %v1878_v31 = vsel %vm9011_vm14, %v1873_v26, %v1877_v57  ;;  %v1929_v35 = vrot.slane %v1927_v14, 4  ;;  %v1935_v22 = vrot.slane %v1933_v17, 5  ;;  %v1892_v42 = vrot.slane %v1890_v38, 4  ;;  %v9572_v14 = vpop.permute.xlu1 %3288 }
 0x13c   : > { %3300 = vrot.lane.b32.xlu1 %v8615_v21, %s8748_s8  ;;  %v1888_v41 = vsel %vm9011_vm14, %v1883_v58, %v1887_v6  ;;  %v3310_v13 = vunpack.c.l.b16 %v1878_v31  ;;  %v1920_v49 = vor.u32 %v1919_v27, %v1916_v15  ;;  %v1893_v9 = vshll.u32 %v1775_v24, 16  ;;  %11925 = vst [vmem:[#allocation15_spill] sm:$0xff] %v9572_v14  ;;  %v9575_v31 = vpop.permute.xlu0 %3292 }
 0x13d   : > { %3356 = vrot.lane.b32.xlu2 %v3339_v16, %s8750_s10  ;;  %v3311_v23 = vunpack.c.l.b16 %v1888_v41  ;;  %v1930_v63 = vor.u32 %v1929_v35, %v1925_v47  ;;  %v1899_v57 = vshll.u32 %v9551_v37, 16  ;;  %v1903_v59 = vshrl.u32 %v9551_v37, 16  ;;  %v9561_v16 = vpop.permute.xlu2 %3190  ;;  %11926 = vst [vmem:[#allocation16_spill] sm:$0xff] %v9575_v31 }
 0x13e   : > { %v1921_v4 = vrot.slane %v1920_v49, 4  ;;  %v1909_v44 = vshll.u32 %v9553_v33, 16  ;;  %11924 = vst [vmem:[#allocation14_spill] sm:$0xff] %v9561_v16  ;;  %v1895_v62 = vrot.slane %v1893_v9, 5  ;;  %v1938_v6 = vshrl.u32 %v1779_v60, 16 }
 0x13f   : > { %v3340_v61 = vpack.c.b16 %v3311_v23, %v3310_v13  ;;  %v1931_v28 = vrot.slane %v1930_v63, 4  ;;  %v1901_v24 = vrot.slane %v1899_v57, 5  ;;  %v1905_v8 = vrot.slane %v1903_v59, 4  ;;  %v1781_v49 = vld [vmem:[#allocation2 + $0x54] sm:$0xf] }
 0x140   : > { %v1926_v51 = vsel %vm9011_vm14, %v1921_v4, %v1925_v47  ;;  %v1911_v15 = vrot.slane %v1909_v44, 5  ;;  %v1896_v26 = vor.u32 %v1895_v62, %v1892_v42  ;;  %v1940_v46 = vrot.slane %v1938_v6, 4  ;;  %v9580_v9 = vld [vmem:[#allocation2 + $0x64] sm:$0xf]  ;;  %v9584_v59 = vld [vmem:[#allocation2 + $0x68] sm:$0x1] }
 0x141   : > { %v1936_v21 = vsel %vm9011_vm14, %v1931_v28, %v1935_v22  ;;  %v3314_v18 = vunpack.c.l.b16 %v1926_v51  ;;  %v1906_v27 = vor.u32 %v1905_v8, %v1901_v24  ;;  %v1941_v17 = vshll.u32 %v1779_v60, 16 }
 0x142   : > { %3358 = vrot.lane.b32.xlu0 %v3340_v61, %s8750_s10  ;;  %v3315_v58 = vunpack.c.l.b16 %v1936_v21  ;;  %v1947_v38 = vshll.u32 %v9563_v43, 16  ;;  %v1897_v47 = vrot.slane %v1896_v26, 4  ;;  %v1951_v35 = vshrl.u32 %v9563_v43, 16 }
 0x143   : > { %v1957_v41 = vshll.u32 %v9567_v55, 16  ;;  %v1986_v13 = vshrl.u32 %v1783_v39, 16  ;;  %v1907_v23 = vrot.slane %v1906_v27, 4  ;;  %v1943_v63 = vrot.slane %v1941_v17, 5 }
 0x144   : > { %3354 = vrot.lane.b32.xlu1 %v3338_v54, %s8750_s10  ;;  %v3342_v22 = vpack.c.b16 %v3315_v58, %v3314_v18  ;;  %v1949_v42 = vrot.slane %v1947_v38, 5  ;;  %v1902_v60 = vsel %vm9011_vm14, %v1897_v47, %v1901_v24  ;;  %v1953_v4 = vrot.slane %v1951_v35, 4 }
 0x145   : > { %v1959_v57 = vrot.slane %v1957_v41, 5  ;;  %v1988_v54 = vrot.slane %v1986_v13, 4  ;;  %v1912_v44 = vsel %vm9011_vm14, %v1907_v23, %v1911_v15  ;;  %v3312_v61 = vunpack.c.l.b16 %v1902_v60  ;;  %v9592_v35 = vpop.permute.xlu2 %3196  ;;  %v9594_v15 = vld [vmem:[#allocation2 + $0x58] sm:$0xf]  ;;  %v9598_v13 = vld [vmem:[#allocation2 + $0x5c] sm:$0x1] }
 0x146   : > { %3362 = vrot.lane.b32.xlu2 %v3342_v22, %s8750_s10  ;;  %v1944_v28 = vor.u32 %v1943_v63, %v1940_v46  ;;  %v1989_v62 = vshll.u32 %v1783_v39, 16  ;;  %v3313_v6 = vunpack.c.l.b16 %v1912_v44  ;;  %v1954_v51 = vor.u32 %v1953_v4, %v1949_v42  ;;  %11927 = vst [vmem:[#allocation17_spill] sm:$0xff] %v9592_v35  ;;  %v1785_v23 = vld [vmem:[#allocation2 + $0x6c] sm:$0xf] }
 0x147   : > { %v1995_v8 = vshll.u32 %v9580_v9, 16  ;;  %v1999_v21 = vshrl.u32 %v9580_v9, 16  ;;  %v2005_v26 = vshll.u32 %v9584_v59, 16  ;;  %v1962_v58 = vshrl.u32 %v1781_v49, 16 }
 0x148   : > { %v1945_v24 = vrot.slane %v1944_v28, 4  ;;  %v1991_v18 = vrot.slane %v1989_v62, 5  ;;  %v3341_v27 = vpack.c.b16 %v3313_v6, %v3312_v61  ;;  %v1955_v17 = vrot.slane %v1954_v51, 4  ;;  %v9603_v61 = vpop.permute.xlu1 %3294  ;;  %v9607_v6 = vpop.permute.xlu0 %3180 }
 0x149   : > { %v1997_v38 = vrot.slane %v1995_v8, 5  ;;  %v2001_v47 = vrot.slane %v1999_v21, 4  ;;  %v2007_v41 = vrot.slane %v2005_v26, 5  ;;  %v1964_v22 = vrot.slane %v1962_v58, 4  ;;  %11928 = vst [vmem:[#allocation18_spill] sm:$0xff] %v9603_v61 }
 0x14a   : > { %v1950_v39 = vsel %vm9011_vm14, %v1945_v24, %v1949_v42  ;;  %v1992_v46 = vor.u32 %v1991_v18, %v1988_v54  ;;  %v1960_v63 = vsel %vm9011_vm14, %v1955_v17, %v1959_v57  ;;  %v1965_v44 = vshll.u32 %v1781_v49, 16  ;;  %11929 = vst [vmem:[#allocation19_spill] sm:$0xff] %v9607_v6  ;;  %v9612_v58 = vld [vmem:[#allocation2 + $0x70] sm:$0xf] }
 0x14b   : > { %v3316_v60 = vunpack.c.l.b16 %v1950_v39  ;;  %v2002_v4 = vor.u32 %v2001_v47, %v1997_v38  ;;  %v3317_v28 = vunpack.c.l.b16 %v1960_v63  ;;  %v1971_v42 = vshll.u32 %v9594_v15, 16  ;;  %v1789_v63 = vld [vmem:[#allocation2 + $0x84] sm:$0xf] }
 0x14c   : > { %3360 = vrot.lane.b32.xlu1 %v3341_v27, %s8750_s10  ;;  %v1993_v62 = vrot.slane %v1992_v46, 4  ;;  %v1975_v54 = vshrl.u32 %v9594_v15, 16  ;;  %v1967_v8 = vrot.slane %v1965_v44, 5  ;;  %v1981_v21 = vshll.u32 %v9598_v13, 16  ;;  %v9614_v27 = vld [vmem:[#allocation2 + $0x74] sm:$0x1] }
 0x14d   : > { %v2003_v51 = vrot.slane %v2002_v4, 4  ;;  %v2010_v24 = vshrl.u32 %v1785_v23, 16  ;;  %v3343_v18 = vpack.c.b16 %v3317_v28, %v3316_v60  ;;  %v1973_v49 = vrot.slane %v1971_v42, 5 }
 0x14e   : > { %v1998_v57 = vsel %vm9011_vm14, %v1993_v62, %v1997_v38  ;;  %v1977_v26 = vrot.slane %v1975_v54, 4  ;;  %v1968_v39 = vor.u32 %v1967_v8, %v1964_v22  ;;  %v1983_v46 = vrot.slane %v1981_v21, 5  ;;  %v9622_v22 = vld [vmem:[#allocation2 + $0x88] sm:$0xf] }
 0x14f   : > { %v2008_v17 = vsel %vm9011_vm14, %v2003_v51, %v2007_v41  ;;  %v3320_v47 = vunpack.c.l.b16 %v1998_v57  ;;  %3364 = vrot.lane.b32.xlu0 %v3343_v18, %s8750_s10  ;;  %v2012_v44 = vrot.slane %v2010_v24, 4  ;;  %v2013_v28 = vshll.u32 %v1785_v23, 16  ;;  %v9626_v57 = vld [vmem:[#allocation2 + $0x8c] sm:$0x1] }
 0x150   : > { %v3321_v4 = vunpack.c.l.b16 %v2008_v17  ;;  %v1978_v60 = vor.u32 %v1977_v26, %v1973_v49  ;;  %v1969_v38 = vrot.slane %v1968_v39, 4  ;;  %v2019_v62 = vshll.u32 %v9612_v58, 16  ;;  %v9628_v26 = vpop.permute.xlu2 %3202  ;;  %v9640_v16 = vpop.permute.xlu0 %3186 }
 0x151   : > { %v2023_v42 = vshrl.u32 %v9612_v58, 16  ;;  %v2029_v54 = vshll.u32 %v9614_v27, 16  ;;  %v2015_v51 = vrot.slane %v2013_v28, 5  ;;  %v2058_v8 = vshrl.u32 %v1789_v63, 16  ;;  %11930 = vst [vmem:[#allocation20_spill] sm:$0xff] %v9628_v26 }
 0x152   : > { %v3345_v53 = vpack.c.b16 %v3321_v4, %v3320_v47  ;;  %v1979_v41 = vrot.slane %v1978_v60, 4  ;;  %v1974_v21 = vsel %vm9011_vm14, %v1969_v38, %v1973_v49  ;;  %v2021_v18 = vrot.slane %v2019_v62, 5  ;;  %v9634_v38 = vpop.permute.xlu1 %3182  ;;  %11932 = vst [vmem:[#allocation22_spill] sm:$0xff] %v9640_v16 }
 0x153   : > { %v2025_v24 = vrot.slane %v2023_v42, 4  ;;  %v2031_v23 = vrot.slane %v2029_v54, 5  ;;  %v3318_v47 = vunpack.c.l.b16 %v1974_v21  ;;  %v2016_v39 = vor.u32 %v2015_v51, %v2012_v44  ;;  %11931 = vst [vmem:[#allocation21_spill] sm:$0xff] %v9634_v38 }
 0x154   : > { %3368 = vrot.lane.b32.xlu2 %v3345_v53, %s8750_s10  ;;  %v1984_v17 = vsel %vm9011_vm14, %v1979_v41, %v1983_v46  ;;  %v2060_v4 = vrot.slane %v2058_v8, 4  ;;  %v2061_v14 = vshll.u32 %v1789_v63, 16  ;;  %v2067_v49 = vshll.u32 %v9622_v22, 16  ;;  %v9642_v8 = vld [vmem:[#allocation2 + $0x80] sm:$0x1] }
 0x155   : > { %v3319_v60 = vunpack.c.l.b16 %v1984_v17  ;;  %v2026_v28 = vor.u32 %v2025_v24, %v2021_v18  ;;  %v2017_v62 = vrot.slane %v2016_v39, 4  ;;  %v2071_v42 = vshrl.u32 %v9622_v22, 16  ;;  %v1791_v39 = vld [vmem:[#allocation2 + $0x90] sm:$0xf] }
 0x156   : > { %v2077_v54 = vshll.u32 %v9626_v57, 16  ;;  %v2034_v53 = vshrl.u32 %v1787_v3, 16  ;;  %v2063_v41 = vrot.slane %v2061_v14, 5  ;;  %v2069_v51 = vrot.slane %v2067_v49, 5 }
 0x157   : > { %v3344_v46 = vpack.c.b16 %v3319_v60, %v3318_v47  ;;  %v2027_v44 = vrot.slane %v2026_v28, 4  ;;  %v2022_v63 = vsel %vm9011_vm14, %v2017_v62, %v2021_v18  ;;  %v2073_v21 = vrot.slane %v2071_v42, 4 }
 0x158   : > { %v2079_v24 = vrot.slane %v2077_v54, 5  ;;  %v2036_v17 = vrot.slane %v2034_v53, 4  ;;  %v3322_v26 = vunpack.c.l.b16 %v2022_v63  ;;  %v2064_v12 = vor.u32 %v2063_v41, %v2060_v4  ;;  %v9656_v4 = vld [vmem:[#allocation2 + $0x98] sm:$0x1]  ;;  %v1795_v41 = vld [vmem:[#allocation2 + $0xa8] sm:$0xf] }
 0x159   : > { %3366 = vrot.lane.b32.xlu1 %v3344_v46, %s8750_s10  ;;  %v2032_v19 = vsel %vm9011_vm14, %v2027_v44, %v2031_v23  ;;  %v2037_v47 = vshll.u32 %v1787_v3, 16  ;;  %v2074_v14 = vor.u32 %v2073_v21, %v2069_v51  ;;  %v2043_v28 = vshll.u32 %v9638_v52, 16 }
 0x15a   : > { %v3323_v60 = vunpack.c.l.b16 %v2032_v19  ;;  %v2047_v49 = vshrl.u32 %v9638_v52, 16  ;;  %v2065_v16 = vrot.slane %v2064_v12, 4  ;;  %v2053_v62 = vshll.u32 %v9642_v8, 16  ;;  %v9658_v12 = vpop.permute.xlu2 %3208 }
 0x15b   : > { %v2039_v18 = vrot.slane %v2037_v47, 5  ;;  %v2082_v42 = vshrl.u32 %v1791_v39, 16  ;;  %v2075_v53 = vrot.slane %v2074_v14, 4  ;;  %v2045_v46 = vrot.slane %v2043_v28, 5  ;;  %11933 = vst [vmem:[#allocation23_spill] sm:$0xff] %v9658_v12 }
 0x15c   : > { %v3346_v54 = vpack.c.b16 %v3323_v60, %v3322_v26  ;;  %v2049_v1 = vrot.slane %v2047_v49, 4  ;;  %v2070_v3 = vsel %vm9011_vm14, %v2065_v16, %v2069_v51  ;;  %v2055_v23 = vrot.slane %v2053_v62, 5  ;;  %v1793_v12 = vld [vmem:[#allocation2 + $0x9c] sm:$0xf] }
 0x15d   : > { %v2040_v19 = vor.u32 %v2039_v18, %v2036_v17  ;;  %v2084_v44 = vrot.slane %v2082_v42, 4  ;;  %v2080_v26 = vsel %vm9011_vm14, %v2075_v53, %v2079_v24  ;;  %v3326_v63 = vunpack.c.l.b16 %v2070_v3  ;;  %v9665_v17 = vpop.permute.xlu1 %3188  ;;  %v9668_v42 = vpop.permute.xlu0 %3192  ;;  %v9672_v53 = vld [vmem:[#allocation2 + $0xac] sm:$0xf]  ;;  %v9674_v3 = vld [vmem:[#allocation2 + $0xb0] sm:$0x1] }
 0x15e   : > { %3370 = vrot.lane.b32.xlu0 %v3346_v54, %s8750_s10  ;;  %v2050_v21 = vor.u32 %v2049_v1, %v2045_v46  ;;  %v2085_v47 = vshll.u32 %v1791_v39, 16  ;;  %v3327_v60 = vunpack.c.l.b16 %v2080_v26  ;;  %v2091_v16 = vshll.u32 %v9652_v2, 16  ;;  %11934 = vst [vmem:[#allocation24_spill] sm:$0xff] %v9665_v17 }
 0x15f   : > { %v2041_v14 = vrot.slane %v2040_v19, 4  ;;  %v2095_v51 = vshrl.u32 %v9652_v2, 16  ;;  %v2101_v18 = vshll.u32 %v9656_v4, 16  ;;  %v2130_v62 = vshrl.u32 %v1795_v41, 16  ;;  %11935 = vst [vmem:[#allocation25_spill] sm:$0xff] %v9668_v42 }
 0x160   : > { %v2051_v28 = vrot.slane %v2050_v21, 4  ;;  %v2087_v49 = vrot.slane %v2085_v47, 5  ;;  %v3348_v54 = vpack.c.b16 %v3327_v60, %v3326_v63  ;;  %v2093_v24 = vrot.slane %v2091_v16, 5 }
 0x161   : > { %v2046_v1 = vsel %vm9011_vm14, %v2041_v14, %v2045_v46  ;;  %v2097_v39 = vrot.slane %v2095_v51, 4  ;;  %v2103_v47 = vrot.slane %v2101_v18, 5  ;;  %v2132_v60 = vrot.slane %v2130_v62, 4 }
 0x162   : > { %v2056_v19 = vsel %vm9011_vm14, %v2051_v28, %v2055_v23  ;;  %v3324_v26 = vunpack.c.l.b16 %v2046_v1  ;;  %v2088_v21 = vor.u32 %v2087_v49, %v2084_v44  ;;  %3374 = vrot.lane.b32.xlu2 %v3348_v54, %s8750_s10  ;;  %v2133_v17 = vshll.u32 %v1795_v41, 16  ;;  %v9684_v49 = vld [vmem:[#allocation2 + $0xa4] sm:$0x1] }
 0x163   : > { %v3325_v42 = vunpack.c.l.b16 %v2056_v19  ;;  %v2098_v63 = vor.u32 %v2097_v39, %v2093_v24  ;;  %v2139_v14 = vshll.u32 %v9672_v53, 16  ;;  %v2143_v16 = vshrl.u32 %v9672_v53, 16  ;;  %v1797_v39 = vld [vmem:[#allocation2 + $0xb4] sm:$0xf] }
 0x164   : > { %v2089_v46 = vrot.slane %v2088_v21, 4  ;;  %v2149_v51 = vshll.u32 %v9674_v3, 16  ;;  %v2135_v44 = vrot.slane %v2133_v17, 5  ;;  %v2106_v18 = vshrl.u32 %v1793_v12, 16 }
 0x165   : > { %v3347_v23 = vpack.c.b16 %v3325_v42, %v3324_v26  ;;  %v2099_v28 = vrot.slane %v2098_v63, 4  ;;  %v2141_v62 = vrot.slane %v2139_v14, 5  ;;  %v2145_v41 = vrot.slane %v2143_v16, 4  ;;  %v9691_v26 = vpop.permute.xlu2 %3100 }
 0x166   : > { %v2094_v54 = vsel %vm9011_vm14, %v2089_v46, %v2093_v24  ;;  %v2151_v1 = vrot.slane %v2149_v51, 5  ;;  %v2136_v61 = vor.u32 %v2135_v44, %v2132_v60  ;;  %v2108_v42 = vrot.slane %v2106_v18, 4  ;;  %11936 = vst [vmem:[#allocation26_spill] sm:$0xff] %v9691_v26  ;;  %v2201_v51 = vld [vmem:[#allocation2 + $0xc] sm:$0xe] }
 0x167   : > { %3372 = vrot.lane.b32.xlu1 %v3347_v23, %s8750_s10  ;;  %v2104_v19 = vsel %vm9011_vm14, %v2099_v28, %v2103_v47  ;;  %v3328_v21 = vunpack.c.l.b16 %v2094_v54  ;;  %v2146_v63 = vor.u32 %v2145_v41, %v2141_v62  ;;  %v2109_v29 = vshll.u32 %v1793_v12, 16  ;;  %v9696_v23 = vpop.permute.xlu1 %3194  ;;  %v1798_v18 = vld [vmem:[#allocation2 + $0xb8] sm:$0xf]  ;;  %v9698_v54 = vpop.permute.xlu0 %3198 }
 0x168   : > { %v3329_v17 = vunpack.c.l.b16 %v2104_v19  ;;  %v2115_v38 = vshll.u32 %v9682_v0, 16  ;;  %v2137_v24 = vrot.slane %v2136_v61, 4  ;;  %v2119_v46 = vshrl.u32 %v9682_v0, 16  ;;  %11937 = vst [vmem:[#allocation27_spill] sm:$0xff] %v9696_v23  ;;  %v1815_v19 = vld [vmem:[#allocation2 + $0xbc] sm:$0x1] }
 0x169   : > { %v2125_v14 = vshll.u32 %v9684_v49, 16  ;;  %v2154_v16 = vshrl.u32 %v1797_v39, 16  ;;  %v2147_v28 = vrot.slane %v2146_v63, 4  ;;  %v2111_v60 = vrot.slane %v2109_v29, 5  ;;  %11938 = vst [vmem:[#allocation28_spill] sm:$0xff] %v9698_v54 }
 0x16a   : > { %v3349_v47 = vpack.c.b16 %v3329_v17, %v3328_v21  ;;  %v2117_v44 = vrot.slane %v2115_v38, 5  ;;  %v2142_v12 = vsel %vm9011_vm14, %v2137_v24, %v2141_v62  ;;  %v2121_v41 = vrot.slane %v2119_v46, 4 }
 0x16b   : > { %v2127_v61 = vrot.slane %v2125_v14, 5  ;;  %v2156_v31 = vrot.slane %v2154_v16, 4  ;;  %v2152_v35 = vsel %vm9011_vm14, %v2147_v28, %v2151_v1  ;;  %v3332_v40 = vunpack.c.l.b16 %v2142_v12 }
 0x16c   : > { %3376 = vrot.lane.b32.xlu0 %v3349_v47, %s8750_s10  ;;  %v2112_v21 = vor.u32 %v2111_v60, %v2108_v42  ;;  %v2157_v17 = vshll.u32 %v1797_v39, 16  ;;  %v3333_v29 = vunpack.c.l.b16 %v2152_v35  ;;  %v2122_v38 = vor.u32 %v2121_v41, %v2117_v44  ;;  %v1799_v39 = vld [vmem:[#allocation2 + $0xc0] sm:$0xf] }
 0x16d   : > { %v2163_v63 = vshll.u32 %v1798_v18, 16  ;;  %v2167_v6 = vshrl.u32 %v1798_v18, 16  ;;  %v2173_v56 = vshll.u32 %v1815_v19, 16  ;;  %v8029_v62 = vrot.slane %v2201_v51, 9  ;;  %v9712_v51 = vpop.permute.xlu2 %3106  ;;  %v1816_v19 = vld [vmem:[#allocation2 + $0xc8] sm:$0x1] }
 0x16e   : > { %v2113_v54 = vrot.slane %v2112_v21, 4  ;;  %v2159_v26 = vrot.slane %v2157_v17, 5  ;;  %v3351_v24 = vpack.c.b16 %v3333_v29, %v3332_v40  ;;  %v2123_v46 = vrot.slane %v2122_v38, 4  ;;  %v2202_v21 = vld [vmem:[#allocation2 + $0x18] sm:$0xe] }
 0x16f   : > { %v2165_v14 = vrot.slane %v2163_v63, 5  ;;  %v2169_v16 = vrot.slane %v2167_v6, 4  ;;  %v2175_v1 = vrot.slane %v2173_v56, 5  ;;  %v2267_v42 = vrot.slane %v9500_v7, 5  ;;  %v1800_v7 = vld [vmem:[#allocation2 + $0xc4] sm:$0xf] }
 0x170   : > { %v2118_v47 = vsel %vm9011_vm14, %v2113_v54, %v2117_v44  ;;  %v2160_v23 = vor.u32 %v2159_v26, %v2156_v31  ;;  %3380 = vrot.lane.b32.xlu2 %v3351_v24, %s8750_s10  ;;  %v2128_v35 = vsel %vm9011_vm14, %v2123_v46, %v2127_v61  ;;  %v2270_v40 = vrot.slane %v9504_v25, 5  ;;  %v9716_v54 = vpop.permute.xlu1 %3200 }
 0x171   : > { %v3330_v28 = vunpack.c.l.b16 %v2118_v47  ;;  %v2170_v60 = vor.u32 %v2169_v16, %v2165_v14  ;;  %v3331_v6 = vunpack.c.l.b16 %v2128_v35  ;;  %v2268_v31 = vsel %vm8963_vm7, %v8029_v62, %v2267_v42 }
 0x172   : > { %v2161_v18 = vrot.slane %v2160_v23, 4  ;;  %v2269_v56 = vrot.slane %v2267_v42, 4  ;;  %v2178_v44 = vshrl.u32 %v1799_v39, 16  ;;  %v3386_v61 = vunpack.c.l.b16 %v2268_v31  ;;  %v9722_v23 = vpop.permute.xlu0 %3204 }
 0x173   : > { %v2171_v26 = vrot.slane %v2170_v60, 4  ;;  %v3350_v12 = vpack.c.b16 %v3331_v6, %v3330_v28  ;;  %11939 = vst [vmem:[#allocation29_spill] sm:$0xff] %v9722_v23  ;;  %v2181_v24 = vshll.u32 %v1799_v39, 16  ;;  %v2187_v46 = vshll.u32 %v1800_v7, 16  ;;  %v2204_v28 = vld [vmem:[#allocation2 + $0x30] sm:$0xe] }
 0x174   : > { %v2166_v41 = vsel %vm9011_vm14, %v2161_v18, %v2165_v14  ;;  %v2271_v25 = vsel %vm8963_vm7, %v2269_v56, %v2270_v40  ;;  %v2180_v63 = vrot.slane %v2178_v44, 4  ;;  %v2191_v14 = vshrl.u32 %v1800_v7, 16  ;;  %v2203_v44 = vld [vmem:[#allocation2 + $0x24] sm:$0xe] }
 0x175   : > { %v2176_v17 = vsel %vm9011_vm14, %v2171_v26, %v2175_v1  ;;  %v3334_v29 = vunpack.c.l.b16 %v2166_v41  ;;  %v3387_v38 = vunpack.c.l.b16 %v2271_v25  ;;  %3378 = vrot.lane.b32.xlu1 %v3350_v12, %s8750_s10  ;;  %v2197_v47 = vshll.u32 %v1816_v19, 16 }
 0x176   : > { %v3335_v62 = vunpack.c.l.b16 %v2176_v17  ;;  %v8030_v42 = vrot.slane %v2202_v21, 9  ;;  %v2274_v35 = vrot.slane %v9487_v45, 5  ;;  %v2183_v40 = vrot.slane %v2181_v24, 5 }
 0x177   : > { %v3418_v16 = vpack.c.b16 %v3387_v38, %v3386_v61  ;;  %v2189_v6 = vrot.slane %v2187_v46, 5  ;;  %v2193_v18 = vrot.slane %v2191_v14, 4  ;;  %v2277_v39 = vrot.slane %v9490_v50, 5  ;;  %v9737_v61 = vpop.permute.xlu2 %3112 }
 0x178   : > { %v3352_v60 = vpack.c.b16 %v3335_v62, %v3334_v29  ;;  %v2275_v1 = vsel %vm8963_vm7, %v8030_v42, %v2274_v35  ;;  %v2276_v31 = vrot.slane %v2274_v35, 4  ;;  %v2184_v56 = vor.u32 %v2183_v40, %v2180_v63  ;;  %11940 = vst [vmem:[#allocation30_spill] sm:$0xff] %v9737_v61  ;;  %v9742_v24 = vpop.permute.xlu1 %3206 }
 0x179   : > { %3434 = vrot.lane.b32.xlu2 %v3418_v16, %s8751_s11  ;;  %v2194_v26 = vor.u32 %v2193_v18, %v2189_v6  ;;  %v2199_v7 = vrot.slane %v2197_v47, 5  ;;  %v8032_v45 = vrot.slane %v2204_v28, 9  ;;  %v2288_v41 = vrot.slane %v9551_v37, 5  ;;  %11941 = vst [vmem:[#allocation31_spill] sm:$0xff] %v9742_v24  ;;  %v2205_v16 = vld [vmem:[#allocation2 + $0x3c] sm:$0xe] }
 0x17a   : > { %3382 = vrot.lane.b32.xlu0 %v3352_v60, %s8750_s10  ;;  %v2278_v12 = vsel %vm8963_vm7, %v2276_v31, %v2277_v39  ;;  %v2291_v25 = vrot.slane %v9553_v33, 5  ;;  %v2185_v19 = vrot.slane %v2184_v56, 4  ;;  %v3388_v17 = vunpack.c.l.b16 %v2275_v1  ;;  %v9748_v47 = vpop.permute.xlu0 %3102  ;;  %v2207_v60 = vld [vmem:[#allocation2 + $0x54] sm:$0xe] }
 0x17b   : > { %v2195_v21 = vrot.slane %v2194_v26, 4  ;;  %v3389_v50 = vunpack.c.l.b16 %v2278_v12  ;;  %v2289_v29 = vsel %vm8963_vm7, %v8032_v45, %v2288_v41  ;;  %v2290_v38 = vrot.slane %v2288_v41, 4 }
 0x17c   : > { %v8031_v63 = vrot.slane %v2203_v44, 9  ;;  %v2281_v62 = vrot.slane %v9513_v48, 5  ;;  %v2190_v37 = vsel %vm9011_vm14, %v2185_v19, %v2189_v6  ;;  %v3392_v14 = vunpack.c.l.b16 %v2289_v29  ;;  %v2206_v19 = vld [vmem:[#allocation2 + $0x48] sm:$0xe] }
 0x17d   : > { %v2200_v33 = vsel %vm9011_vm14, %v2195_v21, %v2199_v7  ;;  %v3419_v46 = vpack.c.b16 %v3389_v50, %v3388_v17  ;;  %v3336_v42 = vunpack.c.l.b16 %v2190_v37  ;;  %v2292_v28 = vsel %vm8963_vm7, %v2290_v38, %v2291_v25  ;;  %v2208_v50 = vld [vmem:[#allocation2 + $0x60] sm:$0xe] }
 0x17e   : > { %v3337_v35 = vunpack.c.l.b16 %v2200_v33  ;;  %v2282_v48 = vsel %vm8963_vm7, %v8031_v63, %v2281_v62  ;;  %v3393_v40 = vunpack.c.l.b16 %v2292_v28  ;;  %v2283_v18 = vrot.slane %v2281_v62, 4 }
 0x17f   : > { %v2284_v6 = vrot.slane %v9518_v32, 5  ;;  %v3390_v1 = vunpack.c.l.b16 %v2282_v48  ;;  %v8033_v39 = vrot.slane %v2205_v16, 9  ;;  %v2295_v56 = vrot.slane %v9531_v36, 5  ;;  %v9770_v63 = vpop.permute.xlu2 %3118 }
 0x180   : > { %v3353_v31 = vpack.c.b16 %v3337_v35, %v3336_v42  ;;  %v2298_v26 = vrot.slane %v9535_v11, 5  ;;  %v3421_v7 = vpack.c.b16 %v3393_v40, %v3392_v14  ;;  %v8035_v44 = vrot.slane %v2207_v60, 9  ;;  %v2210_v35 = vld [vmem:[#allocation2 + $0x78] sm:$0xe]  ;;  %v9777_v28 = vpop.permute.xlu1 %3104 }
 0x181   : > { %v2285_v45 = vsel %vm8963_vm7, %v2283_v18, %v2284_v6  ;;  %v2309_v12 = vrot.slane %v9594_v15, 5  ;;  %v2296_v32 = vsel %vm8963_vm7, %v8033_v39, %v2295_v56  ;;  %v2297_v25 = vrot.slane %v2295_v56, 4 }
 0x182   : > { %3436 = vrot.lane.b32.xlu0 %v3419_v46, %s8751_s11  ;;  %3384 = vrot.lane.b32.xlu1 %v3353_v31, %s8750_s10  ;;  %v3391_v41 = vunpack.c.l.b16 %v2285_v45  ;;  %v2312_v36 = vrot.slane %v9598_v13, 5  ;;  %v3394_v11 = vunpack.c.l.b16 %v2296_v32  ;;  %v8034_v37 = vrot.slane %v2206_v19, 9  ;;  %v9782_v6 = vpop.permute.xlu0 %3108 }
 0x183   : > { %3440 = vrot.lane.b32.xlu2 %v3421_v7, %s8751_s11  ;;  %v2310_v21 = vsel %vm8963_vm7, %v8035_v44, %v2309_v12  ;;  %v2311_v17 = vrot.slane %v2309_v12, 4  ;;  %v2299_v15 = vsel %vm8963_vm7, %v2297_v25, %v2298_v26  ;;  %v2302_v33 = vrot.slane %v9563_v43, 5  ;;  %v2209_v7 = vld [vmem:[#allocation2 + $0x6c] sm:$0xe]  ;;  %v2211_v25 = vld [vmem:[#allocation2 + $0x84] sm:$0xe] }
 0x184   : > { %v3420_v29 = vpack.c.b16 %v3391_v41, %v3390_v1  ;;  %v3398_v38 = vunpack.c.l.b16 %v2310_v21  ;;  %v3395_v62 = vunpack.c.l.b16 %v2299_v15  ;;  %v2305_v14 = vrot.slane %v9567_v55, 5 }
 0x185   : > { %v2313_v13 = vsel %vm8963_vm7, %v2311_v17, %v2312_v36  ;;  %v8036_v16 = vrot.slane %v2208_v50, 9  ;;  %v2316_v42 = vrot.slane %v9580_v9, 5  ;;  %v2303_v60 = vsel %vm8963_vm7, %v8034_v37, %v2302_v33 }
 0x186   : > { %v3399_v46 = vunpack.c.l.b16 %v2313_v13  ;;  %v3422_v48 = vpack.c.b16 %v3395_v62, %v3394_v11  ;;  %v2304_v40 = vrot.slane %v2302_v33, 4  ;;  %v2319_v18 = vrot.slane %v9584_v59, 5 }
 0x187   : > { %v3396_v43 = vunpack.c.l.b16 %v2303_v60  ;;  %v2317_v55 = vsel %vm8963_vm7, %v8036_v16, %v2316_v42  ;;  %v2318_v31 = vrot.slane %v2316_v42, 4  ;;  %v8038_v56 = vrot.slane %v2210_v35, 9  ;;  %v9802_v62 = vpop.permute.xlu2 %3124 }
 0x188   : > { %v3424_v1 = vpack.c.b16 %v3399_v46, %v3398_v38  ;;  %v2306_v9 = vsel %vm8963_vm7, %v2304_v40, %v2305_v14  ;;  %v3400_v39 = vunpack.c.l.b16 %v2317_v55  ;;  %v2330_v26 = vrot.slane %v9638_v52, 5  ;;  %v2213_v52 = vld [vmem:[#allocation2 + $0x9c] sm:$0xe]  ;;  %11942 = vst [vmem:[#allocation32_spill] sm:$0xff] %v9802_v62  ;;  %v9809_v35 = vpop.permute.xlu1 %3110 }
 0x189   : > { %v3397_v59 = vunpack.c.l.b16 %v2306_v9  ;;  %v2320_v45 = vsel %vm8963_vm7, %v2318_v31, %v2319_v18  ;;  %v2333_v44 = vrot.slane %v9642_v8, 5  ;;  %v8037_v19 = vrot.slane %v2209_v7, 9  ;;  %11943 = vst [vmem:[#allocation33_spill] sm:$0xff] %v9809_v35  ;;  %v2214_v9 = vld [vmem:[#allocation2 + $0xa8] sm:$0xe] }
 0x18a   : > { %3442 = vrot.lane.b32.xlu0 %v3422_v48, %s8751_s11  ;;  %3438 = vrot.lane.b32.xlu1 %v3420_v29, %s8751_s11  ;;  %v3401_v12 = vunpack.c.l.b16 %v2320_v45  ;;  %v2331_v41 = vsel %vm8963_vm7, %v8038_v56, %v2330_v26  ;;  %v2332_v32 = vrot.slane %v2330_v26, 4  ;;  %v2323_v50 = vrot.slane %v9612_v58, 5 }
 0x18b   : > { %3446 = vrot.lane.b32.xlu2 %v3424_v1, %s8751_s11  ;;  %v3423_v36 = vpack.c.b16 %v3397_v59, %v3396_v43  ;;  %v3404_v17 = vunpack.c.l.b16 %v2331_v41  ;;  %v2326_v8 = vrot.slane %v9614_v27, 5  ;;  %v8039_v15 = vrot.slane %v2211_v25, 9  ;;  %v2212_v1 = vld [vmem:[#allocation2 + $0x90] sm:$0xe] }
 0x18c   : > { %v3425_v11 = vpack.c.b16 %v3401_v12, %v3400_v39  ;;  %v2334_v21 = vsel %vm8963_vm7, %v2332_v32, %v2333_v44  ;;  %v2337_v38 = vrot.slane %v9622_v22, 5  ;;  %v2324_v13 = vsel %vm8963_vm7, %v8037_v19, %v2323_v50  ;;  %v2379_v19 = vld [vmem:[#allocation2 + $0x1c] sm:$0xf] }
 0x18d   : > { %v3405_v29 = vunpack.c.l.b16 %v2334_v21  ;;  %v2325_v37 = vrot.slane %v2323_v50, 4  ;;  %v2340_v33 = vrot.slane %v9626_v57, 5  ;;  %v8041_v46 = vrot.slane %v2213_v52, 9  ;;  %v9816_v57 = vpop.permute.xlu0 %3114  ;;  %v2410_v50 = vld [vmem:[#allocation2 + $0x20] sm:$0x1] }
 0x18e   : > { %v3402_v16 = vunpack.c.l.b16 %v2324_v13  ;;  %v2338_v58 = vsel %vm8963_vm7, %v8039_v15, %v2337_v38  ;;  %v2339_v42 = vrot.slane %v2337_v38, 4  ;;  %v2351_v48 = vrot.slane %v9682_v0, 5 }
 0x18f   : > { %v3427_v14 = vpack.c.b16 %v3405_v29, %v3404_v17  ;;  %v2327_v27 = vsel %vm8963_vm7, %v2325_v37, %v2326_v8  ;;  %v3406_v22 = vunpack.c.l.b16 %v2338_v58  ;;  %v2354_v60 = vrot.slane %v9684_v49, 5  ;;  %v2378_v49 = vld [vmem:[#allocation2 + $0x18] sm:$0xf]  ;;  %v9834_v29 = vpop.permute.xlu2 %3302 }
 0x190   : > { %v3403_v40 = vunpack.c.l.b16 %v2327_v27  ;;  %v2341_v18 = vsel %vm8963_vm7, %v2339_v42, %v2340_v33  ;;  %v2352_v55 = vsel %vm8963_vm7, %v8041_v46, %v2351_v48  ;;  %v2353_v31 = vrot.slane %v2351_v48, 4  ;;  %11944 = vst [vmem:[#allocation34_spill] sm:$0xff] %v9834_v29  ;;  %v9842_v33 = vpop.permute.xlu1 %3116  ;;  %v2810_v58 = vld [vmem:[#allocation2 + $0x18] sm:$0xe] }
 0x191   : > { %v3407_v43 = vunpack.c.l.b16 %v2341_v18  ;;  %v3410_v39 = vunpack.c.l.b16 %v2352_v55  ;;  %v8040_v7 = vrot.slane %v2212_v1, 9  ;;  %v2344_v59 = vrot.slane %v9652_v2, 5  ;;  %v2394_v48 = vld [vmem:[#allocation2 + $0x78] sm:$0xf]  ;;  %v2395_v18 = vld [vmem:[#allocation2 + $0x7c] sm:$0xf] }
 0x192   : > { %3448 = vrot.lane.b32.xlu0 %v3425_v11, %s8751_s11  ;;  %3444 = vrot.lane.b32.xlu1 %v3423_v36, %s8751_s11  ;;  %v3426_v0 = vpack.c.b16 %v3403_v40, %v3402_v16  ;;  %v2355_v26 = vsel %vm8963_vm7, %v2353_v31, %v2354_v60  ;;  %v2347_v44 = vrot.slane %v9656_v4, 5  ;;  %v8042_v12 = vrot.slane %v2214_v9, 9 }
 0x193   : > { %3452 = vrot.lane.b32.xlu2 %v3427_v14, %s8751_s11  ;;  %v3428_v56 = vpack.c.b16 %v3407_v43, %v3406_v22  ;;  %v3411_v45 = vunpack.c.l.b16 %v2355_v26  ;;  %v2358_v41 = vrot.slane %v9672_v53, 5  ;;  %v2345_v32 = vsel %vm8963_vm7, %v8040_v7, %v2344_v59 }
 0x194   : > { %v2346_v25 = vrot.slane %v2344_v59, 4  ;;  %v2361_v36 = vrot.slane %v9674_v3, 5  ;;  %v2427_v52 = vshrl.u32 %v2378_v49, 16  ;;  %v3408_v21 = vunpack.c.l.b16 %v2345_v32 }
 0x195   : > { %v3430_v11 = vpack.c.b16 %v3411_v45, %v3410_v39  ;;  %v2359_v17 = vsel %vm8963_vm7, %v8042_v12, %v2358_v41  ;;  %v2360_v2 = vrot.slane %v2358_v41, 4  ;;  %v2430_v15 = vshll.u32 %v2378_v49, 16  ;;  %v9845_v42 = vpop.permute.xlu0 %3120  ;;  %v2418_v12 = vld [vmem:[#allocation2 + $0x80] sm:$0x1] }
 0x196   : > { %v2348_v4 = vsel %vm8963_vm7, %v2346_v25, %v2347_v44  ;;  %v3412_v53 = vunpack.c.l.b16 %v2359_v17  ;;  %v2429_v8 = vrot.slane %v2427_v52, 4  ;;  %v2436_v13 = vshll.u32 %v2379_v19, 16 }
 0x197   : > { %v3409_v3 = vunpack.c.l.b16 %v2348_v4  ;;  %v2362_v38 = vsel %vm8963_vm7, %v2360_v2, %v2361_v36  ;;  %v2440_v37 = vshrl.u32 %v2379_v19, 16  ;;  %v2432_v14 = vrot.slane %v2430_v15, 5 }
 0x198   : > { %v3413_v46 = vunpack.c.l.b16 %v2362_v38  ;;  %v2446_v16 = vshll.u32 %v2410_v50, 16  ;;  %v2438_v27 = vrot.slane %v2436_v13, 5  ;;  %v8045_v55 = vrot.slane %v2810_v58, 9 }
 0x199   : > { %v2442_v22 = vrot.slane %v2440_v37, 4  ;;  %v3429_v60 = vpack.c.b16 %v3409_v3, %v3408_v21  ;;  %v2433_v40 = vor.u32 %v2432_v14, %v2429_v8  ;;  %v2876_v31 = vrot.slane %v2379_v19, 5  ;;  %v9859_v8 = vpop.permute.xlu1 %3122  ;;  %v2380_v37 = vld [vmem:[#allocation2 + $0x24] sm:$0xf]  ;;  %v9863_v14 = vld [vmem:[#allocation2 + $0x28] sm:$0xf] }
 0x19a   : > { %3454 = vrot.lane.b32.xlu0 %v3428_v56, %s8751_s11  ;;  %3450 = vrot.lane.b32.xlu1 %v3426_v0, %s8751_s11  ;;  %v3431_v1 = vpack.c.b16 %v3413_v46, %v3412_v53  ;;  %v2448_v0 = vrot.slane %v2446_v16, 5  ;;  %v2619_v39 = vshrl.u32 %v2394_v48, 16  ;;  %v2622_v49 = vshll.u32 %v2394_v48, 16  ;;  %v2818_v53 = vld [vmem:[#allocation2 + $0x78] sm:$0xe] }
 0x19b   : > { %3458 = vrot.lane.b32.xlu2 %v3430_v11, %s8751_s11  ;;  %v2443_v43 = vor.u32 %v2442_v22, %v2438_v27  ;;  %v2434_v9 = vrot.slane %v2433_v40, 4  ;;  %v2878_v26 = vrot.slane %v2876_v31, 4  ;;  %v2879_v7 = vrot.slane %v2410_v50, 5  ;;  %v9857_v11 = vpop.permute.xlu2 %3356  ;;  %v2411_v48 = vld [vmem:[#allocation2 + $0x2c] sm:$0x1] }
 0x19c   : > { %v2628_v59 = vshll.u32 %v2395_v18, 16  ;;  %v2877_v44 = vsel %vm8963_vm7, %v8045_v55, %v2876_v31  ;;  %v2621_v41 = vrot.slane %v2619_v39, 4  ;;  %v2624_v32 = vrot.slane %v2622_v49, 5 }
 0x19d   : > { %v2444_v56 = vrot.slane %v2443_v43, 4  ;;  %v2439_v45 = vsel %vm9011_vm14, %v2434_v9, %v2438_v27  ;;  %v2880_v19 = vsel %vm8963_vm7, %v2878_v26, %v2879_v7  ;;  %v2632_v50 = vshrl.u32 %v2395_v18, 16  ;;  %v9861_v46 = vpop.permute.xlu0 %3126 }
 0x19e   : > { %v3562_v36 = vunpack.c.l.b16 %v2439_v45  ;;  %v2630_v52 = vrot.slane %v2628_v59, 5  ;;  %v3643_v17 = vunpack.c.l.b16 %v2880_v19  ;;  %v2625_v2 = vor.u32 %v2624_v32, %v2621_v41  ;;  %11945 = vst [vmem:[#allocation35_spill] sm:$0xff] %v9861_v46 }
 0x19f   : > { %v2449_v25 = vsel %vm9011_vm14, %v2444_v56, %v2448_v0  ;;  %v2638_v4 = vshll.u32 %v2418_v12, 16  ;;  %v3642_v3 = vunpack.c.l.b16 %v2877_v44  ;;  %v2634_v13 = vrot.slane %v2632_v50, 4 }
 0x1a0   : > { %v3563_v21 = vunpack.c.l.b16 %v2449_v25  ;;  %v2626_v38 = vrot.slane %v2625_v2, 4  ;;  %v8053_v22 = vrot.slane %v2818_v53, 9  ;;  %v2935_v43 = vrot.slane %v2418_v12, 5 }
 0x1a1   : > { %v3674_v16 = vpack.c.b16 %v3643_v17, %v3642_v3  ;;  %v2635_v27 = vor.u32 %v2634_v13, %v2630_v52  ;;  %v2640_v40 = vrot.slane %v2638_v4, 5  ;;  %v2451_v55 = vshrl.u32 %v2380_v37, 16  ;;  %v2396_v17 = vld [vmem:[#allocation2 + $0x84] sm:$0xf]  ;;  %v2397_v4 = vld [vmem:[#allocation2 + $0x88] sm:$0xf] }
 0x1a2   : > { %3460 = vrot.lane.b32.xlu0 %v3431_v1, %s8751_s11  ;;  %3456 = vrot.lane.b32.xlu1 %v3429_v60, %s8751_s11  ;;  %v3594_v15 = vpack.c.b16 %v3563_v21, %v3562_v36  ;;  %v2631_v58 = vsel %vm9011_vm14, %v2626_v38, %v2630_v52  ;;  %v8618_v60 = vld [vmem:[#allocation2 + $0x18] sm:$0xff]  ;;  %v2932_v1 = vrot.slane %v2395_v18, 5  ;;  %v2454_v9 = vshll.u32 %v2380_v37, 16  ;;  %v2811_v36 = vld [vmem:[#allocation2 + $0x24] sm:$0xe] }
 0x1a3   : > { %v2636_v31 = vrot.slane %v2635_v27, 4  ;;  %v2460_v0 = vshll.u32 %v9863_v14, 16  ;;  %v2464_v39 = vshrl.u32 %v9863_v14, 16  ;;  %v3578_v49 = vunpack.c.l.b16 %v2631_v58  ;;  %v9878_v25 = vpop.permute.xlu2 %3362 }
 0x1a4   : > { %3610 = vrot.lane.b32.xlu2 %v3594_v15, %s8752_s12  ;;  %v2933_v56 = vsel %vm8963_vm7, %v8053_v22, %v2932_v1  ;;  %v2934_v26 = vrot.slane %v2932_v1, 4  ;;  %v2453_v18 = vrot.slane %v2451_v55, 4  ;;  %v2456_v59 = vrot.slane %v2454_v9, 5  ;;  %v2419_v1 = vld [vmem:[#allocation2 + $0x8c] sm:$0x1] }
 0x1a5   : > { %v2641_v7 = vsel %vm9011_vm14, %v2636_v31, %v2640_v40  ;;  %v2462_v45 = vrot.slane %v2460_v0, 5  ;;  %v2470_v44 = vshll.u32 %v2411_v48, 16  ;;  %v2466_v32 = vrot.slane %v2464_v39, 4  ;;  %v9882_v37 = vpop.permute.xlu0 %3298 }
 0x1a6   : > { %v3579_v12 = vunpack.c.l.b16 %v2641_v7  ;;  %v2936_v41 = vsel %vm8963_vm7, %v2934_v26, %v2935_v43  ;;  %v3658_v19 = vunpack.c.l.b16 %v2933_v56  ;;  %v2457_v21 = vor.u32 %v2456_v59, %v2453_v18  ;;  %v9880_v53 = vpop.permute.xlu1 %3128 }
 0x1a7   : > { %v3659_v52 = vunpack.c.l.b16 %v2936_v41  ;;  %v2467_v50 = vor.u32 %v2466_v32, %v2462_v45  ;;  %11946 = vst [vmem:[#allocation36_spill] sm:$0xff] %v9880_v53  ;;  %v2472_v38 = vrot.slane %v2470_v44, 5  ;;  %v8046_v13 = vrot.slane %v2811_v36, 9  ;;  %v2819_v41 = vld [vmem:[#allocation2 + $0x84] sm:$0xe] }
 0x1a8   : > { %v3602_v2 = vpack.c.b16 %v3579_v12, %v3578_v49  ;;  %v2458_v3 = vrot.slane %v2457_v21, 4  ;;  %v2883_v27 = vrot.slane %v9863_v14, 5  ;;  %v2886_v22 = vrot.slane %v2411_v48, 5  ;;  %v2382_v21 = vld [vmem:[#allocation2 + $0x30] sm:$0xf] }
 0x1a9   : > { %v3682_v15 = vpack.c.b16 %v3659_v52, %v3658_v19  ;;  %v2468_v58 = vrot.slane %v2467_v50, 4  ;;  %v2646_v43 = vshll.u32 %v2396_v17, 16  ;;  %v2652_v55 = vshll.u32 %v2397_v4, 16 }
 0x1aa   : > { %3690 = vrot.lane.b32.xlu0 %v3674_v16, %s8753_s13  ;;  %3530 = vrot.lane.b32.xlu1 %v8618_v60, %s8754_s14  ;;  %v8626_v16 = vld [vmem:[#allocation2 + $0x78] sm:$0xff]  ;;  %v2643_v60 = vshrl.u32 %v2396_v17, 16  ;;  %v2463_v40 = vsel %vm9011_vm14, %v2458_v3, %v2462_v45  ;;  %v2656_v31 = vshrl.u32 %v2397_v4, 16  ;;  %v2884_v14 = vsel %vm8963_vm7, %v8046_v13, %v2883_v27  ;;  %v2383_v17 = vld [vmem:[#allocation2 + $0x34] sm:$0xf] }
 0x1ab   : > { %v2473_v9 = vsel %vm9011_vm14, %v2468_v58, %v2472_v38  ;;  %v3564_v0 = vunpack.c.l.b16 %v2463_v40  ;;  %v2885_v48 = vrot.slane %v2883_v27, 4  ;;  %v2648_v56 = vrot.slane %v2646_v43, 5 }
 0x1ac   : > { %3626 = vrot.lane.b32.xlu2 %v3602_v2, %s8752_s12  ;;  %v3565_v39 = vunpack.c.l.b16 %v2473_v9  ;;  %v2645_v49 = vrot.slane %v2643_v60, 4  ;;  %v2654_v18 = vrot.slane %v2652_v55, 5  ;;  %v2658_v7 = vrot.slane %v2656_v31, 4 }
 0x1ad   : > { %v2887_v26 = vsel %vm8963_vm7, %v2885_v48, %v2886_v22  ;;  %v2662_v59 = vshll.u32 %v2419_v1, 16  ;;  %v3644_v45 = vunpack.c.l.b16 %v2884_v14  ;;  %v8054_v38 = vrot.slane %v2819_v41, 9  ;;  %v2412_v22 = vld [vmem:[#allocation2 + $0x38] sm:$0x1]  ;;  %v9904_v55 = vpop.permute.xlu0 %3304  ;;  %v2398_v41 = vld [vmem:[#allocation2 + $0x90] sm:$0xf] }
 0x1ae   : > { %v3645_v44 = vunpack.c.l.b16 %v2887_v26  ;;  %v2649_v12 = vor.u32 %v2648_v56, %v2645_v49  ;;  %v3595_v32 = vpack.c.b16 %v3565_v39, %v3564_v0  ;;  %v2659_v36 = vor.u32 %v2658_v7, %v2654_v18  ;;  %v9896_v52 = vpop.permute.xlu2 %3368  ;;  %v9899_v58 = vpop.permute.xlu1 %3300  ;;  %11949 = vst [vmem:[#allocation39_spill] sm:$0xff] %v9904_v55  ;;  %v2814_v55 = vld [vmem:[#allocation2 + $0x48] sm:$0xe] }
 0x1af   : > { %v2664_v19 = vrot.slane %v2662_v59, 5  ;;  %11947 = vst [vmem:[#allocation37_spill] sm:$0xff] %v9896_v52  ;;  %v2939_v13 = vrot.slane %v2397_v4, 5  ;;  %v2475_v60 = vshrl.u32 %v2382_v21, 16  ;;  %v2478_v40 = vshll.u32 %v2382_v21, 16 }
 0x1b0   : > { %v3675_v2 = vpack.c.b16 %v3645_v44, %v3644_v45  ;;  %v2650_v50 = vrot.slane %v2649_v12, 4  ;;  %v2660_v3 = vrot.slane %v2659_v36, 4  ;;  %11948 = vst [vmem:[#allocation38_spill] sm:$0xff] %v9899_v58  ;;  %v2484_v43 = vshll.u32 %v2383_v17, 16  ;;  %v2812_v45 = vld [vmem:[#allocation2 + $0x30] sm:$0xe] }
 0x1b1   : > { %v2941_v9 = vrot.slane %v2939_v13, 4  ;;  %v2477_v48 = vrot.slane %v2475_v60, 4  ;;  %v2480_v39 = vrot.slane %v2478_v40, 5  ;;  %v2488_v26 = vshrl.u32 %v2383_v17, 16 }
 0x1b2   : > { %3706 = vrot.lane.b32.xlu0 %v3682_v15, %s8753_s13  ;;  %3546 = vrot.lane.b32.xlu1 %v8626_v16, %s8754_s14  ;;  %v8619_v15 = vld [vmem:[#allocation2 + $0x24] sm:$0xff]  ;;  %v2942_v16 = vrot.slane %v2419_v1, 5  ;;  %v2655_v27 = vsel %vm9011_vm14, %v2650_v50, %v2654_v18  ;;  %v2665_v31 = vsel %vm9011_vm14, %v2660_v3, %v2664_v19  ;;  %v2940_v1 = vsel %vm8963_vm7, %v8054_v38, %v2939_v13  ;;  %v2399_v38 = vld [vmem:[#allocation2 + $0x94] sm:$0xf] }
 0x1b3   : > { %v3580_v4 = vunpack.c.l.b16 %v2655_v27  ;;  %v3581_v0 = vunpack.c.l.b16 %v2665_v31  ;;  %v3660_v14 = vunpack.c.l.b16 %v2940_v1  ;;  %v2486_v56 = vrot.slane %v2484_v43, 5  ;;  %v8627_v19 = vld [vmem:[#allocation2 + $0x84] sm:$0xff]  ;;  %v2420_v27 = vld [vmem:[#allocation2 + $0x98] sm:$0x1] }
 0x1b4   : > { %3612 = vrot.lane.b32.xlu2 %v3595_v32, %s8752_s12  ;;  %v2943_v49 = vsel %vm8963_vm7, %v2941_v9, %v2942_v16  ;;  %v2494_v18 = vshll.u32 %v2412_v22, 16  ;;  %v2481_v59 = vor.u32 %v2480_v39, %v2477_v48  ;;  %v2490_v12 = vrot.slane %v2488_v26, 4 }
 0x1b5   : > { %v3661_v7 = vunpack.c.l.b16 %v2943_v49  ;;  %v3603_v44 = vpack.c.b16 %v3581_v0, %v3580_v4  ;;  %v2890_v3 = vrot.slane %v2383_v17, 5  ;;  %v2893_v16 = vrot.slane %v2412_v22, 5  ;;  %v9924_v39 = vpop.permute.xlu0 %3358 }
 0x1b6   : > { %v2482_v36 = vrot.slane %v2481_v59, 4  ;;  %v2491_v21 = vor.u32 %v2490_v12, %v2486_v56  ;;  %v2667_v60 = vshrl.u32 %v2398_v41, 16  ;;  %v2670_v40 = vshll.u32 %v2398_v41, 16  ;;  %v9922_v9 = vpop.permute.xlu1 %3354  ;;  %v2384_v41 = vld [vmem:[#allocation2 + $0x3c] sm:$0xf] }
 0x1b7   : > { %v3683_v32 = vpack.c.b16 %v3661_v7, %v3660_v14  ;;  %v2892_v1 = vrot.slane %v2890_v3, 4  ;;  %v2676_v48 = vshll.u32 %v2399_v38, 16  ;;  %v2686_v26 = vshll.u32 %v2420_v27, 16 }
 0x1b8   : > { %v2487_v13 = vsel %vm9011_vm14, %v2482_v36, %v2486_v56  ;;  %v2492_v43 = vrot.slane %v2491_v21, 4  ;;  %v2669_v0 = vrot.slane %v2667_v60, 4  ;;  %v2672_v14 = vrot.slane %v2670_v40, 5 }
 0x1b9   : > { %v3566_v31 = vunpack.c.l.b16 %v2487_v13  ;;  %v2894_v49 = vsel %vm8963_vm7, %v2892_v1, %v2893_v16  ;;  %v2680_v56 = vshrl.u32 %v2399_v38, 16  ;;  %v2946_v60 = vrot.slane %v2399_v38, 5 }
 0x1ba   : > { %3692 = vrot.lane.b32.xlu0 %v3675_v2, %s8753_s13  ;;  %3532 = vrot.lane.b32.xlu1 %v8619_v15, %s8754_s14  ;;  %v2496_v2 = vrot.slane %v2494_v18, 5  ;;  %v8047_v15 = vrot.slane %v2812_v45, 9  ;;  %v3647_v7 = vunpack.c.l.b16 %v2894_v49  ;;  %v2673_v59 = vor.u32 %v2672_v14, %v2669_v0 }
 0x1bb   : > { %v2678_v45 = vrot.slane %v2676_v48, 5  ;;  %v2682_v12 = vrot.slane %v2680_v56, 4  ;;  %v2949_v40 = vrot.slane %v2420_v27, 5  ;;  %v2948_v38 = vrot.slane %v2946_v60, 4  ;;  %v2413_v27 = vld [vmem:[#allocation2 + $0x44] sm:$0x1] }
 0x1bc   : > { %3628 = vrot.lane.b32.xlu2 %v3603_v44, %s8752_s12  ;;  %v9914_v50 = vpop.permute.xlu2 %3374  ;;  %v2891_v4 = vsel %vm8963_vm7, %v8047_v15, %v2890_v3  ;;  %v2497_v22 = vsel %vm9011_vm14, %v2492_v43, %v2496_v2  ;;  %v2820_v44 = vld [vmem:[#allocation2 + $0x90] sm:$0xe]  ;;  %v2674_v21 = vrot.slane %v2673_v59, 4  ;;  %v2688_v15 = vrot.slane %v2686_v26, 5 }
 0x1bd   : > { %v3646_v17 = vunpack.c.l.b16 %v2891_v4  ;;  %v3567_v18 = vunpack.c.l.b16 %v2497_v22  ;;  %v8620_v3 = vld [vmem:[#allocation2 + $0x30] sm:$0xff]  ;;  %v2683_v13 = vor.u32 %v2682_v12, %v2678_v45  ;;  %v8055_v2 = vrot.slane %v2820_v44, 9 }
 0x1be   : > { %v2679_v16 = vsel %vm9011_vm14, %v2674_v21, %v2678_v45  ;;  %v2499_v43 = vshrl.u32 %v2384_v41, 16  ;;  %v2502_v4 = vshll.u32 %v2384_v41, 16  ;;  %v2950_v26 = vsel %vm8963_vm7, %v2948_v38, %v2949_v40  ;;  %v9943_v59 = vpop.permute.xlu1 %3360 }
 0x1bf   : > { %v3596_v36 = vpack.c.b16 %v3567_v18, %v3566_v31  ;;  %v2684_v31 = vrot.slane %v2683_v13, 4  ;;  %v2947_v0 = vsel %vm8963_vm7, %v8055_v2, %v2946_v60  ;;  %v3582_v14 = vunpack.c.l.b16 %v2679_v16  ;;  %v8628_v16 = vld [vmem:[#allocation2 + $0x90] sm:$0xff] }
 0x1c0   : > { %v3662_v48 = vunpack.c.l.b16 %v2947_v0  ;;  %v2501_v22 = vrot.slane %v2499_v43, 4  ;;  %v2504_v49 = vrot.slane %v2502_v4, 5  ;;  %v3663_v44 = vunpack.c.l.b16 %v2950_v26 }
 0x1c1   : > { %v2689_v56 = vsel %vm9011_vm14, %v2684_v31, %v2688_v15  ;;  %v2518_v41 = vshll.u32 %v2413_v27, 16  ;;  %v2401_v15 = vld [vmem:[#allocation2 + $0xa0] sm:$0xf]  ;;  %v2900_v0 = vrot.slane %v2413_v27, 5  ;;  %v8049_v61 = vrot.slane %v2814_v55, 9 }
 0x1c2   : > { %3708 = vrot.lane.b32.xlu0 %v3683_v32, %s8753_s13  ;;  %3548 = vrot.lane.b32.xlu1 %v8627_v19, %s8754_s14  ;;  %v2385_v32 = vld [vmem:[#allocation2 + $0x40] sm:$0xf]  ;;  %v3676_v19 = vpack.c.b16 %v3647_v7, %v3646_v17  ;;  %v3583_v45 = vunpack.c.l.b16 %v2689_v56  ;;  %v2505_v12 = vor.u32 %v2504_v49, %v2501_v22  ;;  %v3684_v2 = vpack.c.b16 %v3663_v44, %v3662_v48  ;;  %v2421_v48 = vld [vmem:[#allocation2 + $0xa4] sm:$0x1] }
 0x1c3   : > { %v2508_v1 = vshll.u32 %v2385_v32, 16  ;;  %v2512_v7 = vshrl.u32 %v2385_v32, 16  ;;  %v2520_v40 = vrot.slane %v2518_v41, 5  ;;  %v2897_v31 = vrot.slane %v2385_v32, 5 }
 0x1c4   : > { %3614 = vrot.lane.b32.xlu2 %v3596_v36, %s8752_s12  ;;  %v9945_v36 = vpop.permute.xlu0 %3364  ;;  %v3604_v13 = vpack.c.b16 %v3583_v45, %v3582_v14  ;;  %v2506_v60 = vrot.slane %v2505_v12, 4  ;;  %v2700_v49 = vshll.u32 %v2401_v15, 16  ;;  %vm3771_vm0 = vcmask 130048  }
 0x1c5   : > { %v2510_v18 = vrot.slane %v2508_v1, 5  ;;  %11951 = vst [vmem:[#allocation41_spill] sm:$0xff] %v9945_v36  ;;  %v2514_v21 = vrot.slane %v2512_v7, 4  ;;  %v2899_v45 = vrot.slane %v2897_v31, 4  ;;  %vm3903_vm9 = vcmask 392192  }
 0x1c6   : > { %v2702_v12 = vrot.slane %v2700_v49, 5  ;;  %vm3936_vm11 = vcmask 457728  }
 0x1c7   : > { %v2515_v43 = vor.u32 %v2514_v21, %v2510_v18  ;;  %v2511_v1 = vsel %vm9011_vm14, %v2506_v60, %v2510_v18  ;;  %v2704_v21 = vshrl.u32 %v2401_v15, 16 }
 0x1c8   : > { %v3568_v56 = vunpack.c.l.b16 %v2511_v1 }
 0x1c9   : > { %v2516_v14 = vrot.slane %v2515_v43, 4  ;;  %v2386_v43 = vld [vmem:[#allocation2 + $0x48] sm:$0xf]  ;;  %v2706_v1 = vrot.slane %v2704_v21, 4 }
 0x1ca   : > { %3694 = vrot.lane.b32.xlu0 %v3676_v19, %s8753_s13  ;;  %3534 = vrot.lane.b32.xlu1 %v8620_v3, %s8754_s14  ;;  %v9935_v17 = vpop.permute.xlu2 %3380  ;;  %v2813_v19 = vld [vmem:[#allocation2 + $0x3c] sm:$0xe] }
 0x1cb   : > { %11950 = vst [vmem:[#allocation40_spill] sm:$0xff] %v9935_v17  ;;  %v2400_v3 = vld [vmem:[#allocation2 + $0x9c] sm:$0xf]  ;;  %v8048_v4 = vrot.slane %v2813_v19, 9  ;;  %v2521_v18 = vsel %vm9011_vm14, %v2516_v14, %v2520_v40  ;;  %v2901_v19 = vsel %vm8963_vm7, %v2899_v45, %v2900_v0  ;;  %v2387_v40 = vld [vmem:[#allocation2 + $0x4c] sm:$0xf]  ;;  %v2707_v0 = vor.u32 %v2706_v1, %v2702_v12 }
 0x1cc   : > { %3630 = vrot.lane.b32.xlu2 %v3604_v13, %s8752_s12  ;;  %v2691_v38 = vshrl.u32 %v2400_v3, 16  ;;  %v2694_v22 = vshll.u32 %v2400_v3, 16  ;;  %v3569_v41 = vunpack.c.l.b16 %v2521_v18  ;;  %v2710_v3 = vshll.u32 %v2421_v48, 16  ;;  %v2821_v13 = vld [vmem:[#allocation2 + $0x9c] sm:$0xe] }
 0x1cd   : > { %v2898_v7 = vsel %vm8963_vm7, %v8048_v4, %v2897_v31  ;;  %v2953_v45 = vrot.slane %v2401_v15, 5  ;;  %v2956_v18 = vrot.slane %v2421_v48, 5  ;;  %v2708_v21 = vrot.slane %v2707_v0, 4 }
 0x1ce   : > { %v2693_v44 = vrot.slane %v2691_v38, 4  ;;  %v3648_v32 = vunpack.c.l.b16 %v2898_v7  ;;  %v2696_v27 = vrot.slane %v2694_v22, 5  ;;  %v3597_v4 = vpack.c.b16 %v3569_v41, %v3568_v56  ;;  %v8621_v38 = vld [vmem:[#allocation2 + $0x3c] sm:$0xff] }
 0x1cf   : > { %v2712_v49 = vrot.slane %v2710_v3, 5  ;;  %v8056_v7 = vrot.slane %v2821_v13, 9  ;;  %v2532_v41 = vshll.u32 %v2387_v40, 16 }
 0x1d0   : > { %v2697_v60 = vor.u32 %v2696_v27, %v2693_v44  ;;  %v9962_v31 = vpop.permute.xlu0 %3370  ;;  %v2414_v44 = vld [vmem:[#allocation2 + $0x50] sm:$0x1]  ;;  %v2526_v27 = vshll.u32 %v2386_v43, 16 }
 0x1d1   : > { %v2954_v13 = vsel %vm8963_vm7, %v8056_v7, %v2953_v45  ;;  %v2713_v1 = vsel %vm9011_vm14, %v2708_v21, %v2712_v49 }
 0x1d2   : > { %3710 = vrot.lane.b32.xlu0 %v3684_v2, %s8753_s13  ;;  %3550 = vrot.lane.b32.xlu1 %v8628_v16, %s8754_s14  ;;  %v3649_v2 = vunpack.c.l.b16 %v2901_v19  ;;  %v9960_v16 = vpop.permute.xlu1 %3366  ;;  %v2698_v22 = vrot.slane %v2697_v60, 4  ;;  %v2523_v19 = vshrl.u32 %v2386_v43, 16  ;;  %v3664_v15 = vunpack.c.l.b16 %v2954_v13  ;;  %v2402_v13 = vld [vmem:[#allocation2 + $0xa8] sm:$0xf] }
 0x1d3   : > { %v9952_v26 = vpop.permute.xlu2 %3434  ;;  %11952 = vst [vmem:[#allocation42_spill] sm:$0xff] %v9960_v16  ;;  %v2528_v60 = vrot.slane %v2526_v27, 5  ;;  %v8629_v27 = vld [vmem:[#allocation2 + $0x9c] sm:$0xff] }
 0x1d4   : > { %v3677_v14 = vpack.c.b16 %v3649_v2, %v3648_v32  ;;  %3616 = vrot.lane.b32.xlu2 %v3597_v4, %s8752_s12  ;;  %v2703_v56 = vsel %vm9011_vm14, %v2698_v22, %v2702_v12  ;;  %v2536_v32 = vshrl.u32 %v2387_v40, 16  ;;  %v2955_v2 = vrot.slane %v2953_v45, 4 }
 0x1d5   : > { %v3584_v3 = vunpack.c.l.b16 %v2703_v56  ;;  %v2525_v48 = vrot.slane %v2523_v19, 4  ;;  %v2534_v4 = vrot.slane %v2532_v41, 5  ;;  %v3585_v22 = vunpack.c.l.b16 %v2713_v1 }
 0x1d6   : > { %v2957_v12 = vsel %vm8963_vm7, %v2955_v2, %v2956_v18  ;;  %v2538_v43 = vrot.slane %v2536_v32, 4  ;;  %v2904_v18 = vrot.slane %v2387_v40, 5  ;;  %v2403_v32 = vld [vmem:[#allocation2 + $0xac] sm:$0xf]  ;;  %v2718_v1 = vshll.u32 %v2402_v13, 16 }
 0x1d7   : > { %v3665_v0 = vunpack.c.l.b16 %v2957_v12  ;;  %v2529_v56 = vor.u32 %v2528_v60, %v2525_v48  ;;  %v3605_v19 = vpack.c.b16 %v3585_v22, %v3584_v3  ;;  %v2907_v48 = vrot.slane %v2414_v44, 5  ;;  %v2422_v3 = vld [vmem:[#allocation2 + $0xb0] sm:$0x1] }
 0x1d8   : > { %v2539_v7 = vor.u32 %v2538_v43, %v2534_v4  ;;  %v2715_v60 = vshrl.u32 %v2402_v13, 16  ;;  %v2905_v55 = vsel %vm8963_vm7, %v8049_v61, %v2904_v18  ;;  %v2906_v40 = vrot.slane %v2904_v18, 4  ;;  %v2389_v18 = vld [vmem:[#allocation2 + $0x58] sm:$0xf] }
 0x1d9   : > { %v2530_v41 = vrot.slane %v2529_v56, 4  ;;  %v3685_v49 = vpack.c.b16 %v3665_v0, %v3664_v15  ;;  %v2720_v0 = vrot.slane %v2718_v1, 5  ;;  %v2734_v13 = vshll.u32 %v2422_v3, 16 }
 0x1da   : > { %3536 = vrot.lane.b32.xlu1 %v8621_v38, %s8754_s14  ;;  %3696 = vrot.lane.b32.xlu0 %v3677_v14, %s8753_s13  ;;  %v2542_v14 = vshll.u32 %v2414_v44, 16  ;;  %v9977_v53 = vpop.permute.xlu1 %3372  ;;  %v2540_v21 = vrot.slane %v2539_v7, 4  ;;  %v2717_v22 = vrot.slane %v2715_v60, 4  ;;  %v2908_v44 = vsel %vm8963_vm7, %v2906_v40, %v2907_v48 }
 0x1db   : > { %v2535_v2 = vsel %vm9011_vm14, %v2530_v41, %v2534_v4  ;;  %v2724_v4 = vshll.u32 %v2403_v32, 16  ;;  %v2728_v7 = vshrl.u32 %v2403_v32, 16  ;;  %v2388_v41 = vld [vmem:[#allocation2 + $0x54] sm:$0xf]  ;;  %v2736_v1 = vrot.slane %v2734_v13, 5 }
 0x1dc   : > { %v2544_v45 = vrot.slane %v2542_v14, 5  ;;  %3632 = vrot.lane.b32.xlu2 %v3605_v19, %s8752_s12  ;;  %v3570_v12 = vunpack.c.l.b16 %v2535_v2  ;;  %v3650_v14 = vunpack.c.l.b16 %v2905_v55  ;;  %v2822_v19 = vld [vmem:[#allocation2 + $0xa8] sm:$0xe]  ;;  %v2960_v24 = vrot.slane %v2403_v32, 5  ;;  %v2415_v13 = vld [vmem:[#allocation2 + $0x5c] sm:$0x1] }
 0x1dd   : > { %v9973_v38 = vpop.permute.xlu2 %3440  ;;  %v2730_v61 = vrot.slane %v2728_v7, 4  ;;  %v8622_v2 = vld [vmem:[#allocation2 + $0x48] sm:$0xff]  ;;  %v8057_v55 = vrot.slane %v2822_v19, 9  ;;  %v2963_v46 = vrot.slane %v2422_v3, 5  ;;  %v2547_v48 = vshrl.u32 %v2388_v41, 16 }
 0x1de   : > { %v9979_v52 = vpop.permute.xlu0 %3376  ;;  %v2545_v15 = vsel %vm9011_vm14, %v2540_v21, %v2544_v45  ;;  %v2721_v45 = vor.u32 %v2720_v0, %v2717_v22  ;;  %v2726_v21 = vrot.slane %v2724_v4, 5  ;;  %v2556_v22 = vshll.u32 %v2389_v18, 16 }
 0x1df   : > { %v3571_v43 = vunpack.c.l.b16 %v2545_v15  ;;  %v2560_v0 = vshrl.u32 %v2389_v18, 16  ;;  %v2961_v32 = vsel %vm8963_vm7, %v8057_v55, %v2960_v24  ;;  %v2962_v3 = vrot.slane %v2960_v24, 4 }
 0x1e0   : > { %v2722_v60 = vrot.slane %v2721_v45, 4  ;;  %v2731_v29 = vor.u32 %v2730_v61, %v2726_v21  ;;  %v3666_v7 = vunpack.c.l.b16 %v2961_v32  ;;  %v2549_v19 = vrot.slane %v2547_v48, 4  ;;  %v2815_v45 = vld [vmem:[#allocation2 + $0x54] sm:$0xe] }
 0x1e1   : > { %v2562_v61 = vrot.slane %v2560_v0, 4  ;;  %v2566_v55 = vshll.u32 %v2415_v13, 16  ;;  %v2911_v32 = vrot.slane %v2389_v18, 5  ;;  %v2404_v48 = vld [vmem:[#allocation2 + $0xb4] sm:$0xf] }
 0x1e2   : > { %3552 = vrot.lane.b32.xlu1 %v8629_v27, %s8754_s14  ;;  %3712 = vrot.lane.b32.xlu0 %v3685_v49, %s8753_s13  ;;  %v3651_v27 = vunpack.c.l.b16 %v2908_v44  ;;  %v3598_v49 = vpack.c.b16 %v3571_v43, %v3570_v12  ;;  %v2727_v40 = vsel %vm9011_vm14, %v2722_v60, %v2726_v21  ;;  %v2550_v43 = vshll.u32 %v2388_v41, 16 }
 0x1e3   : > { %v3586_v4 = vunpack.c.l.b16 %v2727_v40  ;;  %v2558_v21 = vrot.slane %v2556_v22, 5  ;;  %v8050_v40 = vrot.slane %v2815_v45, 9  ;;  %v2568_v17 = vrot.slane %v2566_v55, 5 }
 0x1e4   : > { %v3678_v15 = vpack.c.b16 %v3651_v27, %v3650_v14  ;;  %3618 = vrot.lane.b32.xlu2 %v3598_v49, %s8752_s12  ;;  %v2732_v14 = vrot.slane %v2731_v29, 4  ;;  %v2552_v27 = vrot.slane %v2550_v43, 5  ;;  %v2964_v29 = vsel %vm8963_vm7, %v2962_v3, %v2963_v46 }
 0x1e5   : > { %v9990_v56 = vpop.permute.xlu2 %3446  ;;  %v2563_v24 = vor.u32 %v2562_v61, %v2558_v21  ;;  %v2912_v46 = vsel %vm8963_vm7, %v8050_v40, %v2911_v32  ;;  %v2913_v22 = vrot.slane %v2911_v32, 4  ;;  %v2739_v0 = vshrl.u32 %v2404_v48, 16  ;;  %v2823_v61 = vld [vmem:[#allocation2 + $0xb4] sm:$0xe] }
 0x1e6   : > { %11953 = vst [vmem:[#allocation43_spill] sm:$0xff] %v9990_v56  ;;  %v2737_v41 = vsel %vm9011_vm14, %v2732_v14, %v2736_v1  ;;  %v2553_v60 = vor.u32 %v2552_v27, %v2549_v19  ;;  %v2914_v1 = vrot.slane %v2415_v13, 5  ;;  %v2405_v14 = vld [vmem:[#allocation2 + $0xb8] sm:$0xf]  ;;  %v2742_v3 = vshll.u32 %v2404_v48, 16 }
 0x1e7   : > { %v9998_v12 = vpop.permute.xlu1 %3378  ;;  %v2564_v35 = vrot.slane %v2563_v24, 4  ;;  %v2423_v27 = vld [vmem:[#allocation2 + $0xbc] sm:$0x1]  ;;  %v2748_v45 = vshll.u32 %v2405_v14, 16  ;;  %v8058_v48 = vrot.slane %v2823_v61, 9 }
 0x1e8   : > { %v2554_v16 = vrot.slane %v2553_v60, 4  ;;  %v2915_v19 = vsel %vm8963_vm7, %v2913_v22, %v2914_v1  ;;  %v2390_v60 = vld [vmem:[#allocation2 + $0x60] sm:$0xf]  ;;  %v2758_v24 = vshll.u32 %v2423_v27, 16  ;;  %v2391_v1 = vld [vmem:[#allocation2 + $0x64] sm:$0xf] }
 0x1e9   : > { %v8586_v22 = vld [vmem:[#allocation2] sm:$0xff] }
 0x1ea   : > { %3538 = vrot.lane.b32.xlu1 %v8622_v2, %s8754_s14  ;;  %3698 = vrot.lane.b32.xlu0 %v3678_v15, %s8753_s13  ;;  %v3587_v2 = vunpack.c.l.b16 %v2737_v41  ;;  %v3667_v15 = vunpack.c.l.b16 %v2964_v29  ;;  %v2559_v18 = vsel %vm9011_vm14, %v2554_v16, %v2558_v21  ;;  %v3652_v29 = vunpack.c.l.b16 %v2912_v46  ;;  %v8623_v46 = vld [vmem:[#allocation2 + $0x54] sm:$0xff] }
 0x1eb   : > { %v3653_v16 = vunpack.c.l.b16 %v2915_v19  ;;  %v2741_v21 = vrot.slane %v2739_v0, 4  ;;  %v2970_v0 = vrot.slane %v2423_v27, 5 }
 0x1ec   : > { %v10001_v44 = vpop.permute.xlu0 %3382  ;;  %v3606_v43 = vpack.c.b16 %v3587_v2, %v3586_v4  ;;  %v3686_v56 = vpack.c.b16 %v3667_v15, %v3666_v7  ;;  %v2569_v4 = vsel %vm9011_vm14, %v2564_v35, %v2568_v17  ;;  %v3572_v7 = vunpack.c.l.b16 %v2559_v18 }
 0x1ed   : > { %11954 = vst [vmem:[#allocation44_spill] sm:$0xff] %v10001_v44  ;;  %v10007_v49 = vpop.permute.xlu2 %3452  ;;  %v8630_v44 = vld [vmem:[#allocation2 + $0xa8] sm:$0xff]  ;;  %v3573_v41 = vunpack.c.l.b16 %v2569_v4  ;;  %v2744_v2 = vrot.slane %v2742_v3, 5  ;;  %v2752_v15 = vshrl.u32 %v2405_v14, 16  ;;  %v3679_v17 = vpack.c.b16 %v3653_v16, %v3652_v29 }
 0x1ee   : > { %3634 = vrot.lane.b32.xlu2 %v3606_v43, %s8752_s12  ;;  %v2967_v43 = vrot.slane %v2405_v14, 5  ;;  %v2760_v18 = vrot.slane %v2758_v24, 5  ;;  %v2571_v4 = vshrl.u32 %v2390_v60, 16  ;;  %v2574_v3 = vshll.u32 %v2390_v60, 16 }
 0x1ef   : > { %v3599_v35 = vpack.c.b16 %v3573_v41, %v3572_v7  ;;  %v2745_v40 = vor.u32 %v2744_v2, %v2741_v21  ;;  %v2754_v32 = vrot.slane %v2752_v15, 4  ;;  %v2580_v14 = vshll.u32 %v2391_v1, 16  ;;  %v2416_v15 = vld [vmem:[#allocation2 + $0x68] sm:$0x1] }
 0x1f0   : > { %v2968_v7 = vsel %vm8963_vm7, %v8058_v48, %v2967_v43  ;;  %v2969_v41 = vrot.slane %v2967_v43, 4  ;;  %v2573_v29 = vrot.slane %v2571_v4, 4  ;;  %v2576_v16 = vrot.slane %v2574_v3, 5 }
 0x1f1   : > { %v2746_v19 = vrot.slane %v2745_v40, 4  ;;  %v2584_v60 = vshrl.u32 %v2391_v1, 16 }
 0x1f2   : > { %3554 = vrot.lane.b32.xlu1 %v8630_v44, %s8754_s14  ;;  %3714 = vrot.lane.b32.xlu0 %v3686_v56, %s8753_s13  ;;  %v2750_v56 = vrot.slane %v2748_v45, 5  ;;  %v2971_v2 = vsel %vm8963_vm7, %v2969_v41, %v2970_v0  ;;  %v2577_v48 = vor.u32 %v2576_v16, %v2573_v29  ;;  %v4010_v0 = vld [vmem:[%s11895_s2 + $0x20] sm:$0xf]  ;;  %v2918_v41 = vrot.slane %v2391_v1, 5  ;;  %v2215_v29 = vld [vmem:[#allocation2 + $0xb4] sm:$0xe] }
 0x1f3   : > { %v3669_v43 = vunpack.c.l.b16 %v2971_v2  ;;  %v2586_v4 = vrot.slane %v2584_v60, 4 }
 0x1f4   : > { %v10020_v13 = vpop.permute.xlu0 %3436  ;;  %v10024_v44 = vpop.permute.xlu1 %3384  ;;  %v2755_v45 = vor.u32 %v2754_v32, %v2750_v56  ;;  %v2751_v27 = vsel %vm9011_vm14, %v2746_v19, %v2750_v56  ;;  %v3668_v32 = vunpack.c.l.b16 %v2968_v7  ;;  %v2578_v19 = vrot.slane %v2577_v48, 4 }
 0x1f5   : > { %11955 = vst [vmem:[#allocation45_spill] sm:$0xff] %v10024_v44  ;;  %v10026_v55 = vpop.permute.xlu2 %3458  ;;  %v3588_v24 = vunpack.c.l.b16 %v2751_v27  ;;  %v2921_v7 = vrot.slane %v2416_v15, 5  ;;  %v8631_v27 = vld [vmem:[#allocation2 + $0xb4] sm:$0xff] }
 0x1f6   : > { %3620 = vrot.lane.b32.xlu2 %v3599_v35, %s8752_s12  ;;  %v2756_v21 = vrot.slane %v2755_v45, 4  ;;  %v3725_v35 = vsel %vm3722_vm15, %v8586_v22, %v9478_v5  ;;  %v2590_v5 = vshll.u32 %v2416_v15, 16  ;;  %v3687_v60 = vpack.c.b16 %v3669_v43, %v3668_v32 }
 0x1f8   : > { %v2761_v56 = vsel %vm9011_vm14, %v2756_v21, %v2760_v18  ;;  %v4032_v21 = vunpack.c.l.b16 %v4010_v0  ;;  %v8719_v0 = vld [vmem:[#allocation2 + $0xb8] sm:$0xf] }
 0x1f9   : > { %v3589_v3 = vunpack.c.l.b16 %v2761_v56  ;;  %v2920_v56 = vrot.slane %v2918_v41, 4 }
 0x1fa   : > { %3540 = vrot.lane.b32.xlu1 %v8623_v46, %s8754_s14  ;;  %3700 = vrot.lane.b32.xlu0 %v3679_v17, %s8753_s13  ;;  %v2816_v17 = vld [vmem:[#allocation2 + $0x60] sm:$0xe]  ;;  %v2582_v46 = vrot.slane %v2580_v14, 5  ;;  %v2592_v14 = vrot.slane %v2590_v5, 5  ;;  %v4037_v15 = vpack.c.b16 %v4032_v21, %v4032_v21 }
 0x1fb   : > { %v8051_v45 = vrot.slane %v2816_v17, 9  ;;  %v3607_v16 = vpack.c.b16 %v3589_v3, %v3588_v24  ;;  %v8043_v24 = vrot.slane %v2215_v29, 9  ;;  %v2406_v17 = vld [vmem:[#allocation2 + $0xc0] sm:$0xf]  ;;  %v2922_v43 = vsel %vm8963_vm7, %v2920_v56, %v2921_v7 }
 0x1fc   : > { %v10035_v61 = vpop.permute.xlu0 %3442  ;;  %v10041_v40 = vpop.permute.xlu1 %3438  ;;  %v2587_v22 = vor.u32 %v2586_v4, %v2582_v46  ;;  %v2583_v18 = vsel %vm9011_vm14, %v2578_v19, %v2582_v46  ;;  %v2365_v3 = vrot.slane %v8719_v0, 5  ;;  %v3773_v7 = vsel %vm3771_vm0, %v3725_v35, %v9413_v10  ;;  %v2392_v0 = vld [vmem:[#allocation2 + $0x6c] sm:$0xf] }
 0x1fd   : > { %v2919_v48 = vsel %vm8963_vm7, %v8051_v45, %v2918_v41  ;;  %v3574_v1 = vunpack.c.l.b16 %v2583_v18  ;;  %v4077_v45 = vsel %vm4075_vm1, %v4037_v15, 0  ;;  %v8720_v41 = vld [vmem:[#allocation2 + $0xbc] sm:$0x1]  ;;  %v2424_v18 = vld [vmem:[#allocation2 + $0xc8] sm:$0x1]  ;;  %vm4232_vm1 = vcmask 27648  }
 0x1fe   : > { %v10050_v2 = vpop.permute.xlu2 %3610  ;;  %v2588_v44 = vrot.slane %v2587_v22, 4  ;;  %3636 = vrot.lane.b32.xlu2 %v3607_v16, %s8752_s12  ;;  %v3654_v4 = vunpack.c.l.b16 %v2919_v48  ;;  %v3655_v22 = vunpack.c.l.b16 %v2922_v43  ;;  %v2368_v29 = vrot.slane %v8720_v41, 5  ;;  %v2407_v16 = vld [vmem:[#allocation2 + $0xc4] sm:$0xf]  ;;  %4082 = vmatpush.bf16.msra.mxu0 %v4077_v45  ;;  %v2824_v48 = vld [vmem:[#allocation2 + $0xc0] sm:$0xe] }
 0x1ff   : > { %8688 = vmatpush.bf16.msra.mxu2 %v4077_v45  ;;  %v2366_v21 = vsel %vm8963_vm7, %v8043_v24, %v2365_v3  ;;  %v2776_v43 = vshrl.u32 %v2407_v16, 16  ;;  %v8624_v41 = vld [vmem:[#allocation2 + $0x60] sm:$0xff]  ;;  %v2782_v23 = vshll.u32 %v2424_v18, 16  ;;  %v8636_v24 = vld [vmem:[%s11895_s2 + $0x10] sm:$0xff] }
 0x200   : > { %v2593_v46 = vsel %vm9011_vm14, %v2588_v44, %v2592_v14  ;;  %v8637_v44 = vld [vmem:[%s11895_s2 + $0x18] sm:$0xff]  ;;  %v2763_v14 = vshrl.u32 %v2406_v17, 16 }
 0x201   : > { %v3575_v19 = vunpack.c.l.b16 %v2593_v46  ;;  %v2772_v46 = vshll.u32 %v2407_v16, 16  ;;  %v2778_v35 = vrot.slane %v2776_v43, 4  ;;  %v10090_v43 = vld [vmem:[#allocation2 + $0x74] sm:$0x1] }
 0x202   : > { %3556 = vrot.lane.b32.xlu1 %v8631_v27, %s8754_s14  ;;  %3716 = vrot.lane.b32.xlu0 %v3687_v60, %s8753_s13  ;;  %v2367_v27 = vrot.slane %v2365_v3, 4  ;;  %v2766_v60 = vshll.u32 %v2406_v17, 16  ;;  %v2765_v15 = vrot.slane %v2763_v14, 4  ;;  %v2974_v17 = vrot.slane %v2407_v16, 5  ;;  %v10086_v16 = vld [vmem:[#allocation2 + $0x70] sm:$0xf] }
 0x203   : > { %v3600_v56 = vpack.c.b16 %v3575_v19, %v3574_v1  ;;  %4083 = vmatpush.bf16.msra.mxu0 %v8637_v44  ;;  %v2774_v10 = vrot.slane %v2772_v46, 5  ;;  %8689 = vmatpush.bf16.msra.mxu2 %v8637_v44  ;;  %v8059_v1 = vrot.slane %v2824_v48, 9  ;;  %v3806_v3 = vsel %vm3804_vm4, %v3773_v7, %v9476_v34 }
 0x204   : > { %v10059_v32 = vpop.permute.xlu0 %3448  ;;  %v10063_v5 = vpop.permute.xlu1 %3444  ;;  %v2369_v58 = vsel %vm8963_vm7, %v2367_v27, %v2368_v29  ;;  %v2768_v45 = vrot.slane %v2766_v60, 5  ;;  %v2595_v29 = vshrl.u32 %v2392_v0, 16  ;;  %v2784_v44 = vrot.slane %v2782_v23, 5 }
 0x205   : > { %11956 = vst [vmem:[#allocation46_spill] sm:$0xff] %v10059_v32  ;;  %v3680_v32 = vpack.c.b16 %v3655_v22, %v3654_v4  ;;  %v2977_v22 = vrot.slane %v2424_v18, 5  ;;  %v2779_v14 = vor.u32 %v2778_v35, %v2774_v10  ;;  %v2976_v60 = vrot.slane %v2974_v17, 4 }
 0x206   : > { %11957 = vst [vmem:[#allocation47_spill] sm:$0xff] %v10063_v5  ;;  %3622 = vrot.lane.b32.xlu2 %v3600_v56, %s8752_s12  ;;  %v10080_v4 = vpop.permute.xlu2 %3626  ;;  %v2769_v19 = vor.u32 %v2768_v45, %v2765_v15  ;;  %v2598_v48 = vshll.u32 %v2392_v0, 16  ;;  %v3414_v7 = vunpack.c.l.b16 %v2366_v21  ;;  %v3415_v56 = vunpack.c.l.b16 %v2369_v58  ;;  %v8721_v5 = vld [vmem:[#allocation2 + $0xc4] sm:$0xf] }
 0x207   : > { %v2597_v15 = vrot.slane %v2595_v29, 4  ;;  %v2780_v18 = vrot.slane %v2779_v14, 4  ;;  %4084 = vmatpush.bf16.msra.mxu0 %v8636_v24  ;;  %v2975_v23 = vsel %vm8963_vm7, %v8059_v1, %v2974_v17  ;;  %8690 = vmatpush.bf16.msra.mxu2 %v8636_v24  ;;  %v2978_v58 = vsel %vm8963_vm7, %v2976_v60, %v2977_v22  ;;  %v8632_v1 = vld [vmem:[#allocation2 + $0xc0] sm:$0xff] }
 0x208   : > { %v2770_v46 = vrot.slane %v2769_v19, 4  ;;  %v2604_v0 = vshll.u32 %v10086_v16, 16  ;;  %v2608_v45 = vshrl.u32 %v10086_v16, 16  ;;  %v2614_v14 = vshll.u32 %v10090_v43, 16  ;;  %v2216_v60 = vld [vmem:[#allocation2 + $0xc0] sm:$0xe] }
 0x209   : > { %v2785_v35 = vsel %vm9011_vm14, %v2780_v18, %v2784_v44  ;;  %v3432_v17 = vpack.c.b16 %v3415_v56, %v3414_v7  ;;  %v2372_v36 = vrot.slane %v8721_v5, 5  ;;  %v8634_v44 = vld [vmem:[%s11895_s2] sm:$0xff] }
 0x20a   : > { %3542 = vrot.lane.b32.xlu1 %v8624_v41, %s8754_s14  ;;  %3702 = vrot.lane.b32.xlu0 %v3680_v32, %s8753_s13  ;;  %v8635_v32 = vld [vmem:[%s11895_s2 + $0x8] sm:$0xff]  ;;  %v2600_v41 = vrot.slane %v2598_v48, 5  ;;  %v2775_v21 = vsel %vm9011_vm14, %v2770_v46, %v2774_v10  ;;  %v3591_v24 = vunpack.c.l.b16 %v2785_v35  ;;  %v2606_v48 = vrot.slane %v2604_v0, 5 }
 0x20b   : > { %v3590_v19 = vunpack.c.l.b16 %v2775_v21  ;;  %v2610_v62 = vrot.slane %v2608_v45, 4  ;;  %4085 = vmatpush.bf16.msra.mxu0 %v8635_v32  ;;  %v3670_v10 = vunpack.c.l.b16 %v2975_v23  ;;  %v3671_v46 = vunpack.c.l.b16 %v2978_v58  ;;  %8691 = vmatpush.bf16.msra.mxu2 %v8635_v32  ;;  %v8594_v23 = vld [vmem:[#allocation2 + $0x60] sm:$0xff]  ;;  %v2817_v32 = vld [vmem:[#allocation2 + $0x6c] sm:$0xe] }
 0x20c   : > { %v10084_v27 = vpop.permute.xlu0 %3454  ;;  %v10088_v34 = vpop.permute.xlu1 %3450  ;;  %v2601_v29 = vor.u32 %v2600_v41, %v2597_v15  ;;  %v2616_v18 = vrot.slane %v2614_v14, 5  ;;  %v3839_v41 = vsel %vm3837_vm5, %v3806_v3, %v9922_v9  ;;  %v8044_v45 = vrot.slane %v2216_v60, 9 }
 0x20d   : > { %v3608_v7 = vpack.c.b16 %v3591_v24, %v3590_v19  ;;  %v2611_v56 = vor.u32 %v2610_v62, %v2606_v48  ;;  %v2374_v35 = vrot.slane %v2372_v36, 4  ;;  %v8722_v19 = vld [vmem:[#allocation2 + $0xc8] sm:$0x1]  ;;  %v3749_v14 = vsel %vm3722_vm15, %v8594_v23, %v9816_v57  ;;  %v10132_v57 = vld [vmem:[#allocation2 + $0xd4] sm:$0x1] }
 0x20e   : > { %v2602_v22 = vrot.slane %v2601_v29, 4  ;;  %3558 = vrot.lane.b32.xlu2 %v8632_v1, %s8754_s14  ;;  %v10110_v15 = vpop.permute.xlu2 %3612  ;;  %v2375_v62 = vrot.slane %v8722_v19, 5  ;;  %v2408_v29 = vld [vmem:[#allocation2 + $0xcc] sm:$0xf]  ;;  %v3872_v9 = vsel %vm3870_vm6, %v3839_v41, %v9952_v26  ;;  %v3688_v3 = vpack.c.b16 %v3671_v46, %v3670_v10 }
 0x20f   : > { %v2612_v0 = vrot.slane %v2611_v56, 4  ;;  %4086 = vmatpush.bf16.msra.mxu0 %v8634_v44  ;;  %8692 = vmatpush.bf16.msra.mxu2 %v8634_v44  ;;  %v2787_v56 = vshrl.u32 %v2408_v29, 16  ;;  %v2790_v26 = vshll.u32 %v2408_v29, 16  ;;  %v8625_v10 = vld [vmem:[#allocation2 + $0x6c] sm:$0xff]  ;;  %v2373_v46 = vsel %vm8963_vm7, %v8044_v45, %v2372_v36 }
 0x210   : > { %v2607_v21 = vsel %vm9011_vm14, %v2602_v22, %v2606_v48  ;;  %v8052_v48 = vrot.slane %v2817_v32, 9  ;;  %v2925_v22 = vrot.slane %v10086_v16, 5  ;;  %v2376_v44 = vsel %vm8963_vm7, %v2374_v35, %v2375_v62 }
 0x211   : > { %v3576_v1 = vunpack.c.l.b16 %v2607_v21  ;;  %v2617_v24 = vsel %vm9011_vm14, %v2612_v0, %v2616_v18  ;;  %v2789_v21 = vrot.slane %v2787_v56, 4  ;;  %v2806_v45 = vshll.u32 %v10132_v57, 16 }
 0x212   : > { %3462 = vrot.lane.b32.xlu1 %v3432_v17, %s8751_s11  ;;  %3638 = vrot.lane.b32.xlu0 %v3608_v7, %s8752_s12  ;;  %v10126_v17 = vld [vmem:[#allocation2 + $0xd0] sm:$0xf]  ;;  %v3577_v60 = vunpack.c.l.b16 %v2617_v24  ;;  %v2928_v7 = vrot.slane %v10090_v43, 5  ;;  %v2927_v23 = vrot.slane %v2925_v22, 4  ;;  %v2926_v16 = vsel %vm8963_vm7, %v8052_v48, %v2925_v22 }
 0x213   : > { %v2796_v18 = vshll.u32 %v10126_v17, 16  ;;  %v2792_v43 = vrot.slane %v2790_v26, 5  ;;  %v2800_v0 = vshrl.u32 %v10126_v17, 16  ;;  %v3416_v19 = vunpack.c.l.b16 %v2373_v46  ;;  %v11958_v46 = vld [vmem:[#allocation27_spill] sm:$0xff] }
 0x214   : > { %v10115_v5 = vpop.permute.xlu0 %3460  ;;  %v10120_v58 = vpop.permute.xlu1 %3456  ;;  %v3601_v41 = vpack.c.b16 %v3577_v60, %v3576_v1  ;;  %v2929_v32 = vsel %vm8963_vm7, %v2927_v23, %v2928_v7  ;;  %v3417_v1 = vunpack.c.l.b16 %v2376_v44  ;;  %v3789_v23 = vsel %vm3771_vm0, %v3749_v14, %v11958_v46  ;;  %v11961_v46 = vld [vmem:[#allocation19_spill] sm:$0xff] }
 0x215   : > { %v2798_v36 = vrot.slane %v2796_v18, 5  ;;  %v2793_v29 = vor.u32 %v2792_v43, %v2789_v21  ;;  %v3657_v48 = vunpack.c.l.b16 %v2929_v32  ;;  %v2802_v22 = vrot.slane %v2800_v0, 4  ;;  %v8587_v43 = vld [vmem:[#allocation2 + $0xc] sm:$0xff] }
 0x216   : > { %3544 = vrot.lane.b32.xlu2 %v8625_v10, %s8754_s14  ;;  %v10147_v35 = vpop.permute.xlu2 %3628  ;;  %v2808_v10 = vrot.slane %v2806_v45, 5  ;;  %v11959_v32 = vld [vmem:[#allocation7_spill] sm:$0xff] }
 0x217   : > { %v2794_v7 = vrot.slane %v2793_v29, 4  ;;  %v2803_v26 = vor.u32 %v2802_v22, %v2798_v36  ;;  %v2984_v22 = vrot.slane %v10132_v57, 5 }
 0x219   : > { %v2799_v44 = vsel %vm9011_vm14, %v2794_v7, %v2798_v36  ;;  %v2804_v21 = vrot.slane %v2803_v26, 4 }
 0x21a   : > { %3718 = vrot.lane.b32.xlu1 %v3688_v3, %s8753_s13  ;;  %3624 = vrot.lane.b32.xlu0 %v3601_v41, %s8752_s12  ;;  %v3656_v3 = vunpack.c.l.b16 %v2926_v16  ;;  %v3433_v41 = vpack.c.b16 %v3417_v1, %v3416_v19  ;;  %v3592_v0 = vunpack.c.l.b16 %v2799_v44 }
 0x21b   : > { %v2809_v14 = vsel %vm9011_vm14, %v2804_v21, %v2808_v10 }
 0x21c   : > { %v3691_v62 = vpop.permute.xlu0 %3690  ;;  %v3531_v24 = vpop.permute.xlu1 %3530  ;;  %v3681_v16 = vpack.c.b16 %v3657_v48, %v3656_v3  ;;  %v3593_v19 = vunpack.c.l.b16 %v2809_v14  ;;  %v2825_v3 = vld [vmem:[#allocation2 + $0xcc] sm:$0xe]  ;;  %v2981_v48 = vrot.slane %v10126_v17, 5 }
 0x21d   : > { %v3905_v60 = vsel %vm3903_vm9, %v3872_v9, %v3531_v24  ;;  %v8633_v9 = vld [vmem:[#allocation2 + $0xcc] sm:$0xff] }
 0x21e   : > { %v3938_v56 = vsel %vm3936_vm11, %v3905_v60, %v10050_v2  ;;  %v3822_v2 = vsel %vm3804_vm4, %v3789_v23, %v11959_v32  ;;  %3464 = vrot.lane.b32.xlu2 %v3433_v41, %s8751_s11  ;;  %v3615_v60 = vpop.permute.xlu2 %3614  ;;  %v3609_v26 = vpack.c.b16 %v3593_v19, %v3592_v0  ;;  %v2983_v10 = vrot.slane %v2981_v48, 4  ;;  %v8595_v41 = vld [vmem:[#allocation2 + $0x6c] sm:$0xff]  ;;  %s8756_s11 = smov 20  }
 0x21f   : > { %v3971_v18 = vsel %vm3969_vm12, %v3938_v56, %v3691_v62  ;;  %v3855_v36 = vsel %vm3837_vm5, %v3822_v2, %v9962_v31  ;;  %v11960_v62 = vld [vmem:[#allocation26_spill] sm:$0xff]  ;;  %v8060_v31 = vrot.slane %v2825_v3, 9  ;;  %v3752_v32 = vsel %vm3722_vm15, %v8595_v41, %v9842_v33  ;;  %v8588_v33 = vld [vmem:[#allocation2 + $0x18] sm:$0xff] }
 0x220   : > { %8269 = vmatmul.msk.bf16.vlgmr.msra.gmra.mxu0 %vm4042_vm13, %v3971_v18  ;;  %v3728_v29 = vsel %vm3722_vm15, %v8587_v43, %v11960_v62  ;;  %v3888_v1 = vsel %vm3870_vm6, %v3855_v36, %v10088_v34  ;;  %v2985_v17 = vsel %vm8963_vm7, %v2983_v10, %v2984_v22  ;;  %v3731_v3 = vsel %vm3722_vm15, %v8588_v33, %v9748_v47  ;;  %v8596_v10 = vld [vmem:[#allocation2 + $0x78] sm:$0xff] }
 0x221   : > { %v3775_v34 = vsel %vm3771_vm0, %v3728_v29, %v11961_v46  ;;  %v2982_v18 = vsel %vm8963_vm7, %v8060_v31, %v2981_v48  ;;  %v3673_v44 = vunpack.c.l.b16 %v2985_v17  ;;  %v11964_v29 = vld [vmem:[#allocation16_spill] sm:$0xff]  ;;  %v11965_v31 = vld [vmem:[#allocation21_spill] sm:$0xff] }
 0x222   : > { %3704 = vrot.lane.b32.xlu1 %v3681_v16, %s8753_s13  ;;  %3560 = vrot.lane.b32.xlu0 %v8633_v9, %s8754_s14  ;;  %v3672_v57 = vunpack.c.l.b16 %v2982_v18  ;;  %v11962_v16 = vld [vmem:[#allocation9_spill] sm:$0xff] }
 0x223   : > { %v11966_v46 = vld [vmem:[#allocation5_spill] sm:$0xff] }
 0x224   : > { %v3707_v45 = vpop.permute.xlu0 %3706  ;;  %v3547_v24 = vpop.permute.xlu1 %3546  ;;  %v3689_v43 = vpack.c.b16 %v3673_v44, %v3672_v57  ;;  %v11967_v44 = vld [vmem:[#allocation28_spill] sm:$0xff] }
 0x225   : > { %v3921_v7 = vsel %vm3903_vm9, %v3888_v1, %v3547_v24 }
 0x226   : > { %v3954_v56 = vsel %vm3936_vm11, %v3921_v7, %v10080_v4  ;;  %v3808_v4 = vsel %vm3804_vm4, %v3775_v34, %v11962_v16  ;;  %3720 = vrot.lane.b32.xlu2 %v3689_v43, %s8753_s13 }
 0x227   : > { %v3987_v23 = vsel %vm3969_vm12, %v3954_v56, %v3707_v45  ;;  %v3841_v9 = vsel %vm3837_vm5, %v3808_v4, %v9857_v11  ;;  %v11963_v45 = vld [vmem:[#allocation17_spill] sm:$0xff]  ;;  %v3631_v11 = vpop.permute.xlu2 %3630  ;;  %v3777_v56 = vsel %vm3771_vm0, %v3731_v3, %v11965_v31  ;;  %v11968_v4 = vld [vmem:[#allocation18_spill] sm:$0xff] }
 0x228   : > { %8277 = vmatmul.msk.bf16.vlgmr.msra.gmra.mxu2 %vm4042_vm13, %v3987_v23  ;;  %v3874_v2 = vsel %vm3870_vm6, %v3841_v9, %v10020_v13  ;;  %v3791_v19 = vsel %vm3771_vm0, %v3752_v32, %v11963_v45  ;;  %v3810_v47 = vsel %vm3804_vm4, %v3777_v56, %v11966_v46  ;;  %v3755_v23 = vsel %vm3722_vm15, %v8596_v10, %v9770_v63 }
 0x229   : > { %v3824_v13 = vsel %vm3804_vm4, %v3791_v19, %v11964_v29  ;;  %v3793_v41 = vsel %vm3771_vm0, %v3755_v23, %v11967_v44  ;;  %v11970_v19 = vld [vmem:[#allocation10_spill] sm:$0xff] }
 0x22a   : > { %3640 = vrot.lane.b32.xlu1 %v3609_v26, %s8752_s12  ;;  %v3857_v1 = vsel %vm3837_vm5, %v3824_v13, %v9977_v53  ;;  %v3826_v9 = vsel %vm3804_vm4, %v3793_v41, %v11968_v4  ;;  %v11974_v41 = vld [vmem:[#allocation20_spill] sm:$0xff]  ;;  %s8757_s12 = smov 28  }
 0x22b   : > { %v3859_v63 = vsel %vm3837_vm5, %v3826_v9, %v9914_v50  ;;  %v8597_v50 = vld [vmem:[#allocation2 + $0x84] sm:$0xff] }
 0x22c   : > { %v3693_v21 = vpop.permute.xlu0 %3692  ;;  %v3533_v14 = vpop.permute.xlu1 %3532 }
 0x22d   : > { %v3907_v0 = vsel %vm3903_vm9, %v3874_v2, %v3533_v14 }
 0x22e   : > { %v3940_v36 = vsel %vm3936_vm11, %v3907_v0, %v10110_v15  ;;  %v3890_v15 = vsel %vm3870_vm6, %v3857_v1, %v10007_v49  ;;  %v3843_v49 = vsel %vm3837_vm5, %v3810_v47, %v9924_v39  ;;  %v8589_v39 = vld [vmem:[#allocation2 + $0x24] sm:$0xff] }
 0x22f   : > { %v3973_v62 = vsel %vm3969_vm12, %v3940_v36, %v3693_v21  ;;  %v3617_v53 = vpop.permute.xlu2 %3616  ;;  %v3734_v43 = vsel %vm3722_vm15, %v8589_v39, %v9777_v28  ;;  %v11969_v0 = vld [vmem:[#allocation11_spill] sm:$0xff]  ;;  %v8591_v39 = vld [vmem:[#allocation2 + $0x3c] sm:$0xff] }
 0x230   : > { %8270 = vmatmul.msk.bf16.gmra.mxu0 %vm4042_vm13, %v3973_v62  ;;  %v3779_v36 = vsel %vm3771_vm0, %v3734_v43, %v11969_v0  ;;  %v8599_v0 = vld [vmem:[#allocation2 + $0x9c] sm:$0xff] }
 0x231   : > { %v3812_v62 = vsel %vm3804_vm4, %v3779_v36, %v11970_v19  ;;  %v11978_v36 = vld [vmem:[#allocation47_spill] sm:$0xff] }
 0x232   : > { %v3845_v28 = vsel %vm3837_vm5, %v3812_v62, %v9943_v59  ;;  %v8590_v59 = vld [vmem:[#allocation2 + $0x30] sm:$0xff] }
 0x234   : > { %v3709_v24 = vpop.permute.xlu0 %3708  ;;  %v3549_v48 = vpop.permute.xlu1 %3548 }
 0x235   : > { %v3923_v22 = vsel %vm3903_vm9, %v3890_v15, %v3549_v48  ;;  %v11971_v48 = vld [vmem:[#allocation8_spill] sm:$0xff] }
 0x236   : > { %v3956_v7 = vsel %vm3936_vm11, %v3923_v22, %v10147_v35  ;;  %v3876_v35 = vsel %vm3870_vm6, %v3843_v49, %v10041_v40  ;;  %v3737_v22 = vsel %vm3722_vm15, %v8590_v59, %v9712_v51  ;;  %v8598_v49 = vld [vmem:[#allocation2 + $0x90] sm:$0xff] }
 0x237   : > { %v3989_v26 = vsel %vm3969_vm12, %v3956_v7, %v3709_v24  ;;  %v3633_v40 = vpop.permute.xlu2 %3632 }
 0x238   : > { %8278 = vmatmul.msk.bf16.gmra.mxu2 %vm4042_vm13, %v3989_v26 }
 0x23c   : > { %v3695_v34 = vpop.permute.xlu0 %3694  ;;  %v3535_v18 = vpop.permute.xlu1 %3534 }
 0x23d   : > { %v3909_v17 = vsel %vm3903_vm9, %v3876_v35, %v3535_v18 }
 0x23e   : > { %v3942_v57 = vsel %vm3936_vm11, %v3909_v17, %v3615_v60  ;;  %v3892_v60 = vsel %vm3870_vm6, %v3859_v63, %v10084_v27  ;;  %v3758_v27 = vsel %vm3722_vm15, %v8597_v50, %v9845_v42  ;;  %v3761_v17 = vsel %vm3722_vm15, %v8598_v49, %v9859_v8 }
 0x23f   : > { %v3975_v16 = vsel %vm3969_vm12, %v3942_v57, %v3695_v34  ;;  %v3619_v29 = vpop.permute.xlu2 %3618  ;;  %v3795_v3 = vsel %vm3771_vm0, %v3758_v27, %v9716_v54  ;;  %v3740_v8 = vsel %vm3722_vm15, %v8591_v39, %v9782_v6  ;;  %v11977_v6 = vld [vmem:[#allocation41_spill] sm:$0xff]  ;;  %v11990_v39 = vmov 0  }
 0x240   : > { %8271 = vmatmul.msk.bf16.gmra.mxu0 %vm4042_vm13, %v3975_v16  ;;  %v3828_v42 = vsel %vm3804_vm4, %v3795_v3, %v11971_v48  ;;  %v11983_v48 = vld [vmem:[#allocation33_spill] sm:$0xff]  ;;  %4237 = vst.msk [vmem:[#allocation3 + $0xc] sm:$0xf] %vm4232_vm1, %v11990_v39 }
 0x241   : > { %4233 = vst.msk [vmem:[#allocation3] sm:$0xf] %vm4232_vm1, %v11990_v39 }
 0x242   : > { %4234 = vst.msk [vmem:[#allocation3 + $0x4] sm:$0xf] %vm4232_vm1, %v11990_v39 }
 0x243   : > { %4238 = vst.msk [vmem:[#allocation3 + $0x10] sm:$0xf] %vm4232_vm1, %v11990_v39 }
 0x244   : > { %v3711_v21 = vpop.permute.xlu0 %3710  ;;  %v3551_v32 = vpop.permute.xlu1 %3550  ;;  %4240 = vst.msk [vmem:[#allocation3 + $0x18] sm:$0xf] %vm4232_vm1, %v11990_v39 }
 0x245   : > { %v3925_v2 = vsel %vm3903_vm9, %v3892_v60, %v3551_v32  ;;  %v11975_v60 = vld [vmem:[#allocation24_spill] sm:$0xff]  ;;  %4241 = vst.msk [vmem:[#allocation3 + $0x1c] sm:$0xf] %vm4232_vm1, %v11990_v39 }
 0x246   : > { %v3958_v14 = vsel %vm3936_vm11, %v3925_v2, %v3631_v11  ;;  %v3878_v11 = vsel %vm3870_vm6, %v3845_v28, %v9973_v38  ;;  %v3861_v38 = vsel %vm3837_vm5, %v3828_v42, %v9979_v52  ;;  %v11973_v52 = vld [vmem:[#allocation12_spill] sm:$0xff]  ;;  %v3783_v32 = vsel %vm3771_vm0, %v3740_v8, %v11975_v60  ;;  %4243 = vst.msk [vmem:[#allocation3 + $0x24] sm:$0xf] %vm4232_vm1, %v11990_v39 }
 0x247   : > { %v3991_v45 = vsel %vm3969_vm12, %v3958_v14, %v3711_v21  ;;  %v3894_v7 = vsel %vm3870_vm6, %v3861_v38, %v10120_v58  ;;  %v11979_v28 = vld [vmem:[#allocation32_spill] sm:$0xff]  ;;  %4244 = vst.msk [vmem:[#allocation3 + $0x28] sm:$0xf] %vm4232_vm1, %v11990_v39 }
 0x248   : > { %8279 = vmatmul.msk.bf16.gmra.mxu2 %vm4042_vm13, %v3991_v45  ;;  %v3635_v46 = vpop.permute.xlu2 %3634  ;;  %v3764_v27 = vsel %vm3722_vm15, %v8599_v0, %v11979_v28  ;;  %4246 = vst.msk [vmem:[#allocation3 + $0x30] sm:$0xf] %vm4232_vm1, %v11990_v39  ;;  %v11997_v28 = vld [vmem:[#allocation46_spill] sm:$0xff] }
 0x249   : > { %4247 = vst.msk [vmem:[#allocation3 + $0x34] sm:$0xf] %vm4232_vm1, %v11990_v39 }
 0x24a   : > { %4249 = vst.msk [vmem:[#allocation3 + $0x3c] sm:$0xf] %vm4232_vm1, %v11990_v39 }
 0x24b   : > { %4250 = vst.msk [vmem:[#allocation3 + $0x40] sm:$0xf] %vm4232_vm1, %v11990_v39 }
 0x24c   : > { %v3537_v33 = vpop.permute.xlu1 %3536  ;;  %v3697_v1 = vpop.permute.xlu0 %3696  ;;  %4252 = vst.msk [vmem:[#allocation3 + $0x48] sm:$0xf] %vm4232_vm1, %v11990_v39 }
 0x24d   : > { %v3911_v13 = vsel %vm3903_vm9, %v3878_v11, %v3537_v33  ;;  %4253 = vst.msk [vmem:[#allocation3 + $0x4c] sm:$0xf] %vm4232_vm1, %v11990_v39 }
 0x24e   : > { %v3944_v24 = vsel %vm3936_vm11, %v3911_v13, %v3617_v53  ;;  %v11972_v53 = vld [vmem:[#allocation22_spill] sm:$0xff]  ;;  %4255 = vst.msk [vmem:[#allocation3 + $0x54] sm:$0xf] %vm4232_vm1, %v11990_v39 }
 0x24f   : > { %v3977_v15 = vsel %vm3969_vm12, %v3944_v24, %v3697_v1  ;;  %v3781_v10 = vsel %vm3771_vm0, %v3737_v22, %v11972_v53  ;;  %v8592_v1 = vld [vmem:[#allocation2 + $0x48] sm:$0xff]  ;;  %v11981_v24 = vld [vmem:[#allocation38_spill] sm:$0xff]  ;;  %4256 = vst.msk [vmem:[#allocation3 + $0x58] sm:$0xf] %vm4232_vm1, %v11990_v39 }
 0x250   : > { %8272 = vmatmul.msk.bf16.gmra.mxu0 %vm4042_vm13, %v3977_v15  ;;  %v3814_v51 = vsel %vm3804_vm4, %v3781_v10, %v11973_v52  ;;  %v3621_v16 = vpop.permute.xlu2 %3620  ;;  %v11982_v15 = vld [vmem:[#allocation40_spill] sm:$0xff]  ;;  %v3743_v42 = vsel %vm3722_vm15, %v8592_v1, %v11983_v48  ;;  %v11986_v52 = vld [vmem:[#allocation42_spill] sm:$0xff]  ;;  %4258 = vst.msk [vmem:[#allocation3 + $0x60] sm:$0xf] %vm4232_vm1, %v11990_v39 }
 0x251   : > { %v3847_v58 = vsel %vm3837_vm5, %v3814_v51, %v9878_v25  ;;  %v3797_v25 = vsel %vm3771_vm0, %v3761_v17, %v11974_v41  ;;  %v8600_v51 = vld [vmem:[#allocation2 + $0xa8] sm:$0xff]  ;;  %4259 = vst.msk [vmem:[#allocation3 + $0x64] sm:$0xf] %vm4232_vm1, %v11990_v39 }
 0x252   : > { %v3880_v34 = vsel %vm3870_vm6, %v3847_v58, %v10035_v61  ;;  %v3830_v61 = vsel %vm3804_vm4, %v3797_v25, %v9882_v37  ;;  %v11987_v58 = vld [vmem:[#allocation43_spill] sm:$0xff]  ;;  %4261 = vst.msk [vmem:[#allocation3 + $0x6c] sm:$0xf] %vm4232_vm1, %v11990_v39 }
 0x253   : > { %v3863_v4 = vsel %vm3837_vm5, %v3830_v61, %v9998_v12  ;;  %v11976_v12 = vld [vmem:[#allocation6_spill] sm:$0xff]  ;;  %v11989_v25 = vld [vmem:[#allocation31_spill] sm:$0xff]  ;;  %4262 = vst.msk [vmem:[#allocation3 + $0x70] sm:$0xf] %vm4232_vm1, %v11990_v39 }
 0x254   : > { %v3553_v31 = vpop.permute.xlu1 %3552  ;;  %v3713_v56 = vpop.permute.xlu0 %3712  ;;  %v3896_v9 = vsel %vm3870_vm6, %v3863_v4, %v10026_v55  ;;  %v3816_v2 = vsel %vm3804_vm4, %v3783_v32, %v11976_v12  ;;  %v11991_v61 = vld [vmem:[#allocation34_spill] sm:$0xff]  ;;  %4264 = vst.msk [vmem:[#allocation3 + $0x78] sm:$0xf] %vm4232_vm1, %v11990_v39 }
 0x255   : > { %v3927_v54 = vsel %vm3903_vm9, %v3894_v7, %v3553_v31  ;;  %v3849_v14 = vsel %vm3837_vm5, %v3816_v2, %v11977_v6  ;;  %4265 = vst.msk [vmem:[#allocation3 + $0x7c] sm:$0xf] %vm4232_vm1, %v11990_v39 }
 0x256   : > { %v3960_v26 = vsel %vm3936_vm11, %v3927_v54, %v3633_v40  ;;  %v3882_v45 = vsel %vm3870_vm6, %v3849_v14, %v11978_v36  ;;  %v11994_v14 = vld [vmem:[#allocation25_spill] sm:$0xff]  ;;  %4267 = vst.msk [vmem:[#allocation3 + $0x84] sm:$0xf] %vm4232_vm1, %v11990_v39 }
 0x257   : > { %v3993_v47 = vsel %vm3969_vm12, %v3960_v26, %v3713_v56  ;;  %v11984_v26 = vld [vmem:[#allocation14_spill] sm:$0xff]  ;;  %4268 = vst.msk [vmem:[#allocation3 + $0x88] sm:$0xf] %vm4232_vm1, %v11990_v39 }
 0x258   : > { %8280 = vmatmul.msk.bf16.gmra.mxu2 %vm4042_vm13, %v3993_v47  ;;  %v3637_v55 = vpop.permute.xlu2 %3636  ;;  %v3785_v53 = vsel %vm3771_vm0, %v3743_v42, %v11984_v26  ;;  %v12000_v42 = vld [vmem:[#allocation39_spill] sm:$0xff]  ;;  %4270 = vst.msk [vmem:[#allocation3 + $0x90] sm:$0xf] %vm4232_vm1, %v11990_v39 }
 0x259   : > { %4271 = vst.msk [vmem:[#allocation3 + $0x94] sm:$0xf] %vm4232_vm1, %v11990_v39 }
 0x25a   : > { %4273 = vst.msk [vmem:[#allocation3 + $0x9c] sm:$0xf] %vm4232_vm1, %v11990_v39 }
 0x25b   : > { %4274 = vst.msk [vmem:[#allocation3 + $0xa0] sm:$0xf] %vm4232_vm1, %v11990_v39 }
 0x25c   : > { %v3539_v23 = vpop.permute.xlu1 %3538  ;;  %v3699_v18 = vpop.permute.xlu0 %3698  ;;  %4276 = vst.msk [vmem:[#allocation3 + $0xa8] sm:$0xf] %vm4232_vm1, %v11990_v39 }
 0x25d   : > { %v3913_v35 = vsel %vm3903_vm9, %v3880_v34, %v3539_v23  ;;  %4277 = vst.msk [vmem:[#allocation3 + $0xac] sm:$0xf] %vm4232_vm1, %v11990_v39 }
 0x25e   : > { %v3946_v57 = vsel %vm3936_vm11, %v3913_v35, %v3619_v29  ;;  %v11980_v29 = vld [vmem:[#allocation29_spill] sm:$0xff]  ;;  %4279 = vst.msk [vmem:[#allocation3 + $0xb4] sm:$0xf] %vm4232_vm1, %v11990_v39 }
 0x25f   : > { %v3979_v44 = vsel %vm3969_vm12, %v3946_v57, %v3699_v18  ;;  %v3799_v13 = vsel %vm3771_vm0, %v3764_v27, %v11980_v29  ;;  %v11988_v18 = vld [vmem:[#allocation35_spill] sm:$0xff]  ;;  %4280 = vst.msk [vmem:[#allocation3 + $0xb8] sm:$0xf] %vm4232_vm1, %v11990_v39 }
 0x260   : > { %8273 = vmatmul.msk.bf16.gmra.mxu0 %vm4042_vm13, %v3979_v44  ;;  %v3832_v3 = vsel %vm3804_vm4, %v3799_v13, %v11981_v24  ;;  %v3623_v7 = vpop.permute.xlu2 %3622  ;;  %v3767_v17 = vsel %vm3722_vm15, %v8600_v51, %v11988_v18  ;;  %v11998_v24 = vld [vmem:[#allocation36_spill] sm:$0xff]  ;;  %4282 = vst.msk [vmem:[#allocation3 + $0xc0] sm:$0xf] %vm4232_vm1, %v11990_v39 }
 0x261   : > { %v3865_v59 = vsel %vm3837_vm5, %v3832_v3, %v11982_v15  ;;  %4283 = vst.msk [vmem:[#allocation3 + $0xc4] sm:$0xf] %vm4232_vm1, %v11990_v39 }
 0x262   : > { %v3898_v38 = vsel %vm3870_vm6, %v3865_v59, %v10115_v5  ;;  %v11999_v59 = vld [vmem:[#allocation23_spill] sm:$0xff]  ;;  %4285 = vst.msk [vmem:[#allocation3 + $0xcc] sm:$0xf] %vm4232_vm1, %v11990_v39 }
 0x263   : > { %4286 = vst.msk [vmem:[#allocation3 + $0xd0] sm:$0xf] %vm4232_vm1, %v11990_v39 }
 0x264   : > { %v3555_v63 = vpop.permute.xlu1 %3554  ;;  %v3715_v21 = vpop.permute.xlu0 %3714 }
 0x265   : > { %v3929_v40 = vsel %vm3903_vm9, %v3896_v9, %v3555_v63  ;;  %v11992_v9 = vld [vmem:[#allocation44_spill] sm:$0xff] }
 0x266   : > { %v3962_v43 = vsel %vm3936_vm11, %v3929_v40, %v3635_v46  ;;  %v11985_v46 = vld [vmem:[#allocation13_spill] sm:$0xff] }
 0x267   : > { %v3995_v37 = vsel %vm3969_vm12, %v3962_v43, %v3715_v21  ;;  %v3818_v47 = vsel %vm3804_vm4, %v3785_v53, %v11985_v46  ;;  %v8593_v43 = vld [vmem:[#allocation2 + $0x54] sm:$0xff] }
 0x268   : > { %8281 = vmatmul.msk.bf16.gmra.mxu2 %vm4042_vm13, %v3995_v37  ;;  %v3851_v5 = vsel %vm3837_vm5, %v3818_v47, %v11986_v52  ;;  %v3559_v44 = vpop.permute.xlu2 %3558  ;;  %v11993_v37 = vld [vmem:[#allocation30_spill] sm:$0xff] }
 0x269   : > { %v3884_v49 = vsel %vm3870_vm6, %v3851_v5, %v11987_v58  ;;  %v3746_v12 = vsel %vm3722_vm15, %v8593_v43, %v11993_v37 }
 0x26c   : > { %v3541_v50 = vpop.permute.xlu1 %3540  ;;  %v3701_v62 = vpop.permute.xlu0 %3700 }
 0x26d   : > { %v3915_v19 = vsel %vm3903_vm9, %v3882_v45, %v3541_v50  ;;  %v11995_v45 = vld [vmem:[#allocation15_spill] sm:$0xff] }
 0x26e   : > { %v3948_v11 = vsel %vm3936_vm11, %v3915_v19, %v3621_v16  ;;  %v3801_v16 = vsel %vm3771_vm0, %v3767_v17, %v11989_v25  ;;  %v11996_v19 = vld [vmem:[#allocation37_spill] sm:$0xff] }
 0x26f   : > { %v3981_v33 = vsel %vm3969_vm12, %v3948_v11, %v3701_v62  ;;  %v3834_v4 = vsel %vm3804_vm4, %v3801_v16, %v11991_v61  ;;  %v8601_v11 = vld [vmem:[#allocation2 + $0xb4] sm:$0xff] }
 0x270   : > { %8274 = vmatmul.msk.bf16.gmra.mxu0 %vm4042_vm13, %v3981_v33  ;;  %v3867_v63 = vsel %vm3837_vm5, %v3834_v4, %v11992_v9  ;;  %v3545_v60 = vpop.permute.xlu2 %3544  ;;  %v3770_v3 = vsel %vm3722_vm15, %v8601_v11, %v11998_v24  ;;  %v4611_v9 = vld [vmem:[#allocation3 + $0xc] sm:$0xf] }
 0x271   : > { %v3803_v48 = vsel %vm3771_vm0, %v3770_v3, %v11999_v59 }
 0x274   : > { %v3557_v22 = vpop.permute.xlu1 %3556  ;;  %v3717_v54 = vpop.permute.xlu0 %3716 }
 0x275   : > { %v3931_v31 = vsel %vm3903_vm9, %v3898_v38, %v3557_v22  ;;  %v3836_v38 = vsel %vm3804_vm4, %v3803_v48, %v12000_v42 }
 0x276   : > { %v3964_v56 = vsel %vm3936_vm11, %v3931_v31, %v3637_v55  ;;  %v3787_v55 = vsel %vm3771_vm0, %v3746_v12, %v11994_v14 }
 0x277   : > { %v3997_v10 = vsel %vm3969_vm12, %v3964_v56, %v3717_v54  ;;  %v3820_v50 = vsel %vm3804_vm4, %v3787_v55, %v11995_v45  ;;  %v10423_v54 = vld [vmem:[%s11896_s3] ss:$0 sm:$0xff] }
 0x278   : > { %8282 = vmatmul.msk.bf16.gmra.mxu2 %vm4042_vm13, %v3997_v10  ;;  %v3853_v62 = vsel %vm3837_vm5, %v3820_v50, %v11996_v19  ;;  %v3465_v29 = vpop.permute.xlu2 %3464 }
 0x279   : > { %v3886_v27 = vsel %vm3870_vm6, %v3853_v62, %v11997_v28 }
 0x27a   : > { %v3919_v33 = vsel %vm3903_vm9, %v3886_v27, %v3545_v60 }
 0x27c   : > { %v3543_v34 = vpop.permute.xlu1 %3542  ;;  %v3703_v35 = vpop.permute.xlu0 %3702 }
 0x27d   : > { %v3917_v23 = vsel %vm3903_vm9, %v3884_v49, %v3543_v34  ;;  %v4725_v49 = vld [vmem:[#allocation3] sm:$0xf]  ;;  %v4726_v34 = vld [vmem:[#allocation3 + $0x4] sm:$0xf] }
 0x27e   : > { %v3950_v57 = vsel %vm3936_vm11, %v3917_v23, %v3623_v7  ;;  %v12001_v7 = vld [vmem:[#allocation45_spill] sm:$0xff]  ;;  %v4774_v23 = vshrl.u32 %v4725_v49, 16  ;;  %v4787_v25 = vshrl.u32 %v4726_v34, 16 }
 0x27f   : > { %v3983_v41 = vsel %vm3969_vm12, %v3950_v57, %v3703_v35  ;;  %v3869_v31 = vsel %vm3837_vm5, %v3836_v38, %v12001_v7  ;;  %v4777_v35 = vshll.u32 %v4725_v49, 16 }
 0x280   : > { %8275 = vmatmul.msk.bf16.gmra.mxu0 %vm4042_vm13, %v3983_v41  ;;  %v3902_v56 = vsel %vm3870_vm6, %v3869_v31, %v3465_v29  ;;  %v3721_v26 = vpop.permute.xlu2 %3720  ;;  %v4776_v57 = vrot.slane %v4774_v23, 4  ;;  %v4783_v41 = vshll.u32 %v4726_v34, 16  ;;  %v4789_v60 = vrot.slane %v4787_v25, 4  ;;  %v4669_v25 = vld [vmem:[#allocation3 + $0x6c] sm:$0xf] }
 0x282   : > { %v4785_v43 = vrot.slane %v4783_v41, 5 }
 0x284   : > { %v3463_v8 = vpop.permute.xlu1 %3462  ;;  %v3639_v21 = vpop.permute.xlu0 %3638  ;;  %v4790_v62 = vor.u32 %v4789_v60, %v4785_v43  ;;  %v4620_v60 = vld [vmem:[#allocation3 + $0x18] sm:$0xf] }
 0x285   : > { %v3900_v40 = vsel %vm3870_vm6, %v3867_v63, %v3463_v8  ;;  %vm4235_vm6 = vcmask 24576  }
 0x286   : > { %v3933_v32 = vsel %vm3903_vm9, %v3900_v40, %v3559_v44  ;;  %v4779_v44 = vrot.slane %v4777_v35, 5  ;;  %4239 = vst.msk [vmem:[#allocation3 + $0x14] sm:$0x1] %vm4235_vm6, %v11990_v39  ;;  %v4791_v38 = vrot.slane %v4790_v62, 4 }
 0x287   : > { %v3966_v2 = vsel %vm3936_vm11, %v3933_v32, %v3639_v21  ;;  %4236 = vst.msk [vmem:[#allocation3 + $0x8] sm:$0x1] %vm4235_vm6, %v11990_v39  ;;  %v5157_v32 = vld [vmem:[#allocation3] sm:$0xe] }
 0x288   : > { %v4780_v63 = vor.u32 %v4779_v44, %v4776_v57  ;;  %4242 = vst.msk [vmem:[#allocation3 + $0x20] sm:$0x1] %vm4235_vm6, %v11990_v39  ;;  %v8285_v55 = vrot.slane %v5157_v32, 9 }
 0x289   : > { %4245 = vst.msk [vmem:[#allocation3 + $0x2c] sm:$0x1] %vm4235_vm6, %v11990_v39 }
 0x28a   : > { %v4781_v14 = vrot.slane %v4780_v63, 4  ;;  %4248 = vst.msk [vmem:[#allocation3 + $0x38] sm:$0x1] %vm4235_vm6, %v11990_v39 }
 0x28b   : > { %4251 = vst.msk [vmem:[#allocation3 + $0x44] sm:$0x1] %vm4235_vm6, %v11990_v39 }
 0x28c   : > { %v3719_v6 = vpop.permute.xlu1 %3718  ;;  %v3625_v36 = vpop.permute.xlu0 %3624  ;;  %4254 = vst.msk [vmem:[#allocation3 + $0x50] sm:$0x1] %vm4235_vm6, %v11990_v39  ;;  %v4786_v24 = vsel %vm9011_vm14, %v4781_v14, %v4785_v43 }
 0x28d   : > { %v3999_v0 = vsel %vm3969_vm12, %v3966_v2, %v3719_v6  ;;  %v3952_v13 = vsel %vm3936_vm11, %v3919_v33, %v3625_v36  ;;  %v5223_v2 = vrot.slane %v4726_v34, 5  ;;  %4257 = vst.msk [vmem:[#allocation3 + $0x5c] sm:$0x1] %vm4235_vm6, %v11990_v39 }
 0x28e   : > { %8283 = vmatmul.msk.bf16.gmra.mxu2 %vm4042_vm13, %v3999_v0  ;;  %4260 = vst.msk [vmem:[#allocation3 + $0x68] sm:$0x1] %vm4235_vm6, %v11990_v39 }
 0x28f   : > { %v5225_v33 = vrot.slane %v5223_v2, 4  ;;  %v5224_v3 = vsel %vm8963_vm7, %v8285_v55, %v5223_v2  ;;  %4263 = vst.msk [vmem:[#allocation3 + $0x74] sm:$0x1] %vm4235_vm6, %v11990_v39 }
 0x290   : > { %4266 = vst.msk [vmem:[#allocation3 + $0x80] sm:$0x1] %vm4235_vm6, %v11990_v39 }
 0x291   : > { %4269 = vst.msk [vmem:[#allocation3 + $0x8c] sm:$0x1] %vm4235_vm6, %v11990_v39 }
 0x292   : > { %4272 = vst.msk [vmem:[#allocation3 + $0x98] sm:$0x1] %vm4235_vm6, %v11990_v39 }
 0x293   : > { %4275 = vst.msk [vmem:[#allocation3 + $0xa4] sm:$0x1] %vm4235_vm6, %v11990_v39 }
 0x294   : > { %v3705_v1 = vpop.permute.xlu1 %3704  ;;  %v3561_v22 = vpop.permute.xlu0 %3560  ;;  %4278 = vst.msk [vmem:[#allocation3 + $0xb0] sm:$0x1] %vm4235_vm6, %v11990_v39 }
 0x295   : > { %v3985_v15 = vsel %vm3969_vm12, %v3952_v13, %v3705_v1  ;;  %v3935_v53 = vsel %vm3903_vm9, %v3902_v56, %v3561_v22  ;;  %vm10460_vm9 = vmand %vm4232_vm1, %vm1039_vm8  ;;  %v4617_v13 = vld [vmem:[#allocation3 + $0x14] sm:$0x1]  ;;  %v4757_v1 = vld [vmem:[#allocation3 + $0x8] sm:$0x1]  ;;  %4281 = vst.msk [vmem:[#allocation3 + $0xbc] sm:$0x1] %vm4235_vm6, %v11990_v39 }
 0x296   : > { %8276 = vmatmul.msk.bf16.gmra.mxu0 %vm4042_vm13, %v3985_v15  ;;  %vm10484_vm8 = vmand %vm4235_vm6, %vm714_vm3  ;;  %v4793_v22 = vshll.u32 %v4757_v1, 16  ;;  %v5226_v7 = vrot.slane %v4757_v1, 5  ;;  %4284 = vst.msk [vmem:[#allocation3 + $0xc8] sm:$0x1] %vm4235_vm6, %v11990_v39  ;;  %v4673_v62 = vld [vmem:[#allocation3 + $0x74] sm:$0x1] }
 0x297   : > { %4287 = vst.msk [vmem:[#allocation3 + $0xd4] sm:$0x1] %vm4235_vm6, %v11990_v39  ;;  %vm7366_vm3 = vcmask 97280  }
 0x29c   : > { %v3641_v10 = vpop.permute.xlu1 %3640 }
 0x29d   : > { %v3968_v46 = vsel %vm3936_vm11, %v3935_v53, %v3641_v10  ;;  %v4088_v47 = vpop.f32.mrf.mxu0  ;;  %v6614_v10 = vunpack.c.l.b16 %v4786_v24  ;;  %vm7618_vm11 = vcmask 1041408  }
 0x29e   : > { %v4089_v52 = vadd.f32 %v10423_v54, %v4088_v47  ;;  %v4001_v5 = vsel %vm3969_vm12, %v3968_v46, %v3721_v26  ;;  %vm7496_vm12 = vcmask 228352  }
 0x29f   : > { %8284 = vmatmul.msk.bf16.gmra.mxu2 %vm4042_vm13, %v4001_v5  ;;  %v5227_v5 = vsel %vm8963_vm7, %v5225_v33, %v5226_v7  ;;  %vm7585_vm13 = vcmask 293888  }
 0x2a0   : > { %v4168_v51 = vmax.f32 %v4089_v52, 0.0  ;;  %v4795_v52 = vrot.slane %v4793_v22, 5  ;;  %v6695_v23 = vunpack.c.l.b16 %v5227_v5 }
 0x2a2   : > { %v4200_v58 = vpack.c.bf16 %v4168_v51, %v4168_v51  ;;  %v6694_v51 = vunpack.c.l.b16 %v5224_v3 }
 0x2a4   : > { %v4289_v18 = vshrl.u32 %v4200_v58, 16  ;;  %v4292_v61 = vshll.u32 %v4200_v58, 16 }
 0x2a5   : > { %v4090_v17 = vpop.f32.mrf.mxu0 }
 0x2a6   : > { %v4291_v16 = vrot.slane %v4289_v18, 7  ;;  %v4091_v4 = vadd.f32 %v10423_v54, %v4090_v17  ;;  %v4796_v17 = vsel %vm9011_vm14, %v4791_v38, %v4795_v52 }
 0x2a8   : > { %v4294_v40 = vor.u32 %v4292_v61, %v4291_v16  ;;  %v4169_v21 = vmax.f32 %v4091_v4, 0.0  ;;  %v4295_v45 = vrot.slane %v4291_v16, 4  ;;  %v6615_v4 = vunpack.c.l.b16 %v4796_v17 }
 0x2aa   : > { %v4612_v37 = vsel %vm10460_vm9, %v4294_v40, %v4611_v9  ;;  %v4201_v12 = vpack.c.bf16 %v4169_v21, %v4169_v21  ;;  %v6726_v40 = vpack.c.b16 %v6695_v23, %v6694_v51  ;;  %v4624_v51 = vld [vmem:[#allocation3 + $0x20] sm:$0x1] }
 0x2ab   : > { %4613 = vst [vmem:[#allocation3 + $0xc] sm:$0xf] %v4612_v37  ;;  %v4128_v6 = vpop.f32.mrf.mxu2  ;;  %v6646_v37 = vpack.c.b16 %v6615_v4, %v6614_v10 }
 0x2ac   : > { %v4297_v0 = vshrl.u32 %v4201_v12, 16  ;;  %v4129_v36 = vadd.f32 %v10423_v54, %v4128_v6  ;;  %v4300_v50 = vshll.u32 %v4201_v12, 16  ;;  %6742 = vrot.lane.b32.xlu1 %v6726_v40, %s8749_s9 }
 0x2ad   : > { %v4093_v19 = vpop.f32.mrf.mxu0  ;;  %6662 = vrot.lane.b32.xlu0 %v6646_v37, %s8745_s27 }
 0x2ae   : > { %v4299_v28 = vrot.slane %v4297_v0, 7  ;;  %v4184_v27 = vmax.f32 %v4129_v36, 0.0  ;;  %v4094_v11 = vadd.f32 %v10423_v54, %v4093_v19 }
 0x2b0   : > { %v4302_v15 = vor.u32 %v4300_v50, %v4299_v28  ;;  %v4304_v59 = vrot.slane %v4299_v28, 4  ;;  %v4216_v48 = vpack.c.bf16 %v4184_v27, %v4184_v27  ;;  %v4170_v42 = vmax.f32 %v4094_v11, 0.0 }
 0x2b2   : > { %v4303_v56 = vsel %vm8981_vm10, %v4295_v45, %v4302_v15  ;;  %v4618_v26 = vsel %vm10484_vm8, %v4304_v59, %v4617_v13  ;;  %v4425_v53 = vshrl.u32 %v4216_v48, 16  ;;  %v4202_v46 = vpack.c.bf16 %v4170_v42, %v4170_v42  ;;  %v10510_v35 = vld [vmem:[#allocation3 + $0xc] sm:$0xe] }
 0x2b3   : > { %4614 = vst.msk [vmem:[#allocation3 + $0x10] sm:$0xf] %vm4232_vm1, %v4303_v56  ;;  %v4130_v47 = vpop.f32.mrf.mxu2  ;;  %v4428_v49 = vshll.u32 %v4216_v48, 16  ;;  %v10516_v44 = vld [vmem:[#allocation3 + $0xc] sm:$0xf]  ;;  %v8286_v12 = vrot.slane %v10510_v35, 9 }
 0x2b4   : > { %4619 = vst [vmem:[#allocation3 + $0x14] sm:$0x1] %v4618_v26  ;;  %v10507_v58 = vrot.slane %v4425_v53, 7  ;;  %v4131_v34 = vadd.f32 %v10423_v54, %v4130_v47  ;;  %v4306_v18 = vshrl.u32 %v4202_v46, 16  ;;  %v4309_v16 = vshll.u32 %v4202_v46, 16 }
 0x2b5   : > { %v4095_v57 = vpop.f32.mrf.mxu0  ;;  %v4798_v21 = vshrl.u32 %v10516_v44, 16  ;;  %v4801_v55 = vshll.u32 %v10516_v44, 16  ;;  %v5765_v17 = vld [vmem:[#allocation3 + $0xc] sm:$0xe] }
 0x2b6   : > { %v4430_v41 = vor.u32 %v4428_v49, %v10507_v58  ;;  %v4185_v61 = vmax.f32 %v4131_v34, 0.0  ;;  %v10523_v9 = vrot.slane %v4306_v18, 7  ;;  %v4096_v63 = vadd.f32 %v10423_v54, %v4095_v57 }
 0x2b7   : > { %v4431_v43 = vrot.slane %v10507_v58, 4  ;;  %v10542_v50 = vrot.slane %v4798_v21, 4 }
 0x2b8   : > { %v4217_v32 = vpack.c.bf16 %v4185_v61, %v4185_v61  ;;  %v4670_v2 = vsel %vm10460_vm9, %v4430_v41, %v4669_v25  ;;  %v4311_v6 = vor.u32 %v4309_v16, %v10523_v9  ;;  %v4171_v14 = vmax.f32 %v4096_v63, 0.0 }
 0x2b9   : > { %v4312_v0 = vrot.slane %v10523_v9, 4  ;;  %4671 = vst [vmem:[#allocation3 + $0x6c] sm:$0xf] %v4670_v2  ;;  %v4803_v25 = vrot.slane %v4801_v55, 5 }
 0x2ba   : > { %v4433_v36 = vshrl.u32 %v4217_v32, 16  ;;  %v4436_v45 = vshll.u32 %v4217_v32, 16  ;;  %v4621_v19 = vsel %vm10460_vm9, %v4311_v6, %v4620_v60  ;;  %v4203_v28 = vpack.c.bf16 %v4171_v14, %v4171_v14  ;;  %v4728_v11 = vld [vmem:[#allocation3 + $0x10] sm:$0xf]  ;;  %v4676_v32 = vld [vmem:[#allocation3 + $0x78] sm:$0xf] }
 0x2bb   : > { %v4133_v27 = vpop.f32.mrf.mxu2  ;;  %v4758_v33 = vld [vmem:[#allocation3 + $0x14] sm:$0x1]  ;;  %v4811_v24 = vshrl.u32 %v4728_v11, 16  ;;  %4622 = vst [vmem:[#allocation3 + $0x18] sm:$0xf] %v4621_v19  ;;  %v5230_v42 = vrot.slane %v4728_v11, 5  ;;  %v4804_v2 = vor.u32 %v4803_v25, %v10542_v50 }
 0x2bc   : > { %v4435_v13 = vrot.slane %v4433_v36, 7  ;;  %v4134_v1 = vadd.f32 %v10423_v54, %v4133_v27  ;;  %v4817_v3 = vshll.u32 %v4758_v33, 16  ;;  %v4314_v15 = vshrl.u32 %v4203_v28, 16  ;;  %v8654_v56 = vld [vmem:[#allocation3 + $0xc] sm:$0xff] }
 0x2bd   : > { %v4317_v59 = vshll.u32 %v4203_v28, 16  ;;  %v4098_v48 = vpop.f32.mrf.mxu0  ;;  %v5233_v39 = vrot.slane %v4758_v33, 5  ;;  %v4813_v10 = vrot.slane %v4811_v24, 4  ;;  %v5231_v47 = vsel %vm8963_vm7, %v8286_v12, %v5230_v42  ;;  %6838 = vrot.lane.b32.xlu0 %v8654_v56, %s8755_s30  ;;  %v10575_v19 = vld [vmem:[#allocation3 + $0x10] sm:$0xf] }
 0x2be   : > { %v4438_v38 = vor.u32 %v4436_v45, %v4435_v13  ;;  %v4440_v22 = vrot.slane %v4435_v13, 4  ;;  %v4186_v7 = vmax.f32 %v4134_v1, 0.0  ;;  %v4099_v26 = vadd.f32 %v10423_v54, %v4098_v48  ;;  %v5333_v56 = vld [vmem:[#allocation3 + $0xc] sm:$0xf] }
 0x2bf   : > { %v4316_v53 = vrot.slane %v4314_v15, 7  ;;  %v10550_v46 = vrot.slane %v4817_v3, 5  ;;  %v5232_v35 = vrot.slane %v5230_v42, 4  ;;  %v6696_v18 = vunpack.c.l.b16 %v5231_v47  ;;  %v10582_v3 = vld [vmem:[#allocation3 + $0x14] sm:$0x1] }
 0x2c0   : > { %v4439_v52 = vsel %vm8981_vm10, %v4431_v43, %v4438_v38  ;;  %v4674_v5 = vsel %vm10484_vm8, %v4440_v22, %v4673_v62  ;;  %v4218_v58 = vpack.c.bf16 %v4186_v7, %v4186_v7  ;;  %v4172_v49 = vmax.f32 %v4099_v26, 0.0  ;;  %v4627_v62 = vld [vmem:[#allocation3 + $0x24] sm:$0xf] }
 0x2c1   : > { %4672 = vst.msk [vmem:[#allocation3 + $0x70] sm:$0xf] %vm4232_vm1, %v4439_v52  ;;  %v4319_v34 = vor.u32 %v4317_v59, %v4316_v53  ;;  %v4321_v23 = vrot.slane %v4316_v53, 4  ;;  %v5234_v9 = vsel %vm8963_vm7, %v5232_v35, %v5233_v39  ;;  %v4807_v63 = vshll.u32 %v4728_v11, 16 }
 0x2c2   : > { %4675 = vst [vmem:[#allocation3 + $0x74] sm:$0x1] %v4674_v5  ;;  %v4442_v57 = vshrl.u32 %v4218_v58, 16  ;;  %v4445_v44 = vshll.u32 %v4218_v58, 16  ;;  %v4204_v41 = vpack.c.bf16 %v4172_v49, %v4172_v49  ;;  %v6697_v37 = vunpack.c.l.b16 %v5234_v9 }
 0x2c3   : > { %v4320_v16 = vsel %vm8981_vm10, %v4312_v0, %v4319_v34  ;;  %v4625_v61 = vsel %vm10484_vm8, %v4321_v23, %v4624_v51  ;;  %v4135_v4 = vpop.f32.mrf.mxu2  ;;  %v4809_v6 = vrot.slane %v4807_v63, 5  ;;  %v8301_v14 = vrot.slane %v5765_v17, 9  ;;  %v4680_v23 = vld [vmem:[#allocation3 + $0x80] sm:$0x1] }
 0x2c4   : > { %4623 = vst.msk [vmem:[#allocation3 + $0x1c] sm:$0xf] %vm4232_vm1, %v4320_v16  ;;  %v10567_v40 = vrot.slane %v4442_v57, 7  ;;  %v4323_v21 = vshrl.u32 %v4204_v41, 16  ;;  %v4326_v43 = vshll.u32 %v4204_v41, 16  ;;  %v4136_v60 = vadd.f32 %v10423_v54, %v4135_v4 }
 0x2c5   : > { %4626 = vst [vmem:[#allocation3 + $0x20] sm:$0x1] %v4625_v61  ;;  %v4100_v12 = vpop.f32.mrf.mxu0  ;;  %v6727_v28 = vpack.c.b16 %v6697_v37, %v6696_v18  ;;  %v4805_v11 = vrot.slane %v4804_v2, 4  ;;  %v4814_v33 = vor.u32 %v4813_v10, %v4809_v6  ;;  %v5831_v42 = vrot.slane %v10575_v19, 5 }
 0x2c6   : > { %v4447_v55 = vor.u32 %v4445_v44, %v10567_v40  ;;  %v4448_v0 = vrot.slane %v10567_v40, 4  ;;  %v10573_v36 = vrot.slane %v4323_v21, 7  ;;  %v4187_v45 = vmax.f32 %v4136_v60, 0.0 }
 0x2c7   : > { %v4101_v27 = vadd.f32 %v10423_v54, %v4100_v12  ;;  %6744 = vrot.lane.b32.xlu2 %v6727_v28, %s8749_s9  ;;  %v4810_v59 = vsel %vm9011_vm14, %v4805_v11, %v4809_v6  ;;  %v4815_v48 = vrot.slane %v4814_v33, 4  ;;  %v5832_v47 = vsel %vm8963_vm7, %v8301_v14, %v5831_v42  ;;  %v4683_v28 = vld [vmem:[#allocation3 + $0x84] sm:$0xf] }
 0x2c8   : > { %v4677_v50 = vsel %vm10460_vm9, %v4447_v55, %v4676_v32  ;;  %v4328_v13 = vor.u32 %v4326_v43, %v10573_v36  ;;  %v4329_v1 = vrot.slane %v10573_v36, 4  ;;  %v4219_v24 = vpack.c.bf16 %v4187_v45, %v4187_v45  ;;  %v4631_v43 = vld [vmem:[#allocation3 + $0x2c] sm:$0x1] }
 0x2c9   : > { %4678 = vst [vmem:[#allocation3 + $0x78] sm:$0xf] %v4677_v50  ;;  %v4173_v15 = vmax.f32 %v4101_v27, 0.0  ;;  %v6616_v7 = vunpack.c.l.b16 %v4810_v59  ;;  %v4820_v53 = vsel %vm9011_vm14, %v4815_v48, %v10550_v46  ;;  %v5833_v52 = vrot.slane %v5831_v42, 4 }
 0x2ca   : > { %v4628_v39 = vsel %vm10460_vm9, %v4328_v13, %v4627_v62  ;;  %v4450_v38 = vshrl.u32 %v4219_v24, 16  ;;  %v4453_v22 = vshll.u32 %v4219_v24, 16  ;;  %v6617_v58 = vunpack.c.l.b16 %v4820_v53  ;;  %v6374_v13 = vld [vmem:[#allocation3 + $0x18] sm:$0xe] }
 0x2cb   : > { %4629 = vst [vmem:[#allocation3 + $0x24] sm:$0xf] %v4628_v39  ;;  %v4205_v26 = vpack.c.bf16 %v4173_v15, %v4173_v15  ;;  %v4138_v10 = vpop.f32.mrf.mxu2  ;;  %v8670_v5 = vld [vmem:[#allocation3 + $0x18] sm:$0xff]  ;;  %v5834_v34 = vrot.slane %v10582_v3, 5  ;;  %v6950_v17 = vunpack.c.l.b16 %v5832_v47  ;;  %v5382_v46 = vshrl.u32 %v5333_v56, 16 }
 0x2cc   : > { %v4452_v51 = vrot.slane %v4450_v38, 7  ;;  %v4139_v49 = vadd.f32 %v10423_v54, %v4138_v10  ;;  %7094 = vrot.lane.b32.xlu0 %v8670_v5, %s8748_s8  ;;  %v6647_v25 = vpack.c.b16 %v6617_v58, %v6616_v7  ;;  %v5385_v6 = vshll.u32 %v5333_v56, 16  ;;  %v10612_v50 = vld [vmem:[#allocation3 + $0x1c] sm:$0xf]  ;;  %v10621_v7 = vld [vmem:[#allocation3 + $0x20] sm:$0x1] }
 0x2cd   : > { %v4331_v35 = vshrl.u32 %v4205_v26, 16  ;;  %v4334_v18 = vshll.u32 %v4205_v26, 16  ;;  %v4103_v57 = vpop.f32.mrf.mxu0  ;;  %v5835_v4 = vsel %vm8963_vm7, %v5833_v52, %v5834_v34  ;;  %v5384_v63 = vrot.slane %v5382_v46, 4  ;;  %v8655_v24 = vld [vmem:[#allocation3 + $0x18] sm:$0xff]  ;;  %v4634_v58 = vld [vmem:[#allocation3 + $0x30] sm:$0xf] }
 0x2ce   : > { %v4455_v44 = vor.u32 %v4453_v22, %v4452_v51  ;;  %v4457_v41 = vrot.slane %v4452_v51, 4  ;;  %v4188_v16 = vmax.f32 %v4139_v49, 0.0  ;;  %v4104_v9 = vadd.f32 %v10423_v54, %v4103_v57  ;;  %6664 = vrot.lane.b32.xlu1 %v6647_v25, %s8745_s27 }
 0x2cf   : > { %v4333_v61 = vrot.slane %v4331_v35, 7  ;;  %v6951_v32 = vunpack.c.l.b16 %v5835_v4  ;;  %v5387_v11 = vrot.slane %v5385_v6, 5  ;;  %v5401_v48 = vshll.u32 %v10582_v3, 16 }
 0x2d0   : > { %v4456_v40 = vsel %vm8981_vm10, %v4448_v0, %v4455_v44  ;;  %v4681_v21 = vsel %vm10484_vm8, %v4457_v41, %v4680_v23  ;;  %v4220_v60 = vpack.c.bf16 %v4188_v16, %v4188_v16  ;;  %v4174_v2 = vmax.f32 %v4104_v9, 0.0  ;;  %v5766_v16 = vld [vmem:[#allocation3 + $0x18] sm:$0xe] }
 0x2d1   : > { %4679 = vst.msk [vmem:[#allocation3 + $0x7c] sm:$0xf] %vm4232_vm1, %v4456_v40  ;;  %v4336_v37 = vor.u32 %v4334_v18, %v4333_v61  ;;  %v4338_v12 = vrot.slane %v4333_v61, 4  ;;  %v6982_v36 = vpack.c.b16 %v6951_v32, %v6950_v17  ;;  %v5391_v0 = vshll.u32 %v10575_v19, 16 }
 0x2d2   : > { %4682 = vst [vmem:[#allocation3 + $0x80] sm:$0x1] %v4681_v21  ;;  %v4459_v14 = vshrl.u32 %v4220_v60, 16  ;;  %v4462_v55 = vshll.u32 %v4220_v60, 16  ;;  %v4206_v27 = vpack.c.bf16 %v4174_v2, %v4174_v2  ;;  %v5388_v38 = vor.u32 %v5387_v11, %v5384_v63  ;;  %v10640_v21 = vld [vmem:[#allocation3 + $0x1c] sm:$0xf] }
 0x2d3   : > { %v4337_v45 = vsel %vm8981_vm10, %v4329_v1, %v4336_v37  ;;  %v4632_v62 = vsel %vm10484_vm8, %v4338_v12, %v4631_v43  ;;  %v4140_v33 = vpop.f32.mrf.mxu2  ;;  %6998 = vrot.lane.b32.xlu2 %v6982_v36, %s8756_s11  ;;  %v5393_v59 = vrot.slane %v5391_v0, 5  ;;  %v5395_v1 = vshrl.u32 %v10575_v19, 16  ;;  %v10642_v43 = vld [vmem:[#allocation3 + $0x20] sm:$0x1] }
 0x2d4   : > { %4630 = vst.msk [vmem:[#allocation3 + $0x28] sm:$0xf] %vm4232_vm1, %v4337_v45  ;;  %v10615_v15 = vrot.slane %v4459_v14, 7  ;;  %v4340_v42 = vshrl.u32 %v4206_v27, 16  ;;  %v4343_v39 = vshll.u32 %v4206_v27, 16  ;;  %v4141_v22 = vadd.f32 %v10423_v54, %v4140_v33  ;;  %6840 = vrot.lane.b32.xlu0 %v8655_v24, %s8755_s30 }
 0x2d5   : > { %4633 = vst [vmem:[#allocation3 + $0x2c] sm:$0x1] %v4632_v62  ;;  %v5397_v53 = vrot.slane %v5395_v1, 4  ;;  %v5403_v10 = vrot.slane %v5401_v48, 5  ;;  %v4105_v47 = vpop.f32.mrf.mxu0  ;;  %v5389_v3 = vrot.slane %v5388_v38, 4  ;;  %v8317_v5 = vrot.slane %v6374_v13, 9 }
 0x2d6   : > { %v4464_v56 = vor.u32 %v4462_v55, %v10615_v15  ;;  %v4465_v26 = vrot.slane %v10615_v15, 4  ;;  %v10626_v19 = vrot.slane %v4340_v42, 7  ;;  %v4189_v52 = vmax.f32 %v4141_v22, 0.0  ;;  %v4687_v14 = vld [vmem:[#allocation3 + $0x8c] sm:$0x1] }
 0x2d7   : > { %v5398_v49 = vor.u32 %v5397_v53, %v5393_v59  ;;  %v6440_v34 = vrot.slane %v10612_v50, 5  ;;  %v6443_v23 = vrot.slane %v10621_v7, 5  ;;  %v5394_v17 = vsel %vm9011_vm14, %v5389_v3, %v5393_v59  ;;  %v5166_v27 = vld [vmem:[#allocation3 + $0x6c] sm:$0xe]  ;;  %v10654_v42 = vld [vmem:[#allocation3 + $0x70] sm:$0xf] }
 0x2d8   : > { %v4684_v51 = vsel %vm10460_vm9, %v4464_v56, %v4683_v28  ;;  %v4345_v35 = vor.u32 %v4343_v39, %v10626_v19  ;;  %v4346_v18 = vrot.slane %v10626_v19, 4  ;;  %v4221_v57 = vpack.c.bf16 %v4189_v52, %v4189_v52  ;;  %v10656_v39 = vld [vmem:[#allocation3 + $0x74] sm:$0x1]  ;;  %v8678_v20 = vld [vmem:[#allocation3 + $0x78] sm:$0xff] }
 0x2d9   : > { %4685 = vst [vmem:[#allocation3 + $0x84] sm:$0xf] %v4684_v51  ;;  %v5399_v46 = vrot.slane %v5398_v49, 4  ;;  %v6870_v44 = vunpack.c.l.b16 %v5394_v17  ;;  %v6441_v41 = vsel %vm8963_vm7, %v8317_v5, %v6440_v34  ;;  %v6442_v25 = vrot.slane %v6440_v34, 4 }
 0x2da   : > { %v4635_v61 = vsel %vm10460_vm9, %v4345_v35, %v4634_v58  ;;  %v4467_v4 = vshrl.u32 %v4221_v57, 16  ;;  %v4470_v9 = vshll.u32 %v4221_v57, 16  ;;  %v7206_v63 = vunpack.c.l.b16 %v6441_v41  ;;  %v4638_v35 = vld [vmem:[#allocation3 + $0x38] sm:$0x1]  ;;  %v4690_v41 = vld [vmem:[#allocation3 + $0x90] sm:$0xf] }
 0x2db   : > { %v4143_v40 = vpop.f32.mrf.mxu2  ;;  %4636 = vst [vmem:[#allocation3 + $0x30] sm:$0xf] %v4635_v61  ;;  %v5404_v60 = vsel %vm9011_vm14, %v5399_v46, %v5403_v10  ;;  %v6444_v32 = vsel %vm8963_vm7, %v6442_v25, %v6443_v23  ;;  %v4106_v37 = vadd.f32 %v10423_v54, %v4105_v47  ;;  %v8302_v36 = vrot.slane %v5766_v16, 9  ;;  %v5942_v47 = vld [vmem:[#allocation3 + $0x18] sm:$0xf] }
 0x2dc   : > { %v4144_v12 = vadd.f32 %v10423_v54, %v4143_v40  ;;  %v6871_v2 = vunpack.c.l.b16 %v5404_v60  ;;  %v4469_v6 = vrot.slane %v4467_v4, 7  ;;  %v7207_v55 = vunpack.c.l.b16 %v6444_v32 }
 0x2dd   : > { %v4175_v0 = vmax.f32 %v4106_v37, 0.0  ;;  %v5838_v62 = vrot.slane %v10640_v21, 5  ;;  %v5841_v28 = vrot.slane %v10642_v43, 5  ;;  %v4108_v38 = vpop.f32.mrf.mxu0  ;;  %v8294_v10 = vrot.slane %v5166_v27, 9 }
 0x2de   : > { %v4190_v45 = vmax.f32 %v4144_v12, 0.0  ;;  %v6902_v11 = vpack.c.b16 %v6871_v2, %v6870_v44  ;;  %v4472_v33 = vor.u32 %v4470_v9, %v4469_v6  ;;  %v4474_v13 = vrot.slane %v4469_v6, 4  ;;  %v8663_v44 = vld [vmem:[#allocation3 + $0x78] sm:$0xff] }
 0x2df   : > { %v7238_v24 = vpack.c.b16 %v7207_v55, %v7206_v63  ;;  %v4207_v15 = vpack.c.bf16 %v4175_v0, %v4175_v0  ;;  %v5839_v1 = vsel %vm8963_vm7, %v8302_v36, %v5838_v62  ;;  %v5840_v48 = vrot.slane %v5838_v62, 4 }
 0x2e0   : > { %v4222_v59 = vpack.c.bf16 %v4190_v45, %v4190_v45  ;;  %6918 = vrot.lane.b32.xlu1 %v6902_v11, %s8747_s7  ;;  %v4473_v22 = vsel %vm8981_vm10, %v4465_v26, %v4472_v33  ;;  %v4688_v56 = vsel %vm10484_vm8, %v4474_v13, %v4687_v14  ;;  %v6952_v53 = vunpack.c.l.b16 %v5839_v1  ;;  %v4729_v45 = vld [vmem:[#allocation3 + $0x18] sm:$0xf]  ;;  %v10695_v1 = vld [vmem:[#allocation3 + $0x1c] sm:$0xf] }
 0x2e1   : > { %7254 = vrot.lane.b32.xlu2 %v7238_v24, %s8750_s10  ;;  %4686 = vst.msk [vmem:[#allocation3 + $0x88] sm:$0xf] %vm4232_vm1, %v4473_v22  ;;  %v4348_v3 = vshrl.u32 %v4207_v15, 16  ;;  %v4351_v52 = vshll.u32 %v4207_v15, 16  ;;  %v5842_v58 = vsel %vm8963_vm7, %v5840_v48, %v5841_v28  ;;  %v5286_v26 = vrot.slane %v10654_v42, 5 }
 0x2e2   : > { %v4476_v5 = vshrl.u32 %v4222_v59, 16  ;;  %v4479_v51 = vshll.u32 %v4222_v59, 16  ;;  %4689 = vst [vmem:[#allocation3 + $0x8c] sm:$0x1] %v4688_v56  ;;  %v5289_v49 = vrot.slane %v10656_v39, 5  ;;  %v4109_v34 = vadd.f32 %v10423_v54, %v4108_v38 }
 0x2e3   : > { %v4350_v23 = vrot.slane %v4348_v3, 7  ;;  %v6953_v57 = vunpack.c.l.b16 %v5842_v58  ;;  %v5991_v46 = vshrl.u32 %v5942_v47, 16  ;;  %v5287_v25 = vsel %vm8963_vm7, %v8294_v10, %v5286_v26  ;;  %v4145_v0 = vpop.f32.mrf.mxu2  ;;  %v4641_v38 = vld [vmem:[#allocation3 + $0x3c] sm:$0xf] }
 0x2e4   : > { %v10670_v17 = vrot.slane %v4476_v5, 7  ;;  %v5288_v16 = vrot.slane %v5286_v26, 4  ;;  %v4176_v61 = vmax.f32 %v4109_v34, 0.0  ;;  %v5994_v4 = vshll.u32 %v5942_v47, 16  ;;  %v10700_v5 = vld [vmem:[#allocation3 + $0x20] sm:$0x1] }
 0x2e5   : > { %v4353_v9 = vor.u32 %v4351_v52, %v4350_v23  ;;  %v4355_v63 = vrot.slane %v4350_v23, 4  ;;  %v6983_v32 = vpack.c.b16 %v6953_v57, %v6952_v53  ;;  %v6712_v12 = vunpack.c.l.b16 %v5287_v25  ;;  %v4743_v57 = vld [vmem:[#allocation3 + $0x6c] sm:$0xf] }
 0x2e6   : > { %v4481_v40 = vor.u32 %v4479_v51, %v10670_v17  ;;  %v4482_v60 = vrot.slane %v10670_v17, 4  ;;  %v5290_v37 = vsel %vm8963_vm7, %v5288_v16, %v5289_v49  ;;  %v4208_v2 = vpack.c.bf16 %v4176_v61, %v4176_v61 }
 0x2e7   : > { %v4354_v6 = vsel %vm8981_vm10, %v4346_v18, %v4353_v9  ;;  %v4639_v14 = vsel %vm10484_vm8, %v4355_v63, %v4638_v35  ;;  %v6713_v36 = vunpack.c.l.b16 %v5290_v37  ;;  %v5993_v28 = vrot.slane %v5991_v46, 4 }
 0x2e8   : > { %v4691_v55 = vsel %vm10460_vm9, %v4481_v40, %v4690_v41  ;;  %4637 = vst.msk [vmem:[#allocation3 + $0x34] sm:$0xf] %vm4232_vm1, %v4354_v6  ;;  %6856 = vrot.lane.b32.xlu1 %v8663_v44, %s8755_s30  ;;  %v4357_v62 = vshrl.u32 %v4208_v2, 16  ;;  %v4360_v19 = vshll.u32 %v4208_v2, 16  ;;  %v5996_v27 = vrot.slane %v5994_v4, 5 }
 0x2e9   : > { %7000 = vrot.lane.b32.xlu2 %v6983_v32, %s8756_s11  ;;  %4640 = vst [vmem:[#allocation3 + $0x38] sm:$0x1] %v4639_v14  ;;  %v6735_v18 = vpack.c.b16 %v6713_v36, %v6712_v12  ;;  %v6000_v11 = vshll.u32 %v10612_v50, 16  ;;  %v6004_v33 = vshrl.u32 %v10612_v50, 16  ;;  %v6010_v13 = vshll.u32 %v10621_v7, 16 }
 0x2ea   : > { %4692 = vst [vmem:[#allocation3 + $0x90] sm:$0xf] %v4691_v55  ;;  %v10692_v24 = vrot.slane %v4357_v62, 7  ;;  %v5997_v15 = vor.u32 %v5996_v27, %v5993_v28  ;;  %v4146_v59 = vadd.f32 %v10423_v54, %v4145_v0  ;;  %v4822_v48 = vshrl.u32 %v4729_v45, 16  ;;  %v4694_v55 = vld [vmem:[#allocation3 + $0x98] sm:$0x1] }
 0x2eb   : > { %6760 = vrot.lane.b32.xlu0 %v6735_v18, %s8749_s9  ;;  %v6002_v22 = vrot.slane %v6000_v11, 5  ;;  %v6006_v56 = vrot.slane %v6004_v33, 4  ;;  %v6012_v53 = vrot.slane %v6010_v13, 5  ;;  %v4825_v10 = vshll.u32 %v4729_v45, 16 }
 0x2ec   : > { %v4362_v50 = vor.u32 %v4360_v19, %v10692_v24  ;;  %v4363_v7 = vrot.slane %v10692_v24, 4  ;;  %v5998_v47 = vrot.slane %v5997_v15, 4  ;;  %v4191_v3 = vmax.f32 %v4146_v59, 0.0  ;;  %v4110_v19 = vpop.f32.mrf.mxu0 }
 0x2ed   : > { %v6007_v52 = vor.u32 %v6006_v56, %v6002_v22  ;;  %v4824_v51 = vrot.slane %v4822_v48, 4  ;;  %v4827_v58 = vrot.slane %v4825_v10, 5  ;;  %v4831_v26 = vshll.u32 %v10695_v1, 16  ;;  %v5335_v48 = vld [vmem:[#allocation3 + $0x18] sm:$0xf] }
 0x2ee   : > { %v4642_v49 = vsel %vm10460_vm9, %v4362_v50, %v4641_v38  ;;  %v6003_v34 = vsel %vm9011_vm14, %v5998_v47, %v6002_v22  ;;  %v4223_v23 = vpack.c.bf16 %v4191_v3, %v4191_v3  ;;  %v4835_v35 = vshrl.u32 %v10695_v1, 16 }
 0x2ef   : > { %4643 = vst [vmem:[#allocation3 + $0x3c] sm:$0xf] %v4642_v49  ;;  %v6008_v46 = vrot.slane %v6007_v52, 4  ;;  %v7126_v44 = vunpack.c.l.b16 %v6003_v34  ;;  %v4828_v41 = vor.u32 %v4827_v58, %v4824_v51  ;;  %v4833_v25 = vrot.slane %v4831_v26, 5  ;;  %v5351_v34 = vld [vmem:[#allocation3 + $0x78] sm:$0xf] }
 0x2f0   : > { %v4484_v16 = vshrl.u32 %v4223_v23, 16  ;;  %v4487_v61 = vshll.u32 %v4223_v23, 16  ;;  %v4837_v4 = vrot.slane %v4835_v35, 4  ;;  %v4841_v9 = vshll.u32 %v10700_v5, 16 }
 0x2f1   : > { %v6013_v63 = vsel %vm9011_vm14, %v6008_v46, %v6012_v53  ;;  %v4829_v40 = vrot.slane %v4828_v41, 4  ;;  %v4990_v32 = vshrl.u32 %v4743_v57, 16  ;;  %v4993_v37 = vshll.u32 %v4743_v57, 16 }
 0x2f2   : > { %v7127_v12 = vunpack.c.l.b16 %v6013_v63  ;;  %v4486_v2 = vrot.slane %v4484_v16, 7  ;;  %v4838_v6 = vor.u32 %v4837_v4, %v4833_v25  ;;  %v4843_v14 = vrot.slane %v4841_v9, 5 }
 0x2f3   : > { %v4834_v36 = vsel %vm9011_vm14, %v4829_v40, %v4833_v25  ;;  %v4992_v0 = vrot.slane %v4990_v32, 4  ;;  %v4995_v45 = vrot.slane %v4993_v37, 5  ;;  %v4999_v62 = vshll.u32 %v10654_v42, 16 }
 0x2f4   : > { %v7158_v28 = vpack.c.b16 %v7127_v12, %v7126_v44  ;;  %v4489_v27 = vor.u32 %v4487_v61, %v4486_v2  ;;  %v4491_v18 = vrot.slane %v4486_v2, 4  ;;  %v4839_v11 = vrot.slane %v4838_v6, 4  ;;  %v10736_v2 = vld [vmem:[#allocation3 + $0x7c] sm:$0xf]  ;;  %v4113_v6 = vpop.f32.mrf.mxu0 }
 0x2f5   : > { %v6618_v33 = vunpack.c.l.b16 %v4834_v36  ;;  %v4996_v13 = vor.u32 %v4995_v45, %v4992_v0  ;;  %v5001_v15 = vrot.slane %v4999_v62, 5  ;;  %v5003_v59 = vshrl.u32 %v10654_v42, 16 }
 0x2f6   : > { %7174 = vrot.lane.b32.xlu1 %v7158_v28, %s8757_s12  ;;  %v4490_v38 = vsel %vm8981_vm10, %v4482_v60, %v4489_v27  ;;  %v4695_v22 = vsel %vm10484_vm8, %v4491_v18, %v4694_v55  ;;  %v4844_v56 = vsel %vm9011_vm14, %v4839_v11, %v4843_v14  ;;  %v5009_v53 = vshll.u32 %v10656_v39, 16  ;;  %v4148_v39 = vpop.f32.mrf.mxu2 }
 0x2f7   : > { %4693 = vst.msk [vmem:[#allocation3 + $0x94] sm:$0xf] %vm4232_vm1, %v4490_v38  ;;  %v6619_v42 = vunpack.c.l.b16 %v4844_v56  ;;  %v4997_v10 = vrot.slane %v4996_v13, 4  ;;  %v5005_v50 = vrot.slane %v5003_v59, 4  ;;  %v4111_v47 = vadd.f32 %v10423_v54, %v4110_v19  ;;  %v4645_v19 = vld [vmem:[#allocation3 + $0x44] sm:$0x1] }
 0x2f8   : > { %4696 = vst [vmem:[#allocation3 + $0x98] sm:$0x1] %v4695_v22  ;;  %v5011_v17 = vrot.slane %v5009_v53, 5  ;;  %v5406_v3 = vshrl.u32 %v5335_v48, 16  ;;  %v5409_v52 = vshll.u32 %v5335_v48, 16  ;;  %v5415_v60 = vshll.u32 %v10640_v21, 16 }
 0x2f9   : > { %v6648_v51 = vpack.c.b16 %v6619_v42, %v6618_v33  ;;  %v5002_v58 = vsel %vm9011_vm14, %v4997_v10, %v5001_v15  ;;  %v5006_v26 = vor.u32 %v5005_v50, %v5001_v15  ;;  %v4177_v49 = vmax.f32 %v4111_v47, 0.0  ;;  %v10741_v59 = vld [vmem:[#allocation3 + $0x80] sm:$0x1]  ;;  %v5159_v53 = vld [vmem:[#allocation3 + $0x18] sm:$0xe] }
 0x2fa   : > { %v6632_v23 = vunpack.c.l.b16 %v5002_v58  ;;  %v5408_v35 = vrot.slane %v5406_v3, 4  ;;  %v5411_v57 = vrot.slane %v5409_v52, 5  ;;  %v5417_v46 = vrot.slane %v5415_v60, 5  ;;  %v4697_v47 = vld [vmem:[#allocation3 + $0x9c] sm:$0xf] }
 0x2fb   : > { %6666 = vrot.lane.b32.xlu2 %v6648_v51, %s8745_s27  ;;  %v5007_v44 = vrot.slane %v5006_v26, 4  ;;  %v4209_v41 = vpack.c.bf16 %v4177_v49, %v4177_v49  ;;  %v5419_v25 = vshrl.u32 %v10640_v21, 16  ;;  %v5425_v16 = vshll.u32 %v10642_v43, 16 }
 0x2fc   : > { %v5412_v61 = vor.u32 %v5411_v57, %v5408_v35  ;;  %v4149_v4 = vadd.f32 %v10423_v54, %v4148_v39  ;;  %v5598_v9 = vshrl.u32 %v5351_v34, 16  ;;  %v5601_v63 = vshll.u32 %v5351_v34, 16  ;;  %v10763_v57 = vld [vmem:[#allocation3 + $0x28] sm:$0xf] }
 0x2fd   : > { %v5012_v40 = vsel %vm9011_vm14, %v5007_v44, %v5011_v17  ;;  %v4365_v32 = vshrl.u32 %v4209_v41, 16  ;;  %v4368_v37 = vshll.u32 %v4209_v41, 16  ;;  %v5421_v12 = vrot.slane %v5419_v25, 4 }
 0x2fe   : > { %v6633_v14 = vunpack.c.l.b16 %v5012_v40  ;;  %v5413_v55 = vrot.slane %v5412_v61, 4  ;;  %v5427_v36 = vrot.slane %v5425_v16, 5  ;;  %v4192_v21 = vmax.f32 %v4149_v4, 0.0  ;;  %v4150_v3 = vpop.f32.mrf.mxu2 }
 0x2ff   : > { %v4367_v0 = vrot.slane %v4365_v32, 7  ;;  %v5422_v43 = vor.u32 %v5421_v12, %v5417_v46  ;;  %v5600_v45 = vrot.slane %v5598_v9, 4  ;;  %v5603_v62 = vrot.slane %v5601_v63, 5  ;;  %v10775_v63 = vld [vmem:[%s11896_s3] ss:$0 sm:$0xff] }
 0x300   : > { %v6655_v54 = vpack.c.b16 %v6633_v14, %v6632_v23  ;;  %v5418_v28 = vsel %vm9011_vm14, %v5413_v55, %v5417_v46  ;;  %v4224_v27 = vpack.c.bf16 %v4192_v21, %v4192_v21  ;;  %v5607_v18 = vshll.u32 %v10736_v2, 16  ;;  %v6375_v46 = vld [vmem:[#allocation3 + $0x24] sm:$0xe] }
 0x301   : > { %v4370_v11 = vor.u32 %v4368_v37, %v4367_v0  ;;  %v4372_v33 = vrot.slane %v4367_v0, 4  ;;  %v5423_v13 = vrot.slane %v5422_v43, 4  ;;  %v6872_v15 = vunpack.c.l.b16 %v5418_v28  ;;  %v5167_v43 = vld [vmem:[#allocation3 + $0x78] sm:$0xe] }
 0x302   : > { %6680 = vrot.lane.b32.xlu0 %v6655_v54, %s8745_s27  ;;  %v4493_v48 = vshrl.u32 %v4224_v27, 16  ;;  %v4496_v38 = vshll.u32 %v4224_v27, 16  ;;  %v5604_v22 = vor.u32 %v5603_v62, %v5600_v45  ;;  %v5609_v56 = vrot.slane %v5607_v18, 5 }
 0x303   : > { %v4371_v42 = vsel %vm8981_vm10, %v4363_v7, %v4370_v11  ;;  %v4646_v10 = vsel %vm10484_vm8, %v4372_v33, %v4645_v19  ;;  %v5428_v50 = vsel %vm9011_vm14, %v5423_v13, %v5427_v36  ;;  %v5611_v17 = vshrl.u32 %v10736_v2, 16 }
 0x304   : > { %4644 = vst.msk [vmem:[#allocation3 + $0x40] sm:$0xf] %vm4232_vm1, %v4371_v42  ;;  %v6873_v52 = vunpack.c.l.b16 %v5428_v50  ;;  %v10754_v60 = vrot.slane %v4493_v48, 7  ;;  %v5605_v51 = vrot.slane %v5604_v22, 4  ;;  %v5617_v24 = vshll.u32 %v10741_v59, 16 }
 0x305   : > { %4647 = vst [vmem:[#allocation3 + $0x44] sm:$0x1] %v4646_v10  ;;  %v5613_v7 = vrot.slane %v5611_v17, 4  ;;  %v8287_v58 = vrot.slane %v5159_v53, 9  ;;  %v5237_v26 = vrot.slane %v10695_v1, 5  ;;  %v5240_v49 = vrot.slane %v10700_v5, 5  ;;  %v4115_v5 = vpop.f32.mrf.mxu0 }
 0x306   : > { %v6903_v39 = vpack.c.b16 %v6873_v52, %v6872_v15  ;;  %v4498_v34 = vor.u32 %v4496_v38, %v10754_v60  ;;  %v4499_v23 = vrot.slane %v10754_v60, 4  ;;  %v5610_v35 = vsel %vm9011_vm14, %v5605_v51, %v5609_v56  ;;  %v10767_v1 = vld [vmem:[#allocation3 + $0x2c] sm:$0x1]  ;;  %v10788_v15 = vld [vmem:[#allocation3 + $0x7c] sm:$0xf]  ;;  %v4153_v22 = vpop.f32.mrf.mxu2  ;;  %v8656_v10 = vld [vmem:[#allocation3 + $0x24] sm:$0xff] }
 0x307   : > { %v5614_v44 = vor.u32 %v5613_v7, %v5609_v56  ;;  %v5619_v41 = vrot.slane %v5617_v24, 5  ;;  %v6888_v25 = vunpack.c.l.b16 %v5610_v35  ;;  %v5238_v16 = vsel %vm8963_vm7, %v8287_v58, %v5237_v26  ;;  %v10790_v48 = vld [vmem:[#allocation3 + $0x80] sm:$0x1]  ;;  %v4648_v24 = vld [vmem:[#allocation3 + $0x48] sm:$0xf] }
 0x308   : > { %6920 = vrot.lane.b32.xlu1 %v6903_v39, %s8747_s7  ;;  %v4698_v61 = vsel %vm10460_vm9, %v4498_v34, %v4697_v47  ;;  %v5239_v4 = vrot.slane %v5237_v26, 4  ;;  %v6698_v9 = vunpack.c.l.b16 %v5238_v16  ;;  %v4114_v40 = vadd.f32 %v10775_v63, %v4113_v6 }
 0x309   : > { %4699 = vst [vmem:[#allocation3 + $0x9c] sm:$0xf] %v4698_v61  ;;  %v5615_v32 = vrot.slane %v5614_v44, 4  ;;  %v4151_v37 = vadd.f32 %v10775_v63, %v4150_v3  ;;  %v8318_v12 = vrot.slane %v6375_v46, 9  ;;  %v6447_v14 = vrot.slane %v10763_v57, 5 }
 0x30a   : > { %v5241_v55 = vsel %vm8963_vm7, %v5239_v4, %v5240_v49  ;;  %v4178_v36 = vmax.f32 %v4114_v40, 0.0  ;;  %v6450_v21 = vrot.slane %v10767_v1, 5  ;;  %v4116_v0 = vadd.f32 %v10775_v63, %v4115_v5  ;;  %v5774_v46 = vld [vmem:[#allocation3 + $0x78] sm:$0xe] }
 0x30b   : > { %v5620_v45 = vsel %vm9011_vm14, %v5615_v32, %v5619_v41  ;;  %v6699_v6 = vunpack.c.l.b16 %v5241_v55  ;;  %v4193_v62 = vmax.f32 %v4151_v37, 0.0  ;;  %v6448_v54 = vsel %vm8963_vm7, %v8318_v12, %v6447_v14  ;;  %v4652_v37 = vld [vmem:[#allocation3 + $0x50] sm:$0x1] }
 0x30c   : > { %v6889_v19 = vunpack.c.l.b16 %v5620_v45  ;;  %v4210_v28 = vpack.c.bf16 %v4178_v36, %v4178_v36  ;;  %v6449_v27 = vrot.slane %v6447_v14, 4  ;;  %v7208_v18 = vunpack.c.l.b16 %v6448_v54  ;;  %v8671_v45 = vld [vmem:[#allocation3 + $0x24] sm:$0xff] }
 0x30d   : > { %v6728_v11 = vpack.c.b16 %v6699_v6, %v6698_v9  ;;  %v4225_v33 = vpack.c.bf16 %v4193_v62, %v4193_v62  ;;  %v4179_v13 = vmax.f32 %v4116_v0, 0.0  ;;  %v8295_v38 = vrot.slane %v5167_v43, 9  ;;  %v4118_v36 = vpop.f32.mrf.mxu0 }
 0x30e   : > { %v6911_v56 = vpack.c.b16 %v6889_v19, %v6888_v25  ;;  %v4374_v53 = vshrl.u32 %v4210_v28, 16  ;;  %v4377_v42 = vshll.u32 %v4210_v28, 16  ;;  %v6451_v50 = vsel %vm8963_vm7, %v6449_v27, %v6450_v21  ;;  %v4701_v25 = vld [vmem:[#allocation3 + $0xa4] sm:$0x1]  ;;  %v4745_v21 = vld [vmem:[#allocation3 + $0x78] sm:$0xf] }
 0x30f   : > { %6746 = vrot.lane.b32.xlu0 %v6728_v11, %s8749_s9  ;;  %v4501_v47 = vshrl.u32 %v4225_v33, 16  ;;  %v4504_v17 = vshll.u32 %v4225_v33, 16  ;;  %v7209_v3 = vunpack.c.l.b16 %v6451_v50  ;;  %v4211_v52 = vpack.c.bf16 %v4179_v13, %v4179_v13 }
 0x310   : > { %6936 = vrot.lane.b32.xlu2 %v6911_v56, %s8747_s7  ;;  %v4376_v51 = vrot.slane %v4374_v53, 7  ;;  %6842 = vrot.lane.b32.xlu1 %v8656_v10, %s8755_s30  ;;  %v5293_v7 = vrot.slane %v10788_v15, 5  ;;  %v5296_v58 = vrot.slane %v10790_v48, 5  ;;  %v4154_v26 = vadd.f32 %v10775_v63, %v4153_v22 }
 0x311   : > { %v4503_v49 = vrot.slane %v4501_v47, 7  ;;  %v7239_v39 = vpack.c.b16 %v7209_v3, %v7208_v18  ;;  %v4382_v34 = vshrl.u32 %v4211_v52, 16  ;;  %v4385_v35 = vshll.u32 %v4211_v52, 16  ;;  %v4704_v3 = vld [vmem:[#allocation3 + $0xa8] sm:$0xf] }
 0x312   : > { %v4379_v44 = vor.u32 %v4377_v42, %v4376_v51  ;;  %v4380_v41 = vrot.slane %v4376_v51, 4  ;;  %v5294_v16 = vsel %vm8963_vm7, %v8295_v38, %v5293_v7  ;;  %v5295_v5 = vrot.slane %v5293_v7, 4  ;;  %v4155_v38 = vpop.f32.mrf.mxu2 }
 0x313   : > { %v4506_v61 = vor.u32 %v4504_v17, %v4503_v49  ;;  %v4508_v4 = vrot.slane %v4503_v49, 4  ;;  %v4384_v9 = vrot.slane %v4382_v34, 7  ;;  %v6714_v40 = vunpack.c.l.b16 %v5294_v16  ;;  %v5337_v34 = vld [vmem:[#allocation3 + $0x24] sm:$0xf] }
 0x314   : > { %v4649_v32 = vsel %vm10460_vm9, %v4379_v44, %v4648_v24  ;;  %v5297_v12 = vsel %vm8963_vm7, %v5295_v5, %v5296_v58  ;;  %v4194_v14 = vmax.f32 %v4154_v26, 0.0  ;;  %v8310_v55 = vrot.slane %v5774_v46, 9  ;;  %v8664_v16 = vld [vmem:[#allocation3 + $0x84] sm:$0xff] }
 0x315   : > { %4650 = vst [vmem:[#allocation3 + $0x48] sm:$0xf] %v4649_v32  ;;  %v4507_v0 = vsel %vm8981_vm10, %v4499_v23, %v4506_v61  ;;  %v4702_v43 = vsel %vm10484_vm8, %v4508_v4, %v4701_v25  ;;  %v4387_v6 = vor.u32 %v4385_v35, %v4384_v9  ;;  %v4389_v62 = vrot.slane %v4384_v9, 4 }
 0x316   : > { %4700 = vst.msk [vmem:[#allocation3 + $0xa0] sm:$0xf] %vm4232_vm1, %v4507_v0  ;;  %v6715_v54 = vunpack.c.l.b16 %v5297_v12  ;;  %v4226_v19 = vpack.c.bf16 %v4194_v14, %v4194_v14  ;;  %v5894_v28 = vrot.slane %v10736_v2, 5  ;;  %v5897_v27 = vrot.slane %v10741_v59, 5 }
 0x317   : > { %4703 = vst [vmem:[#allocation3 + $0xa4] sm:$0x1] %v4702_v43  ;;  %7096 = vrot.lane.b32.xlu0 %v8671_v45, %s8748_s8  ;;  %v4388_v60 = vsel %vm8981_vm10, %v4380_v41, %v4387_v6  ;;  %v4653_v23 = vsel %vm10484_vm8, %v4389_v62, %v4652_v37  ;;  %v4119_v18 = vadd.f32 %v10775_v63, %v4118_v36  ;;  %v5014_v11 = vshrl.u32 %v4745_v21, 16  ;;  %v5338_v41 = vld [vmem:[#allocation3 + $0x28] sm:$0xf] }
 0x318   : > { %7256 = vrot.lane.b32.xlu2 %v7239_v39, %s8750_s10  ;;  %4651 = vst.msk [vmem:[#allocation3 + $0x4c] sm:$0xf] %vm4232_vm1, %v4388_v60  ;;  %v6736_v33 = vpack.c.b16 %v6715_v54, %v6714_v40  ;;  %v4510_v2 = vshrl.u32 %v4226_v19, 16  ;;  %v4513_v13 = vshll.u32 %v4226_v19, 16  ;;  %v5895_v59 = vsel %vm8963_vm7, %v8310_v55, %v5894_v28  ;;  %v4655_v37 = vld [vmem:[#allocation3 + $0x54] sm:$0xf] }
 0x319   : > { %4654 = vst [vmem:[#allocation3 + $0x50] sm:$0x1] %v4653_v23  ;;  %v5896_v22 = vrot.slane %v5894_v28, 4  ;;  %v6968_v56 = vunpack.c.l.b16 %v5895_v59  ;;  %v4180_v53 = vmax.f32 %v4119_v18, 0.0  ;;  %v5016_v42 = vrot.slane %v5014_v11, 4 }
 0x31a   : > { %6762 = vrot.lane.b32.xlu1 %v6736_v33, %s8749_s9  ;;  %v10826_v10 = vrot.slane %v4510_v2, 7  ;;  %v5017_v50 = vshll.u32 %v4745_v21, 16  ;;  %v5023_v47 = vshll.u32 %v10788_v15, 16  ;;  %v5027_v17 = vshrl.u32 %v10788_v15, 16  ;;  %v5367_v6 = vld [vmem:[#allocation3 + $0x2c] sm:$0x1] }
 0x31b   : > { %v5898_v52 = vsel %vm8963_vm7, %v5896_v22, %v5897_v27  ;;  %v4212_v51 = vpack.c.bf16 %v4180_v53, %v4180_v53  ;;  %v5033_v24 = vshll.u32 %v10790_v48, 16  ;;  %v4156_v7 = vadd.f32 %v10775_v63, %v4155_v38  ;;  %v5767_v27 = vld [vmem:[#allocation3 + $0x24] sm:$0xe] }
 0x31c   : > { %v4515_v58 = vor.u32 %v4513_v13, %v10826_v10  ;;  %v4516_v26 = vrot.slane %v10826_v10, 4  ;;  %v6969_v49 = vunpack.c.l.b16 %v5898_v52  ;;  %v5019_v39 = vrot.slane %v5017_v50, 5  ;;  %v4708_v50 = vld [vmem:[#allocation3 + $0xb0] sm:$0x1]  ;;  %v4120_v52 = vpop.f32.mrf.mxu0 }
 0x31d   : > { %v4391_v35 = vshrl.u32 %v4212_v51, 16  ;;  %v4394_v46 = vshll.u32 %v4212_v51, 16  ;;  %v5025_v44 = vrot.slane %v5023_v47, 5  ;;  %v5029_v15 = vrot.slane %v5027_v17, 4 }
 0x31e   : > { %v4705_v25 = vsel %vm10460_vm9, %v4515_v58, %v4704_v3  ;;  %v6991_v5 = vpack.c.b16 %v6969_v49, %v6968_v56  ;;  %v5020_v48 = vor.u32 %v5019_v39, %v5016_v42  ;;  %v5035_v61 = vrot.slane %v5033_v24, 5  ;;  %v10852_v49 = vld [vmem:[#allocation3 + $0x28] sm:$0xf]  ;;  %v5160_v39 = vld [vmem:[#allocation3 + $0x24] sm:$0xe] }
 0x31f   : > { %4706 = vst [vmem:[#allocation3 + $0xa8] sm:$0xf] %v4705_v25  ;;  %v10838_v4 = vrot.slane %v4391_v35, 7  ;;  %v5030_v9 = vor.u32 %v5029_v15, %v5025_v44  ;;  %v4195_v40 = vmax.f32 %v4156_v7, 0.0  ;;  %v5430_v32 = vshrl.u32 %v5337_v34, 16 }
 0x320   : > { %6858 = vrot.lane.b32.xlu2 %v8664_v16, %s8755_s30  ;;  %7016 = vrot.lane.b32.xlu0 %v6991_v5, %s8756_s11  ;;  %v5021_v12 = vrot.slane %v5020_v48, 4  ;;  %v5433_v14 = vshll.u32 %v5337_v34, 16  ;;  %v5439_v55 = vshll.u32 %v5338_v41, 16  ;;  %v5443_v36 = vshrl.u32 %v5338_v41, 16  ;;  %v10857_v15 = vld [vmem:[#allocation3 + $0x2c] sm:$0x1] }
 0x321   : > { %v4396_v21 = vor.u32 %v4394_v46, %v10838_v4  ;;  %v4397_v0 = vrot.slane %v10838_v4, 4  ;;  %v5031_v43 = vrot.slane %v5030_v9, 4  ;;  %v4227_v45 = vpack.c.bf16 %v4195_v40, %v4195_v40  ;;  %v4747_v48 = vld [vmem:[#allocation3 + $0x84] sm:$0xf] }
 0x322   : > { %v5026_v62 = vsel %vm9011_vm14, %v5021_v12, %v5025_v44  ;;  %v5432_v54 = vrot.slane %v5430_v32, 4  ;;  %v5435_v19 = vrot.slane %v5433_v14, 5  ;;  %v5441_v28 = vrot.slane %v5439_v55, 5  ;;  %v4748_v14 = vld [vmem:[#allocation3 + $0x88] sm:$0xf] }
 0x323   : > { %v4656_v60 = vsel %vm10460_vm9, %v4396_v21, %v4655_v37  ;;  %v5036_v23 = vsel %vm9011_vm14, %v5031_v43, %v5035_v61  ;;  %v6634_v18 = vunpack.c.l.b16 %v5026_v62  ;;  %v4518_v11 = vshrl.u32 %v4227_v45, 16 }
 0x324   : > { %4657 = vst [vmem:[#allocation3 + $0x54] sm:$0xf] %v4656_v60  ;;  %v6635_v33 = vunpack.c.l.b16 %v5036_v23  ;;  %v4521_v2 = vshll.u32 %v4227_v45, 16  ;;  %v5436_v13 = vor.u32 %v5435_v19, %v5432_v54  ;;  %v5445_v59 = vrot.slane %v5443_v36, 4  ;;  %v4768_v19 = vld [vmem:[#allocation3 + $0x8c] sm:$0x1] }
 0x325   : > { %v4520_v38 = vrot.slane %v4518_v11, 7  ;;  %v5449_v22 = vshll.u32 %v5367_v6, 16  ;;  %v8303_v56 = vrot.slane %v5767_v27, 9  ;;  %v5845_v53 = vrot.slane %v5338_v41, 5 }
 0x326   : > { %v6656_v42 = vpack.c.b16 %v6635_v33, %v6634_v18  ;;  %v5437_v47 = vrot.slane %v5436_v13, 4  ;;  %v5446_v17 = vor.u32 %v5445_v59, %v5441_v28  ;;  %v5848_v3 = vrot.slane %v5367_v6, 5 }
 0x327   : > { %v4523_v51 = vor.u32 %v4521_v2, %v4520_v38  ;;  %v4525_v24 = vrot.slane %v4520_v38, 4  ;;  %v5451_v7 = vrot.slane %v5449_v22, 5  ;;  %v5846_v58 = vsel %vm8963_vm7, %v8303_v56, %v5845_v53 }
 0x328   : > { %6682 = vrot.lane.b32.xlu1 %v6656_v42, %s8745_s27  ;;  %v5442_v34 = vsel %vm9011_vm14, %v5437_v47, %v5441_v28  ;;  %v5447_v35 = vrot.slane %v5446_v17, 4  ;;  %v5847_v46 = vrot.slane %v5845_v53, 4  ;;  %v6954_v44 = vunpack.c.l.b16 %v5846_v58  ;;  %v4731_v28 = vld [vmem:[#allocation3 + $0x24] sm:$0xf]  ;;  %v4659_v17 = vld [vmem:[#allocation3 + $0x5c] sm:$0x1] }
 0x329   : > { %v4524_v41 = vsel %vm8981_vm10, %v4516_v26, %v4523_v51  ;;  %v4709_v25 = vsel %vm10484_vm8, %v4525_v24, %v4708_v50  ;;  %v6874_v16 = vunpack.c.l.b16 %v5442_v34  ;;  %v4121_v5 = vadd.f32 %v10775_v63, %v4120_v52 }
 0x32a   : > { %4707 = vst.msk [vmem:[#allocation3 + $0xac] sm:$0xf] %vm4232_vm1, %v4524_v41  ;;  %v5452_v61 = vsel %vm9011_vm14, %v5447_v35, %v5451_v7  ;;  %v5849_v9 = vsel %vm8963_vm7, %v5847_v46, %v5848_v3  ;;  %v8288_v40 = vrot.slane %v5160_v39, 9  ;;  %v5244_v10 = vrot.slane %v10852_v49, 5  ;;  %v4158_v35 = vpop.f32.mrf.mxu2 }
 0x32b   : > { %4710 = vst [vmem:[#allocation3 + $0xb0] sm:$0x1] %v4709_v25  ;;  %v6875_v26 = vunpack.c.l.b16 %v5452_v61  ;;  %v6955_v32 = vunpack.c.l.b16 %v5849_v9  ;;  %v4181_v37 = vmax.f32 %v4121_v5, 0.0  ;;  %v5247_v12 = vrot.slane %v10857_v15, 5  ;;  %v5960_v5 = vld [vmem:[#allocation3 + $0x84] sm:$0xf] }
 0x32c   : > { %v5245_v55 = vsel %vm8963_vm7, %v8288_v40, %v5244_v10  ;;  %v5246_v36 = vrot.slane %v5244_v10, 4  ;;  %v5038_v21 = vshrl.u32 %v4747_v48, 16  ;;  %v5041_v43 = vshll.u32 %v4747_v48, 16 }
 0x32d   : > { %v6904_v45 = vpack.c.b16 %v6875_v26, %v6874_v16  ;;  %v6984_v6 = vpack.c.b16 %v6955_v32, %v6954_v44  ;;  %v4213_v62 = vpack.c.bf16 %v4181_v37, %v4181_v37  ;;  %v6700_v54 = vunpack.c.l.b16 %v5245_v55  ;;  %v4123_v16 = vpop.f32.mrf.mxu0 }
 0x32e   : > { %v5248_v27 = vsel %vm8963_vm7, %v5246_v36, %v5247_v12  ;;  %v5040_v60 = vrot.slane %v5038_v21, 4  ;;  %v5043_v23 = vrot.slane %v5041_v43, 5  ;;  %v5047_v18 = vshll.u32 %v4748_v14, 16  ;;  %v8679_v43 = vld [vmem:[#allocation3 + $0x84] sm:$0xff] }
 0x32f   : > { %6922 = vrot.lane.b32.xlu2 %v6904_v45, %s8747_s7  ;;  %7002 = vrot.lane.b32.xlu0 %v6984_v6, %s8756_s11  ;;  %v4399_v11 = vshrl.u32 %v4213_v62, 16  ;;  %v4402_v33 = vshll.u32 %v4213_v62, 16  ;;  %v6701_v2 = vunpack.c.l.b16 %v5248_v27  ;;  %v5051_v13 = vshrl.u32 %v4748_v14, 16 }
 0x330   : > { %v5044_v59 = vor.u32 %v5043_v23, %v5040_v60  ;;  %v5049_v38 = vrot.slane %v5047_v18, 5  ;;  %v5057_v22 = vshll.u32 %v4768_v19, 16  ;;  %v4846_v56 = vshrl.u32 %v4731_v28, 16 }
 0x331   : > { %v4401_v53 = vrot.slane %v4399_v11, 7  ;;  %v6729_v42 = vpack.c.b16 %v6701_v2, %v6700_v54  ;;  %v5053_v50 = vrot.slane %v5051_v13, 4  ;;  %v4849_v47 = vshll.u32 %v4731_v28, 16  ;;  %v5983_v11 = vld [vmem:[#allocation3 + $0x8c] sm:$0x1] }
 0x332   : > { %v5045_v3 = vrot.slane %v5044_v59, 4  ;;  %v5059_v52 = vrot.slane %v5057_v22, 5  ;;  %v4848_v51 = vrot.slane %v4846_v56, 4  ;;  %v4855_v24 = vshll.u32 %v10852_v49, 16  ;;  %v6383_v13 = vld [vmem:[#allocation3 + $0x84] sm:$0xe] }
 0x333   : > { %v4404_v7 = vor.u32 %v4402_v33, %v4401_v53  ;;  %v4406_v58 = vrot.slane %v4401_v53, 4  ;;  %6748 = vrot.lane.b32.xlu1 %v6729_v42, %s8749_s9  ;;  %v5054_v39 = vor.u32 %v5053_v50, %v5049_v38  ;;  %v4851_v34 = vrot.slane %v4849_v47, 5 }
 0x334   : > { %v5050_v46 = vsel %vm9011_vm14, %v5045_v3, %v5049_v38  ;;  %v4857_v44 = vrot.slane %v4855_v24, 5  ;;  %v4859_v41 = vshrl.u32 %v10852_v49, 16  ;;  %v4865_v25 = vshll.u32 %v10857_v15, 16  ;;  %v5961_v15 = vld [vmem:[#allocation3 + $0x88] sm:$0xf]  ;;  %v4160_v24 = vpop.f32.mrf.mxu2 }
 0x335   : > { %v4405_v48 = vsel %vm8981_vm10, %v4397_v0, %v4404_v7  ;;  %v4660_v61 = vsel %vm10484_vm8, %v4406_v58, %v4659_v17  ;;  %v5055_v9 = vrot.slane %v5054_v39, 4  ;;  %v6636_v40 = vunpack.c.l.b16 %v5050_v46  ;;  %v4711_v58 = vld [vmem:[#allocation3 + $0xb4] sm:$0xf] }
 0x336   : > { %4658 = vst.msk [vmem:[#allocation3 + $0x58] sm:$0xf] %vm4232_vm1, %v4405_v48  ;;  %v4852_v10 = vor.u32 %v4851_v34, %v4848_v51  ;;  %v4861_v26 = vrot.slane %v4859_v41, 4  ;;  %v4867_v32 = vrot.slane %v4865_v25, 5  ;;  %v4159_v49 = vadd.f32 %v10775_v63, %v4158_v35  ;;  %v4662_v41 = vld [vmem:[#allocation3 + $0x60] sm:$0xf] }
 0x337   : > { %4661 = vst [vmem:[#allocation3 + $0x5c] sm:$0x1] %v4660_v61  ;;  %v5060_v4 = vsel %vm9011_vm14, %v5055_v9, %v5059_v52  ;;  %v4124_v37 = vadd.f32 %v10775_v63, %v4123_v16  ;;  %v6207_v0 = vshrl.u32 %v5960_v5, 16  ;;  %v6210_v12 = vshll.u32 %v5960_v5, 16  ;;  %v5944_v5 = vld [vmem:[#allocation3 + $0x24] sm:$0xf] }
 0x338   : > { %v6637_v14 = vunpack.c.l.b16 %v5060_v4  ;;  %v4853_v55 = vrot.slane %v4852_v10, 4  ;;  %v4862_v36 = vor.u32 %v4861_v26, %v4857_v44  ;;  %v4196_v21 = vmax.f32 %v4159_v49, 0.0 }
 0x339   : > { %v4182_v45 = vmax.f32 %v4124_v37, 0.0  ;;  %v6209_v6 = vrot.slane %v6207_v0, 4  ;;  %v6212_v62 = vrot.slane %v6210_v12, 5  ;;  %v6216_v54 = vshll.u32 %v5961_v15, 16 }
 0x33a   : > { %v6657_v19 = vpack.c.b16 %v6637_v14, %v6636_v40  ;;  %v4858_v28 = vsel %vm9011_vm14, %v4853_v55, %v4857_v44  ;;  %v4863_v27 = vrot.slane %v4862_v36, 4  ;;  %v4228_v60 = vpack.c.bf16 %v4196_v21, %v4196_v21  ;;  %v4125_v21 = vpop.f32.mrf.mxu0 }
 0x33b   : > { %v6620_v23 = vunpack.c.l.b16 %v4858_v28  ;;  %7112 = vrot.lane.b32.xlu1 %v8679_v43, %s8748_s8  ;;  %v4214_v18 = vpack.c.bf16 %v4182_v45, %v4182_v45  ;;  %v6213_v33 = vor.u32 %v6212_v62, %v6209_v6  ;;  %v6218_v2 = vrot.slane %v6216_v54, 5  ;;  %v5161_v54 = vld [vmem:[#allocation3 + $0x30] sm:$0xe] }
 0x33c   : > { %6684 = vrot.lane.b32.xlu2 %v6657_v19, %s8745_s27  ;;  %v4868_v59 = vsel %vm9011_vm14, %v4863_v27, %v4867_v32  ;;  %v4527_v38 = vshrl.u32 %v4228_v60, 16  ;;  %v4530_v22 = vshll.u32 %v4228_v60, 16  ;;  %v6220_v56 = vshrl.u32 %v5961_v15, 16 }
 0x33d   : > { %v6621_v53 = vunpack.c.l.b16 %v4868_v59  ;;  %v4408_v42 = vshrl.u32 %v4214_v18, 16  ;;  %v4411_v50 = vshll.u32 %v4214_v18, 16  ;;  %v6214_v47 = vrot.slane %v6213_v33, 4  ;;  %v5353_v59 = vld [vmem:[#allocation3 + $0x84] sm:$0xf] }
 0x33e   : > { %v10902_v17 = vrot.slane %v4527_v38, 7  ;;  %v6222_v3 = vrot.slane %v6220_v56, 4  ;;  %v6226_v52 = vshll.u32 %v5983_v11, 16  ;;  %v8326_v51 = vrot.slane %v6383_v13, 9  ;;  %v10930_v13 = vld [vmem:[#allocation3 + $0x38] sm:$0x1] }
 0x33f   : > { %v6649_v7 = vpack.c.b16 %v6621_v53, %v6620_v23  ;;  %v10904_v39 = vrot.slane %v4408_v42, 7  ;;  %v6219_v34 = vsel %vm9011_vm14, %v6214_v47, %v6218_v2  ;;  %v6503_v35 = vrot.slane %v5961_v15, 5  ;;  %v10927_v23 = vld [vmem:[#allocation3 + $0x34] sm:$0xf]  ;;  %v4163_v42 = vpop.f32.mrf.mxu2 }
 0x340   : > { %v4532_v46 = vor.u32 %v4530_v22, %v10902_v17  ;;  %v4533_v44 = vrot.slane %v10902_v17, 4  ;;  %v6223_v25 = vor.u32 %v6222_v3, %v6218_v2  ;;  %v6228_v16 = vrot.slane %v6226_v52, 5  ;;  %v10935_v3 = vpop.permute.xlu2 %6744 }
 0x341   : > { %6668 = vrot.lane.b32.xlu0 %v6649_v7, %s8745_s27  ;;  %v4413_v48 = vor.u32 %v4411_v50, %v10904_v39  ;;  %v4414_v61 = vrot.slane %v10904_v39, 4  ;;  %v7144_v9 = vunpack.c.l.b16 %v6219_v34  ;;  %v6504_v40 = vsel %vm8963_vm7, %v8326_v51, %v6503_v35 }
 0x342   : > { %v4712_v10 = vsel %vm10460_vm9, %v4532_v46, %v4711_v58  ;;  %v6224_v26 = vrot.slane %v6223_v25, 4  ;;  %v6505_v32 = vrot.slane %v6503_v35, 4  ;;  %v6506_v49 = vrot.slane %v5983_v11, 5 }
 0x343   : > { %4713 = vst [vmem:[#allocation3 + $0xb4] sm:$0xf] %v4712_v10  ;;  %v4663_v15 = vsel %vm10460_vm9, %v4413_v48, %v4662_v41  ;;  %v7224_v4 = vunpack.c.l.b16 %v6504_v40  ;;  %v4161_v37 = vadd.f32 %v10775_v63, %v4160_v24  ;;  %v6015_v0 = vshrl.u32 %v5944_v5, 16  ;;  %v4715_v41 = vld [vmem:[#allocation3 + $0xbc] sm:$0x1] }
 0x344   : > { %4664 = vst [vmem:[#allocation3 + $0x60] sm:$0xf] %v4663_v15  ;;  %v6229_v12 = vsel %vm9011_vm14, %v6224_v26, %v6228_v16  ;;  %v6507_v14 = vsel %vm8963_vm7, %v6505_v32, %v6506_v49  ;;  %v6018_v55 = vshll.u32 %v5944_v5, 16  ;;  %v6024_v36 = vshll.u32 %v10763_v57, 16  ;;  %v10942_v32 = vld [vmem:[#allocation3 + $0x88] sm:$0xf] }
 0x345   : > { %v7145_v43 = vunpack.c.l.b16 %v6229_v12  ;;  %v7225_v45 = vunpack.c.l.b16 %v6507_v14  ;;  %v4197_v6 = vmax.f32 %v4161_v37, 0.0  ;;  %v6017_v62 = vrot.slane %v6015_v0, 4  ;;  %v10948_v37 = vld [vmem:[#allocation3 + $0x8c] sm:$0x1] }
 0x346   : > { %v6020_v19 = vrot.slane %v6018_v55, 5  ;;  %v6026_v28 = vrot.slane %v6024_v36, 5  ;;  %v6028_v27 = vshrl.u32 %v10763_v57, 16  ;;  %v6034_v60 = vshll.u32 %v10767_v1, 16 }
 0x347   : > { %v7167_v18 = vpack.c.b16 %v7145_v43, %v7144_v9  ;;  %v7247_v11 = vpack.c.b16 %v7225_v45, %v7224_v4  ;;  %v4229_v33 = vpack.c.bf16 %v4197_v6, %v4197_v6  ;;  %v4126_v2 = vadd.f32 %v10775_v63, %v4125_v21  ;;  %v4666_v21 = vld [vmem:[#allocation3 + $0x68] sm:$0x1]  ;;  %v10956_v43 = vld [vmem:[#allocation3 + $0x34] sm:$0xf] }
 0x348   : > { %v6021_v38 = vor.u32 %v6020_v19, %v6017_v62  ;;  %v6030_v22 = vrot.slane %v6028_v27, 4  ;;  %v6036_v56 = vrot.slane %v6034_v60, 5  ;;  %v8289_v53 = vrot.slane %v5161_v54, 9  ;;  %v6376_v27 = vld [vmem:[#allocation3 + $0x30] sm:$0xe] }
 0x349   : > { %7192 = vrot.lane.b32.xlu2 %v7167_v18, %s8757_s12  ;;  %7272 = vrot.lane.b32.xlu0 %v7247_v11, %s8750_s10  ;;  %v4535_v57 = vshrl.u32 %v4229_v33, 16  ;;  %v4538_v1 = vshll.u32 %v4229_v33, 16  ;;  %v4183_v50 = vmax.f32 %v4126_v2, 0.0  ;;  %v5251_v47 = vrot.slane %v10927_v23, 5  ;;  %v10962_v2 = vld [vmem:[#allocation3 + $0x38] sm:$0x1] }
 0x34a   : > { %v6022_v52 = vrot.slane %v6021_v38, 4  ;;  %v6031_v51 = vor.u32 %v6030_v22, %v6026_v28  ;;  %v5254_v24 = vrot.slane %v10930_v13, 5  ;;  %v5622_v7 = vshrl.u32 %v5353_v59, 16 }
 0x34b   : > { %v4537_v58 = vrot.slane %v4535_v57, 7  ;;  %v4215_v34 = vpack.c.bf16 %v4183_v50, %v4183_v50  ;;  %v5252_v35 = vsel %vm8963_vm7, %v8289_v53, %v5251_v47  ;;  %v5253_v46 = vrot.slane %v5251_v47, 4  ;;  %v10972_v53 = vpop.permute.xlu2 %6998  ;;  %v8638_v57 = vld [vmem:[#allocation3] sm:$0xff] }
 0x34c   : > { %v6027_v25 = vsel %vm9011_vm14, %v6022_v52, %v6026_v28  ;;  %v6032_v16 = vrot.slane %v6031_v51, 4  ;;  %v6702_v5 = vunpack.c.l.b16 %v5252_v35  ;;  %v5624_v48 = vrot.slane %v5622_v7, 4 }
 0x34d   : > { %v4540_v9 = vor.u32 %v4538_v1, %v4537_v58  ;;  %v4542_v40 = vrot.slane %v4537_v58, 4  ;;  %v7128_v10 = vunpack.c.l.b16 %v6027_v25  ;;  %v4416_v26 = vshrl.u32 %v4215_v34, 16  ;;  %v4733_v1 = vld [vmem:[#allocation3 + $0x30] sm:$0xf] }
 0x34e   : > { %v6037_v49 = vsel %vm9011_vm14, %v6032_v16, %v6036_v56  ;;  %v4419_v15 = vshll.u32 %v4215_v34, 16  ;;  %v5255_v4 = vsel %vm8963_vm7, %v5253_v46, %v5254_v24  ;;  %v5625_v0 = vshll.u32 %v5353_v59, 16  ;;  %v4165_v59 = vpop.f32.mrf.mxu2  ;;  %v6663_v46 = vpop.permute.xlu0 %6662 }
 0x34f   : > { %v4541_v12 = vsel %vm8981_vm10, %v4533_v44, %v4540_v9  ;;  %v4716_v14 = vsel %vm10484_vm8, %v4542_v40, %v4715_v41  ;;  %v7129_v55 = vunpack.c.l.b16 %v6037_v49  ;;  %v4418_v36 = vrot.slane %v4416_v26, 7  ;;  %v8672_v49 = vld [vmem:[#allocation3 + $0x30] sm:$0xff] }
 0x350   : > { %4714 = vst.msk [vmem:[#allocation3 + $0xb8] sm:$0xf] %vm4232_vm1, %v4541_v12  ;;  %v6703_v45 = vunpack.c.l.b16 %v5255_v4  ;;  %v5627_v6 = vrot.slane %v5625_v0, 5  ;;  %v5631_v62 = vshll.u32 %v10942_v32, 16  ;;  %v5635_v54 = vshrl.u32 %v10942_v32, 16  ;;  %v8680_v0 = vld [vmem:[#allocation3 + $0x90] sm:$0xff] }
 0x351   : > { %4717 = vst [vmem:[#allocation3 + $0xbc] sm:$0x1] %v4716_v14  ;;  %v7159_v17 = vpack.c.b16 %v7129_v55, %v7128_v10  ;;  %v4421_v19 = vor.u32 %v4419_v15, %v4418_v36  ;;  %v4423_v44 = vrot.slane %v4418_v36, 4  ;;  %v5641_v28 = vshll.u32 %v10948_v37, 16 }
 0x352   : > { %v6730_v60 = vpack.c.b16 %v6703_v45, %v6702_v5  ;;  %v5628_v18 = vor.u32 %v5627_v6, %v5624_v48  ;;  %v5633_v11 = vrot.slane %v5631_v62, 5  ;;  %v5637_v33 = vrot.slane %v5635_v54, 4  ;;  %v5946_v54 = vld [vmem:[#allocation3 + $0x30] sm:$0xf] }
 0x353   : > { %7176 = vrot.lane.b32.xlu1 %v7159_v17, %s8757_s12  ;;  %v4422_v38 = vsel %vm8981_vm10, %v4414_v61, %v4421_v19  ;;  %v4667_v22 = vsel %vm10484_vm8, %v4423_v44, %v4666_v21  ;;  %v4164_v56 = vadd.f32 %v10775_v63, %v4163_v42  ;;  %v8319_v52 = vrot.slane %v6376_v27, 9  ;;  %v4718_v17 = vld [vmem:[#allocation3 + $0xc0] sm:$0xf] }
 0x354   : > { %4665 = vst.msk [vmem:[#allocation3 + $0x64] sm:$0xf] %vm4232_vm1, %v4422_v38  ;;  %6750 = vrot.lane.b32.xlu2 %v6730_v60, %s8749_s9  ;;  %v5629_v50 = vrot.slane %v5628_v18, 4  ;;  %v5638_v47 = vor.u32 %v5637_v33, %v5633_v11  ;;  %v6454_v39 = vrot.slane %v10956_v43, 5  ;;  %v5643_v61 = vrot.slane %v5641_v28, 5 }
 0x355   : > { %4668 = vst [vmem:[#allocation3 + $0x68] sm:$0x1] %v4667_v22  ;;  %v4198_v51 = vmax.f32 %v4164_v56, 0.0  ;;  %v6457_v24 = vrot.slane %v10962_v2, 5  ;;  %v4166_v42 = vadd.f32 %v10775_v63, %v4165_v59  ;;  %v10984_v16 = vsel %vm585_vm2, %v8638_v57, %v6663_v46  ;;  %v10996_v59 = vpop.permute.xlu2 %7254  ;;  %v4750_v46 = vld [vmem:[#allocation3 + $0x94] sm:$0xf] }
 0x356   : > { %v5634_v7 = vsel %vm9011_vm14, %v5629_v50, %v5633_v11  ;;  %v5639_v58 = vrot.slane %v5638_v47, 4  ;;  %v6455_v34 = vsel %vm8963_vm7, %v8319_v52, %v6454_v39  ;;  %v6456_v35 = vrot.slane %v6454_v39, 4  ;;  %v4722_v50 = vld [vmem:[#allocation3 + $0xc8] sm:$0x1]  ;;  %v6839_v29 = vpop.permute.xlu0 %6838 }
 0x357   : > { %v6890_v41 = vunpack.c.l.b16 %v5634_v7  ;;  %v4230_v25 = vpack.c.bf16 %v4198_v51, %v4198_v51  ;;  %v4199_v5 = vmax.f32 %v4166_v42, 0.0  ;;  %v4870_v9 = vshrl.u32 %v4733_v1, 16  ;;  %v6743_v42 = vpop.permute.xlu1 %6742 }
 0x358   : > { %v5644_v48 = vsel %vm9011_vm14, %v5639_v58, %v5643_v61  ;;  %v6458_v63 = vsel %vm8963_vm7, %v6456_v35, %v6457_v24  ;;  %v4873_v40 = vshll.u32 %v4733_v1, 16  ;;  %v7210_v15 = vunpack.c.l.b16 %v6455_v34  ;;  %v4749_v24 = vld [vmem:[#allocation3 + $0x90] sm:$0xf] }
 0x359   : > { %v6891_v10 = vunpack.c.l.b16 %v5644_v48  ;;  %v4544_v26 = vshrl.u32 %v4230_v25, 16  ;;  %v7211_v4 = vunpack.c.l.b16 %v6458_v63  ;;  %v4231_v12 = vpack.c.bf16 %v4199_v5, %v4199_v5 }
 0x35a   : > { %v4872_v14 = vrot.slane %v4870_v9, 4  ;;  %v4875_v55 = vrot.slane %v4873_v40, 5  ;;  %v4879_v36 = vshll.u32 %v10927_v23, 16  ;;  %v4547_v6 = vshll.u32 %v4230_v25, 16  ;;  %v4769_v9 = vld [vmem:[#allocation3 + $0x98] sm:$0x1] }
 0x35b   : > { %v6912_v21 = vpack.c.b16 %v6891_v10, %v6890_v41  ;;  %v4546_v45 = vrot.slane %v4544_v26, 7  ;;  %7098 = vrot.lane.b32.xlu1 %v8672_v49, %s8748_s8  ;;  %v4883_v62 = vshrl.u32 %v10927_v23, 16  ;;  %v7240_v19 = vpack.c.b16 %v7211_v4, %v7210_v15 }
 0x35c   : > { %7114 = vrot.lane.b32.xlu2 %v8680_v0, %s8748_s8  ;;  %v4552_v44 = vshrl.u32 %v4231_v12, 16  ;;  %v4876_v28 = vor.u32 %v4875_v55, %v4872_v14  ;;  %v4881_v27 = vrot.slane %v4879_v36, 5  ;;  %v4555_v18 = vshll.u32 %v4231_v12, 16 }
 0x35d   : > { %6938 = vrot.lane.b32.xlu0 %v6912_v21, %s8747_s7  ;;  %v4549_v60 = vor.u32 %v4547_v6, %v4546_v45  ;;  %v4885_v11 = vrot.slane %v4883_v62, 4  ;;  %v4889_v33 = vshll.u32 %v10930_v13, 16  ;;  %v6039_v23 = vshrl.u32 %v5946_v54, 16 }
 0x35e   : > { %v4554_v38 = vrot.slane %v4552_v44, 7  ;;  %v4877_v22 = vrot.slane %v4876_v28, 4  ;;  %v6042_v56 = vshll.u32 %v5946_v54, 16  ;;  %v4550_v57 = vrot.slane %v4546_v45, 4  ;;  %v5775_v54 = vld [vmem:[#allocation3 + $0x84] sm:$0xe] }
 0x35f   : > { %v4719_v1 = vsel %vm10460_vm9, %v4549_v60, %v4718_v17  ;;  %v4886_v47 = vor.u32 %v4885_v11, %v4881_v27  ;;  %v6048_v52 = vshll.u32 %v10956_v43, 16  ;;  %v6041_v51 = vrot.slane %v6039_v23, 4  ;;  %v5162_v17 = vld [vmem:[#allocation3 + $0x3c] sm:$0xe]  ;;  %v11020_v60 = vld [vmem:[#allocation3 + $0x40] sm:$0xf] }
 0x360   : > { %4720 = vst [vmem:[#allocation3 + $0xc0] sm:$0xf] %v4719_v1  ;;  %v4557_v39 = vor.u32 %v4555_v18, %v4554_v38  ;;  %v4559_v61 = vrot.slane %v4554_v38, 4  ;;  %v4882_v13 = vsel %vm9011_vm14, %v4877_v22, %v4881_v27  ;;  %v4891_v58 = vrot.slane %v4889_v33, 5  ;;  %v6665_v18 = vpop.permute.xlu1 %6664 }
 0x361   : > { %v4887_v7 = vrot.slane %v4886_v47, 4  ;;  %v6622_v34 = vunpack.c.l.b16 %v4882_v13  ;;  %v6044_v35 = vrot.slane %v6042_v56, 5  ;;  %v6050_v25 = vrot.slane %v6048_v52, 5 }
 0x362   : > { %v4558_v8 = vsel %vm8981_vm10, %v4550_v57, %v4557_v39  ;;  %v4723_v41 = vsel %vm10484_vm8, %v4559_v61, %v4722_v50  ;;  %v6052_v5 = vshrl.u32 %v10956_v43, 16  ;;  %v5062_v40 = vshrl.u32 %v4749_v24, 16 }
 0x363   : > { %4721 = vst.msk [vmem:[#allocation3 + $0xc4] sm:$0xf] %vm4232_vm1, %v4558_v8  ;;  %v4892_v48 = vsel %vm9011_vm14, %v4887_v7, %v4891_v58  ;;  %v6045_v63 = vor.u32 %v6044_v35, %v6041_v51  ;;  %v5065_v10 = vshll.u32 %v4749_v24, 16  ;;  %v6058_v31 = vshll.u32 %v10962_v2, 16  ;;  %v11015_v2 = vpop.permute.xlu2 %7000  ;;  %v11038_v24 = vpop.permute.xlu0 %7094  ;;  %v6384_v35 = vld [vmem:[#allocation3 + $0x90] sm:$0xe] }
 0x364   : > { %4724 = vst [vmem:[#allocation3 + $0xc8] sm:$0x1] %v4723_v41  ;;  %v6623_v26 = vunpack.c.l.b16 %v4892_v48  ;;  %v6054_v49 = vrot.slane %v6052_v5, 4  ;;  %v5071_v15 = vshll.u32 %v4750_v46, 16  ;;  %v5064_v43 = vrot.slane %v5062_v40, 4 }
 0x365   : > { %7258 = vrot.lane.b32.xlu0 %v7240_v19, %s8750_s10  ;;  %v6046_v4 = vrot.slane %v6045_v63, 4  ;;  %v5067_v0 = vrot.slane %v5065_v10, 5  ;;  %v5075_v12 = vshrl.u32 %v4750_v46, 16  ;;  %v5081_v21 = vshll.u32 %v4769_v9, 16  ;;  %v4735_v46 = vld [vmem:[#allocation3 + $0x3c] sm:$0xf] }
 0x366   : > { %v6650_v14 = vpack.c.b16 %v6623_v26, %v6622_v34  ;;  %v6055_v55 = vor.u32 %v6054_v49, %v6050_v25  ;;  %v5073_v36 = vrot.slane %v5071_v15, 5  ;;  %v6060_v44 = vrot.slane %v6058_v31, 5  ;;  %v5984_v5 = vld [vmem:[#allocation3 + $0x98] sm:$0x1] }
 0x367   : > { %v6051_v45 = vsel %vm9011_vm14, %v6046_v4, %v6050_v25  ;;  %v5068_v6 = vor.u32 %v5067_v0, %v5064_v43  ;;  %v5077_v62 = vrot.slane %v5075_v12, 4  ;;  %v7335_v27 = vsel %vm3722_vm15, %v10984_v16, %v6743_v42  ;;  %v11027_v16 = vld [vmem:[#allocation3 + $0x44] sm:$0x1]  ;;  %v8639_v4 = vld [vmem:[#allocation3 + $0xc] sm:$0xff] }
 0x368   : > { %6670 = vrot.lane.b32.xlu1 %v6650_v14, %s8745_s27  ;;  %v6056_v19 = vrot.slane %v6055_v55, 4  ;;  %v7130_v28 = vunpack.c.l.b16 %v6051_v45  ;;  %v5083_v38 = vrot.slane %v5081_v21, 5  ;;  %v8311_v23 = vrot.slane %v5775_v54, 9  ;;  %v5962_v12 = vld [vmem:[#allocation3 + $0x90] sm:$0xf] }
 0x369   : > { %v5069_v11 = vrot.slane %v5068_v6, 4  ;;  %v5078_v33 = vor.u32 %v5077_v62, %v5073_v36  ;;  %v5901_v56 = vrot.slane %v10942_v32, 5  ;;  %v8290_v57 = vrot.slane %v5162_v17, 9  ;;  %v11036_v32 = vld [vmem:[#allocation3 + $0x94] sm:$0xf]  ;;  %v6919_v6 = vpop.permute.xlu1 %6918 }
 0x36a   : > { %v6061_v22 = vsel %vm9011_vm14, %v6056_v19, %v6060_v44  ;;  %v5258_v52 = vrot.slane %v11020_v60, 5  ;;  %v11031_v39 = vsel %vm7366_vm3, %v7335_v27, %v6839_v29  ;;  %v5904_v51 = vrot.slane %v10948_v37, 5 }
 0x36b   : > { %v7131_v1 = vunpack.c.l.b16 %v6061_v22  ;;  %v5074_v50 = vsel %vm9011_vm14, %v5069_v11, %v5073_v36  ;;  %v5079_v47 = vrot.slane %v5078_v33, 4  ;;  %v5902_v61 = vsel %vm8963_vm7, %v8311_v23, %v5901_v56  ;;  %v11051_v14 = vpop.permute.xlu2 %6666  ;;  %v8657_v33 = vld [vmem:[#allocation3 + $0x30] sm:$0xff] }
 0x36c   : > { %v5903_v13 = vrot.slane %v5901_v56, 4  ;;  %v6638_v58 = vunpack.c.l.b16 %v5074_v50  ;;  %v5259_v34 = vsel %vm8963_vm7, %v8290_v57, %v5258_v52  ;;  %v5260_v25 = vrot.slane %v5258_v52, 4 }
 0x36d   : > { %v7160_v42 = vpack.c.b16 %v7131_v1, %v7130_v28  ;;  %v5084_v7 = vsel %vm9011_vm14, %v5079_v47, %v5083_v38  ;;  %v5261_v37 = vrot.slane %v11027_v16, 5  ;;  %v6970_v48 = vunpack.c.l.b16 %v5902_v61  ;;  %v11067_v47 = vpop.permute.xlu0 %6840 }
 0x36e   : > { %v6639_v8 = vunpack.c.l.b16 %v5084_v7  ;;  %v5905_v41 = vsel %vm8963_vm7, %v5903_v13, %v5904_v51  ;;  %v6704_v9 = vunpack.c.l.b16 %v5259_v34  ;;  %v6510_v40 = vrot.slane %v11036_v32, 5  ;;  %v4751_v13 = vld [vmem:[#allocation3 + $0x9c] sm:$0xf] }
 0x36f   : > { %7178 = vrot.lane.b32.xlu2 %v7160_v42, %s8757_s12  ;;  %v6971_v63 = vunpack.c.l.b16 %v5905_v41  ;;  %v5262_v26 = vsel %vm8963_vm7, %v5260_v25, %v5261_v37  ;;  %v8327_v49 = vrot.slane %v6384_v35, 9  ;;  %v4894_v31 = vshrl.u32 %v4735_v46, 16 }
 0x370   : > { %v6658_v10 = vpack.c.b16 %v6639_v8, %v6638_v58  ;;  %v6705_v29 = vunpack.c.l.b16 %v5262_v26  ;;  %v6512_v43 = vrot.slane %v6510_v40, 4  ;;  %v6513_v0 = vrot.slane %v5984_v5, 5  ;;  %v4752_v8 = vld [vmem:[#allocation3 + $0xa0] sm:$0xf] }
 0x371   : > { %v6992_v15 = vpack.c.b16 %v6971_v63, %v6970_v48  ;;  %v6511_v55 = vsel %vm8963_vm7, %v8327_v49, %v6510_v40  ;;  %v4896_v36 = vrot.slane %v4894_v31, 4  ;;  %v4897_v21 = vshll.u32 %v4735_v46, 16  ;;  %v4770_v40 = vld [vmem:[#allocation3 + $0xa4] sm:$0x1] }
 0x372   : > { %6686 = vrot.lane.b32.xlu0 %v6658_v10, %s8745_s27  ;;  %v4903_v45 = vshll.u32 %v11020_v60, 16  ;;  %v11059_v62 = vsel %vm585_vm2, %v8639_v4, %v6665_v18  ;;  %v6514_v54 = vsel %vm8963_vm7, %v6512_v43, %v6513_v0  ;;  %v4907_v17 = vshrl.u32 %v11020_v60, 16 }
 0x373   : > { %7018 = vrot.lane.b32.xlu1 %v6992_v15, %s8756_s11  ;;  %v4913_v19 = vshll.u32 %v11027_v16, 16  ;;  %v7227_v44 = vunpack.c.l.b16 %v6514_v54  ;;  %v4899_v28 = vrot.slane %v4897_v21, 5  ;;  %v6231_v11 = vshrl.u32 %v5962_v12, 16  ;;  %v11080_v26 = vpop.permute.xlu2 %6936  ;;  %v4763_v54 = vld [vmem:[#allocation3 + $0x50] sm:$0x1] }
 0x374   : > { %v4905_v27 = vrot.slane %v4903_v45, 5  ;;  %v7226_v38 = vunpack.c.l.b16 %v6511_v55  ;;  %v4909_v22 = vrot.slane %v4907_v17, 4  ;;  %v6234_v23 = vshll.u32 %v5962_v12, 16  ;;  %v4737_v12 = vld [vmem:[#allocation3 + $0x48] sm:$0xf] }
 0x375   : > { %v6240_v56 = vshll.u32 %v11036_v32, 16  ;;  %v6731_v57 = vpack.c.b16 %v6705_v29, %v6704_v9  ;;  %v4900_v18 = vor.u32 %v4899_v28, %v4896_v36  ;;  %v6233_v1 = vrot.slane %v6231_v11, 4  ;;  %v4738_v55 = vld [vmem:[#allocation3 + $0x4c] sm:$0xf] }
 0x376   : > { %v6244_v50 = vshrl.u32 %v11036_v32, 16  ;;  %v4910_v60 = vor.u32 %v4909_v22, %v4905_v27  ;;  %v6236_v16 = vrot.slane %v6234_v23, 5  ;;  %v6250_v61 = vshll.u32 %v5984_v5, 16  ;;  %v11075_v5 = vpop.permute.xlu1 %6856 }
 0x377   : > { %6844 = vrot.lane.b32.xlu2 %v8657_v33, %s8755_s30  ;;  %v6242_v52 = vrot.slane %v6240_v56, 5  ;;  %v7248_v51 = vpack.c.b16 %v7227_v44, %v7226_v38  ;;  %v4901_v42 = vrot.slane %v4900_v18, 4  ;;  %v4915_v7 = vrot.slane %v4913_v19, 5  ;;  %v11091_v38 = vpop.permute.xlu0 %6760 }
 0x378   : > { %v6246_v58 = vrot.slane %v6244_v50, 4  ;;  %v4911_v34 = vrot.slane %v4910_v60, 4  ;;  %v6237_v35 = vor.u32 %v6236_v16, %v6233_v1  ;;  %v6252_v46 = vrot.slane %v6250_v61, 5  ;;  %v5163_v16 = vld [vmem:[#allocation3 + $0x48] sm:$0xe] }
 0x379   : > { %vm7431_vm10 = vcmask 162816   ;;  %v4906_v32 = vsel %vm9011_vm14, %v4901_v42, %v4905_v27  ;;  %v7400_v25 = vsel %vm3771_vm0, %v11031_v39, %v6919_v6  ;;  %v5086_v37 = vshrl.u32 %v4751_v13, 16  ;;  %v4753_v42 = vld [vmem:[#allocation3 + $0xa8] sm:$0xf] }
 0x37a   : > { %6752 = vrot.lane.b32.xlu0 %v6731_v57, %s8749_s9  ;;  %v6247_v41 = vor.u32 %v6246_v58, %v6242_v52  ;;  %v4916_v48 = vsel %vm9011_vm14, %v4911_v34, %v4915_v7  ;;  %v6624_v63 = vunpack.c.l.b16 %v4906_v32  ;;  %v6238_v9 = vrot.slane %v6237_v35, 4 }
 0x37b   : > { %7274 = vrot.lane.b32.xlu1 %v7248_v51, %s8750_s10  ;;  %v5089_v10 = vshll.u32 %v4751_v13, 16  ;;  %v6625_v49 = vunpack.c.l.b16 %v4916_v48  ;;  %v5088_v15 = vrot.slane %v5086_v37, 4  ;;  %v5095_v29 = vshll.u32 %v4752_v8, 16  ;;  %v11107_v48 = vpop.permute.xlu2 %7256 }
 0x37c   : > { %v6248_v31 = vrot.slane %v6247_v41, 4  ;;  %v6243_v39 = vsel %vm9011_vm14, %v6238_v9, %v6242_v52  ;;  %v11086_v4 = vsel %vm7431_vm10, %v7400_v25, %v10972_v53  ;;  %v5099_v0 = vshrl.u32 %v4752_v8, 16 }
 0x37d   : > { %v5091_v43 = vrot.slane %v5089_v10, 5  ;;  %v6651_v36 = vpack.c.b16 %v6625_v49, %v6624_v63  ;;  %v5097_v45 = vrot.slane %v5095_v29, 5  ;;  %v5105_v6 = vshll.u32 %v4770_v40, 16 }
 0x37e   : > { %v6253_v21 = vsel %vm9011_vm14, %v6248_v31, %v6252_v46  ;;  %v7146_v17 = vunpack.c.l.b16 %v6243_v39  ;;  %v5101_v28 = vrot.slane %v5099_v0, 4  ;;  %v4918_v27 = vshrl.u32 %v4737_v12, 16  ;;  %v4754_v46 = vld [vmem:[#allocation3 + $0xac] sm:$0xf]  ;;  %v11103_v8 = vpop.permute.xlu1 %7174  ;;  %v4771_v0 = vld [vmem:[#allocation3 + $0xb0] sm:$0x1] }
 0x37f   : > { %v7147_v19 = vunpack.c.l.b16 %v6253_v21  ;;  %v5092_v44 = vor.u32 %v5091_v43, %v5088_v15  ;;  %6672 = vrot.lane.b32.xlu2 %v6651_v36, %s8745_s27  ;;  %v4921_v53 = vshll.u32 %v4737_v12, 16  ;;  %v4927_v11 = vshll.u32 %v4738_v55, 16  ;;  %v7565_v12 = vld [vmem:[%s11897_s4 + $0x10] sm:$0x3] }
 0x380   : > { %v4931_v33 = vshrl.u32 %v4738_v55, 16  ;;  %v5102_v56 = vor.u32 %v5101_v28, %v5097_v45  ;;  %v4937_v57 = vshll.u32 %v4763_v54, 16  ;;  %v4920_v18 = vrot.slane %v4918_v27, 4  ;;  %v5340_v28 = vld [vmem:[#allocation3 + $0x34] sm:$0xf]  ;;  %v11122_v27 = vpop.permute.xlu0 %6680 }
 0x381   : > { %v7168_v22 = vpack.c.b16 %v7147_v19, %v7146_v17  ;;  %v5093_v23 = vrot.slane %v5092_v44, 4  ;;  %v4923_v1 = vrot.slane %v4921_v53, 5  ;;  %v4929_v50 = vrot.slane %v4927_v11, 5 }
 0x382   : > { %v4933_v60 = vrot.slane %v4931_v33, 4  ;;  %v5103_v61 = vrot.slane %v5102_v56, 4  ;;  %v5107_v13 = vrot.slane %v5105_v6, 5  ;;  %v7337_v51 = vsel %vm3722_vm15, %v11059_v62, %v10935_v3  ;;  %v8673_v62 = vld [vmem:[#allocation3 + $0x3c] sm:$0xff]  ;;  %v5339_v6 = vld [vmem:[#allocation3 + $0x30] sm:$0xf] }
 0x383   : > { %7194 = vrot.lane.b32.xlu0 %v7168_v22, %s8757_s12  ;;  %v5098_v52 = vsel %vm9011_vm14, %v5093_v23, %v5097_v45  ;;  %v4924_v7 = vor.u32 %v4923_v1, %v4920_v18  ;;  %v4939_v34 = vrot.slane %v4937_v57, 5  ;;  %v11101_v35 = vsel %vm7366_vm3, %v7337_v51, %v11067_v47  ;;  %v5368_v57 = vld [vmem:[#allocation3 + $0x38] sm:$0x1] }
 0x384   : > { %v4934_v58 = vor.u32 %v4933_v60, %v4929_v50  ;;  %v5108_v32 = vsel %vm9011_vm14, %v5103_v61, %v5107_v13  ;;  %v6640_v41 = vunpack.c.l.b16 %v5098_v52  ;;  %v8291_v25 = vrot.slane %v5163_v16, 9 }
 0x385   : > { %v5265_v37 = vrot.slane %v4738_v55, 5  ;;  %v6641_v3 = vunpack.c.l.b16 %v5108_v32  ;;  %v4925_v63 = vrot.slane %v4924_v7, 4  ;;  %v5110_v40 = vshrl.u32 %v4753_v42, 16 }
 0x386   : > { %v4935_v9 = vrot.slane %v4934_v58, 4  ;;  %v5268_v49 = vrot.slane %v4763_v54, 5  ;;  %v5113_v47 = vshll.u32 %v4753_v42, 16  ;;  %v5119_v31 = vshll.u32 %v4754_v46, 16  ;;  %v5768_v42 = vld [vmem:[#allocation3 + $0x30] sm:$0xe]  ;;  %v11125_v7 = vpop.permute.xlu1 %6920 }
 0x387   : > { %v5267_v10 = vrot.slane %v5265_v37, 4  ;;  %v6659_v15 = vpack.c.b16 %v6641_v3, %v6640_v41  ;;  %7100 = vrot.lane.b32.xlu2 %v8673_v62, %s8748_s8  ;;  %v4930_v29 = vsel %vm9011_vm14, %v4925_v63, %v4929_v50  ;;  %v5266_v43 = vsel %vm8963_vm7, %v8291_v25, %v5265_v37  ;;  %v11127_v41 = vpop.permute.xlu2 %6858  ;;  %v8687_v63 = vld [vmem:[%s11897_s4 + $0x8] sm:$0xff] }
 0x388   : > { %v4940_v39 = vsel %vm9011_vm14, %v4935_v9, %v4939_v34  ;;  %v6626_v55 = vunpack.c.l.b16 %v4930_v29  ;;  %v5112_v45 = vrot.slane %v5110_v40, 4  ;;  %v5115_v17 = vrot.slane %v5113_v47, 5  ;;  %v11134_v47 = vld [vmem:[#allocation3 + $0x58] sm:$0xf] }
 0x389   : > { %v6627_v36 = vunpack.c.l.b16 %v4940_v39  ;;  %v5269_v21 = vsel %vm8963_vm7, %v5267_v10, %v5268_v49  ;;  %6688 = vrot.lane.b32.xlu1 %v6659_v15, %s8745_s27  ;;  %v5121_v19 = vrot.slane %v5119_v31, 5  ;;  %v5123_v44 = vshrl.u32 %v4754_v46, 16  ;;  %v5164_v31 = vld [vmem:[#allocation3 + $0x54] sm:$0xe] }
 0x38a   : > { %v6707_v54 = vunpack.c.l.b16 %v5269_v21  ;;  %v6706_v11 = vunpack.c.l.b16 %v5266_v43  ;;  %v5129_v33 = vshll.u32 %v4771_v0, 16  ;;  %v7579_v22 = vunpack.c.l.b16 %v7565_v12  ;;  %v11141_v21 = vld [vmem:[#allocation3 + $0x5c] sm:$0x1] }
 0x38b   : > { %v6652_v53 = vpack.c.b16 %v6627_v36, %v6626_v55  ;;  %v5116_v23 = vor.u32 %v5115_v17, %v5112_v45  ;;  %v5125_v56 = vrot.slane %v5123_v44, 4  ;;  %v5454_v18 = vshrl.u32 %v5339_v6, 16  ;;  %v11147_v44 = vpop.permute.xlu0 %6746 }
 0x38c   : > { %v6732_v1 = vpack.c.b16 %v6707_v54, %v6706_v11  ;;  %v7582_v50 = vpack.c.b16 %v7579_v22, %v7579_v22  ;;  %v5457_v60 = vshll.u32 %v5339_v6, 16  ;;  %v5463_v16 = vshll.u32 %v5340_v28, 16 }
 0x38d   : > { %6674 = vrot.lane.b32.xlu0 %v6652_v53, %s8745_s27  ;;  %v5117_v52 = vrot.slane %v5116_v23, 4  ;;  %v5126_v61 = vor.u32 %v5125_v56, %v5121_v19  ;;  %v5456_v13 = vrot.slane %v5454_v18, 4  ;;  %v5467_v51 = vshrl.u32 %v5340_v28, 16  ;;  %v11156_v18 = vld [vmem:[#allocation3 + $0x40] sm:$0xf] }
 0x38e   : > { %v7620_v58 = vsel %vm7618_vm11, %v7582_v50, 0  ;;  %v5459_v34 = vrot.slane %v5457_v60, 5  ;;  %v5465_v46 = vrot.slane %v5463_v16, 5  ;;  %v5473_v32 = vshll.u32 %v5368_v57, 16 }
 0x38f   : > { %v5122_v25 = vsel %vm9011_vm14, %v5117_v52, %v5121_v19  ;;  %v5127_v37 = vrot.slane %v5126_v61, 4  ;;  %v5131_v3 = vrot.slane %v5129_v33, 5  ;;  %7627 = vmatpush.bf16.msra.mxu1 %v7620_v58  ;;  %v5469_v62 = vrot.slane %v5467_v51, 4  ;;  %8693 = vmatpush.bf16.msra.mxu3 %v7620_v58  ;;  %v8686_v19 = vld [vmem:[%s11897_s4] sm:$0xff]  ;;  %v5948_v33 = vld [vmem:[#allocation3 + $0x3c] sm:$0xf]  ;;  %v11168_v58 = vpop.permute.xlu1 %6842 }
 0x390   : > { %v6642_v9 = vunpack.c.l.b16 %v5122_v25  ;;  %v5460_v40 = vor.u32 %v5459_v34, %v5456_v13  ;;  %v8304_v10 = vrot.slane %v5768_v42, 9  ;;  %v5852_v49 = vrot.slane %v5340_v28, 5  ;;  %v11166_v13 = vld [vmem:[#allocation3 + $0x44] sm:$0x1] }
 0x391   : > { %6754 = vrot.lane.b32.xlu1 %v6732_v1, %s8749_s9  ;;  %v5132_v15 = vsel %vm9011_vm14, %v5127_v37, %v5131_v3  ;;  %v5470_v29 = vor.u32 %v5469_v62, %v5465_v46  ;;  %v5475_v39 = vrot.slane %v5473_v32, 5  ;;  %v5855_v43 = vrot.slane %v5368_v57, 5  ;;  %v4739_v62 = vld [vmem:[#allocation3 + $0x54] sm:$0xf] }
 0x392   : > { %v6643_v0 = vunpack.c.l.b16 %v5132_v15  ;;  %v5461_v12 = vrot.slane %v5460_v40, 4  ;;  %v5853_v55 = vsel %vm8963_vm7, %v8304_v10, %v5852_v49  ;;  %v5854_v36 = vrot.slane %v5852_v49, 4 }
 0x393   : > { %v5471_v45 = vrot.slane %v5470_v29, 4  ;;  %7628 = vmatpush.bf16.msra.mxu1 %v8687_v63  ;;  %v6956_v6 = vunpack.c.l.b16 %v5853_v55  ;;  %v8292_v54 = vrot.slane %v5164_v31, 9  ;;  %v5272_v17 = vrot.slane %v11134_v47, 5  ;;  %8694 = vmatpush.bf16.msra.mxu3 %v8687_v63  ;;  %v5168_v55 = vld [vmem:[#allocation3 + $0x84] sm:$0xe] }
 0x394   : > { %v6660_v28 = vpack.c.b16 %v6643_v0, %v6642_v9  ;;  %v5466_v53 = vsel %vm9011_vm14, %v5461_v12, %v5465_v46  ;;  %v5856_v11 = vsel %vm8963_vm7, %v5854_v36, %v5855_v43  ;;  %v5275_v57 = vrot.slane %v11141_v21, 5  ;;  %v11184_v36 = vpop.permute.xlu0 %7096 }
 0x395   : > { %v5476_v22 = vsel %vm9011_vm14, %v5471_v45, %v5475_v39  ;;  %v6876_v23 = vunpack.c.l.b16 %v5466_v53  ;;  %v6957_v56 = vunpack.c.l.b16 %v5856_v11  ;;  %v5273_v50 = vsel %vm8963_vm7, %v8292_v54, %v5272_v17  ;;  %v4755_v11 = vld [vmem:[#allocation3 + $0xb4] sm:$0xf] }
 0x396   : > { %6690 = vrot.lane.b32.xlu2 %v6660_v28, %s8745_s27  ;;  %v6877_v1 = vunpack.c.l.b16 %v5476_v22  ;;  %v5274_v60 = vrot.slane %v5272_v17, 4  ;;  %v7465_v16 = vsel %vm3804_vm4, %v11086_v4, %v11038_v24  ;;  %v6063_v51 = vshrl.u32 %v5948_v33, 16  ;;  %v11174_v4 = vpop.permute.xlu2 %6922 }
 0x397   : > { %v6985_v52 = vpack.c.b16 %v6957_v56, %v6956_v6  ;;  %7629 = vmatpush.bf16.msra.mxu1 %v8686_v19  ;;  %v7498_v61 = vsel %vm7496_vm12, %v7465_v16, %v11103_v8  ;;  %v6066_v42 = vshll.u32 %v5948_v33, 16  ;;  %8695 = vmatpush.bf16.msra.mxu3 %v8686_v19  ;;  %v6072_v32 = vshll.u32 %v11156_v18, 16 }
 0x398   : > { %v6905_v34 = vpack.c.b16 %v6877_v1, %v6876_v23  ;;  %v5276_v46 = vsel %vm8963_vm7, %v5274_v60, %v5275_v57  ;;  %v6076_v24 = vshrl.u32 %v11156_v18, 16  ;;  %v6708_v8 = vunpack.c.l.b16 %v5273_v50  ;;  %v8724_v23 = vld [vmem:[#allocation3 + $0x88] sm:$0xf]  ;;  %v8725_v60 = vld [vmem:[#allocation3 + $0x8c] sm:$0x1] }
 0x399   : > { %7004 = vrot.lane.b32.xlu1 %v6985_v52, %s8756_s11  ;;  %v6709_v25 = vunpack.c.l.b16 %v5276_v46  ;;  %v6065_v37 = vrot.slane %v6063_v51, 4  ;;  %v6068_v3 = vrot.slane %v6066_v42, 5  ;;  %v6074_v63 = vrot.slane %v6072_v32, 5  ;;  %v4756_v52 = vld [vmem:[#allocation3 + $0xb8] sm:$0xf] }
 0x39a   : > { %6924 = vrot.lane.b32.xlu0 %v6905_v34, %s8747_s7  ;;  %v6078_v9 = vrot.slane %v6076_v24, 4  ;;  %v6082_v40 = vshll.u32 %v11166_v13, 16  ;;  %v7530_v10 = vsel %vm3837_vm5, %v7498_v61, %v10996_v59  ;;  %v4942_v29 = vshrl.u32 %v4739_v62, 16  ;;  %v11192_v61 = vpop.permute.xlu1 %6762 }
 0x39b   : > { %v6733_v49 = vpack.c.b16 %v6709_v25, %v6708_v8  ;;  %v6069_v31 = vor.u32 %v6068_v3, %v6065_v37  ;;  %v4945_v39 = vshll.u32 %v4739_v62, 16  ;;  %8533 = vmatmul.msk.bf16.vlgmr.msra.gmra.mxu1 %vm7585_vm13, %v7530_v10  ;;  %v4951_v0 = vshll.u32 %v11134_v47, 16  ;;  %v4772_v62 = vld [vmem:[#allocation3 + $0xbc] sm:$0x1] }
 0x39c   : > { %v6079_v15 = vor.u32 %v6078_v9, %v6074_v63  ;;  %v4955_v12 = vshrl.u32 %v11134_v47, 16  ;;  %v6084_v59 = vrot.slane %v6082_v40, 5  ;;  %v4944_v6 = vrot.slane %v4942_v29, 4 }
 0x39d   : > { %v6070_v43 = vrot.slane %v6069_v31, 4  ;;  %v4947_v54 = vrot.slane %v4945_v39, 5  ;;  %v4953_v19 = vrot.slane %v4951_v0, 5  ;;  %v4961_v53 = vshll.u32 %v11141_v21, 16 }
 0x39e   : > { %6756 = vrot.lane.b32.xlu2 %v6733_v49, %s8749_s9  ;;  %v6080_v45 = vrot.slane %v6079_v15, 4  ;;  %v4957_v28 = vrot.slane %v4955_v12, 4  ;;  %v8296_v22 = vrot.slane %v5168_v55, 9  ;;  %v5300_v56 = vrot.slane %v8724_v23, 5  ;;  %v11196_v46 = vpop.permute.xlu2 %6684  ;;  %v6377_v15 = vld [vmem:[#allocation3 + $0x3c] sm:$0xe] }
 0x39f   : > { %v6075_v17 = vsel %vm9011_vm14, %v6070_v43, %v6074_v63  ;;  %v4948_v33 = vor.u32 %v4947_v54, %v4944_v6  ;;  %v5303_v16 = vrot.slane %v8725_v60, 5  ;;  %v5134_v34 = vshrl.u32 %v4755_v11, 16  ;;  %v5356_v12 = vld [vmem:[#allocation3 + $0x94] sm:$0xf]  ;;  %v5776_v55 = vld [vmem:[#allocation3 + $0x90] sm:$0xe]  ;;  %v11205_v54 = vpop.permute.xlu0 %7016 }
 0x3a0   : > { %v6085_v47 = vsel %vm9011_vm14, %v6080_v45, %v6084_v59  ;;  %v7132_v57 = vunpack.c.l.b16 %v6075_v17  ;;  %v4958_v50 = vor.u32 %v4957_v28, %v4953_v19  ;;  %v5301_v21 = vsel %vm8963_vm7, %v8296_v22, %v5300_v56 }
 0x3a1   : > { %v7133_v1 = vunpack.c.l.b16 %v6085_v47  ;;  %v4949_v51 = vrot.slane %v4948_v33, 4  ;;  %v5302_v42 = vrot.slane %v5300_v56, 4  ;;  %v4963_v8 = vrot.slane %v4961_v53, 5 }
 0x3a2   : > { %v4959_v24 = vrot.slane %v4958_v50, 4  ;;  %v5137_v25 = vshll.u32 %v4755_v11, 16  ;;  %v5136_v63 = vrot.slane %v5134_v34, 4  ;;  %v5143_v9 = vshll.u32 %v4756_v52, 16  ;;  %v11208_v11 = vld [vmem:[#allocation3 + $0x98] sm:$0x1] }
 0x3a3   : > { %v7161_v32 = vpack.c.b16 %v7133_v1, %v7132_v57  ;;  %v4954_v37 = vsel %vm9011_vm14, %v4949_v51, %v4953_v19  ;;  %v5304_v3 = vsel %vm8963_vm7, %v5302_v42, %v5303_v16  ;;  %v6716_v10 = vunpack.c.l.b16 %v5301_v21  ;;  %v8647_v50 = vld [vmem:[#allocation3 + $0x6c] sm:$0xff]  ;;  %v11218_v51 = vpop.permute.xlu1 %6682 }
 0x3a4   : > { %v4964_v40 = vsel %vm9011_vm14, %v4959_v24, %v4963_v8  ;;  %v6717_v49 = vunpack.c.l.b16 %v5304_v3  ;;  %v5139_v31 = vrot.slane %v5137_v25, 5  ;;  %v6628_v29 = vunpack.c.l.b16 %v4954_v37 }
 0x3a5   : > { %7180 = vrot.lane.b32.xlu0 %v7161_v32, %s8757_s12  ;;  %v6629_v39 = vunpack.c.l.b16 %v4964_v40  ;;  %v5145_v43 = vrot.slane %v5143_v9, 5  ;;  %v5147_v0 = vshrl.u32 %v4756_v52, 16  ;;  %v5153_v6 = vshll.u32 %v4772_v62, 16  ;;  %v5355_v52 = vld [vmem:[#allocation3 + $0x90] sm:$0xf] }
 0x3a6   : > { %v6737_v45 = vpack.c.b16 %v6717_v49, %v6716_v10  ;;  %v5140_v59 = vor.u32 %v5139_v31, %v5136_v63  ;;  %v8320_v28 = vrot.slane %v6377_v15, 9  ;;  %v6461_v53 = vrot.slane %v11156_v18, 5  ;;  %v11224_v24 = vpop.permute.xlu2 %7192  ;;  %v4741_v40 = vld [vmem:[#allocation3 + $0x60] sm:$0xf] }
 0x3a7   : > { %v6653_v17 = vpack.c.b16 %v6629_v39, %v6628_v29  ;;  %v5149_v19 = vrot.slane %v5147_v0, 4  ;;  %v8312_v33 = vrot.slane %v5776_v55, 9  ;;  %v5908_v22 = vrot.slane %v5356_v12, 5  ;;  %v4742_v29 = vld [vmem:[#allocation3 + $0x64] sm:$0xf]  ;;  %v8640_v55 = vld [vmem:[#allocation3 + $0x18] sm:$0xff] }
 0x3a8   : > { %6764 = vrot.lane.b32.xlu2 %v6737_v45, %s8749_s9  ;;  %v5141_v47 = vrot.slane %v5140_v59, 4  ;;  %v6462_v56 = vsel %vm8963_vm7, %v8320_v28, %v6461_v53  ;;  %v6463_v57 = vrot.slane %v6461_v53, 4  ;;  %v6464_v1 = vrot.slane %v11166_v13, 5  ;;  %v11233_v28 = vpop.permute.xlu0 %7002 }
 0x3a9   : > { %6676 = vrot.lane.b32.xlu1 %v6653_v17, %s8745_s27  ;;  %v5150_v23 = vor.u32 %v5149_v19, %v5145_v43  ;;  %v5909_v18 = vsel %vm8963_vm7, %v8312_v33, %v5908_v22  ;;  %v5910_v60 = vrot.slane %v5908_v22, 4  ;;  %v5911_v16 = vrot.slane %v11208_v11, 5  ;;  %v4765_v17 = vld [vmem:[#allocation3 + $0x68] sm:$0x1] }
 0x3aa   : > { %v5146_v21 = vsel %vm9011_vm14, %v5141_v47, %v5145_v43  ;;  %v5155_v34 = vrot.slane %v5153_v6, 5  ;;  %v6465_v32 = vsel %vm8963_vm7, %v6463_v57, %v6464_v1  ;;  %v7315_v13 = vsel %vm585_vm2, %v8647_v50, %v11122_v27 }
 0x3ab   : > { %v5151_v42 = vrot.slane %v5150_v23, 4  ;;  %v7212_v8 = vunpack.c.l.b16 %v6462_v56  ;;  %v7213_v25 = vunpack.c.l.b16 %v6465_v32  ;;  %v5912_v37 = vsel %vm8963_vm7, %v5910_v60, %v5911_v16  ;;  %v5964_v23 = vld [vmem:[#allocation3 + $0x9c] sm:$0xf] }
 0x3ac   : > { %v6972_v62 = vunpack.c.l.b16 %v5909_v18  ;;  %v6973_v63 = vunpack.c.l.b16 %v5912_v37  ;;  %v5646_v9 = vshrl.u32 %v5355_v52, 16  ;;  %v6644_v10 = vunpack.c.l.b16 %v5146_v21  ;;  %v5965_v37 = vld [vmem:[#allocation3 + $0xa0] sm:$0xf] }
 0x3ad   : > { %v5156_v3 = vsel %vm9011_vm14, %v5151_v42, %v5155_v34  ;;  %v7241_v31 = vpack.c.b16 %v7213_v25, %v7212_v8  ;;  %v5649_v15 = vshll.u32 %v5355_v52, 16  ;;  %v5655_v27 = vshll.u32 %v5356_v12, 16  ;;  %v11242_v34 = vpop.permute.xlu1 %6748 }
 0x3ae   : > { %v6645_v49 = vunpack.c.l.b16 %v5156_v3  ;;  %v6993_v39 = vpack.c.b16 %v6973_v63, %v6972_v62  ;;  %v5648_v43 = vrot.slane %v5646_v9, 4  ;;  %v5659_v0 = vshrl.u32 %v5356_v12, 16  ;;  %v11247_v3 = vpop.permute.xlu2 %6750 }
 0x3af   : > { %v5651_v59 = vrot.slane %v5649_v15, 5  ;;  %v5665_v6 = vshll.u32 %v11208_v11, 16  ;;  %v4966_v19 = vshrl.u32 %v4741_v40, 16  ;;  %v5657_v53 = vrot.slane %v5655_v27, 5 }
 0x3b0   : > { %v6661_v45 = vpack.c.b16 %v6645_v49, %v6644_v10  ;;  %7020 = vrot.lane.b32.xlu2 %v6993_v39, %s8756_s11  ;;  %v5661_v47 = vrot.slane %v5659_v0, 4  ;;  %v4969_v33 = vshll.u32 %v4741_v40, 16  ;;  %v4975_v22 = vshll.u32 %v4742_v29, 16  ;;  %v5985_v49 = vld [vmem:[#allocation3 + $0xa4] sm:$0x1] }
 0x3b1   : > { %7260 = vrot.lane.b32.xlu1 %v7241_v31, %s8750_s10  ;;  %v7294_v12 = vsel %vm585_vm2, %v8640_v55, %v11051_v14  ;;  %v5652_v56 = vor.u32 %v5651_v59, %v5648_v43  ;;  %v4968_v11 = vrot.slane %v4966_v19, 4  ;;  %v4979_v57 = vshrl.u32 %v4742_v29, 16 }
 0x3b2   : > { %6692 = vrot.lane.b32.xlu0 %v6661_v45, %s8745_s27  ;;  %v5662_v1 = vor.u32 %v5661_v47, %v5657_v53  ;;  %v4971_v50 = vrot.slane %v4969_v33, 5  ;;  %v4977_v18 = vrot.slane %v4975_v22, 5  ;;  %v4985_v60 = vshll.u32 %v4765_v17, 16  ;;  %v6385_v45 = vld [vmem:[#allocation3 + $0x9c] sm:$0xe] }
 0x3b3   : > { %v7353_v16 = vsel %vm3722_vm15, %v7315_v13, %v11091_v38  ;;  %v5653_v52 = vrot.slane %v5652_v56, 4  ;;  %v4981_v21 = vrot.slane %v4979_v57, 4  ;;  %v6255_v42 = vshrl.u32 %v5964_v23, 16 }
 0x3b4   : > { %v7402_v14 = vsel %vm3771_vm0, %v11101_v35, %v11125_v7  ;;  %v5663_v32 = vrot.slane %v5662_v1, 4  ;;  %v5667_v8 = vrot.slane %v5665_v6, 5  ;;  %v4972_v25 = vor.u32 %v4971_v50, %v4968_v11  ;;  %v8665_v35 = vld [vmem:[#allocation3 + $0x90] sm:$0xff] }
 0x3b5   : > { %v5658_v62 = vsel %vm9011_vm14, %v5653_v52, %v5657_v53  ;;  %v4982_v63 = vor.u32 %v4981_v21, %v4977_v18  ;;  %v4987_v38 = vrot.slane %v4985_v60, 5  ;;  %v6257_v13 = vrot.slane %v6255_v42, 4  ;;  %v11262_v53 = vpop.permute.xlu0 %6668  ;;  %v5342_v60 = vld [vmem:[#allocation3 + $0x40] sm:$0xf] }
 0x3b6   : > { %v5668_v9 = vsel %vm9011_vm14, %v5663_v32, %v5667_v8  ;;  %v6892_v40 = vunpack.c.l.b16 %v5658_v62  ;;  %v4973_v10 = vrot.slane %v4972_v25, 4  ;;  %v6258_v31 = vshll.u32 %v5964_v23, 16  ;;  %v5369_v25 = vld [vmem:[#allocation3 + $0x44] sm:$0x1] }
 0x3b7   : > { %v6893_v7 = vunpack.c.l.b16 %v5668_v9  ;;  %v4983_v15 = vrot.slane %v4982_v63, 4  ;;  %v6264_v29 = vshll.u32 %v5965_v37, 16  ;;  %v6268_v39 = vshrl.u32 %v5965_v37, 16  ;;  %v5769_v9 = vld [vmem:[#allocation3 + $0x3c] sm:$0xe] }
 0x3b8   : > { %v7339_v43 = vsel %vm3722_vm15, %v7294_v12, %v11147_v44  ;;  %v7435_v27 = vsel %vm7431_vm10, %v7402_v14, %v11015_v2  ;;  %v4978_v0 = vsel %vm9011_vm14, %v4973_v10, %v4977_v18  ;;  %v6260_v55 = vrot.slane %v6258_v31, 5  ;;  %v5341_v2 = vld [vmem:[#allocation3 + $0x3c] sm:$0xf]  ;;  %v11277_v14 = vpop.permute.xlu1 %7112 }
 0x3b9   : > { %v6913_v59 = vpack.c.b16 %v6893_v7, %v6892_v40  ;;  %v4988_v6 = vsel %vm9011_vm14, %v4983_v15, %v4987_v38  ;;  %v6266_v17 = vrot.slane %v6264_v29, 5  ;;  %v6274_v19 = vshll.u32 %v5985_v49, 16 }
 0x3ba   : > { %6860 = vrot.lane.b32.xlu0 %v8665_v35, %s8755_s30  ;;  %v6630_v47 = vunpack.c.l.b16 %v4978_v0  ;;  %v6631_v44 = vunpack.c.l.b16 %v4988_v6  ;;  %v6261_v33 = vor.u32 %v6260_v55, %v6257_v13  ;;  %v6270_v22 = vrot.slane %v6268_v39, 4  ;;  %v5950_v39 = vld [vmem:[#allocation3 + $0x48] sm:$0xf] }
 0x3bb   : > { %v11266_v23 = vsel %vm7366_vm3, %v7339_v43, %v11168_v58  ;;  %v11270_v12 = vsel %vm3804_vm4, %v7435_v27, %v11184_v36  ;;  %6940 = vrot.lane.b32.xlu1 %v6913_v59, %s8747_s7  ;;  %v8328_v56 = vrot.slane %v6385_v45, 9  ;;  %v6517_v11 = vrot.slane %v5965_v37, 5  ;;  %v8681_v37 = vld [vmem:[#allocation3 + $0x9c] sm:$0xff]  ;;  %v5951_v45 = vld [vmem:[#allocation3 + $0x4c] sm:$0xf] }
 0x3bc   : > { %v6654_v57 = vpack.c.b16 %v6631_v44, %v6630_v47  ;;  %v7386_v1 = vsel %vm7366_vm3, %v7353_v16, %v11075_v5  ;;  %v6262_v50 = vrot.slane %v6261_v33, 4  ;;  %v6271_v18 = vor.u32 %v6270_v22, %v6266_v17  ;;  %v11282_v16 = vpop.permute.xlu2 %7114 }
 0x3bd   : > { %v6518_v52 = vsel %vm8963_vm7, %v8328_v56, %v6517_v11  ;;  %v6519_v58 = vrot.slane %v6517_v11, 4  ;;  %v6520_v21 = vrot.slane %v5985_v49, 5  ;;  %v5478_v42 = vshrl.u32 %v5341_v2, 16  ;;  %v11291_v47 = vpop.permute.xlu0 %7272  ;;  %v5978_v11 = vld [vmem:[#allocation3 + $0x50] sm:$0x1] }
 0x3be   : > { %6678 = vrot.lane.b32.xlu2 %v6654_v57, %s8745_s27  ;;  %v6267_v36 = vsel %vm9011_vm14, %v6262_v50, %v6266_v17  ;;  %v6272_v32 = vrot.slane %v6271_v18, 4  ;;  %v6276_v8 = vrot.slane %v6274_v19, 5  ;;  %v5481_v5 = vshll.u32 %v5341_v2, 16 }
 0x3bf   : > { %v6521_v62 = vsel %vm8963_vm7, %v6519_v58, %v6520_v21  ;;  %v7228_v63 = vunpack.c.l.b16 %v6518_v52  ;;  %v5480_v38 = vrot.slane %v5478_v42, 4  ;;  %v5487_v13 = vshll.u32 %v5342_v60, 16  ;;  %v8658_v58 = vld [vmem:[#allocation3 + $0x3c] sm:$0xff] }
 0x3c0   : > { %v6277_v40 = vsel %vm9011_vm14, %v6272_v32, %v6276_v8  ;;  %v7229_v10 = vunpack.c.l.b16 %v6521_v62  ;;  %v5483_v49 = vrot.slane %v5481_v5, 5  ;;  %v5491_v31 = vshrl.u32 %v5342_v60, 16  ;;  %v6378_v8 = vld [vmem:[#allocation3 + $0x48] sm:$0xe] }
 0x3c1   : > { %v7148_v35 = vunpack.c.l.b16 %v6267_v36  ;;  %v7149_v7 = vunpack.c.l.b16 %v6277_v40  ;;  %v5489_v15 = vrot.slane %v5487_v13, 5  ;;  %v5497_v29 = vshll.u32 %v5369_v25, 16 }
 0x3c2   : > { %7116 = vrot.lane.b32.xlu0 %v8681_v37, %s8748_s8  ;;  %v5484_v43 = vor.u32 %v5483_v49, %v5480_v38  ;;  %v5493_v27 = vrot.slane %v5491_v31, 4  ;;  %v8305_v0 = vrot.slane %v5769_v9, 9  ;;  %v5859_v55 = vrot.slane %v5342_v60, 5 }
 0x3c3   : > { %v7418_v59 = vsel %vm3771_vm0, %v7386_v1, %v11080_v26  ;;  %v7169_v6 = vpack.c.b16 %v7149_v7, %v7148_v35  ;;  %v7249_v17 = vpack.c.b16 %v7229_v10, %v7228_v63  ;;  %v5862_v19 = vrot.slane %v5369_v25, 5 }
 0x3c4   : > { %v5485_v44 = vrot.slane %v5484_v43, 4  ;;  %v5494_v33 = vor.u32 %v5493_v27, %v5489_v15  ;;  %v5860_v22 = vsel %vm8963_vm7, %v8305_v0, %v5859_v55  ;;  %v5861_v2 = vrot.slane %v5859_v55, 4 }
 0x3c5   : > { %7196 = vrot.lane.b32.xlu1 %v7169_v6, %s8757_s12  ;;  %v5499_v56 = vrot.slane %v5497_v29, 5  ;;  %v6087_v57 = vshrl.u32 %v5950_v39, 16  ;;  %v6090_v50 = vshll.u32 %v5950_v39, 16  ;;  %v6096_v18 = vshll.u32 %v5951_v45, 16  ;;  %v11301_v25 = vpop.permute.xlu1 %7176  ;;  %v8641_v39 = vld [vmem:[#allocation3 + $0x24] sm:$0xff] }
 0x3c6   : > { %7276 = vrot.lane.b32.xlu2 %v7249_v17, %s8750_s10  ;;  %v5490_v26 = vsel %vm9011_vm14, %v5485_v44, %v5489_v15  ;;  %v5495_v1 = vrot.slane %v5494_v33, 4  ;;  %v5863_v60 = vsel %vm8963_vm7, %v5861_v2, %v5862_v19  ;;  %v6100_v52 = vshrl.u32 %v5951_v45, 16  ;;  %v5169_v15 = vld [vmem:[#allocation3 + $0x90] sm:$0xe]  ;;  %v5358_v2 = vld [vmem:[#allocation3 + $0xa0] sm:$0xf] }
 0x3c7   : > { %v6958_v21 = vunpack.c.l.b16 %v5860_v22  ;;  %v6959_v42 = vunpack.c.l.b16 %v5863_v60  ;;  %v6089_v36 = vrot.slane %v6087_v57, 4  ;;  %v6092_v32 = vrot.slane %v6090_v50, 5  ;;  %v5357_v22 = vld [vmem:[#allocation3 + $0x9c] sm:$0xf]  ;;  %v8727_v57 = vld [vmem:[#allocation3 + $0x98] sm:$0x1] }
 0x3c8   : > { %v5500_v5 = vsel %vm9011_vm14, %v5495_v1, %v5499_v56  ;;  %v6098_v37 = vrot.slane %v6096_v18, 5  ;;  %v6102_v62 = vrot.slane %v6100_v52, 4  ;;  %v6106_v63 = vshll.u32 %v5978_v11, 16  ;;  %v8674_v18 = vld [vmem:[#allocation3 + $0x48] sm:$0xff] }
 0x3c9   : > { %v11305_v38 = vpop.permute.xlu2 %7178  ;;  %v7451_v13 = vsel %vm7431_vm10, %v7418_v59, %v11205_v54  ;;  %v6878_v9 = vunpack.c.l.b16 %v5490_v26  ;;  %v6879_v40 = vunpack.c.l.b16 %v5500_v5  ;;  %v6093_v10 = vor.u32 %v6092_v32, %v6089_v36  ;;  %v8726_v59 = vld [vmem:[#allocation3 + $0x94] sm:$0xf] }
 0x3ca   : > { %6846 = vrot.lane.b32.xlu0 %v8658_v58, %s8755_s30  ;;  %v6986_v49 = vpack.c.b16 %v6959_v42, %v6958_v21  ;;  %v6103_v31 = vor.u32 %v6102_v62, %v6098_v37  ;;  %v8321_v35 = vrot.slane %v6378_v8, 9  ;;  %v6468_v7 = vrot.slane %v5951_v45, 5  ;;  %v5377_v58 = vld [vmem:[#allocation3 + $0xa4] sm:$0x1] }
 0x3cb   : > { %v6906_v29 = vpack.c.b16 %v6879_v40, %v6878_v9  ;;  %v6108_v43 = vrot.slane %v6106_v63, 5  ;;  %v6471_v27 = vrot.slane %v5978_v11, 5  ;;  %v7483_v0 = vsel %vm3804_vm4, %v7451_v13, %v11277_v14  ;;  %v5777_v40 = vld [vmem:[#allocation3 + $0x9c] sm:$0xe] }
 0x3cc   : > { %v6094_v55 = vrot.slane %v6093_v10, 4  ;;  %v6104_v6 = vrot.slane %v6103_v31, 4  ;;  %v6470_v54 = vrot.slane %v6468_v7, 4  ;;  %v5307_v17 = vrot.slane %v8726_v59, 5  ;;  %v5966_v59 = vld [vmem:[#allocation3 + $0xa8] sm:$0xf] }
 0x3cd   : > { %6926 = vrot.lane.b32.xlu1 %v6906_v29, %s8747_s7  ;;  %v7297_v19 = vsel %vm585_vm2, %v8641_v39, %v11262_v53  ;;  %v6469_v45 = vsel %vm8963_vm7, %v8321_v35, %v6468_v7  ;;  %v8297_v44 = vrot.slane %v5169_v15, 9  ;;  %v7516_v33 = vsel %vm7496_vm12, %v7483_v0, %v11224_v24  ;;  %v11336_v62 = vpop.permute.xlu1 %7098 }
 0x3ce   : > { %7006 = vrot.lane.b32.xlu2 %v6986_v49, %s8756_s11  ;;  %v6099_v56 = vsel %vm9011_vm14, %v6094_v55, %v6098_v37  ;;  %v6109_v11 = vsel %vm9011_vm14, %v6104_v6, %v6108_v43  ;;  %v6472_v53 = vsel %vm8963_vm7, %v6470_v54, %v6471_v27  ;;  %v5310_v50 = vrot.slane %v8727_v57, 5  ;;  %v8648_v49 = vld [vmem:[#allocation3 + $0x78] sm:$0xff] }
 0x3cf   : > { %v11319_v14 = vpop.permute.xlu0 %6938  ;;  %v7135_v26 = vunpack.c.l.b16 %v6109_v11  ;;  %v7215_v24 = vunpack.c.l.b16 %v6472_v53  ;;  %v5308_v1 = vsel %vm8963_vm7, %v8297_v44, %v5307_v17  ;;  %v5309_v60 = vrot.slane %v5307_v17, 4 }
 0x3d0   : > { %v7548_v52 = vsel %vm3837_vm5, %v7516_v33, %v11291_v47  ;;  %v5670_v21 = vshrl.u32 %v5357_v22, 16  ;;  %v5673_v42 = vshll.u32 %v5357_v22, 16  ;;  %v5679_v36 = vshll.u32 %v5358_v2, 16 }
 0x3d1   : > { %v7134_v32 = vunpack.c.l.b16 %v6099_v56  ;;  %v7214_v8 = vunpack.c.l.b16 %v6469_v45  ;;  %v5311_v5 = vsel %vm8963_vm7, %v5309_v60, %v5310_v50  ;;  %8542 = vmatmul.msk.bf16.vlgmr.msra.gmra.mxu3 %vm7585_vm13, %v7548_v52  ;;  %v5683_v37 = vshrl.u32 %v5358_v2, 16  ;;  %v11338_v10 = vpop.permute.xlu2 %6844 }
 0x3d2   : > { %7102 = vrot.lane.b32.xlu0 %v8674_v18, %s8748_s8  ;;  %v6719_v63 = vunpack.c.l.b16 %v5311_v5  ;;  %v5672_v13 = vrot.slane %v5670_v21, 4  ;;  %v5675_v9 = vrot.slane %v5673_v42, 5  ;;  %v5681_v47 = vrot.slane %v5679_v36, 5  ;;  %v8666_v36 = vld [vmem:[#allocation3 + $0x9c] sm:$0xff]  ;;  %v5343_v5 = vld [vmem:[#allocation3 + $0x48] sm:$0xf] }
 0x3d3   : > { %v7162_v31 = vpack.c.b16 %v7135_v26, %v7134_v32  ;;  %v6718_v35 = vunpack.c.l.b16 %v5308_v1  ;;  %v5685_v7 = vrot.slane %v5683_v37, 4  ;;  %v5689_v15 = vshll.u32 %v5377_v58, 16 }
 0x3d4   : > { %v7242_v29 = vpack.c.b16 %v7215_v24, %v7214_v8  ;;  %v5676_v39 = vor.u32 %v5675_v9, %v5672_v13  ;;  %v7500_v43 = vsel %vm7496_vm12, %v11270_v12, %v11301_v25  ;;  %v5915_v27 = vrot.slane %v5358_v2, 5  ;;  %v5967_v12 = vld [vmem:[#allocation3 + $0xac] sm:$0xf] }
 0x3d5   : > { %v7318_v0 = vsel %vm585_vm2, %v8648_v49, %v11218_v51  ;;  %7182 = vrot.lane.b32.xlu1 %v7162_v31, %s8757_s12  ;;  %v5686_v55 = vor.u32 %v5685_v7, %v5681_v47  ;;  %v8313_v6 = vrot.slane %v5777_v40, 9  ;;  %v11348_v54 = vsel %vm3722_vm15, %v7297_v19, %v11242_v34  ;;  %v5344_v49 = vld [vmem:[#allocation3 + $0x4c] sm:$0xf] }
 0x3d6   : > { %7262 = vrot.lane.b32.xlu2 %v7242_v29, %s8750_s10  ;;  %v6738_v17 = vpack.c.b16 %v6719_v63, %v6718_v35  ;;  %v5677_v45 = vrot.slane %v5676_v39, 4  ;;  %v5917_v44 = vrot.slane %v5915_v27, 4  ;;  %v5918_v33 = vrot.slane %v5377_v58, 5  ;;  %v6386_v58 = vld [vmem:[#allocation3 + $0xa8] sm:$0xe] }
 0x3d7   : > { %v5687_v25 = vrot.slane %v5686_v55, 4  ;;  %v5691_v22 = vrot.slane %v5689_v15, 5  ;;  %v5916_v51 = vsel %vm8963_vm7, %v8313_v6, %v5915_v27  ;;  %v7532_v2 = vsel %vm3837_vm5, %v7500_v43, %v11107_v48  ;;  %v11355_v56 = vpop.permute.xlu0 %7258  ;;  %v5986_v48 = vld [vmem:[#allocation3 + $0xb0] sm:$0x1] }
 0x3d8   : > { %v5682_v34 = vsel %vm9011_vm14, %v5677_v45, %v5681_v47  ;;  %v5919_v19 = vsel %vm8963_vm7, %v5917_v44, %v5918_v33  ;;  %8534 = vmatmul.msk.bf16.gmra.mxu1 %vm7585_vm13, %v7532_v2  ;;  %v6279_v11 = vshrl.u32 %v5966_v59, 16  ;;  %v6282_v53 = vshll.u32 %v5966_v59, 16  ;;  %v5370_v27 = vld [vmem:[#allocation3 + $0x50] sm:$0x1] }
 0x3d9   : > { %v5692_v57 = vsel %vm9011_vm14, %v5687_v25, %v5691_v22  ;;  %v6894_v50 = vunpack.c.l.b16 %v5682_v34  ;;  %v6975_v18 = vunpack.c.l.b16 %v5919_v19  ;;  %v6288_v26 = vshll.u32 %v5967_v12, 16  ;;  %v11372_v40 = vpop.permute.xlu2 %6672  ;;  %v5770_v19 = vld [vmem:[#allocation3 + $0x48] sm:$0xe] }
 0x3da   : > { %6766 = vrot.lane.b32.xlu0 %v6738_v17, %s8749_s9  ;;  %v6895_v24 = vunpack.c.l.b16 %v5692_v57  ;;  %v6281_v1 = vrot.slane %v6279_v11, 4  ;;  %v6284_v60 = vrot.slane %v6282_v53, 5  ;;  %v6292_v52 = vshrl.u32 %v5967_v12, 16  ;;  %v11370_v37 = vpop.permute.xlu1 %6670  ;;  %v8682_v11 = vld [vmem:[#allocation3 + $0xa8] sm:$0xff] }
 0x3db   : > { %v7355_v21 = vsel %vm3722_vm15, %v7318_v0, %v11192_v61  ;;  %v7404_v42 = vsel %vm3771_vm0, %v11266_v23, %v11174_v4  ;;  %v6974_v32 = vunpack.c.l.b16 %v5916_v51  ;;  %v6290_v8 = vrot.slane %v6288_v26, 5 }
 0x3dc   : > { %v6914_v63 = vpack.c.b16 %v6895_v24, %v6894_v50  ;;  %v6285_v13 = vor.u32 %v6284_v60, %v6281_v1  ;;  %v6294_v9 = vrot.slane %v6292_v52, 4  ;;  %v6298_v47 = vshll.u32 %v5986_v48, 16  ;;  %v5952_v60 = vld [vmem:[#allocation3 + $0x54] sm:$0xf] }
 0x3dd   : > { %v7437_v61 = vsel %vm7431_vm10, %v7404_v42, %v11233_v28  ;;  %6862 = vrot.lane.b32.xlu1 %v8666_v36, %s8755_s30  ;;  %v6994_v31 = vpack.c.b16 %v6975_v18, %v6974_v32  ;;  %v8329_v4 = vrot.slane %v6386_v58, 9  ;;  %v6524_v23 = vrot.slane %v5967_v12, 5 }
 0x3de   : > { %6942 = vrot.lane.b32.xlu2 %v6914_v63, %s8747_s7  ;;  %v6286_v35 = vrot.slane %v6285_v13, 4  ;;  %v6295_v7 = vor.u32 %v6294_v9, %v6290_v8  ;;  %v5502_v15 = vshrl.u32 %v5343_v5, 16  ;;  %v5505_v29 = vshll.u32 %v5343_v5, 16 }
 0x3df   : > { %v6526_v39 = vrot.slane %v6524_v23, 4  ;;  %v6527_v43 = vrot.slane %v5986_v48, 5  ;;  %v5511_v0 = vshll.u32 %v5344_v49, 16  ;;  %v5515_v55 = vshrl.u32 %v5344_v49, 16 }
 0x3e0   : > { %v6291_v6 = vsel %vm9011_vm14, %v6286_v35, %v6290_v8  ;;  %v6296_v28 = vrot.slane %v6295_v7, 4  ;;  %v6300_v59 = vrot.slane %v6298_v47, 5  ;;  %v5504_v17 = vrot.slane %v5502_v15, 4  ;;  %v8643_v35 = vld [vmem:[#allocation3 + $0x3c] sm:$0xff] }
 0x3e1   : > { %v6525_v45 = vsel %vm8963_vm7, %v8329_v4, %v6524_v23  ;;  %v6528_v44 = vsel %vm8963_vm7, %v6526_v39, %v6527_v43  ;;  %v5507_v33 = vrot.slane %v5505_v29, 5  ;;  %v5513_v12 = vrot.slane %v5511_v0, 5  ;;  %v11396_v63 = vpop.permute.xlu2 %7100  ;;  %v5979_v4 = vld [vmem:[#allocation3 + $0x5c] sm:$0x1] }
 0x3e2   : > { %7022 = vrot.lane.b32.xlu0 %v6994_v31, %s8756_s11  ;;  %v6301_v22 = vsel %vm9011_vm14, %v6296_v28, %v6300_v59  ;;  %v7469_v51 = vsel %vm3804_vm4, %v7437_v61, %v11336_v62  ;;  %v5517_v2 = vrot.slane %v5515_v55, 4  ;;  %v5521_v34 = vshll.u32 %v5370_v27, 16  ;;  %v8659_v59 = vld [vmem:[#allocation3 + $0x48] sm:$0xff] }
 0x3e3   : > { %v7150_v53 = vunpack.c.l.b16 %v6291_v6  ;;  %v7151_v57 = vunpack.c.l.b16 %v6301_v22  ;;  %v7231_v50 = vunpack.c.l.b16 %v6528_v44  ;;  %v5508_v18 = vor.u32 %v5507_v33, %v5504_v17  ;;  %v6379_v6 = vld [vmem:[#allocation3 + $0x54] sm:$0xe] }
 0x3e4   : > { %v11385_v25 = vpop.permute.xlu0 %6686  ;;  %v7388_v48 = vsel %vm7366_vm3, %v7355_v21, %v11127_v41  ;;  %v7230_v26 = vunpack.c.l.b16 %v6525_v45  ;;  %v5518_v24 = vor.u32 %v5517_v2, %v5513_v12  ;;  %v5866_v1 = vrot.slane %v5344_v49, 5  ;;  %v5953_v21 = vld [vmem:[#allocation3 + $0x58] sm:$0xf]  ;;  %v5170_v2 = vld [vmem:[#allocation3 + $0x9c] sm:$0xe] }
 0x3e5   : > { %7118 = vrot.lane.b32.xlu1 %v8682_v11, %s8748_s8  ;;  %v7170_v52 = vpack.c.b16 %v7151_v57, %v7150_v53  ;;  %v5509_v58 = vrot.slane %v5508_v18, 4  ;;  %v5523_v62 = vrot.slane %v5521_v34, 5  ;;  %v8306_v42 = vrot.slane %v5770_v19, 9  ;;  %v11394_v36 = vpop.permute.xlu1 %7018  ;;  %v8728_v11 = vld [vmem:[#allocation3 + $0xa0] sm:$0xf] }
 0x3e6   : > { %v5519_v32 = vrot.slane %v5518_v24, 4  ;;  %v5868_v8 = vrot.slane %v5866_v1, 4  ;;  %v5869_v5 = vrot.slane %v5370_v27, 5  ;;  %v7502_v41 = vsel %vm7496_vm12, %v7469_v51, %v11305_v38 }
 0x3e7   : > { %7198 = vrot.lane.b32.xlu2 %v7170_v52, %s8757_s12  ;;  %v7250_v13 = vpack.c.b16 %v7231_v50, %v7230_v26  ;;  %v5514_v9 = vsel %vm9011_vm14, %v5509_v58, %v5513_v12  ;;  %v7534_v47 = vsel %vm3837_vm5, %v7502_v41, %v11355_v56  ;;  %v6111_v49 = vshrl.u32 %v5952_v60, 16  ;;  %v5360_v58 = vld [vmem:[#allocation3 + $0xac] sm:$0xf] }
 0x3e8   : > { %v5524_v61 = vsel %vm9011_vm14, %v5519_v32, %v5523_v62  ;;  %v5867_v31 = vsel %vm8963_vm7, %v8306_v42, %v5866_v1  ;;  %v5870_v38 = vsel %vm8963_vm7, %v5868_v8, %v5869_v5  ;;  %8535 = vmatmul.msk.bf16.gmra.mxu1 %vm7585_vm13, %v7534_v47  ;;  %v6114_v23 = vshll.u32 %v5952_v60, 16  ;;  %v8729_v5 = vld [vmem:[#allocation3 + $0xa4] sm:$0x1] }
 0x3e9   : > { %v6881_v7 = vunpack.c.l.b16 %v5524_v61  ;;  %v6961_v15 = vunpack.c.l.b16 %v5870_v38  ;;  %v6113_v56 = vrot.slane %v6111_v49, 4  ;;  %v6120_v29 = vshll.u32 %v5953_v21, 16 }
 0x3ea   : > { %7278 = vrot.lane.b32.xlu0 %v7250_v13, %s8750_s10  ;;  %v7420_v43 = vsel %vm3771_vm0, %v7388_v48, %v11319_v14  ;;  %v6880_v27 = vunpack.c.l.b16 %v5514_v9  ;;  %v6116_v0 = vrot.slane %v6114_v23, 5  ;;  %v6124_v55 = vshrl.u32 %v5953_v21, 16  ;;  %v5359_v48 = vld [vmem:[#allocation3 + $0xa8] sm:$0xf] }
 0x3eb   : > { %v7303_v28 = vsel %vm585_vm2, %v8643_v35, %v11372_v40  ;;  %v6960_v17 = vunpack.c.l.b16 %v5867_v31  ;;  %v6122_v45 = vrot.slane %v6120_v29, 5  ;;  %v6130_v44 = vshll.u32 %v5979_v4, 16  ;;  %v5778_v29 = vld [vmem:[#allocation3 + $0xa8] sm:$0xe] }
 0x3ec   : > { %v6753_v39 = vpop.permute.xlu0 %6752  ;;  %v6907_v33 = vpack.c.b16 %v6881_v7, %v6880_v27  ;;  %v6117_v12 = vor.u32 %v6116_v0, %v6113_v56  ;;  %v6126_v22 = vrot.slane %v6124_v55, 4  ;;  %v6475_v51 = vrot.slane %v5953_v21, 5  ;;  %v5968_v55 = vld [vmem:[#allocation3 + $0xb4] sm:$0xf] }
 0x3ed   : > { %6848 = vrot.lane.b32.xlu1 %v8659_v59, %s8755_s30  ;;  %v6987_v34 = vpack.c.b16 %v6961_v15, %v6960_v17  ;;  %v8322_v14 = vrot.slane %v6379_v6, 9  ;;  %v11419_v19 = vsel %vm3722_vm15, %v7303_v28, %v6753_v39  ;;  %v5314_v53 = vrot.slane %v8728_v11, 5  ;;  %v7275_v52 = vpop.permute.xlu1 %7274  ;;  %v5378_v15 = vld [vmem:[#allocation3 + $0xb0] sm:$0x1] }
 0x3ee   : > { %v6118_v57 = vrot.slane %v6117_v12, 4  ;;  %v6127_v40 = vor.u32 %v6126_v22, %v6122_v45  ;;  %v6477_v50 = vrot.slane %v6475_v51, 4  ;;  %v6478_v18 = vrot.slane %v5979_v4, 5  ;;  %v8675_v4 = vld [vmem:[#allocation3 + $0x54] sm:$0xff] }
 0x3ef   : > { %6928 = vrot.lane.b32.xlu2 %v6907_v33, %s8747_s7  ;;  %v6132_v26 = vrot.slane %v6130_v44, 5  ;;  %v6476_v24 = vsel %vm8963_vm7, %v8322_v14, %v6475_v51  ;;  %v8298_v1 = vrot.slane %v5170_v2, 9  ;;  %v5316_v60 = vrot.slane %v5314_v53, 4 }
 0x3f0   : > { %v6123_v62 = vsel %vm9011_vm14, %v6118_v57, %v6122_v45  ;;  %v6128_v42 = vrot.slane %v6127_v40, 4  ;;  %v6479_v32 = vsel %vm8963_vm7, %v6477_v50, %v6478_v18  ;;  %v11428_v8 = vpop.permute.xlu2 %6690  ;;  %v5317_v41 = vrot.slane %v8729_v5, 5  ;;  %v5969_v45 = vld [vmem:[#allocation3 + $0xb8] sm:$0xf] }
 0x3f1   : > { %v7453_v21 = vsel %vm7431_vm10, %v7420_v43, %v11394_v36  ;;  %v7217_v13 = vunpack.c.l.b16 %v6479_v32  ;;  %v5315_v9 = vsel %vm8963_vm7, %v8298_v1, %v5314_v53  ;;  %v5694_v47 = vshrl.u32 %v5359_v48, 16 }
 0x3f2   : > { %7008 = vrot.lane.b32.xlu0 %v6987_v34, %s8756_s11  ;;  %v6133_v49 = vsel %vm9011_vm14, %v6128_v42, %v6132_v26  ;;  %v5318_v61 = vsel %vm8963_vm7, %v5316_v60, %v5317_v41  ;;  %v5697_v31 = vshll.u32 %v5359_v48, 16  ;;  %v5703_v38 = vshll.u32 %v5360_v58, 16  ;;  %v5987_v48 = vld [vmem:[#allocation3 + $0xbc] sm:$0x1] }
 0x3f3   : > { %v7136_v23 = vunpack.c.l.b16 %v6123_v62  ;;  %v7137_v35 = vunpack.c.l.b16 %v6133_v49  ;;  %v7216_v7 = vunpack.c.l.b16 %v6476_v24  ;;  %v5696_v56 = vrot.slane %v5694_v47, 4  ;;  %v5345_v49 = vld [vmem:[#allocation3 + $0x54] sm:$0xf] }
 0x3f4   : > { %v6720_v39 = vunpack.c.l.b16 %v5315_v9  ;;  %v5699_v43 = vrot.slane %v5697_v31, 5  ;;  %v5705_v27 = vrot.slane %v5703_v38, 5  ;;  %v5707_v0 = vshrl.u32 %v5360_v58, 16 }
 0x3f5   : > { %v7195_v36 = vpop.permute.xlu0 %7194  ;;  %7104 = vrot.lane.b32.xlu1 %v8675_v4, %s8748_s8  ;;  %v7163_v6 = vpack.c.b16 %v7137_v35, %v7136_v23  ;;  %v7243_v28 = vpack.c.b16 %v7217_v13, %v7216_v7  ;;  %v6721_v59 = vunpack.c.l.b16 %v5318_v61  ;;  %v7485_v17 = vsel %vm3804_vm4, %v7453_v21, %v11282_v16  ;;  %v6387_v21 = vld [vmem:[#allocation3 + $0xb4] sm:$0xe]  ;;  %v8667_v61 = vld [vmem:[#allocation3 + $0xa8] sm:$0xff] }
 0x3f6   : > { %v5700_v44 = vor.u32 %v5699_v43, %v5696_v56  ;;  %v5709_v33 = vrot.slane %v5707_v0, 4  ;;  %v5713_v12 = vshll.u32 %v5378_v15, 16  ;;  %v7518_v22 = vsel %vm7496_vm12, %v7485_v17, %v7195_v36  ;;  %v5346_v36 = vld [vmem:[#allocation3 + $0x58] sm:$0xf] }
 0x3f7   : > { %7184 = vrot.lane.b32.xlu2 %v7163_v6, %s8757_s12  ;;  %v7550_v51 = vsel %vm3837_vm5, %v7518_v22, %v7275_v52  ;;  %v8314_v2 = vrot.slane %v5778_v29, 9  ;;  %v5922_v34 = vrot.slane %v5360_v58, 5  ;;  %v6303_v14 = vshrl.u32 %v5968_v55, 16  ;;  %v8644_v6 = vld [vmem:[#allocation3 + $0x48] sm:$0xff] }
 0x3f8   : > { %v5701_v11 = vrot.slane %v5700_v44, 4  ;;  %v5710_v53 = vor.u32 %v5709_v33, %v5705_v27  ;;  %8543 = vmatmul.msk.bf16.gmra.mxu3 %vm7585_vm13, %v7550_v51  ;;  %v6306_v57 = vshll.u32 %v5968_v55, 16  ;;  %v6312_v40 = vshll.u32 %v5969_v45, 16  ;;  %v11451_v58 = vpop.permute.xlu2 %6756 }
 0x3f9   : > { %v5924_v16 = vrot.slane %v5922_v34, 4  ;;  %v5925_v50 = vrot.slane %v5378_v15, 5  ;;  %v6305_v26 = vrot.slane %v6303_v14, 4  ;;  %v6316_v24 = vshrl.u32 %v5969_v45, 16 }
 0x3fa   : > { %7264 = vrot.lane.b32.xlu0 %v7243_v28, %s8750_s10  ;;  %v5706_v1 = vsel %vm9011_vm14, %v5701_v11, %v5705_v27  ;;  %v5711_v60 = vrot.slane %v5710_v53, 4  ;;  %v5715_v52 = vrot.slane %v5713_v12, 5  ;;  %v5923_v62 = vsel %vm8963_vm7, %v8314_v2, %v5922_v34  ;;  %v5371_v11 = vld [vmem:[#allocation3 + $0x5c] sm:$0x1]  ;;  %v5771_v53 = vld [vmem:[#allocation3 + $0x54] sm:$0xe] }
 0x3fb   : > { %v11447_v18 = vpop.permute.xlu1 %6688  ;;  %v6739_v42 = vpack.c.b16 %v6721_v59, %v6720_v39  ;;  %v5926_v32 = vsel %vm8963_vm7, %v5924_v16, %v5925_v50  ;;  %v6308_v5 = vrot.slane %v6306_v57, 5  ;;  %v6314_v41 = vrot.slane %v6312_v40, 5 }
 0x3fc   : > { %v5716_v13 = vsel %vm9011_vm14, %v5711_v60, %v5715_v52  ;;  %v6318_v9 = vrot.slane %v6316_v24, 4  ;;  %v6322_v47 = vshll.u32 %v5987_v48, 16  ;;  %v6896_v31 = vunpack.c.l.b16 %v5706_v1 }
 0x3fd   : > { %6768 = vrot.lane.b32.xlu1 %v6739_v42, %s8749_s9  ;;  %v6897_v38 = vunpack.c.l.b16 %v5716_v13  ;;  %v6976_v4 = vunpack.c.l.b16 %v5923_v62  ;;  %v6309_v23 = vor.u32 %v6308_v5, %v6305_v26  ;;  %v6977_v35 = vunpack.c.l.b16 %v5926_v32  ;;  %v8683_v62 = vld [vmem:[#allocation3 + $0xb4] sm:$0xff] }
 0x3fe   : > { %v6319_v7 = vor.u32 %v6318_v9, %v6314_v41  ;;  %v8330_v15 = vrot.slane %v6387_v21, 9  ;;  %v6531_v56 = vrot.slane %v5969_v45, 5  ;;  %v6324_v43 = vrot.slane %v6322_v47, 5  ;;  %v5955_v21 = vld [vmem:[#allocation3 + $0x64] sm:$0xf] }
 0x3ff   : > { %6864 = vrot.lane.b32.xlu2 %v8667_v61, %s8755_s30  ;;  %v6915_v29 = vpack.c.b16 %v6897_v38, %v6896_v31  ;;  %v6310_v39 = vrot.slane %v6309_v23, 4  ;;  %v6675_v27 = vpop.permute.xlu0 %6674  ;;  %v5526_v0 = vshrl.u32 %v5345_v49, 16  ;;  %v6534_v59 = vrot.slane %v5987_v48, 5  ;;  %v5954_v48 = vld [vmem:[#allocation3 + $0x60] sm:$0xf] }
 0x400   : > { %v6320_v55 = vrot.slane %v6319_v7, 4  ;;  %v6533_v28 = vrot.slane %v6531_v56, 4  ;;  %v5529_v17 = vshll.u32 %v5345_v49, 16  ;;  %v6532_v45 = vsel %vm8963_vm7, %v8330_v15, %v6531_v56  ;;  %v5980_v7 = vld [vmem:[#allocation3 + $0x68] sm:$0x1] }
 0x401   : > { %v6315_v44 = vsel %vm9011_vm14, %v6310_v39, %v6314_v41  ;;  %v5528_v12 = vrot.slane %v5526_v0, 4  ;;  %v5535_v22 = vshll.u32 %v5346_v36, 16  ;;  %v6995_v51 = vpack.c.b16 %v6977_v35, %v6976_v4 }
 0x402   : > { %6944 = vrot.lane.b32.xlu0 %v6915_v29, %s8747_s7  ;;  %v6325_v2 = vsel %vm9011_vm14, %v6320_v55, %v6324_v43  ;;  %v7306_v34 = vsel %vm585_vm2, %v8644_v6, %v6675_v27  ;;  %v6535_v14 = vsel %vm8963_vm7, %v6533_v28, %v6534_v59  ;;  %v5531_v50 = vrot.slane %v5529_v17, 5  ;;  %v11474_v24 = vpop.permute.xlu2 %6764 }
 0x403   : > { %v6755_v33 = vpop.permute.xlu1 %6754  ;;  %v7153_v57 = vunpack.c.l.b16 %v6325_v2  ;;  %v7233_v40 = vunpack.c.l.b16 %v6535_v14  ;;  %v7152_v26 = vunpack.c.l.b16 %v6315_v44  ;;  %v7232_v1 = vunpack.c.l.b16 %v6532_v45 }
 0x404   : > { %v11472_v16 = vsel %vm3722_vm15, %v7306_v34, %v6755_v33  ;;  %v5537_v60 = vrot.slane %v5535_v22, 5  ;;  %v5539_v52 = vshrl.u32 %v5346_v36, 16  ;;  %v5532_v42 = vor.u32 %v5531_v50, %v5528_v12  ;;  %v6380_v12 = vld [vmem:[#allocation3 + $0x60] sm:$0xe]  ;;  %v8660_v34 = vld [vmem:[#allocation3 + $0x54] sm:$0xff] }
 0x405   : > { %7024 = vrot.lane.b32.xlu1 %v6995_v51, %s8756_s11  ;;  %v5545_v32 = vshll.u32 %v5371_v11, 16  ;;  %v8307_v5 = vrot.slane %v5771_v53, 9  ;;  %v5873_v41 = vrot.slane %v5346_v36, 5  ;;  %v7171_v13 = vpack.c.b16 %v7153_v57, %v7152_v26 }
 0x406   : > { %v7251_v9 = vpack.c.b16 %v7233_v40, %v7232_v1  ;;  %v5541_v47 = vrot.slane %v5539_v52, 4  ;;  %v6135_v49 = vshrl.u32 %v5954_v48, 16  ;;  %v5533_v61 = vrot.slane %v5532_v42, 4  ;;  %v5171_v40 = vld [vmem:[#allocation3 + $0xa8] sm:$0xe] }
 0x407   : > { %7120 = vrot.lane.b32.xlu2 %v8683_v62, %s8748_s8  ;;  %v5875_v31 = vrot.slane %v5873_v41, 4  ;;  %v5876_v38 = vrot.slane %v5371_v11, 5  ;;  %v6138_v4 = vshll.u32 %v5954_v48, 16  ;;  %v5874_v35 = vsel %vm8963_vm7, %v8307_v5, %v5873_v41  ;;  %v8730_v62 = vld [vmem:[#allocation3 + $0xac] sm:$0xf] }
 0x408   : > { %v5542_v23 = vor.u32 %v5541_v47, %v5537_v60  ;;  %v6137_v15 = vrot.slane %v6135_v49, 4  ;;  %v6144_v56 = vshll.u32 %v5955_v21, 16  ;;  %v5538_v36 = vsel %vm9011_vm14, %v5533_v61, %v5537_v60  ;;  %v5362_v47 = vld [vmem:[#allocation3 + $0xb8] sm:$0xf] }
 0x409   : > { %v5877_v29 = vsel %vm8963_vm7, %v5875_v31, %v5876_v38  ;;  %v6140_v39 = vrot.slane %v6138_v4, 5  ;;  %v6148_v43 = vshrl.u32 %v5955_v21, 16  ;;  %v5547_v0 = vrot.slane %v5545_v32, 5  ;;  %v5361_v32 = vld [vmem:[#allocation3 + $0xb4] sm:$0xf] }
 0x40a   : > { %7200 = vrot.lane.b32.xlu0 %v7171_v13, %s8757_s12  ;;  %v5543_v27 = vrot.slane %v5542_v23, 4  ;;  %v6963_v6 = vunpack.c.l.b16 %v5877_v29  ;;  %v6146_v28 = vrot.slane %v6144_v56, 5  ;;  %v6962_v59 = vunpack.c.l.b16 %v5874_v35  ;;  %v11492_v50 = vpop.permute.xlu2 %7020  ;;  %v8731_v31 = vld [vmem:[#allocation3 + $0xb0] sm:$0x1] }
 0x40b   : > { %v7005_v17 = vpop.permute.xlu1 %7004  ;;  %v6141_v44 = vor.u32 %v6140_v39, %v6137_v15  ;;  %v6150_v45 = vrot.slane %v6148_v43, 4  ;;  %v6154_v33 = vshll.u32 %v5980_v7, 16  ;;  %v7374_v22 = vsel %vm7366_vm3, %v11348_v54, %v11338_v10 }
 0x40c   : > { %v6925_v55 = vpop.permute.xlu0 %6924  ;;  %v5548_v51 = vsel %vm9011_vm14, %v5543_v27, %v5547_v0  ;;  %v6882_v2 = vunpack.c.l.b16 %v5538_v36  ;;  %v6988_v53 = vpack.c.b16 %v6963_v6, %v6962_v59  ;;  %v8323_v1 = vrot.slane %v6380_v12, 9  ;;  %v5379_v36 = vld [vmem:[#allocation3 + $0xbc] sm:$0x1]  ;;  %v5779_v6 = vld [vmem:[#allocation3 + $0xb4] sm:$0xe] }
 0x40d   : > { %7280 = vrot.lane.b32.xlu1 %v7251_v9, %s8750_s10  ;;  %v6883_v14 = vunpack.c.l.b16 %v5548_v51  ;;  %v7406_v11 = vsel %vm3771_vm0, %v7374_v22, %v6925_v55  ;;  %v6151_v57 = vor.u32 %v6150_v45, %v6146_v28  ;;  %v6142_v26 = vrot.slane %v6141_v44, 4 }
 0x40e   : > { %v7439_v48 = vsel %vm7431_vm10, %v7406_v11, %v7005_v17  ;;  %v6482_v10 = vrot.slane %v5955_v21, 5  ;;  %v6156_v52 = vrot.slane %v6154_v33, 5  ;;  %v5321_v42 = vrot.slane %v8730_v62, 5  ;;  %v5970_v33 = vld [vmem:[#allocation3 + $0xc0] sm:$0xf] }
 0x40f   : > { %6850 = vrot.lane.b32.xlu2 %v8660_v34, %s8755_s30  ;;  %v6908_v54 = vpack.c.b16 %v6883_v14, %v6882_v2  ;;  %v6152_v60 = vrot.slane %v6151_v57, 4  ;;  %v6147_v5 = vsel %vm9011_vm14, %v6142_v26, %v6146_v28  ;;  %v6485_v13 = vrot.slane %v5980_v7, 5  ;;  %v8676_v28 = vld [vmem:[#allocation3 + $0x60] sm:$0xff]  ;;  %v11515_v34 = vld [vmem:[%s11898_s5] ss:$0 sm:$0xff] }
 0x410   : > { %v6484_v41 = vrot.slane %v6482_v10, 4  ;;  %v8299_v9 = vrot.slane %v5171_v40, 9  ;;  %v6483_v49 = vsel %vm8963_vm7, %v8323_v1, %v6482_v10  ;;  %v5323_v61 = vrot.slane %v5321_v42, 4 }
 0x411   : > { %v6157_v21 = vsel %vm9011_vm14, %v6152_v60, %v6156_v52  ;;  %v5324_v38 = vrot.slane %v8731_v31, 5  ;;  %v5718_v7 = vshrl.u32 %v5361_v32, 16  ;;  %v5721_v29 = vshll.u32 %v5361_v32, 16  ;;  %v5988_v31 = vld [vmem:[#allocation3 + $0xc8] sm:$0x1] }
 0x412   : > { %6930 = vrot.lane.b32.xlu0 %v6908_v54, %s8747_s7  ;;  %v7139_v4 = vunpack.c.l.b16 %v6157_v21  ;;  %v6486_v23 = vsel %vm8963_vm7, %v6484_v41, %v6485_v13  ;;  %v5322_v35 = vsel %vm8963_vm7, %v8299_v9, %v5321_v42  ;;  %v5727_v39 = vshll.u32 %v5362_v47, 16 }
 0x413   : > { %v7219_v15 = vunpack.c.l.b16 %v6486_v23  ;;  %v5325_v56 = vsel %vm8963_vm7, %v5323_v61, %v5324_v38  ;;  %v7138_v43 = vunpack.c.l.b16 %v6147_v5  ;;  %v7471_v27 = vsel %vm3804_vm4, %v7439_v48, %v11396_v63  ;;  %v11517_v63 = vld [vmem:[#allocation3 + $0xc4] sm:$0xf] }
 0x414   : > { %v5720_v0 = vrot.slane %v5718_v7, 4  ;;  %v5731_v55 = vshrl.u32 %v5362_v47, 16  ;;  %v7218_v59 = vunpack.c.l.b16 %v6483_v49  ;;  %v6722_v17 = vunpack.c.l.b16 %v5322_v35 }
 0x415   : > { %7010 = vrot.lane.b32.xlu1 %v6988_v53, %s8756_s11  ;;  %v5723_v44 = vrot.slane %v5721_v29, 5  ;;  %v5729_v45 = vrot.slane %v5727_v39, 5  ;;  %v7164_v12 = vpack.c.b16 %v7139_v4, %v7138_v43  ;;  %v6723_v22 = vunpack.c.l.b16 %v5325_v56  ;;  %v8649_v4 = vld [vmem:[#allocation3 + $0x84] sm:$0xff]  ;;  %v6388_v43 = vld [vmem:[#allocation3 + $0xc0] sm:$0xe] }
 0x416   : > { %v5733_v51 = vrot.slane %v5731_v55, 4  ;;  %v5737_v2 = vshll.u32 %v5379_v36, 16  ;;  %v7244_v14 = vpack.c.b16 %v7219_v15, %v7218_v59  ;;  %v8315_v53 = vrot.slane %v5779_v6, 9 }
 0x417   : > { %7106 = vrot.lane.b32.xlu2 %v8676_v28, %s8748_s8  ;;  %v5724_v11 = vor.u32 %v5723_v44, %v5720_v0  ;;  %v5929_v57 = vrot.slane %v5362_v47, 5  ;;  %v5932_v26 = vrot.slane %v5379_v36, 5  ;;  %v6327_v10 = vshrl.u32 %v5970_v33, 16  ;;  %v7181_v60 = vpop.permute.xlu0 %7180  ;;  %v5347_v0 = vld [vmem:[#allocation3 + $0x60] sm:$0xf]  ;;  %v8668_v44 = vld [vmem:[#allocation3 + $0xb4] sm:$0xff] }
 0x418   : > { %v11520_v40 = vpop.permute.xlu2 %6678  ;;  %v5734_v48 = vor.u32 %v5733_v51, %v5729_v45  ;;  %v7631_v1 = vpop.f32.mrf.mxu1  ;;  %v6330_v54 = vshll.u32 %v5970_v33, 16  ;;  %v6336_v32 = vshll.u32 %v11517_v63, 16  ;;  %v5739_v13 = vrot.slane %v5737_v2, 5 }
 0x419   : > { %v5725_v52 = vrot.slane %v5724_v11, 4  ;;  %v5930_v62 = vsel %vm8963_vm7, %v8315_v53, %v5929_v57  ;;  %v5931_v42 = vrot.slane %v5929_v57, 4  ;;  %v7632_v9 = vadd.f32 %v11515_v34, %v7631_v1 }
 0x41a   : > { %7186 = vrot.lane.b32.xlu0 %v7164_v12, %s8757_s12  ;;  %v5735_v41 = vrot.slane %v5734_v48, 4  ;;  %v6329_v47 = vrot.slane %v6327_v10, 4  ;;  %v6740_v21 = vpack.c.b16 %v6723_v22, %v6722_v17  ;;  %v6332_v38 = vrot.slane %v6330_v54, 5 }
 0x41b   : > { %v11526_v5 = vpop.permute.xlu1 %6676  ;;  %v5730_v49 = vsel %vm9011_vm14, %v5725_v52, %v5729_v45  ;;  %v5933_v61 = vsel %vm8963_vm7, %v5931_v42, %v5932_v26  ;;  %v6978_v35 = vunpack.c.l.b16 %v5930_v62  ;;  %v7711_v15 = vmax.f32 %v7632_v9, 0.0  ;;  %v5348_v26 = vld [vmem:[#allocation3 + $0x64] sm:$0xf] }
 0x41c   : > { %v5740_v23 = vsel %vm9011_vm14, %v5735_v41, %v5739_v13  ;;  %v6979_v7 = vunpack.c.l.b16 %v5933_v61  ;;  %v6333_v36 = vor.u32 %v6332_v38, %v6329_v47  ;;  %v6338_v29 = vrot.slane %v6336_v32, 5  ;;  %v8642_v61 = vld [vmem:[#allocation3 + $0x30] sm:$0xff] }
 0x41d   : > { %7266 = vrot.lane.b32.xlu1 %v7244_v14, %s8750_s10  ;;  %v6899_v56 = vunpack.c.l.b16 %v5740_v23  ;;  %v6340_v39 = vshrl.u32 %v11517_v63, 16  ;;  %v7321_v55 = vsel %vm585_vm2, %v8649_v4, %v11196_v46  ;;  %v6898_v6 = vunpack.c.l.b16 %v5730_v49 }
 0x41e   : > { %v7743_v28 = vpack.c.bf16 %v7711_v15, %v7711_v15  ;;  %v6346_v59 = vshll.u32 %v5988_v31, 16  ;;  %v7504_v17 = vsel %vm7496_vm12, %v7471_v27, %v7181_v60  ;;  %v6996_v45 = vpack.c.b16 %v6979_v7, %v6978_v35  ;;  %v5372_v60 = vld [vmem:[#allocation3 + $0x68] sm:$0x1] }
 0x41f   : > { %6770 = vrot.lane.b32.xlu2 %v6740_v21, %s8749_s9  ;;  %v6342_v33 = vrot.slane %v6340_v39, 4  ;;  %v6538_v12 = vrot.slane %v11517_v63, 5  ;;  %v6916_v51 = vpack.c.b16 %v6899_v56, %v6898_v6  ;;  %v8331_v2 = vrot.slane %v6388_v43, 9  ;;  %v5956_v39 = vld [vmem:[#allocation3 + $0x6c] sm:$0xf] }
 0x420   : > { %v11548_v22 = vpop.permute.xlu2 %7276  ;;  %7775 = vst.msk [vmem:[%s11540_s26] sm:$0xf] %vm4232_vm1, %v7743_v28  ;;  %v7633_v14 = vpop.f32.mrf.mxu1  ;;  %v5550_v46 = vshrl.u32 %v5347_v0, 16  ;;  %v5553_v11 = vshll.u32 %v5347_v0, 16  ;;  %v6334_v53 = vrot.slane %v6333_v36, 4  ;;  %v6541_v48 = vrot.slane %v5988_v31, 5 }
 0x421   : > { %v6343_v27 = vor.u32 %v6342_v33, %v6338_v29  ;;  %v6540_v57 = vrot.slane %v6538_v12, 4  ;;  %v6348_v10 = vrot.slane %v6346_v59, 5  ;;  %v6539_v63 = vsel %vm8963_vm7, %v8331_v2, %v6538_v12  ;;  %v5772_v36 = vld [vmem:[#allocation3 + $0x60] sm:$0xe]  ;;  %v5957_v59 = vld [vmem:[#allocation3 + $0x70] sm:$0xf] }
 0x422   : > { %6866 = vrot.lane.b32.xlu0 %v8668_v44, %s8755_s30  ;;  %v7634_v54 = vadd.f32 %v11515_v34, %v7633_v14  ;;  %v5552_v52 = vrot.slane %v5550_v46, 4  ;;  %v5555_v13 = vrot.slane %v5553_v11, 5  ;;  %v6339_v9 = vsel %vm9011_vm14, %v6334_v53, %v6338_v29  ;;  %v8684_v0 = vld [vmem:[#allocation3 + $0xc0] sm:$0xff]  ;;  %v5981_v11 = vld [vmem:[#allocation3 + $0x74] sm:$0x1] }
 0x423   : > { %v7261_v1 = vpop.permute.xlu1 %7260  ;;  %v6344_v32 = vrot.slane %v6343_v27, 4  ;;  %v6542_v41 = vsel %vm8963_vm7, %v6540_v57, %v6541_v48  ;;  %v5559_v49 = vshll.u32 %v5348_v26, 16  ;;  %v5563_v4 = vshrl.u32 %v5348_v26, 16 }
 0x424   : > { %v11556_v62 = vpop.permute.xlu0 %6692  ;;  %v7536_v42 = vsel %vm3837_vm5, %v7504_v17, %v7261_v1  ;;  %v7235_v47 = vunpack.c.l.b16 %v6542_v41  ;;  %v7712_v21 = vmax.f32 %v7634_v54, 0.0  ;;  %v5556_v38 = vor.u32 %v5555_v13, %v5552_v52 }
 0x425   : > { %8536 = vmatmul.msk.bf16.gmra.mxu1 %vm7585_vm13, %v7536_v42  ;;  %6946 = vrot.lane.b32.xlu1 %v6916_v51, %s8747_s7  ;;  %v6349_v31 = vsel %vm9011_vm14, %v6344_v32, %v6348_v10  ;;  %v5569_v23 = vshll.u32 %v5372_v60, 16  ;;  %v7234_v7 = vunpack.c.l.b16 %v6539_v63  ;;  %v5561_v56 = vrot.slane %v5559_v49, 5 }
 0x426   : > { %v7155_v35 = vunpack.c.l.b16 %v6349_v31  ;;  %v7744_v15 = vpack.c.bf16 %v7712_v21, %v7712_v21  ;;  %v7300_v29 = vsel %vm585_vm2, %v8642_v61, %v11370_v37  ;;  %v7357_v43 = vsel %vm3722_vm15, %v7321_v55, %v11474_v24  ;;  %v8661_v31 = vld [vmem:[#allocation3 + $0x60] sm:$0xff] }
 0x427   : > { %7026 = vrot.lane.b32.xlu2 %v6996_v45, %s8756_s11  ;;  %v7154_v6 = vunpack.c.l.b16 %v6339_v9  ;;  %v5565_v28 = vrot.slane %v5563_v4, 4  ;;  %v7252_v44 = vpack.c.b16 %v7235_v47, %v7234_v7  ;;  %v5557_v33 = vrot.slane %v5556_v38, 4  ;;  %v6381_v9 = vld [vmem:[#allocation3 + $0x6c] sm:$0xe]  ;;  %v5172_v7 = vld [vmem:[#allocation3 + $0xb4] sm:$0xe] }
 0x428   : > { %v11572_v17 = vpop.permute.xlu2 %7006  ;;  %7776 = vst.msk [vmem:[%s11540_s26 + $0x4] sm:$0xf] %vm4232_vm1, %v7744_v15  ;;  %v5571_v12 = vrot.slane %v5569_v23, 5  ;;  %v5880_v51 = vrot.slane %v5348_v26, 5  ;;  %v8308_v2 = vrot.slane %v5772_v36, 9  ;;  %v6159_v14 = vshrl.u32 %v5956_v39, 16 }
 0x429   : > { %v5566_v37 = vor.u32 %v5565_v28, %v5561_v56  ;;  %v6162_v24 = vshll.u32 %v5956_v39, 16  ;;  %v7172_v55 = vpack.c.b16 %v7155_v35, %v7154_v6  ;;  %v5883_v46 = vrot.slane %v5372_v60, 5  ;;  %v8732_v28 = vld [vmem:[#allocation3 + $0xb8] sm:$0xf] }
 0x42a   : > { %7122 = vrot.lane.b32.xlu0 %v8684_v0, %s8748_s8  ;;  %v5882_v45 = vrot.slane %v5880_v51, 4  ;;  %v6168_v53 = vshll.u32 %v5957_v59, 16  ;;  %v5562_v57 = vsel %vm9011_vm14, %v5557_v33, %v5561_v56  ;;  %v6161_v1 = vrot.slane %v6159_v14, 4  ;;  %v5363_v0 = vld [vmem:[#allocation3 + $0xc0] sm:$0xf] }
 0x42b   : > { %v5567_v48 = vrot.slane %v5566_v37, 4  ;;  %v6164_v10 = vrot.slane %v6162_v24, 5  ;;  %v5881_v26 = vsel %vm8963_vm7, %v8308_v2, %v5880_v51  ;;  %v6172_v52 = vshrl.u32 %v5957_v59, 16 }
 0x42c   : > { %v6861_v27 = vpop.permute.xlu0 %6860  ;;  %v5884_v63 = vsel %vm8963_vm7, %v5882_v45, %v5883_v46  ;;  %v6170_v54 = vrot.slane %v6168_v53, 5  ;;  %v6178_v13 = vshll.u32 %v5981_v11, 16  ;;  %v6884_v21 = vunpack.c.l.b16 %v5562_v57 }
 0x42d   : > { %v7390_v42 = vsel %vm7366_vm3, %v7357_v43, %v6861_v27  ;;  %7202 = vrot.lane.b32.xlu1 %v7172_v55, %s8757_s12  ;;  %v6941_v60 = vpop.permute.xlu1 %6940  ;;  %v5572_v32 = vsel %vm9011_vm14, %v5567_v48, %v5571_v12  ;;  %v6165_v41 = vor.u32 %v6164_v10, %v6161_v1  ;;  %v11590_v49 = vsel %vm3722_vm15, %v7300_v29, %v11247_v3  ;;  %v5364_v55 = vld [vmem:[#allocation3 + $0xc4] sm:$0xf] }
 0x42e   : > { %v7422_v47 = vsel %vm3771_vm0, %v7390_v42, %v6941_v60  ;;  %v6174_v61 = vrot.slane %v6172_v52, 4  ;;  %v6885_v38 = vunpack.c.l.b16 %v5572_v32  ;;  %v6964_v4 = vunpack.c.l.b16 %v5881_v26  ;;  %v5380_v26 = vld [vmem:[#allocation3 + $0xc8] sm:$0x1] }
 0x42f   : > { %7282 = vrot.lane.b32.xlu2 %v7252_v44, %s8750_s10  ;;  %v6965_v23 = vunpack.c.l.b16 %v5884_v63  ;;  %v6166_v35 = vrot.slane %v6165_v41, 4  ;;  %v7455_v56 = vsel %vm7431_vm10, %v7422_v47, %v11492_v50  ;;  %v8324_v39 = vrot.slane %v6381_v9, 9  ;;  %v8677_v41 = vld [vmem:[#allocation3 + $0x6c] sm:$0xff] }
 0x430   : > { %v11593_v15 = vpop.permute.xlu2 %7262  ;;  %v6175_v36 = vor.u32 %v6174_v61, %v6170_v54  ;;  %v6489_v43 = vrot.slane %v5957_v59, 5  ;;  %v6180_v29 = vrot.slane %v6178_v13, 5  ;;  %v6492_v6 = vrot.slane %v5981_v11, 5  ;;  %v8733_v59 = vld [vmem:[#allocation3 + $0xbc] sm:$0x1] }
 0x431   : > { %v6171_v3 = vsel %vm9011_vm14, %v6166_v35, %v6170_v54  ;;  %v5328_v44 = vrot.slane %v8732_v28, 5  ;;  %v8300_v37 = vrot.slane %v5172_v7, 9  ;;  %v6909_v2 = vpack.c.b16 %v6885_v38, %v6884_v21  ;;  %v5780_v21 = vld [vmem:[#allocation3 + $0xc0] sm:$0xe]  ;;  %v5972_v61 = vld [vmem:[#allocation3 + $0xcc] sm:$0xf] }
 0x432   : > { %6852 = vrot.lane.b32.xlu0 %v8661_v31, %s8755_s30  ;;  %v6176_v33 = vrot.slane %v6175_v36, 4  ;;  %v6490_v12 = vsel %vm8963_vm7, %v8324_v39, %v6489_v43  ;;  %v6491_v51 = vrot.slane %v6489_v43, 4  ;;  %v5331_v24 = vrot.slane %v8733_v59, 5  ;;  %v11616_v7 = vld [vmem:[#allocation3 + $0xd0] sm:$0xf] }
 0x433   : > { %v5330_v14 = vrot.slane %v5328_v44, 4  ;;  %v5742_v45 = vshrl.u32 %v5363_v0, 16  ;;  %v6989_v46 = vpack.c.b16 %v6965_v23, %v6964_v4  ;;  %v5329_v27 = vsel %vm8963_vm7, %v8300_v37, %v5328_v44 }
 0x434   : > { %v7117_v50 = vpop.permute.xlu0 %7116  ;;  %v6181_v53 = vsel %vm9011_vm14, %v6176_v33, %v6180_v29  ;;  %v6493_v11 = vsel %vm8963_vm7, %v6491_v51, %v6492_v6  ;;  %v7140_v57 = vunpack.c.l.b16 %v6171_v3  ;;  %v7220_v1 = vunpack.c.l.b16 %v6490_v12  ;;  %v11622_v51 = vld [vmem:[#allocation3 + $0xd4] sm:$0x1] }
 0x435   : > { %6932 = vrot.lane.b32.xlu1 %v6909_v2, %s8747_s7  ;;  %v7141_v48 = vunpack.c.l.b16 %v6181_v53  ;;  %v5332_v10 = vsel %vm8963_vm7, %v5330_v14, %v5331_v24  ;;  %v5744_v63 = vrot.slane %v5742_v45, 4  ;;  %v5745_v54 = vshll.u32 %v5363_v0, 16 }
 0x436   : > { %v5751_v52 = vshll.u32 %v5364_v55, 16  ;;  %v5755_v42 = vshrl.u32 %v5364_v55, 16  ;;  %v7487_v60 = vsel %vm3804_vm4, %v7455_v56, %v7117_v50  ;;  %v7221_v13 = vunpack.c.l.b16 %v6493_v11 }
 0x437   : > { %7012 = vrot.lane.b32.xlu2 %v6989_v46, %s8756_s11  ;;  %v7197_v32 = vpop.permute.xlu1 %7196  ;;  %v6724_v9 = vunpack.c.l.b16 %v5329_v27  ;;  %v6725_v47 = vunpack.c.l.b16 %v5332_v10  ;;  %v5747_v4 = vrot.slane %v5745_v54, 5  ;;  %v5761_v35 = vshll.u32 %v5380_v26, 16 }
 0x438   : > { %v7520_v31 = vsel %vm7496_vm12, %v7487_v60, %v7197_v32  ;;  %v11614_v38 = vpop.permute.xlu2 %6942  ;;  %v5753_v23 = vrot.slane %v5751_v52, 5  ;;  %v7165_v36 = vpack.c.b16 %v7141_v48, %v7140_v57  ;;  %v5757_v39 = vrot.slane %v5755_v42, 4  ;;  %v5165_v32 = vld [vmem:[#allocation3 + $0x60] sm:$0xe] }
 0x439   : > { %v7552_v56 = vsel %vm3837_vm5, %v7520_v31, %v11548_v22  ;;  %v5936_v43 = vrot.slane %v5364_v55, 5  ;;  %v5748_v0 = vor.u32 %v5747_v4, %v5744_v63  ;;  %v8316_v3 = vrot.slane %v5780_v21, 9  ;;  %v6389_v63 = vld [vmem:[#allocation3 + $0xcc] sm:$0xe] }
 0x43a   : > { %7108 = vrot.lane.b32.xlu0 %v8677_v41, %s8748_s8  ;;  %8544 = vmatmul.msk.bf16.gmra.mxu3 %vm7585_vm13, %v7552_v56  ;;  %v6351_v29 = vshrl.u32 %v5972_v61, 16  ;;  %v6354_v6 = vshll.u32 %v5972_v61, 16  ;;  %v5758_v44 = vor.u32 %v5757_v39, %v5753_v23  ;;  %v5939_v12 = vrot.slane %v5380_v26, 5  ;;  %v8734_v61 = vld [vmem:[#allocation3 + $0x64] sm:$0xf] }
 0x43b   : > { %v5938_v33 = vrot.slane %v5936_v43, 4  ;;  %v6360_v37 = vshll.u32 %v11616_v7, 16  ;;  %v7245_v50 = vpack.c.b16 %v7221_v13, %v7220_v1  ;;  %v5749_v2 = vrot.slane %v5748_v0, 4  ;;  %v8669_v56 = vld [vmem:[#allocation3 + $0xc0] sm:$0xff] }
 0x43c   : > { %v6847_v28 = vpop.permute.xlu0 %6846  ;;  %v5763_v22 = vrot.slane %v5761_v35, 5  ;;  %v6353_v14 = vrot.slane %v6351_v29, 4  ;;  %v5759_v59 = vrot.slane %v5758_v44, 4  ;;  %v5937_v24 = vsel %vm8963_vm7, %v8316_v3, %v5936_v43  ;;  %v5349_v3 = vld [vmem:[#allocation3 + $0x6c] sm:$0xf] }
 0x43d   : > { %7188 = vrot.lane.b32.xlu1 %v7165_v36, %s8757_s12  ;;  %v5940_v55 = vsel %vm8963_vm7, %v5938_v33, %v5939_v12  ;;  %v6356_v45 = vrot.slane %v6354_v6, 5  ;;  %v5754_v46 = vsel %vm9011_vm14, %v5749_v2, %v5753_v23  ;;  %v6362_v53 = vrot.slane %v6360_v37, 5  ;;  %v8735_v44 = vld [vmem:[#allocation3 + $0x68] sm:$0x1]  ;;  %v11648_v12 = vld [vmem:[#allocation3 + $0x70] sm:$0xf] }
 0x43e   : > { %v6364_v11 = vshrl.u32 %v11616_v7, 16  ;;  %v6370_v27 = vshll.u32 %v11622_v51, 16  ;;  %v7376_v57 = vsel %vm7366_vm3, %v11590_v49, %v6847_v28  ;;  %v6741_v1 = vpack.c.b16 %v6725_v47, %v6724_v9 }
 0x43f   : > { %7268 = vrot.lane.b32.xlu2 %v7245_v50, %s8750_s10  ;;  %v6927_v48 = vpop.permute.xlu1 %6926  ;;  %v5764_v10 = vsel %vm9011_vm14, %v5759_v59, %v5763_v22  ;;  %v6357_v26 = vor.u32 %v6356_v45, %v6353_v14  ;;  %v6981_v42 = vunpack.c.l.b16 %v5940_v55  ;;  %v6900_v49 = vunpack.c.l.b16 %v5754_v46 }
 0x440   : > { %v7408_v54 = vsel %vm3771_vm0, %v7376_v57, %v6927_v48  ;;  %v6901_v52 = vunpack.c.l.b16 %v5764_v10  ;;  %v6366_v60 = vrot.slane %v6364_v11, 4  ;;  %v6980_v13 = vunpack.c.l.b16 %v5937_v24  ;;  %v5958_v57 = vld [vmem:[#allocation3 + $0x78] sm:$0xf]  ;;  %v8685_v10 = vld [vmem:[#allocation3 + $0xcc] sm:$0xff] }
 0x441   : > { %v11641_v41 = vpop.permute.xlu2 %7198  ;;  %v6358_v21 = vrot.slane %v6357_v26, 4  ;;  %v5279_v9 = vrot.slane %v8734_v61, 5  ;;  %v7441_v47 = vsel %vm7431_vm10, %v7408_v54, %v11572_v17  ;;  %v6372_v4 = vrot.slane %v6370_v27, 5 }
 0x442   : > { %6772 = vrot.lane.b32.xlu0 %v6741_v1, %s8749_s9  ;;  %v6367_v31 = vor.u32 %v6366_v60, %v6362_v53  ;;  %v8332_v23 = vrot.slane %v6389_v63, 9  ;;  %v8293_v39 = vrot.slane %v5165_v32, 9  ;;  %v6545_v0 = vrot.slane %v11616_v7, 5  ;;  %v5373_v63 = vld [vmem:[#allocation3 + $0x74] sm:$0x1] }
 0x443   : > { %v6363_v36 = vsel %vm9011_vm14, %v6358_v21, %v6362_v53  ;;  %v5281_v43 = vrot.slane %v5279_v9, 4  ;;  %v6917_v29 = vpack.c.b16 %v6901_v52, %v6900_v49  ;;  %v6997_v6 = vpack.c.b16 %v6981_v42, %v6980_v13  ;;  %v8650_v49 = vld [vmem:[#allocation3 + $0x90] sm:$0xff] }
 0x444   : > { %v7103_v35 = vpop.permute.xlu0 %7102  ;;  %v6368_v28 = vrot.slane %v6367_v31, 4  ;;  %v5282_v33 = vrot.slane %v8735_v44, 5  ;;  %v7156_v37 = vunpack.c.l.b16 %v6363_v36  ;;  %v6547_v50 = vrot.slane %v6545_v0, 4 }
 0x445   : > { %v7473_v17 = vsel %vm3804_vm4, %v7441_v47, %v7103_v35  ;;  %6868 = vrot.lane.b32.xlu1 %v8669_v56, %s8755_s30  ;;  %v6548_v2 = vrot.slane %v11622_v51, 5  ;;  %v6546_v14 = vsel %vm8963_vm7, %v8332_v23, %v6545_v0  ;;  %v5574_v59 = vshrl.u32 %v5349_v3, 16  ;;  %v11674_v47 = vld [vmem:[#allocation3 + $0x7c] sm:$0xf] }
 0x446   : > { %v6373_v22 = vsel %vm9011_vm14, %v6368_v28, %v6372_v4  ;;  %v5283_v7 = vsel %vm8963_vm7, %v5281_v43, %v5282_v33  ;;  %v5577_v46 = vshll.u32 %v5349_v3, 16  ;;  %v5583_v51 = vshll.u32 %v11648_v12, 16 }
 0x447   : > { %6948 = vrot.lane.b32.xlu2 %v6917_v29, %s8747_s7  ;;  %v7183_v24 = vpop.permute.xlu1 %7182  ;;  %v7157_v55 = vunpack.c.l.b16 %v6373_v22  ;;  %v6549_v45 = vsel %vm8963_vm7, %v6547_v50, %v6548_v2  ;;  %v5280_v11 = vsel %vm8963_vm7, %v8293_v39, %v5279_v9  ;;  %v5576_v27 = vrot.slane %v5574_v59, 4  ;;  %v5773_v22 = vld [vmem:[#allocation3 + $0x6c] sm:$0xe] }
 0x448   : > { %v7506_v53 = vsel %vm7496_vm12, %v7473_v17, %v7183_v24  ;;  %v6711_v26 = vunpack.c.l.b16 %v5283_v7  ;;  %v5579_v54 = vrot.slane %v5577_v46, 5  ;;  %v7236_v52 = vunpack.c.l.b16 %v6546_v14 }
 0x449   : > { %v11667_v48 = vpop.permute.xlu2 %6928  ;;  %v7538_v1 = vsel %vm3837_vm5, %v7506_v53, %v11593_v15  ;;  %v7237_v42 = vunpack.c.l.b16 %v6549_v45  ;;  %v5585_v60 = vrot.slane %v5583_v51, 5  ;;  %v5587_v32 = vshrl.u32 %v11648_v12, 16 }
 0x44a   : > { %7028 = vrot.lane.b32.xlu0 %v6997_v6, %s8756_s11  ;;  %8537 = vmatmul.msk.bf16.gmra.mxu1 %vm7585_vm13, %v7538_v1  ;;  %v7173_v21 = vpack.c.b16 %v7157_v55, %v7156_v37  ;;  %v6710_v61 = vunpack.c.l.b16 %v5280_v11  ;;  %v5887_v9 = vrot.slane %v11648_v12, 5  ;;  %v6183_v15 = vshrl.u32 %v5958_v57, 16  ;;  %v11681_v6 = vld [vmem:[#allocation3 + $0x80] sm:$0x1] }
 0x44b   : > { %v5580_v31 = vor.u32 %v5579_v54, %v5576_v27  ;;  %v5589_v4 = vrot.slane %v5587_v32, 4  ;;  %v5593_v23 = vshll.u32 %v5373_v63, 16  ;;  %v6186_v35 = vshll.u32 %v5958_v57, 16 }
 0x44c   : > { %v6767_v13 = vpop.permute.xlu0 %6766  ;;  %v7324_v56 = vsel %vm585_vm2, %v8650_v49, %v11385_v25  ;;  %v6734_v36 = vpack.c.b16 %v6711_v26, %v6710_v61  ;;  %v7253_v39 = vpack.c.b16 %v7237_v42, %v7236_v52  ;;  %v6192_v0 = vshll.u32 %v11674_v47, 16 }
 0x44d   : > { %7124 = vrot.lane.b32.xlu1 %v8685_v10, %s8748_s8  ;;  %v5590_v43 = vor.u32 %v5589_v4, %v5585_v60  ;;  %v5889_v29 = vrot.slane %v5887_v9, 4  ;;  %v6185_v28 = vrot.slane %v6183_v15, 4  ;;  %v6188_v44 = vrot.slane %v6186_v35, 5 }
 0x44e   : > { %v6196_v33 = vshrl.u32 %v11674_v47, 16  ;;  %v7359_v12 = vsel %vm3722_vm15, %v7324_v56, %v6767_v13  ;;  %v5581_v25 = vrot.slane %v5580_v31, 4  ;;  %v5595_v37 = vrot.slane %v5593_v23, 5 }
 0x44f   : > { %7204 = vrot.lane.b32.xlu2 %v7173_v21, %s8757_s12  ;;  %v6863_v3 = vpop.permute.xlu1 %6862  ;;  %v5591_v17 = vrot.slane %v5590_v43, 4  ;;  %v5890_v7 = vrot.slane %v5373_v63, 5  ;;  %v6194_v14 = vrot.slane %v6192_v0, 5  ;;  %v6202_v45 = vshll.u32 %v11681_v6, 16  ;;  %v8662_v63 = vld [vmem:[#allocation3 + $0x6c] sm:$0xff] }
 0x450   : > { %v7392_v50 = vsel %vm7366_vm3, %v7359_v12, %v6863_v3  ;;  %v6198_v59 = vrot.slane %v6196_v33, 4  ;;  %v5586_v24 = vsel %vm9011_vm14, %v5581_v25, %v5585_v60  ;;  %v6189_v11 = vor.u32 %v6188_v44, %v6185_v28  ;;  %v6382_v43 = vld [vmem:[#allocation3 + $0x78] sm:$0xe] }
 0x451   : > { %v11687_v2 = vpop.permute.xlu2 %7184  ;;  %v5596_v55 = vsel %vm9011_vm14, %v5591_v17, %v5595_v37  ;;  %v5891_v53 = vsel %vm8963_vm7, %v5889_v29, %v5890_v7  ;;  %v7424_v57 = vsel %vm3771_vm0, %v7392_v50, %v11614_v38  ;;  %v8309_v1 = vrot.slane %v5773_v22, 9 }
 0x452   : > { %6758 = vrot.lane.b32.xlu0 %v6734_v36, %s8749_s9  ;;  %v6887_v51 = vunpack.c.l.b16 %v5596_v55  ;;  %v6199_v27 = vor.u32 %v6198_v59, %v6194_v14  ;;  %v6496_v26 = vrot.slane %v11674_v47, 5  ;;  %v6886_v54 = vunpack.c.l.b16 %v5586_v24 }
 0x453   : > { %v5888_v32 = vsel %vm8963_vm7, %v8309_v1, %v5887_v9  ;;  %v6967_v49 = vunpack.c.l.b16 %v5891_v53  ;;  %v6204_v13 = vrot.slane %v6202_v45, 5  ;;  %v6190_v31 = vrot.slane %v6189_v11, 4 }
 0x454   : > { %v7023_v46 = vpop.permute.xlu0 %7022  ;;  %v7676_v10 = vpop.f32.mrf.mxu3  ;;  %v6200_v42 = vrot.slane %v6199_v27, 4  ;;  %v6910_v47 = vpack.c.b16 %v6887_v51, %v6886_v54  ;;  %v6498_v9 = vrot.slane %v6496_v26, 4  ;;  %v6966_v36 = vunpack.c.l.b16 %v5888_v32 }
 0x455   : > { %7284 = vrot.lane.b32.xlu1 %v7253_v39, %s8750_s10  ;;  %v7677_v52 = vadd.f32 %v11515_v34, %v7676_v10  ;;  %v7636_v60 = vpop.f32.mrf.mxu1  ;;  %v7457_v38 = vsel %vm7431_vm10, %v7424_v57, %v7023_v46  ;;  %v6195_v3 = vsel %vm9011_vm14, %v6190_v31, %v6194_v14  ;;  %v6499_v28 = vrot.slane %v11681_v6, 5 }
 0x456   : > { %v7637_v21 = vadd.f32 %v11515_v34, %v7636_v60  ;;  %v6205_v23 = vsel %vm9011_vm14, %v6200_v42, %v6204_v13  ;;  %v6990_v33 = vpack.c.b16 %v6967_v49, %v6966_v36  ;;  %v7142_v6 = vunpack.c.l.b16 %v6195_v3 }
 0x457   : > { %6854 = vrot.lane.b32.xlu2 %v8662_v63, %s8755_s30  ;;  %v7119_v61 = vpop.permute.xlu1 %7118  ;;  %v7729_v15 = vmax.f32 %v7677_v52, 0.0  ;;  %v7143_v12 = vunpack.c.l.b16 %v6205_v23  ;;  %v6500_v17 = vsel %vm8963_vm7, %v6498_v9, %v6499_v28 }
 0x458   : > { %v7489_v4 = vsel %vm3804_vm4, %v7457_v38, %v7119_v61  ;;  %v7713_v35 = vmax.f32 %v7637_v21, 0.0  ;;  %v7223_v55 = vunpack.c.l.b16 %v6500_v17  ;;  %v8651_v61 = vld [vmem:[#allocation3 + $0x9c] sm:$0xff] }
 0x459   : > { %v7522_v56 = vsel %vm7496_vm12, %v7489_v4, %v11641_v41  ;;  %v7761_v39 = vpack.c.bf16 %v7729_v15, %v7729_v15  ;;  %v11712_v0 = vpop.permute.xlu2 %6864  ;;  %v8325_v41 = vrot.slane %v6382_v43, 9  ;;  %v7166_v24 = vpack.c.b16 %v7143_v12, %v7142_v6 }
 0x45a   : > { %6934 = vrot.lane.b32.xlu0 %v6910_v47, %s8747_s7  ;;  %v7745_v29 = vpack.c.bf16 %v7713_v35, %v7713_v35  ;;  %v7327_v31 = vsel %vm585_vm2, %v8651_v61, %v11447_v18 }
 0x45b   : > { %7793 = vst.msk [vmem:[%s11540_s26 + $0x48] sm:$0xf] %vm4232_vm1, %v7761_v39  ;;  %v6497_v7 = vsel %vm8963_vm7, %v8325_v41, %v6496_v26 }
 0x45c   : > { %v7279_v44 = vpop.permute.xlu0 %7278  ;;  %7777 = vst.msk [vmem:[%s11540_s26 + $0x8] sm:$0xf] %vm4232_vm1, %v7745_v29  ;;  %v7678_v37 = vpop.f32.mrf.mxu3  ;;  %v7222_v53 = vunpack.c.l.b16 %v6497_v7 }
 0x45d   : > { %v7554_v25 = vsel %vm3837_vm5, %v7522_v56, %v7279_v44  ;;  %7014 = vrot.lane.b32.xlu1 %v6990_v33, %s8756_s11  ;;  %v7679_v50 = vadd.f32 %v11515_v34, %v7678_v37  ;;  %v7638_v22 = vpop.f32.mrf.mxu1 }
 0x45e   : > { %8545 = vmatmul.msk.bf16.gmra.mxu3 %vm7585_vm13, %v7554_v25  ;;  %v7639_v14 = vadd.f32 %v11515_v34, %v7638_v22  ;;  %v7246_v57 = vpack.c.b16 %v7223_v55, %v7222_v53  ;;  %v8652_v53 = vld [vmem:[#allocation3 + $0xa8] sm:$0xff] }
 0x45f   : > { %7110 = vrot.lane.b32.xlu2 %v8678_v20, %s8748_s8  ;;  %v6849_v59 = vpop.permute.xlu1 %6848  ;;  %v7730_v45 = vmax.f32 %v7679_v50, 0.0 }
 0x460   : > { %v7714_v46 = vmax.f32 %v7639_v14, 0.0  ;;  %v7378_v51 = vsel %vm7366_vm3, %v11419_v19, %v6849_v59 }
 0x461   : > { %v7762_v11 = vpack.c.bf16 %v7730_v45, %v7730_v45  ;;  %v7121_v1 = vpop.permute.xlu2 %7120  ;;  %v7410_v10 = vsel %vm3771_vm0, %v7378_v51, %v11667_v48 }
 0x462   : > { %7190 = vrot.lane.b32.xlu0 %v7166_v24, %s8757_s12  ;;  %v7746_v30 = vpack.c.bf16 %v7714_v46, %v7714_v46 }
 0x463   : > { %7794 = vst.msk [vmem:[%s11540_s26 + $0x4c] sm:$0xf] %vm4232_vm1, %v7762_v11  ;;  %v7330_v11 = vsel %vm585_vm2, %v8652_v53, %v11428_v8  ;;  %v8646_v53 = vld [vmem:[#allocation3 + $0x60] sm:$0xff] }
 0x464   : > { %v7009_v27 = vpop.permute.xlu0 %7008  ;;  %7778 = vst.msk [vmem:[%s11540_s26 + $0xc] sm:$0xf] %vm4232_vm1, %v7746_v30 }
 0x465   : > { %7270 = vrot.lane.b32.xlu1 %v7246_v57, %s8750_s10  ;;  %v7641_v26 = vpop.f32.mrf.mxu1  ;;  %v7443_v63 = vsel %vm7431_vm10, %v7410_v10, %v7009_v27 }
 0x466   : > { %v7642_v19 = vadd.f32 %v11515_v34, %v7641_v26 }
 0x467   : > { %v7105_v54 = vpop.permute.xlu1 %7104 }
 0x468   : > { %v7475_v52 = vsel %vm3804_vm4, %v7443_v63, %v7105_v54  ;;  %v7715_v42 = vmax.f32 %v7642_v19, 0.0 }
 0x469   : > { %v7508_v60 = vsel %vm7496_vm12, %v7475_v52, %v11687_v2  ;;  %v6851_v21 = vpop.permute.xlu2 %6850 }
 0x46a   : > { %v7747_v32 = vpack.c.bf16 %v7715_v42, %v7715_v42  ;;  %v7380_v6 = vsel %vm7366_vm3, %v11472_v16, %v6851_v21 }
 0x46c   : > { %v7265_v49 = vpop.permute.xlu0 %7264  ;;  %7779 = vst.msk [vmem:[%s11540_s26 + $0x10] sm:$0xf] %vm4232_vm1, %v7747_v32  ;;  %v8645_v32 = vld [vmem:[#allocation3 + $0x54] sm:$0xff] }
 0x46d   : > { %v7540_v48 = vsel %vm3837_vm5, %v7508_v60, %v7265_v49  ;;  %v7643_v13 = vpop.f32.mrf.mxu1 }
 0x46e   : > { %8538 = vmatmul.msk.bf16.gmra.mxu1 %vm7585_vm13, %v7540_v48  ;;  %v7644_v38 = vadd.f32 %v11515_v34, %v7643_v13  ;;  %v7309_v13 = vsel %vm585_vm2, %v8645_v32, %v11526_v5 }
 0x46f   : > { %v6769_v47 = vpop.permute.xlu1 %6768  ;;  %v7349_v61 = vsel %vm3722_vm15, %v7309_v13, %v11451_v58 }
 0x470   : > { %v7716_v15 = vmax.f32 %v7644_v38, 0.0  ;;  %v7361_v2 = vsel %vm3722_vm15, %v7327_v31, %v6769_v47 }
 0x471   : > { %v7394_v35 = vsel %vm7366_vm3, %v7361_v2, %v11712_v0  ;;  %v7107_v56 = vpop.permute.xlu2 %7106 }
 0x472   : > { %v7748_v4 = vpack.c.bf16 %v7716_v15, %v7716_v15 }
 0x474   : > { %v6945_v23 = vpop.permute.xlu0 %6944  ;;  %7780 = vst.msk [vmem:[%s11540_s26 + $0x14] sm:$0xf] %vm4232_vm1, %v7748_v4 }
 0x475   : > { %v7426_v36 = vsel %vm3771_vm0, %v7394_v35, %v6945_v23 }
 0x477   : > { %v7025_v9 = vpop.permute.xlu1 %7024 }
 0x478   : > { %v7459_v39 = vsel %vm7431_vm10, %v7426_v36, %v7025_v9 }
 0x479   : > { %v7491_v18 = vsel %vm3804_vm4, %v7459_v39, %v7121_v1  ;;  %v6771_v25 = vpop.permute.xlu2 %6770 }
 0x47a   : > { %v7363_v30 = vsel %vm3722_vm15, %v7330_v11, %v6771_v25 }
 0x47b   : > { %v7681_v3 = vpop.f32.mrf.mxu3 }
 0x47c   : > { %v7201_v43 = vpop.permute.xlu0 %7200  ;;  %v7682_v29 = vadd.f32 %v11515_v34, %v7681_v3 }
 0x47d   : > { %v7524_v44 = vsel %vm7496_vm12, %v7491_v18, %v7201_v43 }
 0x47e   : > { %v7731_v28 = vmax.f32 %v7682_v29, 0.0 }
 0x47f   : > { %v7281_v33 = vpop.permute.xlu1 %7280 }
 0x480   : > { %v7556_v0 = vsel %vm3837_vm5, %v7524_v44, %v7281_v33  ;;  %v7763_v12 = vpack.c.bf16 %v7731_v28, %v7731_v28  ;;  %v8653_v28 = vld [vmem:[#allocation3 + $0xb4] sm:$0xff] }
 0x481   : > { %8546 = vmatmul.msk.bf16.gmra.mxu3 %vm7585_vm13, %v7556_v0  ;;  %v7027_v55 = vpop.permute.xlu2 %7026  ;;  %v7333_v44 = vsel %vm585_vm2, %v8653_v28, %v11556_v62 }
 0x482   : > { %7795 = vst.msk [vmem:[%s11540_s26 + $0x50] sm:$0xf] %vm4232_vm1, %v7763_v12 }
 0x483   : > { %v7683_v17 = vpop.f32.mrf.mxu3 }
 0x484   : > { %v6931_v41 = vpop.permute.xlu0 %6930  ;;  %v7684_v37 = vadd.f32 %v11515_v34, %v7683_v17 }
 0x485   : > { %v7412_v22 = vsel %vm3771_vm0, %v7380_v6, %v6931_v41 }
 0x486   : > { %v7732_v20 = vmax.f32 %v7684_v37, 0.0 }
 0x487   : > { %v7011_v50 = vpop.permute.xlu1 %7010 }
 0x488   : > { %v7764_v7 = vpack.c.bf16 %v7732_v20, %v7732_v20  ;;  %v7445_v14 = vsel %vm7431_vm10, %v7412_v22, %v7011_v50 }
 0x489   : > { %v7477_v24 = vsel %vm3804_vm4, %v7445_v14, %v7107_v56  ;;  %v7283_v27 = vpop.permute.xlu2 %7282 }
 0x48a   : > { %7796 = vst.msk [vmem:[%s11540_s26 + $0x54] sm:$0xf] %vm4232_vm1, %v7764_v7 }
 0x48c   : > { %v7187_v59 = vpop.permute.xlu0 %7186 }
 0x48d   : > { %v7510_v45 = vsel %vm7496_vm12, %v7477_v24, %v7187_v59  ;;  %v11818_v59 = vld [vmem:[%s11898_s5] ss:$0 sm:$0xff] }
 0x48f   : > { %v7267_v46 = vpop.permute.xlu1 %7266 }
 0x490   : > { %v7542_v51 = vsel %vm3837_vm5, %v7510_v45, %v7267_v46 }
 0x491   : > { %8539 = vmatmul.msk.bf16.gmra.mxu1 %vm7585_vm13, %v7542_v51  ;;  %v7013_v42 = vpop.permute.xlu2 %7012 }
 0x494   : > { %v6867_v16 = vpop.permute.xlu0 %6866 }
 0x495   : > { %v7396_v1 = vsel %vm7366_vm3, %v7363_v30, %v6867_v16 }
 0x497   : > { %v6947_v57 = vpop.permute.xlu1 %6946 }
 0x498   : > { %v7428_v10 = vsel %vm3771_vm0, %v7396_v1, %v6947_v57  ;;  %v7312_v57 = vsel %vm585_vm2, %v8646_v53, %v11520_v40 }
 0x499   : > { %v7461_v19 = vsel %vm7431_vm10, %v7428_v10, %v7027_v55  ;;  %v7269_v23 = vpop.permute.xlu2 %7268 }
 0x49c   : > { %v7123_v26 = vpop.permute.xlu0 %7122 }
 0x49d   : > { %v7493_v63 = vsel %vm3804_vm4, %v7461_v19, %v7123_v26 }
 0x49f   : > { %v7203_v54 = vpop.permute.xlu1 %7202 }
 0x4a0   : > { %v7526_v52 = vsel %vm7496_vm12, %v7493_v63, %v7203_v54 }
 0x4a1   : > { %v7558_v8 = vsel %vm3837_vm5, %v7526_v52, %v7283_v27  ;;  %v6949_v18 = vpop.permute.xlu2 %6948 }
 0x4a2   : > { %v7646_v60 = vpop.f32.mrf.mxu1  ;;  %8547 = vmatmul.msk.bf16.gmra.mxu3 %vm7585_vm13, %v7558_v8 }
 0x4a3   : > { %v7647_v49 = vadd.f32 %v11515_v34, %v7646_v60 }
 0x4a4   : > { %v6853_v48 = vpop.permute.xlu0 %6852 }
 0x4a5   : > { %v7717_v21 = vmax.f32 %v7647_v49, 0.0  ;;  %v7382_v15 = vsel %vm7366_vm3, %v7349_v61, %v6853_v48 }
 0x4a7   : > { %v7749_v38 = vpack.c.bf16 %v7717_v21, %v7717_v21  ;;  %v6933_v47 = vpop.permute.xlu1 %6932 }
 0x4a8   : > { %v7414_v31 = vsel %vm3771_vm0, %v7382_v15, %v6933_v47 }
 0x4a9   : > { %7781 = vst.msk [vmem:[%s11540_s26 + $0x18] sm:$0xf] %vm4232_vm1, %v7749_v38  ;;  %v7447_v5 = vsel %vm7431_vm10, %v7414_v31, %v7013_v42  ;;  %v7205_v17 = vpop.permute.xlu2 %7204 }
 0x4aa   : > { %v7648_v2 = vpop.f32.mrf.mxu1 }
 0x4ab   : > { %v7649_v4 = vadd.f32 %v11515_v34, %v7648_v2 }
 0x4ac   : > { %v7109_v35 = vpop.permute.xlu0 %7108 }
 0x4ad   : > { %v7718_v9 = vmax.f32 %v7649_v4, 0.0  ;;  %v7479_v36 = vsel %vm3804_vm4, %v7447_v5, %v7109_v35 }
 0x4af   : > { %v7750_v56 = vpack.c.bf16 %v7718_v9, %v7718_v9  ;;  %v7189_v39 = vpop.permute.xlu1 %7188 }
 0x4b0   : > { %v7512_v58 = vsel %vm7496_vm12, %v7479_v36, %v7189_v39 }
 0x4b1   : > { %7782 = vst.msk [vmem:[%s11540_s26 + $0x1c] sm:$0xf] %vm4232_vm1, %v7750_v56  ;;  %v7544_v43 = vsel %vm3837_vm5, %v7512_v58, %v7269_v23  ;;  %v6855_v11 = vpop.permute.xlu2 %6854 }
 0x4b2   : > { %8540 = vmatmul.msk.bf16.gmra.mxu1 %vm7585_vm13, %v7544_v43 }
 0x4b4   : > { %v6773_v3 = vpop.permute.xlu0 %6772 }
 0x4b5   : > { %v7365_v0 = vsel %vm3722_vm15, %v7333_v44, %v6773_v3 }
 0x4b7   : > { %v6869_v29 = vpop.permute.xlu1 %6868 }
 0x4b8   : > { %v7398_v12 = vsel %vm7366_vm3, %v7365_v0, %v6869_v29 }
 0x4b9   : > { %v7430_v20 = vsel %vm3771_vm0, %v7398_v12, %v6949_v18  ;;  %v7111_v60 = vpop.permute.xlu2 %7110 }
 0x4bc   : > { %v7029_v33 = vpop.permute.xlu0 %7028 }
 0x4bd   : > { %v7686_v25 = vpop.f32.mrf.mxu3  ;;  %v7463_v22 = vsel %vm7431_vm10, %v7430_v20, %v7029_v33 }
 0x4be   : > { %v7687_v41 = vadd.f32 %v11515_v34, %v7686_v25 }
 0x4bf   : > { %v7125_v37 = vpop.permute.xlu1 %7124 }
 0x4c0   : > { %v7733_v6 = vmax.f32 %v7687_v41, 0.0  ;;  %v7495_v62 = vsel %vm3804_vm4, %v7463_v22, %v7125_v37 }
 0x4c1   : > { %v7528_v45 = vsel %vm7496_vm12, %v7495_v62, %v7205_v17 }
 0x4c2   : > { %v7765_v50 = vpack.c.bf16 %v7733_v6, %v7733_v6 }
 0x4c4   : > { %v6759_v7 = vpop.permute.xlu0 %6758  ;;  %7797 = vst.msk [vmem:[%s11540_s26 + $0x58] sm:$0xf] %vm4232_vm1, %v7765_v50 }
 0x4c5   : > { %v7688_v14 = vpop.f32.mrf.mxu3  ;;  %v7351_v10 = vsel %vm3722_vm15, %v7312_v57, %v6759_v7 }
 0x4c6   : > { %v7689_v34 = vadd.f32 %v11818_v59, %v7688_v14  ;;  %v7384_v19 = vsel %vm7366_vm3, %v7351_v10, %v6855_v11 }
 0x4c7   : > { %v7285_v24 = vpop.permute.xlu1 %7284  ;;  %v7651_v55 = vpop.f32.mrf.mxu1 }
 0x4c8   : > { %v7734_v46 = vmax.f32 %v7689_v34, 0.0  ;;  %v7652_v51 = vadd.f32 %v11818_v59, %v7651_v55  ;;  %v7560_v16 = vsel %vm3837_vm5, %v7528_v45, %v7285_v24 }
 0x4c9   : > { %8548 = vmatmul.msk.bf16.gmra.mxu3 %vm7585_vm13, %v7560_v16 }
 0x4ca   : > { %v7766_v30 = vpack.c.bf16 %v7734_v46, %v7734_v46  ;;  %v7719_v27 = vmax.f32 %v7652_v51, 0.0 }
 0x4cc   : > { %v6935_v1 = vpop.permute.xlu0 %6934  ;;  %7798 = vst.msk [vmem:[%s11540_s26 + $0x5c] sm:$0xf] %vm4232_vm1, %v7766_v30  ;;  %v7751_v26 = vpack.c.bf16 %v7719_v27, %v7719_v27 }
 0x4cd   : > { %v7416_v52 = vsel %vm3771_vm0, %v7384_v19, %v6935_v1 }
 0x4ce   : > { %7783 = vst.msk [vmem:[%s11540_s26 + $0x20] sm:$0xf] %vm4232_vm1, %v7751_v26 }
 0x4cf   : > { %v7015_v63 = vpop.permute.xlu1 %7014  ;;  %v7653_v54 = vpop.f32.mrf.mxu1 }
 0x4d0   : > { %v7654_v42 = vadd.f32 %v11818_v59, %v7653_v54  ;;  %v7449_v40 = vsel %vm7431_vm10, %v7416_v52, %v7015_v63 }
 0x4d1   : > { %v7481_v48 = vsel %vm3804_vm4, %v7449_v40, %v7111_v60 }
 0x4d2   : > { %v7720_v8 = vmax.f32 %v7654_v42, 0.0 }
 0x4d4   : > { %v7752_v32 = vpack.c.bf16 %v7720_v8, %v7720_v8  ;;  %v7191_v49 = vpop.permute.xlu0 %7190 }
 0x4d5   : > { %v7514_v13 = vsel %vm7496_vm12, %v7481_v48, %v7191_v49 }
 0x4d6   : > { %7784 = vst.msk [vmem:[%s11540_s26 + $0x24] sm:$0xf] %vm4232_vm1, %v7752_v32 }
 0x4d7   : > { %v7271_v21 = vpop.permute.xlu1 %7270 }
 0x4d8   : > { %v7546_v38 = vsel %vm3837_vm5, %v7514_v13, %v7271_v21 }
 0x4d9   : > { %8541 = vmatmul.msk.bf16.gmra.mxu1 %vm7585_vm13, %v7546_v38 }
 0x4e1   : > { %v7691_v61 = vpop.f32.mrf.mxu3 }
 0x4e2   : > { %v7692_v47 = vadd.f32 %v11818_v59, %v7691_v61 }
 0x4e4   : > { %v7735_v15 = vmax.f32 %v7692_v47, 0.0 }
 0x4e6   : > { %v7767_v31 = vpack.c.bf16 %v7735_v15, %v7735_v15 }
 0x4e8   : > { %7799 = vst.msk [vmem:[%s11540_s26 + $0x60] sm:$0xf] %vm4232_vm1, %v7767_v31 }
 0x4e9   : > { %v7693_v2 = vpop.f32.mrf.mxu3 }
 0x4ea   : > { %v7694_v4 = vadd.f32 %v11818_v59, %v7693_v2 }
 0x4eb   : > { %v7656_v23 = vpop.f32.mrf.mxu1 }
 0x4ec   : > { %v7736_v35 = vmax.f32 %v7694_v4, 0.0  ;;  %v7657_v5 = vadd.f32 %v11818_v59, %v7656_v23 }
 0x4ee   : > { %v7768_v9 = vpack.c.bf16 %v7736_v35, %v7736_v35  ;;  %v7721_v56 = vmax.f32 %v7657_v5, 0.0 }
 0x4f0   : > { %7800 = vst.msk [vmem:[%s11540_s26 + $0x64] sm:$0xf] %vm4232_vm1, %v7768_v9  ;;  %v7753_v36 = vpack.c.bf16 %v7721_v56, %v7721_v56 }
 0x4f2   : > { %7785 = vst.msk [vmem:[%s11540_s26 + $0x28] sm:$0xf] %vm4232_vm1, %v7753_v36 }
 0x4f3   : > { %v7658_v39 = vpop.f32.mrf.mxu1 }
 0x4f4   : > { %v7659_v58 = vadd.f32 %v11818_v59, %v7658_v39 }
 0x4f6   : > { %v7722_v43 = vmax.f32 %v7659_v58, 0.0 }
 0x4f8   : > { %v7754_v3 = vpack.c.bf16 %v7722_v43, %v7722_v43 }
 0x4fa   : > { %7786 = vst.msk [vmem:[%s11540_s26 + $0x2c] sm:$0xf] %vm4232_vm1, %v7754_v3 }
 0x504   : > { %v7696_v18 = vpop.f32.mrf.mxu3 }
 0x505   : > { %v7697_v29 = vadd.f32 %v11818_v59, %v7696_v18 }
 0x507   : > { %v7737_v28 = vmax.f32 %v7697_v29, 0.0 }
 0x509   : > { %v7769_v44 = vpack.c.bf16 %v7737_v28, %v7737_v28 }
 0x50b   : > { %7801 = vst.msk [vmem:[%s11540_s26 + $0x68] sm:$0xf] %vm4232_vm1, %v7769_v44 }
 0x50c   : > { %v7698_v33 = vpop.f32.mrf.mxu3 }
 0x50d   : > { %v7699_v0 = vadd.f32 %v11818_v59, %v7698_v33 }
 0x50e   : > { %v7661_v12 = vpop.f32.mrf.mxu1 }
 0x50f   : > { %v7738_v25 = vmax.f32 %v7699_v0, 0.0  ;;  %v7662_v41 = vadd.f32 %v11818_v59, %v7661_v12 }
 0x511   : > { %v7770_v17 = vpack.c.bf16 %v7738_v25, %v7738_v25  ;;  %v7723_v37 = vmax.f32 %v7662_v41, 0.0 }
 0x513   : > { %7802 = vst.msk [vmem:[%s11540_s26 + $0x6c] sm:$0xf] %vm4232_vm1, %v7770_v17  ;;  %v7755_v20 = vpack.c.bf16 %v7723_v37, %v7723_v37 }
 0x515   : > { %7787 = vst.msk [vmem:[%s11540_s26 + $0x30] sm:$0xf] %vm4232_vm1, %v7755_v20 }
 0x516   : > { %v7663_v6 = vpop.f32.mrf.mxu1 }
 0x517   : > { %v7664_v50 = vadd.f32 %v11818_v59, %v7663_v6 }
 0x519   : > { %v7724_v22 = vmax.f32 %v7664_v50, 0.0 }
 0x51b   : > { %v7756_v7 = vpack.c.bf16 %v7724_v22, %v7724_v22 }
 0x51d   : > { %7788 = vst.msk [vmem:[%s11540_s26 + $0x34] sm:$0xf] %vm4232_vm1, %v7756_v7 }
 0x525   : > { %v7701_v62 = vpop.f32.mrf.mxu3 }
 0x526   : > { %v7702_v14 = vadd.f32 %v11818_v59, %v7701_v62 }
 0x528   : > { %v7739_v34 = vmax.f32 %v7702_v14, 0.0 }
 0x52a   : > { %v7771_v24 = vpack.c.bf16 %v7739_v34, %v7739_v34 }
 0x52c   : > { %7803 = vst.msk [vmem:[%s11540_s26 + $0x70] sm:$0xf] %vm4232_vm1, %v7771_v24 }
 0x52d   : > { %v7703_v55 = vpop.f32.mrf.mxu3 }
 0x52e   : > { %v7704_v45 = vadd.f32 %v11818_v59, %v7703_v55 }
 0x52f   : > { %v7666_v46 = vpop.f32.mrf.mxu1 }
 0x530   : > { %v7740_v51 = vmax.f32 %v7704_v45, 0.0  ;;  %v7667_v16 = vadd.f32 %v11818_v59, %v7666_v46 }
 0x532   : > { %v7772_v53 = vpack.c.bf16 %v7740_v51, %v7740_v51  ;;  %v7725_v11 = vmax.f32 %v7667_v16, 0.0 }
 0x534   : > { %7804 = vst.msk [vmem:[%s11540_s26 + $0x74] sm:$0xf] %vm4232_vm1, %v7772_v53  ;;  %v7757_v30 = vpack.c.bf16 %v7725_v11, %v7725_v11 }
 0x536   : > { %7789 = vst.msk [vmem:[%s11540_s26 + $0x38] sm:$0xf] %vm4232_vm1, %v7757_v30 }
 0x537   : > { %v7668_v27 = vpop.f32.mrf.mxu1 }
 0x538   : > { %v7669_v57 = vadd.f32 %v11818_v59, %v7668_v27 }
 0x53a   : > { %v7726_v1 = vmax.f32 %v7669_v57, 0.0 }
 0x53c   : > { %v7758_v10 = vpack.c.bf16 %v7726_v1, %v7726_v1 }
 0x53e   : > { %7790 = vst.msk [vmem:[%s11540_s26 + $0x3c] sm:$0xf] %vm4232_vm1, %v7758_v10 }
 0x54c   : > { %v7706_v26 = vpop.f32.mrf.mxu3 }
 0x54d   : > { %v7707_v19 = vadd.f32 %v11818_v59, %v7706_v26 }
 0x54f   : > { %v7741_v63 = vmax.f32 %v7707_v19, 0.0 }
 0x551   : > { %v7773_v54 = vpack.c.bf16 %v7741_v63, %v7741_v63 }
 0x553   : > { %7805 = vst.msk [vmem:[%s11540_s26 + $0x78] sm:$0xf] %vm4232_vm1, %v7773_v54 }
 0x554   : > { %v7708_v52 = vpop.f32.mrf.mxu3 }
 0x555   : > { %v7709_v42 = vadd.f32 %v11818_v59, %v7708_v52 }
 0x556   : > { %v7671_v40 = vpop.f32.mrf.mxu1 }
 0x557   : > { %v7742_v8 = vmax.f32 %v7709_v42, 0.0  ;;  %v7672_v60 = vadd.f32 %v11818_v59, %v7671_v40 }
 0x559   : > { %v7774_v32 = vpack.c.bf16 %v7742_v8, %v7742_v8  ;;  %v7727_v49 = vmax.f32 %v7672_v60, 0.0 }
 0x55b   : > { %7806 = vst.msk [vmem:[%s11540_s26 + $0x7c] sm:$0xf] %vm4232_vm1, %v7774_v32  ;;  %v7759_v48 = vpack.c.bf16 %v7727_v49, %v7727_v49 }
 0x55d   : > { %7791 = vst.msk [vmem:[%s11540_s26 + $0x40] sm:$0xf] %vm4232_vm1, %v7759_v48 }
 0x55e   : > { %v7673_v13 = vpop.f32.mrf.mxu1 }
 0x55f   : > { %v7674_v21 = vadd.f32 %v11818_v59, %v7673_v13 }
 0x561   : > { %v7728_v38 = vmax.f32 %v7674_v21, 0.0 }
 0x563   : > { %v7760_v61 = vpack.c.bf16 %v7728_v38, %v7728_v38 }
 0x565   : > { %7792 = vst.msk [vmem:[%s11540_s26 + $0x44] sm:$0xf] %vm4232_vm1, %v7760_v61 }
 0x566 PF: > { %s16_s21 = sadd.s32 1, %s8743_s21  }
 0x567   : > { %p13_p4 = scmp.ge.s32.totalorder %s16_s21, 4  }
 0x569   :  { %15 = sbr.rel (!%p13_p4) target bundleno = 1 (0x1), region = 81 }

</bundles_post_ra>
